<compile_context>
chip_gen: v5e
topology: v5e:2x2
jax: 0.10.0
libtpu: 0.0.40
codegen_flags: <defaults>
</compile_context>

<pallas_src>
import jax
import jax.numpy as jnp
from jax.experimental import pallas as pl
from jax.experimental.pallas import tpu as pltpu


def _pendulum_decoder_kernel(z_ref, w1_ref, b1_ref, w2_ref, b2_ref,
                             w3_ref, b3_ref, o_ref):
    """Fused MLP decoder: 3x (bf16 matmul, f32 acc) + bias + ReLU + sigmoid."""
    z = z_ref[...]  # bf16 (TB, Din_pad)

    h1 = jnp.dot(z, w1_ref[...], preferred_element_type=jnp.float32)
    h1 = jnp.maximum(h1 + b1_ref[...], 0.0)                       # f32 VPU

    h2 = jnp.dot(h1.astype(jnp.bfloat16), w2_ref[...],
                 preferred_element_type=jnp.float32)
    h2 = jnp.maximum(h2 + b2_ref[...], 0.0)

    logits = jnp.dot(h2.astype(jnp.bfloat16), w3_ref[...],
                     preferred_element_type=jnp.float32) + b3_ref[...]

    # sigmoid(x) = 0.5 * tanh(0.5 * x) + 0.5: one EUP op per element, no
    # exp(-x) overflow path.
    sig = 0.5 * jnp.tanh(0.5 * logits) + 0.5
    o_ref[...] = sig.astype(o_ref.dtype)


def _round_up(n, m):
    return ((n + m - 1) // m) * m


def _pad_to(a, shape):
    pads = [(0, s - d) for d, s in zip(a.shape, shape)]
    return jnp.pad(a, pads)


def fold_batchnorm(params, eps=1e-5):
    """Fold eval-mode BatchNorm1d into the preceding Linear (exact)."""
    (w1, b1, g1, be1, m1, v1,
     w2, b2, g2, be2, m2, v2,
     w3, b3) = params
    s1 = g1 / jnp.sqrt(v1 + eps)
    s2 = g2 / jnp.sqrt(v2 + eps)
    w1f = w1 * s1[None, :]
    b1f = (b1 - m1) * s1 + be1
    w2f = w2 * s2[None, :]
    b2f = (b2 - m2) * s2 + be2
    return w1f, b1f, w2f, b2f, w3, b3


def prepare_decoder_params(params, eps=1e-5):
    """One-time prep: fold BN, zero-pad to lane-dense sizes, cast to bf16.

    Do this once (outside the per-call path) and reuse the result; the kernel
    then is the only per-call reader of the weights.
    """
    w1f, b1f, w2f, b2f, w3f, b3f = fold_batchnorm(params, eps)
    dim_in, hidden = w1f.shape
    dim_out = w3f.shape[1]

    din_p = _round_up(dim_in, 128)
    h_p = _round_up(hidden, 128)
    dout_p = _round_up(dim_out, 128)

    w1_p = _pad_to(w1f, (din_p, h_p)).astype(jnp.bfloat16)
    w2_p = _pad_to(w2f, (h_p, h_p)).astype(jnp.bfloat16)
    w3_p = _pad_to(w3f, (h_p, dout_p)).astype(jnp.bfloat16)
    b1_p = _pad_to(b1f.reshape(1, -1), (1, h_p)).astype(jnp.float32)
    b2_p = _pad_to(b2f.reshape(1, -1), (1, h_p)).astype(jnp.float32)
    b3_p = _pad_to(b3f.reshape(1, -1), (1, dout_p)).astype(jnp.float32)

    dims = (dim_in, hidden, dim_out, din_p, h_p, dout_p)
    prepared = (w1_p, b1_p, w2_p, b2_p, w3_p, b3_p, dims)
    return jax.tree_util.tree_map(
        lambda x: x if isinstance(x, int) else jax.block_until_ready(x),
        prepared)


def _choose_batch_tile(B, block_b):
    """Batch tile: multiple of 16 (bf16 sublane); single step for small B."""
    b_min = _round_up(B, 16)
    if b_min <= 256:
        return b_min                      # one grid step, weight-DMA bound
    return _round_up(max(16, min(block_b, 256)), 16)


def pendulum_decoder_forward(z, prepared, *, block_b=256,
                             out_dtype=jnp.bfloat16):
    """Equivalent of PendulumDecoder.forward(z) (BatchNorm in eval mode)."""
    w1_p, b1_p, w2_p, b2_p, w3_p, b3_p, dims = prepared
    dim_in, hidden, dim_out, din_p, h_p, dout_p = dims

    B = z.shape[0]
    assert z.shape[1] == dim_in

    tb = _choose_batch_tile(B, block_b)
    b_p = _round_up(B, tb)
    n_blocks = b_p // tb

    z_p = _pad_to(z, (b_p, din_p)).astype(jnp.bfloat16)

    const = lambda i: (0, 0)          # weights/biases: VMEM-resident
    batched = lambda i: (i, 0)        # z / out tiled over the batch grid

    def wspec(shape):
        # Constant-index operands: single-buffered (no need for a 2nd buffer).
        return pl.BlockSpec(shape, const, pipeline_mode=pl.Buffered(1))

    out_bytes = jnp.dtype(out_dtype).itemsize
    flops = 2 * b_p * (din_p * h_p + h_p * h_p + h_p * dout_p)
    bytes_accessed = (z_p.size * 2
                      + (w1_p.size + w2_p.size + w3_p.size) * 2
                      + (b1_p.size + b2_p.size + b3_p.size) * 4
                      + b_p * dout_p * out_bytes)

    # Only shard across TensorCores when each core gets enough rows to
    # amortize its duplicated weight fetch.
    semantics = ("parallel",) if (n_blocks >= 2 and tb >= 256) else ("arbitrary",)

    out = pl.pallas_call(
        _pendulum_decoder_kernel,
        out_shape=jax.ShapeDtypeStruct((b_p, dout_p), out_dtype),
        grid_spec=pltpu.PrefetchScalarGridSpec(
            num_scalar_prefetch=0,
            grid=(n_blocks,),
            in_specs=[
                pl.BlockSpec((tb, din_p), batched),     # z
                wspec((din_p, h_p)),                    # W1 (BN1-folded)
                wspec((1, h_p)),                        # b1 (BN1-folded)
                wspec((h_p, h_p)),                      # W2 (BN2-folded)
                wspec((1, h_p)),                        # b2 (BN2-folded)
                wspec((h_p, dout_p)),                   # W3
                wspec((1, dout_p)),                     # b3
            ],
            out_specs=pl.BlockSpec((tb, dout_p), batched),
        ),
        compiler_params=pltpu.CompilerParams(
            dimension_semantics=semantics,
            vmem_limit_bytes=64 * 1024 * 1024),
        cost_estimate=pl.CostEstimate(
            flops=flops,
            transcendentals=b_p * dout_p,
            bytes_accessed=bytes_accessed),
    )(z_p, w1_p, b1_p, w2_p, b2_p, w3_p, b3_p)

    return out[:B, :dim_out]


def init_params(key, dim_in, dim_out, hidden=800):
    """PyTorch-style Linear init + synthetic BatchNorm running stats."""
    ks = jax.random.split(key, 14)

    def linear(kw, kb, fan_in, fan_out):
        s = 1.0 / jnp.sqrt(float(fan_in))
        w = jax.random.uniform(kw, (fan_in, fan_out), jnp.float32, -s, s)
        b = jax.random.uniform(kb, (fan_out,), jnp.float32, -s, s)
        return w, b

    def bn(kg, kb, km, kv, n):
        g = jax.random.uniform(kg, (n,), jnp.float32, 0.5, 1.5)
        be = 0.1 * jax.random.normal(kb, (n,), jnp.float32)
        m = 0.1 * jax.random.normal(km, (n,), jnp.float32)
        v = jax.random.uniform(kv, (n,), jnp.float32, 0.5, 1.5)
        return g, be, m, v

    w1, b1 = linear(ks[0], ks[1], dim_in, hidden)
    w2, b2 = linear(ks[2], ks[3], hidden, hidden)
    w3, b3 = linear(ks[4], ks[5], hidden, dim_out)
    g1, be1, m1, v1 = bn(ks[6], ks[7], ks[8], ks[9], hidden)
    g2, be2, m2, v2 = bn(ks[10], ks[11], ks[12], ks[13], hidden)
    return (w1, b1, g1, be1, m1, v1,
            w2, b2, g2, be2, m2, v2,
            w3, b3)


def reference_forward(z, params, eps=1e-5):
    """Plain-JAX f32 reference: Linear -> BN(eval) -> ReLU -> ... -> Sigmoid."""
    (w1, b1, g1, be1, m1, v1,
     w2, b2, g2, be2, m2, v2,
     w3, b3) = params
    h = z @ w1 + b1
    h = (h - m1) / jnp.sqrt(v1 + eps) * g1 + be1
    h = jnp.maximum(h, 0.0)
    h = h @ w2 + b2
    h = (h - m2) / jnp.sqrt(v2 + eps) * g2 + be2
    h = jnp.maximum(h, 0.0)
    return jax.nn.sigmoid(h @ w3 + b3)


if __name__ == "__main__":
    # Pendulum decoder: 3-d latent -> 48*48 = 2304-pixel image, hidden=800
    # (hidden width is fixed by the module definition).
    B, dim_in, dim_out = 16, 3, 2304

    key = jax.random.PRNGKey(0)
    kz, kp = jax.random.split(key)
    z = jax.random.normal(kz, (B, dim_in), jnp.float32)
    params = init_params(kp, dim_in, dim_out)

    # One-time weight prep (fold BN, pad, cast to bf16) — cached across calls.
    prepared = prepare_decoder_params(params)

    # Small batch -> single grid step (tb = 16), weights VMEM-resident.
    out = pendulum_decoder_forward(z, prepared)
    jax.block_until_ready(out)

    ref = reference_forward(z, params)
    assert out.shape == (B, dim_out)
    max_err = float(jnp.max(jnp.abs(out.astype(jnp.float32) - ref)))
    # bf16 matmul operands + bf16 output of a [0,1] sigmoid: agrees with the
    # f32 reference to well under 2e-2 absolute.
    assert max_err < 2e-2, f"max abs err {max_err}"

    print("KERNEL_OK")
</pallas_src>

<mosaic_0001>
module attributes {stable_mosaic.version = 11 : i64} {
  func.func @_pendulum_decoder_kernel(%arg0: i32, %arg1: memref<16x128xbf16, #tpu.memory_space<vmem>>, %arg2: memref<128x896xbf16, #tpu.memory_space<vmem>>, %arg3: memref<1x896xf32, #tpu.memory_space<vmem>>, %arg4: memref<896x896xbf16, #tpu.memory_space<vmem>>, %arg5: memref<1x896xf32, #tpu.memory_space<vmem>>, %arg6: memref<896x2304xbf16, #tpu.memory_space<vmem>>, %arg7: memref<1x2304xf32, #tpu.memory_space<vmem>>, %arg8: memref<16x2304xbf16, #tpu.memory_space<vmem>>) attributes {dimension_semantics = [#tpu.dimension_semantics<arbitrary>], iteration_bounds = array<i64: 1>, scalar_prefetch = 0 : i64, scratch_operands = 0 : i64, tpu.core_type = #tpu.core_type<tc>, window_params = [{transform_indices = @transform_0, window_bounds = array<i64: 16, 128>}, {pipeline_mode = #tpu.pipeline_mode<synchronous>, transform_indices = @transform_1, window_bounds = array<i64: 128, 896>}, {pipeline_mode = #tpu.pipeline_mode<synchronous>, transform_indices = @transform_2, window_bounds = array<i64: 1, 896>}, {pipeline_mode = #tpu.pipeline_mode<synchronous>, transform_indices = @transform_3, window_bounds = array<i64: 896, 896>}, {pipeline_mode = #tpu.pipeline_mode<synchronous>, transform_indices = @transform_4, window_bounds = array<i64: 1, 896>}, {pipeline_mode = #tpu.pipeline_mode<synchronous>, transform_indices = @transform_5, window_bounds = array<i64: 896, 2304>}, {pipeline_mode = #tpu.pipeline_mode<synchronous>, transform_indices = @transform_6, window_bounds = array<i64: 1, 2304>}, {transform_indices = @transform_7, window_bounds = array<i64: 16, 2304>}]} {
    %c0 = arith.constant 0 : index
    %c0_0 = arith.constant 0 : index
    %0 = vector.load %arg1[%c0, %c0_0] : memref<16x128xbf16, #tpu.memory_space<vmem>>, vector<16x128xbf16>
    %c0_1 = arith.constant 0 : index
    %c0_2 = arith.constant 0 : index
    %1 = vector.load %arg2[%c0_1, %c0_2] : memref<128x896xbf16, #tpu.memory_space<vmem>>, vector<128x896xbf16>
    %cst = arith.constant dense<0.000000e+00> : vector<16x896xf32>
    %2 = tpu.matmul %0, %1, %cst {dimension_numbers = #tpu.dot_dimension_numbers<[1], [0], [0], [1], [0, 0, 1, 1], [], []>} : vector<16x128xbf16>, vector<128x896xbf16>, vector<16x896xf32> -> vector<16x896xf32>
    %c0_3 = arith.constant 0 : index
    %c0_4 = arith.constant 0 : index
    %3 = vector.load %arg3[%c0_3, %c0_4] : memref<1x896xf32, #tpu.memory_space<vmem>>, vector<1x896xf32>
    %4 = vector.broadcast %3 : vector<1x896xf32> to vector<16x896xf32>
    %5 = arith.addf %2, %4 : vector<16x896xf32>
    %cst_5 = arith.constant 0.000000e+00 : f32
    %6 = vector.broadcast %cst_5 : f32 to vector<16x896xf32>
    %7 = arith.maximumf %5, %6 : vector<16x896xf32>
    %8 = arith.truncf %7 : vector<16x896xf32> to vector<16x896xbf16>
    %c0_6 = arith.constant 0 : index
    %c0_7 = arith.constant 0 : index
    %9 = vector.load %arg4[%c0_6, %c0_7] : memref<896x896xbf16, #tpu.memory_space<vmem>>, vector<896x896xbf16>
    %cst_8 = arith.constant dense<0.000000e+00> : vector<16x896xf32>
    %10 = tpu.matmul %8, %9, %cst_8 {dimension_numbers = #tpu.dot_dimension_numbers<[1], [0], [0], [1], [0, 0, 1, 1], [], []>} : vector<16x896xbf16>, vector<896x896xbf16>, vector<16x896xf32> -> vector<16x896xf32>
    %c0_9 = arith.constant 0 : index
    %c0_10 = arith.constant 0 : index
    %11 = vector.load %arg5[%c0_9, %c0_10] : memref<1x896xf32, #tpu.memory_space<vmem>>, vector<1x896xf32>
    %12 = vector.broadcast %11 : vector<1x896xf32> to vector<16x896xf32>
    %13 = arith.addf %10, %12 : vector<16x896xf32>
    %cst_11 = arith.constant 0.000000e+00 : f32
    %14 = vector.broadcast %cst_11 : f32 to vector<16x896xf32>
    %15 = arith.maximumf %13, %14 : vector<16x896xf32>
    %16 = arith.truncf %15 : vector<16x896xf32> to vector<16x896xbf16>
    %c0_12 = arith.constant 0 : index
    %c0_13 = arith.constant 0 : index
    %17 = vector.load %arg6[%c0_12, %c0_13] : memref<896x2304xbf16, #tpu.memory_space<vmem>>, vector<896x2304xbf16>
    %cst_14 = arith.constant dense<0.000000e+00> : vector<16x2304xf32>
    %18 = tpu.matmul %16, %17, %cst_14 {dimension_numbers = #tpu.dot_dimension_numbers<[1], [0], [0], [1], [0, 0, 1, 1], [], []>} : vector<16x896xbf16>, vector<896x2304xbf16>, vector<16x2304xf32> -> vector<16x2304xf32>
    %c0_15 = arith.constant 0 : index
    %c0_16 = arith.constant 0 : index
    %19 = vector.load %arg7[%c0_15, %c0_16] : memref<1x2304xf32, #tpu.memory_space<vmem>>, vector<1x2304xf32>
    %20 = vector.broadcast %19 : vector<1x2304xf32> to vector<16x2304xf32>
    %21 = arith.addf %18, %20 : vector<16x2304xf32>
    %cst_17 = arith.constant 5.000000e-01 : f32
    %22 = vector.broadcast %cst_17 : f32 to vector<16x2304xf32>
    %23 = arith.mulf %22, %21 : vector<16x2304xf32>
    %24 = math.tanh %23 : vector<16x2304xf32>
    %cst_18 = arith.constant 5.000000e-01 : f32
    %25 = vector.broadcast %cst_18 : f32 to vector<16x2304xf32>
    %26 = arith.mulf %25, %24 : vector<16x2304xf32>
    %cst_19 = arith.constant 5.000000e-01 : f32
    %27 = vector.broadcast %cst_19 : f32 to vector<16x2304xf32>
    %28 = arith.addf %26, %27 : vector<16x2304xf32>
    %29 = arith.truncf %28 : vector<16x2304xf32> to vector<16x2304xbf16>
    %c0_20 = arith.constant 0 : index
    %c0_21 = arith.constant 0 : index
    %30 = vector.load %arg8[%c0_20, %c0_21] : memref<16x2304xbf16, #tpu.memory_space<vmem>>, vector<16x2304xbf16>
    tpu.vector_store %arg8[%c0_20, %c0_21], %29 {strides = array<i32>} : memref<16x2304xbf16, #tpu.memory_space<vmem>>, vector<16x2304xbf16>,
    return
  }
  func.func @transform_0(%arg0: i32) -> (i32, i32) {
    %c0_i32 = arith.constant 0 : i32
    %c0_i32_0 = arith.constant 0 : i32
    return %arg0, %c0_i32 : i32, i32
  }
  func.func @transform_1(%arg0: i32) -> (i32, i32) {
    %c0_i32 = arith.constant 0 : i32
    %c0_i32_0 = arith.constant 0 : i32
    %c0_i32_1 = arith.constant 0 : i32
    return %c0_i32, %c0_i32_0 : i32, i32
  }
  func.func @transform_2(%arg0: i32) -> (i32, i32) {
    %c0_i32 = arith.constant 0 : i32
    %c0_i32_0 = arith.constant 0 : i32
    %c0_i32_1 = arith.constant 0 : i32
    return %c0_i32, %c0_i32_0 : i32, i32
  }
  func.func @transform_3(%arg0: i32) -> (i32, i32) {
    %c0_i32 = arith.constant 0 : i32
    %c0_i32_0 = arith.constant 0 : i32
    %c0_i32_1 = arith.constant 0 : i32
    return %c0_i32, %c0_i32_0 : i32, i32
  }
  func.func @transform_4(%arg0: i32) -> (i32, i32) {
    %c0_i32 = arith.constant 0 : i32
    %c0_i32_0 = arith.constant 0 : i32
    %c0_i32_1 = arith.constant 0 : i32
    return %c0_i32, %c0_i32_0 : i32, i32
  }
  func.func @transform_5(%arg0: i32) -> (i32, i32) {
    %c0_i32 = arith.constant 0 : i32
    %c0_i32_0 = arith.constant 0 : i32
    %c0_i32_1 = arith.constant 0 : i32
    return %c0_i32, %c0_i32_0 : i32, i32
  }
  func.func @transform_6(%arg0: i32) -> (i32, i32) {
    %c0_i32 = arith.constant 0 : i32
    %c0_i32_0 = arith.constant 0 : i32
    %c0_i32_1 = arith.constant 0 : i32
    return %c0_i32, %c0_i32_0 : i32, i32
  }
  func.func @transform_7(%arg0: i32) -> (i32, i32) {
    %c0_i32 = arith.constant 0 : i32
    %c0_i32_0 = arith.constant 0 : i32
    return %arg0, %c0_i32 : i32, i32
  }
}

</mosaic_0001>

<bundles_post_ra>
// kernel: tpu_custom_call.1
= control target key start
LH: loop header
LB: loop body
LE: loop exit
PB: predicated region body
PF: predicated region fallthrough
CT: control target
= control target key end

     0   :  { %12 = vsyncpa [#allocation3], 0  ;;  %s20331_s0 = inlined_call_operand.hbm [shape: bf16[16,128], index: 0, kind: input, shape index: {}]   ;;  %s20332_s1 = inlined_call_operand.hbm [shape: bf16[128,896], index: 1, kind: input, shape index: {}]   ;;  %s20333_s2 = inlined_call_operand.hbm [shape: f32[1,896], index: 2, kind: input, shape index: {}]   ;;  %s20334_s3 = inlined_call_operand.hbm [shape: bf16[896,896], index: 3, kind: input, shape index: {}]   ;;  %s20335_s4 = inlined_call_operand.hbm [shape: f32[1,896], index: 4, kind: input, shape index: {}]   ;;  %s20336_s5 = inlined_call_operand.hbm [shape: bf16[896,2304], index: 5, kind: input, shape index: {}]   ;;  %s20337_s6 = inlined_call_operand.hbm [shape: f32[1,2304], index: 6, kind: input, shape index: {}]   ;;  %s20338_s7 = inlined_call_operand.hbm [shape: bf16[16,2304], index: 7, kind: output, shape index: {}]  }
   0x1   :  { %13 = vsyncpa [#allocation6], 0 }
   0x2   :  { %14 = vsyncpa [#allocation9], 0 }
   0x3   :  { %15 = vsyncpa [#allocation12], 0  ;;  %s34_s26 = sshll.u32 %s20332_s1, 4  ;;  %s35_s26 = int_to_ptr.hbm [resolvable:$true] %s34_s26 }
   0x4   :  { %16 = vsyncpa [#allocation4], 0  ;;  %s19448_s27 = smov [#allocation5]   ;;  %s58_s8 = sshll.u32 %s20334_s3, 4  ;;  %s59_s8 = int_to_ptr.hbm [resolvable:$true] %s58_s8 }
   0x5   :  { %s36_s28 = sshll.u32 %s19448_s27, 4  ;;  %s19449_s9 = smov 448   ;;  %s37_s28 = int_to_ptr.vmem [resolvable:$true] %s36_s28 }
   0x6   :  { %s19450_s10 = smov 28   ;;  %s19451_s11 = smov [#allocation8]  }
   0x7   :  { %42 = dma.hbm_to_vmem [thread:$0]  %s35_s26, 7168, %s37_s28, [#allocation6], %s19449_s9, %s19449_s9, %s19450_s10  }
   0x8   :  { %s60_s12 = sshll.u32 %s19451_s11, 4  ;;  %s82_s15 = sshll.u32 %s20336_s5, 4  ;;  %s61_s12 = int_to_ptr.vmem [resolvable:$true] %s60_s12  ;;  %s83_s15 = int_to_ptr.hbm [resolvable:$true] %s82_s15 }
   0x9   :  { %66 = dma.hbm_to_vmem [thread:$0]  %s59_s8, 50176, %s61_s12, [#allocation9], %s19449_s9, %s19449_s9, %s19450_s10  }
   0xa   :  { %s19452_s1 = smov [#allocation11]   ;;  %s21_s3 = sshll.u32 %s20331_s0, 4  ;;  %s22_s3 = int_to_ptr.hbm [resolvable:$true] %s21_s3 }
   0xb   :  { %s84_s16 = sshll.u32 %s19452_s1, 4  ;;  %s19453_s19 = smov 1152   ;;  %s85_s16 = int_to_ptr.vmem [resolvable:$true] %s84_s16 }
   0xc   :  { %s19454_s20 = smov 72   ;;  %s19455_s21 = smov [#allocation2]  }
   0xd   :  { %90 = dma.hbm_to_vmem [thread:$0]  %s83_s15, 129024, %s85_s16, [#allocation12], %s19453_s19, %s19453_s19, %s19454_s20  }
   0xe   :  { %s23_s22 = sshll.u32 %s19455_s21, 4  ;;  %s19456_s5 = smov 64   ;;  %s24_s22 = int_to_ptr.vmem [resolvable:$true] %s23_s22 }
   0xf   :  { %s19457_s23 = smov 4   ;;  %s48_s26 = sshll.u32 %s20333_s2, 4  ;;  %s49_s26 = int_to_ptr.hbm [resolvable:$true] %s48_s26 }
  0x10   :  { %29 = dma.hbm_to_vmem [thread:$0]  %s22_s3, 128, %s24_s22, [#allocation3], %s19456_s5, %s19456_s5, %s19457_s23  }
  0x11   :  { %s19458_s27 = smov [#allocation7]   ;;  %s72_s30 = sshll.u32 %s20335_s4, 4  ;;  %s73_s30 = int_to_ptr.hbm [resolvable:$true] %s72_s30 }
  0x12   :  { %s50_s0 = sshll.u32 %s19458_s27, 4  ;;  %s19459_s8 = smov [#allocation10]   ;;  %s51_s0 = int_to_ptr.vmem [resolvable:$true] %s50_s0 }
  0x13   :  { %53 = dma.hbm_to_vmem [thread:$0]  %s49_s26, 112, %s51_s0, [#allocation6]  }
  0x14   :  { %s74_s9 = sshll.u32 %s19459_s8, 4  ;;  %s96_s12 = sshll.u32 %s20337_s6, 4  ;;  %s75_s9 = int_to_ptr.vmem [resolvable:$true] %s74_s9  ;;  %s97_s12 = int_to_ptr.hbm [resolvable:$true] %s96_s12 }
  0x15   :  { %77 = dma.hbm_to_vmem [thread:$0]  %s73_s30, 112, %s75_s9, [#allocation9]  }
  0x16   :  { %s19460_s2 = smov [#allocation13]  }
  0x17   :  { %s98_s13 = sshll.u32 %s19460_s2, 4  ;;  %s99_s13 = int_to_ptr.vmem [resolvable:$true] %s98_s13 }
  0x18   :  { %101 = dma.hbm_to_vmem [thread:$0]  %s97_s12, 288, %s99_s13, [#allocation12]  }
  0x19   :  { %19438 = dma.done.wait [#allocation3], 128  }
  0x1a   :  { %19439 = vsyncadd [#allocation3], 4294967168 }
  0x1b   :  { %19440 = dma.done.wait [#allocation6], 7280  }
  0x1c   :  { %19441 = vsyncadd [#allocation6], 4294960016 }
  0x1d   :  { %19442 = dma.done.wait [#allocation9], 50288  }
  0x1e   :  { %19443 = vsyncadd [#allocation9], 4294917008 }
  0x1f   :  { %19444 = dma.done.wait [#allocation12], 129312  }
  0x20   :  { %19445 = vsyncadd [#allocation12], 4294837984  ;;  %v12070_v0 = vld [vmem:[#allocation5 + $0x188] sm:$0xf]  ;;  %v17749_v1 = vld [vmem:[#allocation5 + $0x1a0] sm:$0xf0] }
  0x21   :  { %v17746_v2 = vld [vmem:[#allocation5 + $0x18c] sm:$0xf]  ;;  %v12071_v3 = vor.u32 %v17749_v1, %v12070_v0  ;;  %v12072_v4 = vld [vmem:[#allocation5 + $0x1a4] sm:$0xf0]  ;;  %v12078_v5 = vld [vmem:[#allocation5 + $0x190] sm:$0xf] }
  0x22   :  { %v17750_v6 = vld [vmem:[#allocation5 + $0x1a8] sm:$0xf0]  ;;  %v12075_v7 = vor.u32 %v17746_v2, %v12072_v4  ;;  %v17747_v9 = vld [vmem:[#allocation5 + $0x194] sm:$0xf]  ;;  %v12080_v10 = vld [vmem:[#allocation5 + $0x1ac] sm:$0xf0] }
  0x23   :  { %v12079_v8 = vor.u32 %v17750_v6, %v12078_v5  ;;  %v12042_v11 = vld [vmem:[#allocation5 + $0x150] sm:$0xf]  ;;  %506 = vmatpush.bf16.msra.mxu0 %v12071_v3  ;;  %v12083_v12 = vor.u32 %v17747_v9, %v12080_v10  ;;  %v17742_v13 = vld [vmem:[#allocation5 + $0x168] sm:$0xf0]  ;;  %v17739_v14 = vld [vmem:[#allocation5 + $0x154] sm:$0xf] }
  0x24   :  { %v12044_v15 = vld [vmem:[#allocation5 + $0x16c] sm:$0xf0]  ;;  %520 = vmatpush.bf16.msra.mxu1 %v12075_v7  ;;  %v12043_v16 = vor.u32 %v17742_v13, %v12042_v11  ;;  %v12050_v18 = vld [vmem:[#allocation5 + $0x158] sm:$0xf]  ;;  %v17743_v19 = vld [vmem:[#allocation5 + $0x170] sm:$0xf0] }
  0x25   :  { %534 = vmatpush.bf16.msra.mxu2 %v12079_v8  ;;  %v12047_v17 = vor.u32 %v17739_v14, %v12044_v15  ;;  %v17740_v20 = vld [vmem:[#allocation5 + $0x15c] sm:$0xf]  ;;  %548 = vmatpush.bf16.msra.mxu3 %v12083_v12  ;;  %v12051_v21 = vor.u32 %v17743_v19, %v12050_v18  ;;  %v12052_v22 = vld [vmem:[#allocation5 + $0x174] sm:$0xf0]  ;;  %v17735_v24 = vld [vmem:[#allocation5 + $0x130] sm:$0xf0] }
  0x26   :  { %v12014_v23 = vld [vmem:[#allocation5 + $0x118] sm:$0xf]  ;;  %v12055_v25 = vor.u32 %v17740_v20, %v12052_v22  ;;  %v17732_v26 = vld [vmem:[#allocation5 + $0x11c] sm:$0xf]  ;;  %v12022_v28 = vld [vmem:[#allocation5 + $0x120] sm:$0xf] }
  0x27   :  { %v12016_v27 = vld [vmem:[#allocation5 + $0x134] sm:$0xf0]  ;;  %507 = vmatpush.bf16.msra.mxu0 %v12043_v16  ;;  %v12015_v29 = vor.u32 %v17735_v24, %v12014_v23  ;;  %v17736_v30 = vld [vmem:[#allocation5 + $0x138] sm:$0xf0]  ;;  %v17733_v31 = vld [vmem:[#allocation5 + $0x124] sm:$0xf] }
  0x28   :  { %v12024_v32 = vld [vmem:[#allocation5 + $0x13c] sm:$0xf0]  ;;  %521 = vmatpush.bf16.msra.mxu1 %v12047_v17  ;;  %v12019_v33 = vor.u32 %v17732_v26, %v12016_v27  ;;  %v12023_v34 = vor.u32 %v17736_v30, %v12022_v28  ;;  %v17728_v36 = vld [vmem:[#allocation5 + $0xf8] sm:$0xf0]  ;;  %v17725_v37 = vld [vmem:[#allocation5 + $0xe4] sm:$0xf] }
  0x29   :  { %535 = vmatpush.bf16.msra.mxu2 %v12051_v21  ;;  %v11986_v35 = vld [vmem:[#allocation5 + $0xe0] sm:$0xf]  ;;  %549 = vmatpush.bf16.msra.mxu3 %v12055_v25  ;;  %v12027_v38 = vor.u32 %v17733_v31, %v12024_v32  ;;  %v11994_v40 = vld [vmem:[#allocation5 + $0xe8] sm:$0xf]  ;;  %v17729_v41 = vld [vmem:[#allocation5 + $0x100] sm:$0xf0] }
  0x2a   :  { %v11988_v39 = vld [vmem:[#allocation5 + $0xfc] sm:$0xf0]  ;;  %v17726_v42 = vld [vmem:[#allocation5 + $0xec] sm:$0xf]  ;;  %v11996_v43 = vld [vmem:[#allocation5 + $0x104] sm:$0xf0]  ;;  %v11987_v44 = vor.u32 %v17728_v36, %v11986_v35  ;;  %v11995_v46 = vor.u32 %v17729_v41, %v11994_v40 }
  0x2b   :  { %508 = vmatpush.bf16.msra.mxu0 %v12015_v29  ;;  %v11991_v45 = vor.u32 %v17725_v37, %v11988_v39  ;;  %v11958_v47 = vld [vmem:[#allocation5 + $0xa8] sm:$0xf]  ;;  %v17721_v48 = vld [vmem:[#allocation5 + $0xc0] sm:$0xf0]  ;;  %v17718_v49 = vld [vmem:[#allocation5 + $0xac] sm:$0xf]  ;;  %v11999_v50 = vor.u32 %v17726_v42, %v11996_v43 }
  0x2c   :  { %522 = vmatpush.bf16.msra.mxu1 %v12019_v33  ;;  %v11960_v51 = vld [vmem:[#allocation5 + $0xc4] sm:$0xf0]  ;;  %v11966_v52 = vld [vmem:[#allocation5 + $0xb0] sm:$0xf]  ;;  %v17722_v53 = vld [vmem:[#allocation5 + $0xc8] sm:$0xf0]  ;;  %v11959_v56 = vor.u32 %v17721_v48, %v11958_v47 }
  0x2d   :  { %536 = vmatpush.bf16.msra.mxu2 %v12023_v34  ;;  %550 = vmatpush.bf16.msra.mxu3 %v12027_v38  ;;  %v17719_v54 = vld [vmem:[#allocation5 + $0xb4] sm:$0xf]  ;;  %v11968_v55 = vld [vmem:[#allocation5 + $0xcc] sm:$0xf0]  ;;  %v11963_v57 = vor.u32 %v17718_v49, %v11960_v51  ;;  %v11967_v58 = vor.u32 %v17722_v53, %v11966_v52  ;;  %v17714_v60 = vld [vmem:[#allocation5 + $0x88] sm:$0xf0] }
  0x2e   :  { %v11930_v59 = vld [vmem:[#allocation5 + $0x70] sm:$0xf]  ;;  %v17711_v61 = vld [vmem:[#allocation5 + $0x74] sm:$0xf]  ;;  %v11971_v62 = vor.u32 %v17719_v54, %v11968_v55  ;;  %v11938_v0 = vld [vmem:[#allocation5 + $0x78] sm:$0xf] }
  0x2f   :  { %509 = vmatpush.bf16.msra.mxu0 %v11987_v44  ;;  %v11932_v63 = vld [vmem:[#allocation5 + $0x8c] sm:$0xf0]  ;;  %v17715_v1 = vld [vmem:[#allocation5 + $0x90] sm:$0xf0]  ;;  %v17712_v2 = vld [vmem:[#allocation5 + $0x7c] sm:$0xf]  ;;  %v11931_v4 = vor.u32 %v17714_v60, %v11930_v59 }
  0x30   :  { %523 = vmatpush.bf16.msra.mxu1 %v11991_v45  ;;  %v11940_v3 = vld [vmem:[#allocation5 + $0x94] sm:$0xf0]  ;;  %v11935_v5 = vor.u32 %v17711_v61, %v11932_v63  ;;  %v11939_v6 = vor.u32 %v17715_v1, %v11938_v0  ;;  %v17707_v8 = vld [vmem:[#allocation5 + $0x50] sm:$0xf0]  ;;  %v17704_v9 = vld [vmem:[#allocation5 + $0x3c] sm:$0xf] }
  0x31   :  { %537 = vmatpush.bf16.msra.mxu2 %v11995_v46  ;;  %551 = vmatpush.bf16.msra.mxu3 %v11999_v50  ;;  %v11902_v7 = vld [vmem:[#allocation5 + $0x38] sm:$0xf]  ;;  %v11943_v10 = vor.u32 %v17712_v2, %v11940_v3  ;;  %v11910_v12 = vld [vmem:[#allocation5 + $0x40] sm:$0xf]  ;;  %v17708_v13 = vld [vmem:[#allocation5 + $0x58] sm:$0xf0] }
  0x32   :  { %v11904_v11 = vld [vmem:[#allocation5 + $0x54] sm:$0xf0]  ;;  %v17705_v14 = vld [vmem:[#allocation5 + $0x44] sm:$0xf]  ;;  %v11912_v15 = vld [vmem:[#allocation5 + $0x5c] sm:$0xf0]  ;;  %v11903_v16 = vor.u32 %v17707_v8, %v11902_v7  ;;  %v11911_v20 = vor.u32 %v17708_v13, %v11910_v12 }
  0x33   :  { %510 = vmatpush.bf16.msra.mxu0 %v11959_v56  ;;  %v11874_v17 = vld [vmem:[#allocation5] sm:$0xf]  ;;  %v17700_v18 = vld [vmem:[#allocation5 + $0x18] sm:$0xf0]  ;;  %v11907_v19 = vor.u32 %v17704_v9, %v11904_v11  ;;  %v17697_v21 = vld [vmem:[#allocation5 + $0x4] sm:$0xf]  ;;  %v11915_v24 = vor.u32 %v17705_v14, %v11912_v15 }
  0x34   :  { %524 = vmatpush.bf16.msra.mxu1 %v11963_v57  ;;  %v11876_v22 = vld [vmem:[#allocation5 + $0x1c] sm:$0xf0]  ;;  %v11882_v23 = vld [vmem:[#allocation5 + $0x8] sm:$0xf]  ;;  %v17701_v25 = vld [vmem:[#allocation5 + $0x20] sm:$0xf0]  ;;  %v11875_v31 = vor.u32 %v17700_v18, %v11874_v17 }
  0x35   :  { %538 = vmatpush.bf16.msra.mxu2 %v11967_v58  ;;  %552 = vmatpush.bf16.msra.mxu3 %v11971_v62  ;;  %v17698_v26 = vld [vmem:[#allocation5 + $0xc] sm:$0xf]  ;;  %v11884_v27 = vld [vmem:[#allocation5 + $0x24] sm:$0xf0]  ;;  %v12086_v28 = vld [vmem:[#allocation5 + $0x198] sm:$0xf]  ;;  %v11879_v35 = vor.u32 %v17697_v21, %v11876_v22  ;;  %v11883_v36 = vor.u32 %v17701_v25, %v11882_v23 }
  0x36   :  { %v17751_v29 = vld [vmem:[#allocation5 + $0x1b0] sm:$0xf0]  ;;  %v17748_v30 = vld [vmem:[#allocation5 + $0x19c] sm:$0xf]  ;;  %v12088_v32 = vld [vmem:[#allocation5 + $0x1b4] sm:$0xf0]  ;;  %v11887_v37 = vor.u32 %v17698_v26, %v11884_v27 }
  0x37   :  { %511 = vmatpush.bf16.msra.mxu0 %v11931_v4  ;;  %v12094_v33 = vld [vmem:[#allocation5 + $0x1a0] sm:$0xf]  ;;  %v17752_v34 = vld [vmem:[#allocation5 + $0x1b8] sm:$0xf0]  ;;  %v12087_v38 = vor.u32 %v17751_v29, %v12086_v28  ;;  %v12091_v40 = vor.u32 %v17748_v30, %v12088_v32  ;;  %v17741_v44 = vld [vmem:[#allocation5 + $0x164] sm:$0xf] }
  0x38   :  { %525 = vmatpush.bf16.msra.mxu1 %v11935_v5  ;;  %v19526_v39 = vld [vmem:[#allocation2] sm:$0xff]  ;;  %v12095_v41 = vor.u32 %v17752_v34, %v12094_v33  ;;  %v12058_v42 = vld [vmem:[#allocation5 + $0x160] sm:$0xf]  ;;  %v12066_v46 = vld [vmem:[#allocation5 + $0x168] sm:$0xf]  ;;  %s19461_s4 = smov [#allocation14]  }
  0x39   :  { %539 = vmatpush.bf16.msra.mxu2 %v11939_v6  ;;  %553 = vmatpush.bf16.msra.mxu3 %v11943_v10  ;;  %v17744_v43 = vld [vmem:[#allocation5 + $0x178] sm:$0xf0]  ;;  %v12060_v45 = vld [vmem:[#allocation5 + $0x17c] sm:$0xf0]  ;;  %v17745_v47 = vld [vmem:[#allocation5 + $0x180] sm:$0xf0] }
  0x3a   :  { %v12059_v48 = vor.u32 %v17744_v43, %v12058_v42  ;;  %v12063_v49 = vor.u32 %v17741_v44, %v12060_v45  ;;  %v12067_v50 = vor.u32 %v17745_v47, %v12066_v46  ;;  %v12030_v51 = vld [vmem:[#allocation5 + $0x128] sm:$0xf]  ;;  %v17737_v52 = vld [vmem:[#allocation5 + $0x140] sm:$0xf0]  ;;  %v17734_v53 = vld [vmem:[#allocation5 + $0x12c] sm:$0xf] }
  0x3b   :  { %512 = vmatpush.bf16.msra.mxu0 %v11903_v16  ;;  %v12032_v54 = vld [vmem:[#allocation5 + $0x144] sm:$0xf0]  ;;  %v12038_v55 = vld [vmem:[#allocation5 + $0x130] sm:$0xf]  ;;  %v17738_v56 = vld [vmem:[#allocation5 + $0x148] sm:$0xf0]  ;;  %v12031_v58 = vor.u32 %v17737_v52, %v12030_v51 }
  0x3c   :  { %526 = vmatpush.bf16.msra.mxu1 %v11907_v19  ;;  %v12002_v57 = vld [vmem:[#allocation5 + $0xf0] sm:$0xf]  ;;  %v17730_v59 = vld [vmem:[#allocation5 + $0x108] sm:$0xf0]  ;;  %v17727_v60 = vld [vmem:[#allocation5 + $0xf4] sm:$0xf]  ;;  %v12035_v62 = vor.u32 %v17734_v53, %v12032_v54  ;;  %v12039_v63 = vor.u32 %v17738_v56, %v12038_v55 }
  0x3d   :  { %540 = vmatpush.bf16.msra.mxu2 %v11911_v20  ;;  %554 = vmatpush.bf16.msra.mxu3 %v11915_v24  ;;  %v12294_v61 = vld [vmem:[#allocation8 + $0x188] sm:$0xf]  ;;  %v12010_v1 = vld [vmem:[#allocation5 + $0xf8] sm:$0xf]  ;;  %v17805_v2 = vld [vmem:[#allocation8 + $0x1a0] sm:$0xf0]  ;;  %v12003_v7 = vor.u32 %v17730_v59, %v12002_v57 }
  0x3e   :  { %v12004_v0 = vld [vmem:[#allocation5 + $0x10c] sm:$0xf0]  ;;  %v17731_v3 = vld [vmem:[#allocation5 + $0x110] sm:$0xf0]  ;;  %v12295_v4 = vor.u32 %v17805_v2, %v12294_v61  ;;  %v12266_v5 = vld [vmem:[#allocation8 + $0x150] sm:$0xf] }
  0x3f   :  { %513 = vmatpush.bf16.msra.mxu0 %v11875_v31  ;;  %v17798_v6 = vld [vmem:[#allocation8 + $0x168] sm:$0xf0]  ;;  %v11974_v8 = vld [vmem:[#allocation5 + $0xb8] sm:$0xf]  ;;  %v12007_v11 = vor.u32 %v17727_v60, %v12004_v0  ;;  %v12011_v12 = vor.u32 %v17731_v3, %v12010_v1  ;;  %v17720_v13 = vld [vmem:[#allocation5 + $0xbc] sm:$0xf] }
  0x40   :  { %527 = vmatpush.bf16.msra.mxu1 %v11879_v35  ;;  %v17723_v9 = vld [vmem:[#allocation5 + $0xd0] sm:$0xf0]  ;;  %v12267_v10 = vor.u32 %v17798_v6, %v12266_v5  ;;  %v12238_v14 = vld [vmem:[#allocation8 + $0x118] sm:$0xf]  ;;  %v17791_v15 = vld [vmem:[#allocation8 + $0x130] sm:$0xf0] }
  0x41   :  { %541 = vmatpush.bf16.msra.mxu2 %v11883_v36  ;;  %555 = vmatpush.bf16.msra.mxu3 %v11887_v37  ;;  %v11976_v16 = vld [vmem:[#allocation5 + $0xd4] sm:$0xf0]  ;;  %v11982_v17 = vld [vmem:[#allocation5 + $0xc0] sm:$0xf]  ;;  %v17724_v18 = vld [vmem:[#allocation5 + $0xd8] sm:$0xf0]  ;;  %v11975_v19 = vor.u32 %v17723_v9, %v11974_v8  ;;  %v12239_v22 = vor.u32 %v17791_v15, %v12238_v14 }
  0x42   :  { %514 = vmatmul.bf16.vlgmr.msra.gmra.mxu0 %v19526_v39  ;;  %v11946_v20 = vld [vmem:[#allocation5 + $0x80] sm:$0xf]  ;;  %v17716_v21 = vld [vmem:[#allocation5 + $0x98] sm:$0xf0]  ;;  %v11979_v23 = vor.u32 %v17720_v13, %v11976_v16  ;;  %v11983_v24 = vor.u32 %v17724_v18, %v11982_v17  ;;  %v17713_v25 = vld [vmem:[#allocation5 + $0x84] sm:$0xf] }
  0x43   :  { %562 = vmatpush.bf16.msrb.mxu0 %v12087_v38  ;;  %528 = vmatmul.bf16.vlgmr.msra.gmra.mxu1 %v19526_v39  ;;  %v12210_v26 = vld [vmem:[#allocation8 + $0xe0] sm:$0xf]  ;;  %v17784_v27 = vld [vmem:[#allocation8 + $0xf8] sm:$0xf0]  ;;  %v11948_v28 = vld [vmem:[#allocation5 + $0x9c] sm:$0xf0]  ;;  %v11947_v31 = vor.u32 %v17716_v21, %v11946_v20 }
  0x44   :  { %576 = vmatpush.bf16.msrb.mxu1 %v12091_v40  ;;  %542 = vmatmul.bf16.vlgmr.msra.gmra.mxu2 %v19526_v39  ;;  %v11954_v29 = vld [vmem:[#allocation5 + $0x88] sm:$0xf]  ;;  %v17717_v30 = vld [vmem:[#allocation5 + $0xa0] sm:$0xf0]  ;;  %v12211_v34 = vor.u32 %v17784_v27, %v12210_v26  ;;  %v11951_v35 = vor.u32 %v17713_v25, %v11948_v28  ;;  %v17706_v37 = vld [vmem:[#allocation5 + $0x4c] sm:$0xf] }
  0x45   :  { %590 = vmatpush.bf16.msrb.mxu2 %v12095_v41  ;;  %556 = vmatmul.bf16.vlgmr.msra.gmra.mxu3 %v19526_v39  ;;  %v11918_v32 = vld [vmem:[#allocation5 + $0x48] sm:$0xf]  ;;  %v17709_v33 = vld [vmem:[#allocation5 + $0x60] sm:$0xf0]  ;;  %v11955_v36 = vor.u32 %v17717_v30, %v11954_v29  ;;  %v12182_v38 = vld [vmem:[#allocation8 + $0xa8] sm:$0xf] }
  0x46   :  { %3105 = vmatpush.bf16.msrb.mxu3 %v12295_v4  ;;  %v17777_v40 = vld [vmem:[#allocation8 + $0xc0] sm:$0xf0]  ;;  %v11920_v41 = vld [vmem:[#allocation5 + $0x64] sm:$0xf0]  ;;  %v11926_v42 = vld [vmem:[#allocation5 + $0x50] sm:$0xf]  ;;  %v11919_v44 = vor.u32 %v17709_v33, %v11918_v32 }
  0x47   :  { %563 = vmatpush.bf16.msrb.mxu0 %v12059_v48  ;;  %v17710_v43 = vld [vmem:[#allocation5 + $0x68] sm:$0xf0]  ;;  %v11890_v45 = vld [vmem:[#allocation5 + $0x10] sm:$0xf]  ;;  %v17699_v47 = vld [vmem:[#allocation5 + $0x14] sm:$0xf]  ;;  %v12183_v48 = vor.u32 %v17777_v40, %v12182_v38 }
  0x48   :  { %577 = vmatpush.bf16.msrb.mxu1 %v12063_v49  ;;  %v17702_v46 = vld [vmem:[#allocation5 + $0x28] sm:$0xf0]  ;;  %v11923_v49 = vor.u32 %v17706_v37, %v11920_v41  ;;  %v11892_v51 = vld [vmem:[#allocation5 + $0x2c] sm:$0xf0]  ;;  %v12154_v52 = vld [vmem:[#allocation8 + $0x70] sm:$0xf] }
  0x49   :  { %591 = vmatpush.bf16.msrb.mxu2 %v12067_v50  ;;  %v11927_v50 = vor.u32 %v17710_v43, %v11926_v42  ;;  %v17770_v53 = vld [vmem:[#allocation8 + $0x88] sm:$0xf0]  ;;  %v11898_v54 = vld [vmem:[#allocation5 + $0x18] sm:$0xf]  ;;  %v12518_v56 = vld [vmem:[#allocation8 + $0x348] sm:$0xf]  ;;  %v11891_v60 = vor.u32 %v17702_v46, %v11890_v45  ;;  %v11895_v0 = vor.u32 %v17699_v47, %v11892_v51 }
  0x4a   :  { %3106 = vmatpush.bf16.msrb.mxu3 %v12267_v10  ;;  %v17703_v55 = vld [vmem:[#allocation5 + $0x30] sm:$0xf0]  ;;  %v17861_v57 = vld [vmem:[#allocation8 + $0x360] sm:$0xf0]  ;;  %v12966_v61 = vld [vmem:[#allocation8 + $0x6c8] sm:$0xf] }
  0x4b   :  { %564 = vmatpush.bf16.msrb.mxu0 %v12031_v58  ;;  %v12742_v58 = vld [vmem:[#allocation8 + $0x508] sm:$0xf]  ;;  %v17917_v59 = vld [vmem:[#allocation8 + $0x520] sm:$0xf0]  ;;  %v11899_v1 = vor.u32 %v17703_v55, %v11898_v54  ;;  %v12519_v2 = vor.u32 %v17861_v57, %v12518_v56  ;;  %v12490_v3 = vld [vmem:[#allocation8 + $0x310] sm:$0xf] }
  0x4c   :  { %578 = vmatpush.bf16.msrb.mxu1 %v12035_v62  ;;  %v17973_v62 = vld [vmem:[#allocation8 + $0x6e0] sm:$0xf0]  ;;  %v12743_v4 = vor.u32 %v17917_v59, %v12742_v58  ;;  %v12126_v5 = vld [vmem:[#allocation8 + $0x38] sm:$0xf]  ;;  %v17763_v6 = vld [vmem:[#allocation8 + $0x50] sm:$0xf0] }
  0x4d   :  { %592 = vmatpush.bf16.msrb.mxu2 %v12039_v63  ;;  %v12155_v63 = vor.u32 %v17770_v53, %v12154_v52  ;;  %v12967_v8 = vor.u32 %v17973_v62, %v12966_v61  ;;  %v12714_v9 = vld [vmem:[#allocation8 + $0x4d0] sm:$0xf]  ;;  %v17910_v10 = vld [vmem:[#allocation8 + $0x4e8] sm:$0xf0]  ;;  %v12462_v13 = vld [vmem:[#allocation8 + $0x2d8] sm:$0xf]  ;;  %v12127_v14 = vor.u32 %v17763_v6, %v12126_v5 }
  0x4e   :  { %3107 = vmatpush.bf16.msrb.mxu3 %v12239_v22  ;;  %v17847_v16 = vld [vmem:[#allocation8 + $0x2f0] sm:$0xf0]  ;;  %v12715_v17 = vor.u32 %v17910_v10, %v12714_v9  ;;  %v12098_v18 = vld [vmem:[#allocation8] sm:$0xf]  ;;  %v12686_v21 = vld [vmem:[#allocation8 + $0x498] sm:$0xf] }
  0x4f   :  { %565 = vmatpush.bf16.msrb.mxu0 %v12003_v7  ;;  %v17854_v7 = vld [vmem:[#allocation8 + $0x328] sm:$0xf0]  ;;  %v17903_v22 = vld [vmem:[#allocation8 + $0x4b0] sm:$0xf0]  ;;  %v13190_v25 = vld [vmem:[#allocation8 + $0x888] sm:$0xf]  ;;  %v12463_v28 = vor.u32 %v17847_v16, %v12462_v13 }
  0x50   :  { %579 = vmatpush.bf16.msrb.mxu1 %v12007_v11  ;;  %v12938_v11 = vld [vmem:[#allocation8 + $0x690] sm:$0xf]  ;;  %v12491_v15 = vor.u32 %v17854_v7, %v12490_v3  ;;  %v18029_v26 = vld [vmem:[#allocation8 + $0x8a0] sm:$0xf0]  ;;  %v12434_v29 = vld [vmem:[#allocation8 + $0x2a0] sm:$0xf] }
  0x51   :  { %593 = vmatpush.bf16.msrb.mxu2 %v12011_v12  ;;  %v17966_v12 = vld [vmem:[#allocation8 + $0x6a8] sm:$0xf0]  ;;  %v17840_v30 = vld [vmem:[#allocation8 + $0x2b8] sm:$0xf0]  ;;  %v12658_v33 = vld [vmem:[#allocation8 + $0x460] sm:$0xf] }
  0x52   :  { %3108 = vmatpush.bf16.msrb.mxu3 %v12211_v34  ;;  %v12939_v20 = vor.u32 %v17966_v12, %v12938_v11  ;;  %v17896_v34 = vld [vmem:[#allocation8 + $0x478] sm:$0xf0]  ;;  %v13162_v38 = vld [vmem:[#allocation8 + $0x850] sm:$0xf]  ;;  %v12435_v40 = vor.u32 %v17840_v30, %v12434_v29  ;;  %v12406_v41 = vld [vmem:[#allocation8 + $0x268] sm:$0xf] }
  0x53   :  { %566 = vmatpush.bf16.msrb.mxu0 %v11975_v19  ;;  %v17756_v19 = vld [vmem:[#allocation8 + $0x18] sm:$0xf0]  ;;  %v17833_v42 = vld [vmem:[#allocation8 + $0x280] sm:$0xf0]  ;;  %v12659_v43 = vor.u32 %v17896_v34, %v12658_v33  ;;  %v12630_v45 = vld [vmem:[#allocation8 + $0x428] sm:$0xf] }
  0x54   :  { %580 = vmatpush.bf16.msrb.mxu1 %v11979_v23  ;;  %v12910_v23 = vld [vmem:[#allocation8 + $0x658] sm:$0xf]  ;;  %v12099_v27 = vor.u32 %v17756_v19, %v12098_v18  ;;  %v17952_v37 = vld [vmem:[#allocation8 + $0x638] sm:$0xf0]  ;;  %v17889_v46 = vld [vmem:[#allocation8 + $0x440] sm:$0xf0]  ;;  %v12407_v52 = vor.u32 %v17833_v42, %v12406_v41 }
  0x55   :  { %594 = vmatpush.bf16.msrb.mxu2 %v11983_v24  ;;  %v17959_v24 = vld [vmem:[#allocation8 + $0x670] sm:$0xf0]  ;;  %v12854_v47 = vld [vmem:[#allocation8 + $0x5e8] sm:$0xf]  ;;  %v12378_v53 = vld [vmem:[#allocation8 + $0x230] sm:$0xf]  ;;  %v12631_v55 = vor.u32 %v17889_v46, %v12630_v45 }
  0x56   :  { %3109 = vmatpush.bf16.msrb.mxu3 %v12183_v48  ;;  %v12911_v32 = vor.u32 %v17959_v24, %v12910_v23  ;;  %v18015_v51 = vld [vmem:[#allocation8 + $0x830] sm:$0xf0]  ;;  %v17826_v54 = vld [vmem:[#allocation8 + $0x248] sm:$0xf0]  ;;  %v12602_v57 = vld [vmem:[#allocation8 + $0x3f0] sm:$0xf] }
  0x57   :  { %567 = vmatpush.bf16.msrb.mxu0 %v11947_v31  ;;  %v12687_v31 = vor.u32 %v17903_v22, %v12686_v21  ;;  %v17882_v58 = vld [vmem:[#allocation8 + $0x408] sm:$0xf0]  ;;  %v12826_v59 = vld [vmem:[#allocation8 + $0x5b0] sm:$0xf]  ;;  %v13106_v62 = vld [vmem:[#allocation8 + $0x7e0] sm:$0xf] }
  0x58   :  { %581 = vmatpush.bf16.msrb.mxu1 %v11951_v35  ;;  %v12882_v35 = vld [vmem:[#allocation8 + $0x620] sm:$0xf]  ;;  %v17938_v61 = vld [vmem:[#allocation8 + $0x5c8] sm:$0xf0]  ;;  %v17819_v3 = vld [vmem:[#allocation8 + $0x210] sm:$0xf0] }
  0x59   :  { %595 = vmatpush.bf16.msrb.mxu2 %v11955_v36  ;;  %v13191_v36 = vor.u32 %v18029_v26, %v13190_v25  ;;  %v12574_v5 = vld [vmem:[#allocation8 + $0x3b8] sm:$0xf]  ;;  %v17875_v6 = vld [vmem:[#allocation8 + $0x3d0] sm:$0xf0]  ;;  %v12322_v11 = vld [vmem:[#allocation8 + $0x1c0] sm:$0xf] }
  0x5a   :  { %3110 = vmatpush.bf16.msrb.mxu3 %v12155_v63  ;;  %v18008_v63 = vld [vmem:[#allocation8 + $0x7f8] sm:$0xf0]  ;;  %v17931_v9 = vld [vmem:[#allocation8 + $0x590] sm:$0xf0]  ;;  %v13414_v13 = vld [vmem:[#allocation8 + $0xa48] sm:$0xf] }
  0x5b   :  { %568 = vmatpush.bf16.msrb.mxu0 %v11919_v44  ;;  %v12883_v44 = vor.u32 %v17952_v37, %v12882_v35  ;;  %v13107_v7 = vor.u32 %v18008_v63, %v13106_v62  ;;  %v17812_v12 = vld [vmem:[#allocation8 + $0x1d8] sm:$0xf0]  ;;  %v12770_v19 = vld [vmem:[#allocation8 + $0x540] sm:$0xf]  ;;  %v13638_v21 = vld [vmem:[#allocation8 + $0xc08] sm:$0xf] }
  0x5c   :  { %582 = vmatpush.bf16.msrb.mxu1 %v11923_v49  ;;  %v17945_v49 = vld [vmem:[#allocation8 + $0x600] sm:$0xf0]  ;;  %v17868_v18 = vld [vmem:[#allocation8 + $0x398] sm:$0xf0]  ;;  %v17802_v23 = vld [vmem:[#allocation8 + $0x18c] sm:$0xf]  ;;  %v12323_v25 = vor.u32 %v17812_v12, %v12322_v11 }
  0x5d   :  { %596 = vmatpush.bf16.msrb.mxu2 %v11927_v50  ;;  %v13134_v50 = vld [vmem:[#allocation8 + $0x818] sm:$0xf]  ;;  %v12855_v56 = vor.u32 %v17945_v49, %v12854_v47  ;;  %v18141_v22 = vld [vmem:[#allocation8 + $0xc20] sm:$0xf0]  ;;  %v12296_v24 = vld [vmem:[#allocation8 + $0x1a4] sm:$0xf0] }
  0x5e   :  { %3111 = vmatpush.bf16.msrb.mxu3 %v12127_v14  ;;  %v12575_v14 = vor.u32 %v17875_v6, %v12574_v5  ;;  %v13386_v29 = vld [vmem:[#allocation8 + $0xa10] sm:$0xf]  ;;  %v18078_v30 = vld [vmem:[#allocation8 + $0xa28] sm:$0xf0]  ;;  %v17795_v35 = vld [vmem:[#allocation8 + $0x154] sm:$0xf] }
  0x5f   :  { %569 = vmatpush.bf16.msrb.mxu0 %v11891_v60  ;;  %v13135_v60 = vor.u32 %v18015_v51, %v13134_v50  ;;  %v13610_v33 = vld [vmem:[#allocation8 + $0xbd0] sm:$0xf]  ;;  %v18134_v34 = vld [vmem:[#allocation8 + $0xbe8] sm:$0xf0]  ;;  %v13387_v37 = vor.u32 %v18078_v30, %v13386_v29  ;;  %v13582_v46 = vld [vmem:[#allocation8 + $0xb98] sm:$0xf] }
  0x60   :  { %583 = vmatpush.bf16.msrb.mxu1 %v11895_v0  ;;  %v12379_v0 = vor.u32 %v17826_v54, %v12378_v53  ;;  %v18127_v47 = vld [vmem:[#allocation8 + $0xbb0] sm:$0xf0]  ;;  %v12240_v50 = vld [vmem:[#allocation8 + $0x134] sm:$0xf0]  ;;  %v18001_v53 = vld [vmem:[#allocation8 + $0x7c0] sm:$0xf0] }
  0x61   :  { %597 = vmatpush.bf16.msrb.mxu2 %v11899_v1  ;;  %v12350_v1 = vld [vmem:[#allocation8 + $0x1f8] sm:$0xf]  ;;  %v13583_v49 = vor.u32 %v18127_v47, %v13582_v46  ;;  %v13302_v54 = vld [vmem:[#allocation8 + $0x968] sm:$0xf]  ;;  %v12212_v62 = vld [vmem:[#allocation8 + $0xfc] sm:$0xf0] }
  0x62   :  { %570 = vmatmul.bf16.vlgmr.msrb.gmra.mxu0 %v19526_v39  ;;  %3112 = vmatpush.bf16.msrb.mxu3 %v12099_v27  ;;  %v12351_v10 = vor.u32 %v17819_v3, %v12350_v1  ;;  %v17994_v1 = vld [vmem:[#allocation8 + $0x788] sm:$0xf0]  ;;  %v13526_v6 = vld [vmem:[#allocation8 + $0xb28] sm:$0xf]  ;;  %v13022_v12 = vld [vmem:[#allocation8 + $0x738] sm:$0xf] }
  0x63   :  { %3119 = vmatpush.bf16.msra.mxu0 %v12519_v2  ;;  %584 = vmatmul.bf16.vlgmr.msrb.gmra.mxu1 %v19526_v39  ;;  %v12603_v2 = vor.u32 %v17882_v58, %v12602_v57  ;;  %v13554_v58 = vld [vmem:[#allocation8 + $0xb60] sm:$0xf]  ;;  %v13470_v30 = vld [vmem:[#allocation8 + $0xab8] sm:$0xf]  ;;  %s11850_s6 = sshll.u32 %s19461_s4, 4  ;;  %s11852_s1 = sshll.u32 %s20338_s7, 4  ;;  %s11851_s6 = int_to_ptr.vmem [resolvable:$true] %s11850_s6  ;;  %s11853_s1 = int_to_ptr.hbm [resolvable:$true] %s11852_s1 }
  0x64   :  { %3133 = vmatpush.bf16.msra.mxu1 %v12743_v4  ;;  %598 = vmatmul.bf16.vlgmr.msrb.gmra.mxu2 %v19526_v39  ;;  %v18022_v39 = vld [vmem:[#allocation8 + $0x868] sm:$0xf0]  ;;  %v12827_v4 = vor.u32 %v17938_v61, %v12826_v59  ;;  %v18120_v59 = vld [vmem:[#allocation8 + $0xb78] sm:$0xf0] }
  0x65   :  { %3147 = vmatpush.bf16.msra.mxu2 %v12967_v8  ;;  %v13163_v48 = vor.u32 %v18022_v39, %v13162_v38  ;;  %v12798_v8 = vld [vmem:[#allocation8 + $0x578] sm:$0xf]  ;;  %v18071_v39 = vld [vmem:[#allocation8 + $0x9f0] sm:$0xf0]  ;;  %v13555_v61 = vor.u32 %v18120_v59, %v13554_v58 }
  0x66   :  { %3161 = vmatpush.bf16.msra.mxu3 %v13191_v36  ;;  %v12799_v16 = vor.u32 %v17931_v9, %v12798_v8  ;;  %v12268_v36 = vld [vmem:[#allocation8 + $0x16c] sm:$0xf0]  ;;  %v13358_v38 = vld [vmem:[#allocation8 + $0x9d8] sm:$0xf]  ;;  %v17774_v8 = vld [vmem:[#allocation8 + $0xac] sm:$0xf] }
  0x67   :  { %3120 = vmatpush.bf16.msra.mxu0 %v12491_v15  ;;  %v18085_v15 = vld [vmem:[#allocation8 + $0xa60] sm:$0xf0]  ;;  %v12271_v41 = vor.u32 %v17795_v35, %v12268_v36  ;;  %v13359_v42 = vor.u32 %v18071_v39, %v13358_v38  ;;  %v13442_v36 = vld [vmem:[#allocation8 + $0xa80] sm:$0xf] }
  0x68   :  { %3134 = vmatpush.bf16.msra.mxu1 %v12715_v17  ;;  %v12546_v17 = vld [vmem:[#allocation8 + $0x380] sm:$0xf]  ;;  %v13415_v27 = vor.u32 %v18085_v15, %v13414_v13  ;;  %v17987_v13 = vld [vmem:[#allocation8 + $0x750] sm:$0xf0]  ;;  %v17753_v39 = vld [vmem:[#allocation8 + $0x4] sm:$0xf] }
  0x69   :  { %3148 = vmatpush.bf16.msra.mxu2 %v12939_v20  ;;  %v17924_v20 = vld [vmem:[#allocation8 + $0x558] sm:$0xf0]  ;;  %v12547_v26 = vor.u32 %v17868_v18, %v12546_v17  ;;  %v13023_v15 = vor.u32 %v17987_v13, %v13022_v12  ;;  %v13498_v18 = vld [vmem:[#allocation8 + $0xaf0] sm:$0xf] }
  0x6a   :  { %3162 = vmatpush.bf16.msra.mxu3 %v13163_v48  ;;  %v17788_v48 = vld [vmem:[#allocation8 + $0x11c] sm:$0xf] }
  0x6b   :  { %3121 = vmatpush.bf16.msra.mxu0 %v12463_v28  ;;  %v12771_v28 = vor.u32 %v17924_v20, %v12770_v19  ;;  %v12243_v51 = vor.u32 %v17788_v48, %v12240_v50  ;;  %v18106_v19 = vld [vmem:[#allocation8 + $0xb08] sm:$0xf0] }
  0x6c   :  { %3135 = vmatpush.bf16.msra.mxu1 %v12687_v31  ;;  %v13639_v31 = vor.u32 %v18141_v22, %v13638_v21  ;;  %v13499_v20 = vor.u32 %v18106_v19, %v13498_v18  ;;  %v17767_v21 = vld [vmem:[#allocation8 + $0x74] sm:$0xf]  ;;  %v12156_v22 = vld [vmem:[#allocation8 + $0x8c] sm:$0xf0]  ;;  %v13192_v18 = vld [vmem:[#allocation8 + $0x8a4] sm:$0xf0] }
  0x6d   :  { %3149 = vmatpush.bf16.msra.mxu2 %v12911_v32  ;;  %v12299_v32 = vor.u32 %v17802_v23, %v12296_v24  ;;  %v12159_v23 = vor.u32 %v17767_v21, %v12156_v22  ;;  %v12994_v24 = vld [vmem:[#allocation8 + $0x700] sm:$0xf] }
  0x6e   :  { %3163 = vmatpush.bf16.msra.mxu3 %v13135_v60  ;;  %v17781_v60 = vld [vmem:[#allocation8 + $0xe4] sm:$0xf] }
  0x6f   :  { %3122 = vmatpush.bf16.msra.mxu0 %v12435_v40  ;;  %v13611_v40 = vor.u32 %v18134_v34, %v13610_v33  ;;  %v12215_v63 = vor.u32 %v17781_v60, %v12212_v62  ;;  %v12128_v33 = vld [vmem:[#allocation8 + $0x54] sm:$0xf0]  ;;  %v17914_v60 = vld [vmem:[#allocation8 + $0x50c] sm:$0xf] }
  0x70   :  { %3136 = vmatpush.bf16.msra.mxu1 %v12659_v43  ;;  %v13330_v43 = vld [vmem:[#allocation8 + $0x9a0] sm:$0xf] }
  0x71   :  { %3150 = vmatpush.bf16.msra.mxu2 %v12883_v44  ;;  %v18064_v44 = vld [vmem:[#allocation8 + $0x9b8] sm:$0xf0] }
  0x72   :  { %3164 = vmatpush.bf16.msra.mxu3 %v13107_v7  ;;  %v13331_v45 = vor.u32 %v18064_v44, %v13330_v43  ;;  %v18113_v7 = vld [vmem:[#allocation8 + $0xb40] sm:$0xf0] }
  0x73   :  { %3123 = vmatpush.bf16.msra.mxu0 %v12407_v52  ;;  %v13078_v52 = vld [vmem:[#allocation8 + $0x7a8] sm:$0xf]  ;;  %v13527_v9 = vor.u32 %v18113_v7, %v13526_v6  ;;  %v12492_v6 = vld [vmem:[#allocation8 + $0x32c] sm:$0xf0]  ;;  %v17907_v7 = vld [vmem:[#allocation8 + $0x4d4] sm:$0xf] }
  0x74   :  { %3137 = vmatpush.bf16.msra.mxu1 %v12631_v55  ;;  %v13079_v55 = vor.u32 %v18001_v53, %v13078_v52 }
  0x75   :  { %3151 = vmatpush.bf16.msra.mxu2 %v12855_v56  ;;  %v18057_v56 = vld [vmem:[#allocation8 + $0x980] sm:$0xf0] }
  0x76   :  { %v13303_v57 = vor.u32 %v18057_v56, %v13302_v54  ;;  %3165 = vmatpush.bf16.msra.mxu3 %v13079_v55  ;;  %v17858_v55 = vld [vmem:[#allocation8 + $0x34c] sm:$0xf]  ;;  %v12520_v56 = vld [vmem:[#allocation8 + $0x364] sm:$0xf0] }
  0x77   :  { %3124 = vmatpush.bf16.msra.mxu0 %v12379_v0  ;;  %v13050_v0 = vld [vmem:[#allocation8 + $0x770] sm:$0xf] }
  0x78   :  { %3138 = vmatpush.bf16.msra.mxu1 %v12603_v2  ;;  %v13274_v2 = vld [vmem:[#allocation8 + $0x930] sm:$0xf]  ;;  %v13051_v3 = vor.u32 %v17994_v1, %v13050_v0  ;;  %v17851_v1 = vld [vmem:[#allocation8 + $0x314] sm:$0xf] }
  0x79   :  { %3152 = vmatpush.bf16.msra.mxu2 %v12827_v4  ;;  %v18050_v4 = vld [vmem:[#allocation8 + $0x948] sm:$0xf0] }
  0x7a   :  { %v13275_v5 = vor.u32 %v18050_v4, %v13274_v2  ;;  %3166 = vmatpush.bf16.msra.mxu3 %v13051_v3  ;;  %v12523_v4 = vor.u32 %v17858_v55, %v12520_v56  ;;  %v12632_v55 = vld [vmem:[#allocation8 + $0x444] sm:$0xf0] }
  0x7b   :  { %3125 = vmatpush.bf16.msra.mxu0 %v12351_v10  ;;  %v12184_v10 = vld [vmem:[#allocation8 + $0xc4] sm:$0xf0] }
  0x7c   :  { %3139 = vmatpush.bf16.msra.mxu1 %v12575_v14  ;;  %v12187_v11 = vor.u32 %v17774_v8, %v12184_v10  ;;  %v13246_v14 = vld [vmem:[#allocation8 + $0x8f8] sm:$0xf]  ;;  %v12716_v8 = vld [vmem:[#allocation8 + $0x4ec] sm:$0xf0] }
  0x7d   :  { %3153 = vmatpush.bf16.msra.mxu2 %v12799_v16  ;;  %v18043_v16 = vld [vmem:[#allocation8 + $0x910] sm:$0xf0] }
  0x7e   :  { %v13247_v17 = vor.u32 %v18043_v16, %v13246_v14  ;;  %3167 = vmatpush.bf16.msra.mxu3 %v13023_v15  ;;  %v12495_v14 = vor.u32 %v17851_v1, %v12492_v6  ;;  %v12719_v15 = vor.u32 %v17907_v7, %v12716_v8  ;;  %v12968_v16 = vld [vmem:[#allocation8 + $0x6e4] sm:$0xf0] }
  0x7f   :  { %3126 = vmatpush.bf16.msra.mxu0 %v12323_v25  ;;  %v17980_v25 = vld [vmem:[#allocation8 + $0x718] sm:$0xf0] }
  0x80   :  { %3140 = vmatpush.bf16.msra.mxu1 %v12547_v26  ;;  %v13218_v26 = vld [vmem:[#allocation8 + $0x8c0] sm:$0xf] }
  0x81   :  { %3154 = vmatpush.bf16.msra.mxu2 %v12771_v28  ;;  %v18036_v28 = vld [vmem:[#allocation8 + $0x8d8] sm:$0xf0] }
  0x82   :  { %v13219_v29 = vor.u32 %v18036_v28, %v13218_v26  ;;  %v12688_v26 = vld [vmem:[#allocation8 + $0x4b4] sm:$0xf0] }
  0x83   :  { %3175 = vmatpush.bf16.msrb.mxu0 %v13415_v27  ;;  %v12995_v27 = vor.u32 %v17980_v25, %v12994_v24  ;;  %v12464_v24 = vld [vmem:[#allocation8 + $0x2f4] sm:$0xf0]  ;;  %v17900_v25 = vld [vmem:[#allocation8 + $0x49c] sm:$0xf] }
  0x84   :  { %3189 = vmatpush.bf16.msrb.mxu1 %v13639_v31  ;;  %v18099_v31 = vld [vmem:[#allocation8 + $0xad0] sm:$0xf0] }
  0x85   :  { %3203 = vmatpush.bf16.msrb.mxu2 %v12299_v32  ;;  %3168 = vmatpush.bf16.msra.mxu3 %v12995_v27  ;;  %v17760_v32 = vld [vmem:[#allocation8 + $0x3c] sm:$0xf]  ;;  %v13471_v34 = vor.u32 %v18099_v31, %v13470_v30 }
  0x86   :  { %v12131_v35 = vor.u32 %v17760_v32, %v12128_v33  ;;  %v17963_v32 = vld [vmem:[#allocation8 + $0x694] sm:$0xf]  ;;  %v12940_v33 = vld [vmem:[#allocation8 + $0x6ac] sm:$0xf0] }
  0x87   :  { %3176 = vmatpush.bf16.msrb.mxu0 %v13387_v37  ;;  %v18092_v37 = vld [vmem:[#allocation8 + $0xa98] sm:$0xf0] }
  0x88   :  { %3190 = vmatpush.bf16.msrb.mxu1 %v13611_v40  ;;  %v13443_v38 = vor.u32 %v18092_v37, %v13442_v36  ;;  %v12100_v40 = vld [vmem:[#allocation8 + $0x1c] sm:$0xf0]  ;;  %v12691_v36 = vor.u32 %v17900_v25, %v12688_v26  ;;  %v18019_v37 = vld [vmem:[#allocation8 + $0x854] sm:$0xf] }
  0x89   :  { %3204 = vmatpush.bf16.msrb.mxu2 %v12271_v41  ;;  %v12103_v41 = vor.u32 %v17753_v39, %v12100_v40  ;;  %v17837_v39 = vld [vmem:[#allocation8 + $0x2a4] sm:$0xf]  ;;  %v12436_v40 = vld [vmem:[#allocation8 + $0x2bc] sm:$0xf0]  ;;  %v17935_v26 = vld [vmem:[#allocation8 + $0x5b4] sm:$0xf] }
  0x8b   :  { %3177 = vmatpush.bf16.msrb.mxu0 %v13359_v42  ;;  %v19535_v42 = vld [vmem:[#allocation7] sm:$0xff] }
  0x8c   :  { %3191 = vmatpush.bf16.msrb.mxu1 %v13583_v49  ;;  %v198_v46 = vperm.slane %v19535_v42, 0  ;;  %v201_v52 = vperm.slane %v19535_v42, 3  ;;  %v202_v6 = vperm.slane %v19535_v42, 4  ;;  %v203_v7 = vperm.slane %v19535_v42, 5 }
  0x8d   :  { %3205 = vmatpush.bf16.msrb.mxu2 %v12243_v51  ;;  %v200_v51 = vperm.slane %v19535_v42, 2 }
  0x8f   :  { %3178 = vmatpush.bf16.msrb.mxu0 %v13331_v45  ;;  %v199_v45 = vperm.slane %v19535_v42, 1 }
  0x90   :  { %3192 = vmatpush.bf16.msrb.mxu1 %v13555_v61  ;;  %v12744_v61 = vld [vmem:[#allocation8 + $0x524] sm:$0xf0] }
  0x91   :  { %3206 = vmatpush.bf16.msrb.mxu2 %v12215_v63 }
  0x93   :  { %3179 = vmatpush.bf16.msrb.mxu0 %v13303_v57 }
  0x94   :  { %3193 = vmatpush.bf16.msrb.mxu1 %v13527_v9 }
  0x95   :  { %3207 = vmatpush.bf16.msrb.mxu2 %v12187_v11  ;;  %v17970_v11 = vld [vmem:[#allocation8 + $0x6cc] sm:$0xf] }
  0x97   :  { %3180 = vmatpush.bf16.msrb.mxu0 %v13275_v5  ;;  %v12747_v5 = vor.u32 %v17914_v60, %v12744_v61 }
  0x98   :  { %3194 = vmatpush.bf16.msrb.mxu1 %v13499_v20 }
  0x99   :  { %3208 = vmatpush.bf16.msrb.mxu2 %v12159_v23  ;;  %v17844_v23 = vld [vmem:[#allocation8 + $0x2dc] sm:$0xf] }
  0x9a   :  { %v12467_v31 = vor.u32 %v17844_v23, %v12464_v24 }
  0x9b   :  { %3181 = vmatpush.bf16.msrb.mxu0 %v13247_v17  ;;  %v18026_v17 = vld [vmem:[#allocation8 + $0x88c] sm:$0xf] }
  0x9c   :  { %3195 = vmatpush.bf16.msrb.mxu1 %v13471_v34  ;;  %v13195_v30 = vor.u32 %v18026_v17, %v13192_v18  ;;  %v13080_v17 = vld [vmem:[#allocation8 + $0x7c4] sm:$0xf0]  ;;  %v17816_v18 = vld [vmem:[#allocation8 + $0x1fc] sm:$0xf] }
  0x9d   :  { %3209 = vmatpush.bf16.msrb.mxu2 %v12131_v35 }
  0x9f   :  { %3182 = vmatpush.bf16.msrb.mxu0 %v13219_v29  ;;  %v12971_v29 = vor.u32 %v17970_v11, %v12968_v16  ;;  %v17998_v16 = vld [vmem:[#allocation8 + $0x7ac] sm:$0xf] }
  0xa0   :  { %3196 = vmatpush.bf16.msrb.mxu1 %v13443_v38  ;;  %v13164_v38 = vld [vmem:[#allocation8 + $0x86c] sm:$0xf0]  ;;  %v13083_v25 = vor.u32 %v17998_v16, %v13080_v17 }
  0xa1   :  { %3210 = vmatpush.bf16.msrb.mxu2 %v12103_v41  ;;  %v17893_v41 = vld [vmem:[#allocation8 + $0x464] sm:$0xf] }
  0xbf   :  { %v515_v43 = vpop.f32.mrf.mxu0 }
  0xc0   :  { %v529_v44 = vpop.f32.mrf.mxu1  ;;  %v516_v48 = vadd.f32 %v515_v43, %v198_v46  ;;  %v12660_v43 = vld [vmem:[#allocation8 + $0x47c] sm:$0xf0] }
  0xc1   :  { %v530_v47 = vadd.f32 %v529_v44, %v199_v45  ;;  %v12943_v44 = vor.u32 %v17963_v32, %v12940_v33  ;;  %v13052_v33 = vld [vmem:[#allocation8 + $0x78c] sm:$0xf0] }
  0xc2   :  { %v604_v62 = vmax.f32 %v516_v48, 0.0  ;;  %v12439_v48 = vor.u32 %v17837_v39, %v12436_v40  ;;  %v17865_v39 = vld [vmem:[#allocation8 + $0x384] sm:$0xf]  ;;  %v12548_v40 = vld [vmem:[#allocation8 + $0x39c] sm:$0xf0] }
  0xc3   :  { %v605_v57 = vmax.f32 %v530_v47, 0.0  ;;  %v12912_v47 = vld [vmem:[#allocation8 + $0x674] sm:$0xf0] }
  0xc7   :  { %v543_v49 = vpop.f32.mrf.mxu2  ;;  %v517_v53 = vpop.f32.mrf.mxu0 }
  0xc8   :  { %v557_v50 = vpop.f32.mrf.mxu3  ;;  %v531_v54 = vpop.f32.mrf.mxu1  ;;  %v518_v58 = vadd.f32 %v517_v53, %v198_v46  ;;  %v544_v2 = vadd.f32 %v543_v49, %v200_v51  ;;  %v17956_v46 = vld [vmem:[#allocation8 + $0x65c] sm:$0xf]  ;;  %v12663_v49 = vor.u32 %v17893_v41, %v12660_v43  ;;  %v12408_v53 = vld [vmem:[#allocation8 + $0x284] sm:$0xf0]  ;;  %v18082_v41 = vld [vmem:[#allocation8 + $0xa4c] sm:$0xf] }
  0xc9   :  { %v532_v59 = vadd.f32 %v531_v54, %v199_v45  ;;  %v558_v3 = vadd.f32 %v557_v50, %v201_v52  ;;  %v13167_v45 = vor.u32 %v18019_v37, %v13164_v38  ;;  %v18012_v50 = vld [vmem:[#allocation8 + $0x81c] sm:$0xf]  ;;  %v17886_v54 = vld [vmem:[#allocation8 + $0x42c] sm:$0xf]  ;;  %v12915_v56 = vor.u32 %v17956_v46, %v12912_v47  ;;  %v12324_v37 = vld [vmem:[#allocation8 + $0x1dc] sm:$0xf0] }
  0xca   :  { %v611_v63 = vmax.f32 %v518_v58, 0.0  ;;  %v606_v19 = vmax.f32 %v544_v2, 0.0  ;;  %v17949_v58 = vld [vmem:[#allocation8 + $0x624] sm:$0xf]  ;;  %v12635_v61 = vor.u32 %v17886_v54, %v12632_v55  ;;  %v12380_v2 = vld [vmem:[#allocation8 + $0x24c] sm:$0xf0] }
  0xcb   :  { %v612_v0 = vmax.f32 %v532_v59, 0.0  ;;  %v607_v20 = vmax.f32 %v558_v3, 0.0  ;;  %v12884_v59 = vld [vmem:[#allocation8 + $0x63c] sm:$0xf0]  ;;  %v17879_v3 = vld [vmem:[#allocation8 + $0x3f4] sm:$0xf] }
  0xcc   :  { %v19541_v9 = vpack.c.bf16 %v611_v63, %v604_v62  ;;  %v18005_v62 = vld [vmem:[#allocation8 + $0x7e4] sm:$0xf]  ;;  %v13108_v63 = vld [vmem:[#allocation8 + $0x7fc] sm:$0xf0]  ;;  %v12887_v8 = vor.u32 %v17949_v58, %v12884_v59  ;;  %v18138_v46 = vld [vmem:[#allocation8 + $0xc0c] sm:$0xf] }
  0xcd   :  { %v19543_v10 = vpack.c.bf16 %v612_v0, %v605_v57  ;;  %v17823_v0 = vld [vmem:[#allocation8 + $0x234] sm:$0xf]  ;;  %v13111_v11 = vor.u32 %v18005_v62, %v13108_v63  ;;  %v13640_v47 = vld [vmem:[#allocation8 + $0xc24] sm:$0xf0]  ;;  %v17984_v58 = vld [vmem:[#allocation8 + $0x73c] sm:$0xf] }
  0xce   :  { %3113 = vmatmul.bf16.vlgmr.msrb.gmra.mxu3 %v19541_v9  ;;  %v13024_v59 = vld [vmem:[#allocation8 + $0x754] sm:$0xf0] }
  0xcf   :  { %v545_v12 = vpop.f32.mrf.mxu2  ;;  %3127 = vmatmul.bf16.vlgmr.msra.gmra.mxu0 %v19543_v10  ;;  %3217 = vmatpush.bf16.msrb.mxu3 %v12523_v4  ;;  %v12604_v4 = vld [vmem:[#allocation8 + $0x40c] sm:$0xf0] }
  0xd0   :  { %v559_v13 = vpop.f32.mrf.mxu3  ;;  %v546_v21 = vadd.f32 %v545_v12, %v200_v51  ;;  %3231 = vmatpush.bf16.msra.mxu0 %v12747_v5  ;;  %v13136_v51 = vld [vmem:[#allocation8 + $0x834] sm:$0xf0]  ;;  %v17942_v12 = vld [vmem:[#allocation8 + $0x5ec] sm:$0xf] }
  0xd1   :  { %v560_v22 = vadd.f32 %v559_v13, %v201_v52  ;;  %v17830_v52 = vld [vmem:[#allocation8 + $0x26c] sm:$0xf]  ;;  %v13139_v57 = vor.u32 %v18012_v50, %v13136_v51  ;;  %v12856_v13 = vld [vmem:[#allocation8 + $0x604] sm:$0xf0] }
  0xd2   :  { %v613_v27 = vmax.f32 %v546_v21, 0.0  ;;  %v12411_v60 = vor.u32 %v17830_v52, %v12408_v53  ;;  %v12576_v21 = vld [vmem:[#allocation8 + $0x3d4] sm:$0xf0]  ;;  %v12859_v24 = vor.u32 %v17942_v12, %v12856_v13  ;;  %v17928_v52 = vld [vmem:[#allocation8 + $0x57c] sm:$0xf] }
  0xd3   :  { %v614_v28 = vmax.f32 %v560_v22, 0.0  ;;  %3218 = vmatpush.bf16.msrb.mxu3 %v12495_v14  ;;  %v12383_v14 = vor.u32 %v17823_v0, %v12380_v2  ;;  %v204_v22 = vperm.slane %v19535_v42, 6  ;;  %v12800_v53 = vld [vmem:[#allocation8 + $0x594] sm:$0xf0]  ;;  %v13643_v0 = vor.u32 %v18138_v46, %v13640_v47  ;;  %v13388_v2 = vld [vmem:[#allocation8 + $0xa2c] sm:$0xf0] }
  0xd4   :  { %v19547_v34 = vpack.c.bf16 %v613_v27, %v606_v19  ;;  %3232 = vmatpush.bf16.msra.mxu0 %v12719_v15  ;;  %v12607_v15 = vor.u32 %v17879_v3, %v12604_v4  ;;  %v12352_v19 = vld [vmem:[#allocation8 + $0x214] sm:$0xf0]  ;;  %v12828_v27 = vld [vmem:[#allocation8 + $0x5cc] sm:$0xf0]  ;;  %v18131_v3 = vld [vmem:[#allocation8 + $0xbd4] sm:$0xf] }
  0xd5   :  { %v19549_v35 = vpack.c.bf16 %v614_v28, %v607_v20  ;;  %v17872_v20 = vld [vmem:[#allocation8 + $0x3bc] sm:$0xf]  ;;  %v17991_v28 = vld [vmem:[#allocation8 + $0x774] sm:$0xf]  ;;  %v12831_v50 = vor.u32 %v17935_v26, %v12828_v27  ;;  %v17977_v13 = vld [vmem:[#allocation8 + $0x704] sm:$0xf] }
  0xd6   :  { %3141 = vmatmul.bf16.vlgmr.msra.gmra.mxu1 %v19547_v34  ;;  %v12579_v32 = vor.u32 %v17872_v20, %v12576_v21  ;;  %v13055_v51 = vor.u32 %v17991_v28, %v13052_v33  ;;  %v18124_v42 = vld [vmem:[#allocation8 + $0xb9c] sm:$0xf]  ;;  %v17855_v33 = vld [vmem:[#allocation8 + $0x330] sm:$0xf0]  ;;  %v12470_v47 = vld [vmem:[#allocation8 + $0x2e0] sm:$0xf] }
  0xd7   :  { %3155 = vmatmul.bf16.vlgmr.msra.gmra.mxu2 %v19549_v35  ;;  %3245 = vmatpush.bf16.msra.mxu1 %v12971_v29 }
  0xd8   :  { %3259 = vmatpush.bf16.msra.mxu2 %v13195_v30  ;;  %3219 = vmatpush.bf16.msrb.mxu3 %v12467_v31  ;;  %v12355_v31 = vor.u32 %v17816_v18, %v12352_v19  ;;  %v12526_v18 = vld [vmem:[#allocation8 + $0x350] sm:$0xf]  ;;  %v17862_v19 = vld [vmem:[#allocation8 + $0x368] sm:$0xf0] }
  0xd9   :  { %3233 = vmatpush.bf16.msra.mxu0 %v12691_v36  ;;  %v17809_v36 = vld [vmem:[#allocation8 + $0x1c4] sm:$0xf] }
  0xdb   :  { %3246 = vmatpush.bf16.msra.mxu1 %v12943_v44 }
  0xdc   :  { %3260 = vmatpush.bf16.msra.mxu2 %v13167_v45  ;;  %3220 = vmatpush.bf16.msrb.mxu3 %v12439_v48  ;;  %v13416_v45 = vld [vmem:[#allocation8 + $0xa64] sm:$0xf0] }
  0xdd   :  { %3234 = vmatpush.bf16.msra.mxu0 %v12663_v49  ;;  %v13419_v63 = vor.u32 %v18082_v41, %v13416_v45  ;;  %v13332_v41 = vld [vmem:[#allocation8 + $0x9bc] sm:$0xf0] }
  0xdf   :  { %v571_v1 = vpop.f32.mrf.mxu0  ;;  %3247 = vmatpush.bf16.msra.mxu1 %v12915_v56  ;;  %v12327_v56 = vor.u32 %v17809_v36, %v12324_v37 }
  0xe0   :  { %v585_v5 = vpop.f32.mrf.mxu1  ;;  %3261 = vmatpush.bf16.msra.mxu2 %v13139_v57  ;;  %3221 = vmatpush.bf16.msrb.mxu3 %v12411_v60  ;;  %v572_v29 = vadd.f32 %v571_v1, %v202_v6  ;;  %v12551_v57 = vor.u32 %v17865_v39, %v12548_v40  ;;  %v18075_v1 = vld [vmem:[#allocation8 + $0xa14] sm:$0xf]  ;;  %v18061_v40 = vld [vmem:[#allocation8 + $0x9a4] sm:$0xf] }
  0xe1   :  { %3235 = vmatpush.bf16.msra.mxu0 %v12635_v61  ;;  %v586_v23 = vadd.f32 %v585_v5, %v203_v7  ;;  %v12803_v5 = vor.u32 %v17928_v52, %v12800_v53  ;;  %v13391_v20 = vor.u32 %v18075_v1, %v13388_v2  ;;  %v17799_v39 = vld [vmem:[#allocation8 + $0x170] sm:$0xf0]  ;;  %v17792_v52 = vld [vmem:[#allocation8 + $0x138] sm:$0xf0]  ;;  %v18054_v53 = vld [vmem:[#allocation8 + $0x96c] sm:$0xf] }
  0xe2   :  { %v608_v54 = vmax.f32 %v572_v29, 0.0  ;;  %v12527_v29 = vor.u32 %v17862_v19, %v12526_v18  ;;  %v18047_v2 = vld [vmem:[#allocation8 + $0x934] sm:$0xf]  ;;  %v13248_v18 = vld [vmem:[#allocation8 + $0x914] sm:$0xf0] }
  0xe3   :  { %3248 = vmatpush.bf16.msra.mxu1 %v12887_v8  ;;  %v609_v48 = vmax.f32 %v586_v23, 0.0  ;;  %v17921_v8 = vld [vmem:[#allocation8 + $0x544] sm:$0xf]  ;;  %v17806_v23 = vld [vmem:[#allocation8 + $0x1a8] sm:$0xf0] }
  0xe4   :  { %3262 = vmatpush.bf16.msra.mxu2 %v13111_v11  ;;  %3222 = vmatpush.bf16.msrb.mxu3 %v12383_v14  ;;  %v12772_v11 = vld [vmem:[#allocation8 + $0x55c] sm:$0xf0] }
  0xe5   :  { %3236 = vmatpush.bf16.msra.mxu0 %v12607_v15  ;;  %v12996_v14 = vld [vmem:[#allocation8 + $0x71c] sm:$0xf0]  ;;  %v12302_v15 = vld [vmem:[#allocation8 + $0x190] sm:$0xf]  ;;  %v12775_v27 = vor.u32 %v17921_v8, %v12772_v11 }
  0xe6   :  { %v12999_v28 = vor.u32 %v17977_v13, %v12996_v14  ;;  %v12414_v11 = vld [vmem:[#allocation8 + $0x270] sm:$0xf] }
  0xe7   :  { %v599_v30 = vpop.f32.mrf.mxu2  ;;  %v573_v38 = vpop.f32.mrf.mxu0  ;;  %3211 = vmatmul.bf16.vlgmr.msrb.gmra.mxu2 %v19541_v9  ;;  %3249 = vmatpush.bf16.msra.mxu1 %v12859_v24  ;;  %v18068_v24 = vld [vmem:[#allocation8 + $0x9dc] sm:$0xf]  ;;  %v12190_v14 = vld [vmem:[#allocation8 + $0xb0] sm:$0xf] }
  0xe8   :  { %v574_v43 = vadd.f32 %v573_v38, %v202_v6  ;;  %v587_v44 = vpop.f32.mrf.mxu1  ;;  %3263 = vmatpush.bf16.msra.mxu2 %v13083_v25  ;;  %3223 = vmatpush.bf16.msrb.mxu3 %v12355_v31  ;;  %v600_v60 = vadd.f32 %v599_v30, %v204_v22  ;;  %v13027_v6 = vor.u32 %v17984_v58, %v13024_v59  ;;  %v13360_v25 = vld [vmem:[#allocation8 + $0x9f4] sm:$0xf0]  ;;  %v12442_v59 = vld [vmem:[#allocation8 + $0x2a8] sm:$0xf] }
  0xe9   :  { %v588_v49 = vadd.f32 %v587_v44, %v203_v7  ;;  %3237 = vmatpush.bf16.msra.mxu0 %v12579_v32  ;;  %v13612_v7 = vld [vmem:[#allocation8 + $0xbec] sm:$0xf0]  ;;  %v12303_v31 = vor.u32 %v17806_v23, %v12302_v15  ;;  %v12498_v32 = vld [vmem:[#allocation8 + $0x318] sm:$0xf]  ;;  %v13363_v36 = vor.u32 %v18068_v24, %v13360_v25  ;;  %v13556_v44 = vld [vmem:[#allocation8 + $0xb7c] sm:$0xf0] }
  0xea   :  { %v615_v55 = vmax.f32 %v574_v43, 0.0  ;;  %v610_v16 = vmax.f32 %v600_v60, 0.0  ;;  %v13615_v21 = vor.u32 %v18131_v3, %v13612_v7  ;;  %v12274_v38 = vld [vmem:[#allocation8 + $0x158] sm:$0xf]  ;;  %v18117_v43 = vld [vmem:[#allocation8 + $0xb64] sm:$0xf]  ;;  %v12499_v45 = vor.u32 %v17855_v33, %v12498_v32 }
  0xeb   :  { %v616_v61 = vmax.f32 %v588_v49, 0.0  ;;  %3250 = vmatpush.bf16.msra.mxu1 %v12831_v50  ;;  %v12275_v46 = vor.u32 %v17799_v39, %v12274_v38  ;;  %v13335_v49 = vor.u32 %v18061_v40, %v13332_v41  ;;  %v13559_v50 = vor.u32 %v18117_v43, %v13556_v44  ;;  %v17841_v60 = vld [vmem:[#allocation8 + $0x2c0] sm:$0xf0]  ;;  %v13276_v3 = vld [vmem:[#allocation8 + $0x94c] sm:$0xf0] }
  0xec   :  { %v19559_v62 = vpack.c.bf16 %v615_v55, %v608_v54  ;;  %3264 = vmatpush.bf16.msra.mxu2 %v13055_v51  ;;  %3224 = vmatpush.bf16.msrb.mxu3 %v12327_v56  ;;  %v12246_v51 = vld [vmem:[#allocation8 + $0x120] sm:$0xf]  ;;  %v13304_v54 = vld [vmem:[#allocation8 + $0x984] sm:$0xf0]  ;;  %v18110_v56 = vld [vmem:[#allocation8 + $0xb2c] sm:$0xf]  ;;  %v13279_v13 = vor.u32 %v18047_v2, %v13276_v3 }
  0xed   :  { %v19561_v4 = vpack.c.bf16 %v616_v61, %v609_v48  ;;  %3238 = vmatpush.bf16.msra.mxu0 %v12551_v57  ;;  %v17848_v48 = vld [vmem:[#allocation8 + $0x2f8] sm:$0xf0]  ;;  %v13528_v57 = vld [vmem:[#allocation8 + $0xb44] sm:$0xf0]  ;;  %v12247_v58 = vor.u32 %v17792_v52, %v12246_v51  ;;  %v13307_v61 = vor.u32 %v18054_v53, %v13304_v54  ;;  %v13500_v7 = vld [vmem:[#allocation8 + $0xb0c] sm:$0xf0] }
  0xee   :  { %3169 = vmatmul.bf16.vlgmr.msra.gmra.mxu3 %v19559_v62  ;;  %v12471_v55 = vor.u32 %v17848_v48, %v12470_v47  ;;  %v13531_v1 = vor.u32 %v18110_v56, %v13528_v57  ;;  %v17778_v15 = vld [vmem:[#allocation8 + $0xc8] sm:$0xf0]  ;;  %v12386_v24 = vld [vmem:[#allocation8 + $0x238] sm:$0xf]  ;;  %v17827_v25 = vld [vmem:[#allocation8 + $0x250] sm:$0xf0] }
  0xef   :  { %v601_v12 = vpop.f32.mrf.mxu2  ;;  %3183 = vmatmul.bf16.vlgmr.msrb.gmra.mxu0 %v19561_v4  ;;  %3251 = vmatpush.bf16.msra.mxu1 %v12803_v5  ;;  %v12443_v5 = vor.u32 %v17841_v60, %v12442_v59  ;;  %v12191_v23 = vor.u32 %v17778_v15, %v12190_v14  ;;  %v13444_v32 = vld [vmem:[#allocation8 + $0xa9c] sm:$0xf0]  ;;  %v12387_v33 = vor.u32 %v17827_v25, %v12386_v24  ;;  %v12974_v38 = vld [vmem:[#allocation8 + $0x6d0] sm:$0xf]  ;;  %v17974_v40 = vld [vmem:[#allocation8 + $0x6e8] sm:$0xf0] }
  0xf0   :  { %v602_v17 = vadd.f32 %v601_v12, %v204_v22  ;;  %3273 = vmatpush.bf16.msra.mxu3 %v13419_v63  ;;  %3265 = vmatpush.bf16.msra.mxu2 %v13027_v6  ;;  %v13584_v22 = vld [vmem:[#allocation8 + $0xbb4] sm:$0xf0]  ;;  %v12218_v63 = vld [vmem:[#allocation8 + $0xe8] sm:$0xf]  ;;  %v18103_v6 = vld [vmem:[#allocation8 + $0xaf4] sm:$0xf] }
  0xf1   :  { %3287 = vmatpush.bf16.msrb.mxu0 %v13643_v0  ;;  %v13587_v37 = vor.u32 %v18124_v42, %v13584_v22  ;;  %v17785_v0 = vld [vmem:[#allocation8 + $0x100] sm:$0xf0]  ;;  %v17834_v12 = vld [vmem:[#allocation8 + $0x288] sm:$0xf0]  ;;  %v12358_v41 = vld [vmem:[#allocation8 + $0x200] sm:$0xf] }
  0xf2   :  { %v617_v26 = vmax.f32 %v602_v17, 0.0  ;;  %v12219_v8 = vor.u32 %v17785_v0, %v12218_v63  ;;  %v18040_v17 = vld [vmem:[#allocation8 + $0x8fc] sm:$0xf]  ;;  %v12415_v19 = vor.u32 %v17834_v12, %v12414_v11  ;;  %v18033_v42 = vld [vmem:[#allocation8 + $0x8c4] sm:$0xf] }
  0xf3   :  { %3252 = vmatpush.bf16.msra.mxu1 %v12775_v27  ;;  %v12162_v27 = vld [vmem:[#allocation8 + $0x78] sm:$0xf]  ;;  %v17820_v43 = vld [vmem:[#allocation8 + $0x218] sm:$0xf0]  ;;  %v17911_v52 = vld [vmem:[#allocation8 + $0x4f0] sm:$0xf0] }
  0xf4   :  { %v19567_v30 = vpack.c.bf16 %v617_v26, %v610_v16  ;;  %3274 = vmatpush.bf16.msra.mxu3 %v13391_v20  ;;  %3266 = vmatpush.bf16.msra.mxu2 %v12999_v28  ;;  %v13503_v16 = vor.u32 %v18103_v6, %v13500_v7  ;;  %v18096_v20 = vld [vmem:[#allocation8 + $0xabc] sm:$0xf]  ;;  %v13251_v26 = vor.u32 %v18040_v17, %v13248_v18  ;;  %v17771_v28 = vld [vmem:[#allocation8 + $0x90] sm:$0xf0]  ;;  %v12946_v53 = vld [vmem:[#allocation8 + $0x698] sm:$0xf] }
  0xf5   :  { %3288 = vmatpush.bf16.msrb.mxu0 %v13615_v21  ;;  %v13472_v21 = vld [vmem:[#allocation8 + $0xad4] sm:$0xf0]  ;;  %v12163_v39 = vor.u32 %v17771_v28, %v12162_v27  ;;  %v12359_v51 = vor.u32 %v17820_v43, %v12358_v41  ;;  %v17967_v54 = vld [vmem:[#allocation8 + $0x6b0] sm:$0xf0]  ;;  %v12106_v56 = vld [vmem:[#allocation8 + $0x8] sm:$0xf] }
  0xf6   :  { %20342 = vst [vmem:[#allocation20_spill] sm:$0xff] %v19567_v30  ;;  %3197 = vmatmul.bf16.vlgmr.msrb.gmra.mxu1 %v19567_v30  ;;  %v13475_v22 = vor.u32 %v18096_v20, %v13472_v21  ;;  %v12330_v57 = vld [vmem:[#allocation8 + $0x1c8] sm:$0xf]  ;;  %v17757_v59 = vld [vmem:[#allocation8 + $0x20] sm:$0xf0]  ;;  %v12947_v2 = vor.u32 %v17967_v54, %v12946_v53 }
  0xf7   :  { %3301 = vmatpush.bf16.msrb.mxu1 %v12303_v31  ;;  %3267 = vmatmul.bf16.vlgmr.msra.gmra.mxu2 %v19559_v62  ;;  %v18089_v31 = vld [vmem:[#allocation8 + $0xa84] sm:$0xf]  ;;  %v13422_v60 = vld [vmem:[#allocation8 + $0xa50] sm:$0xf]  ;;  %v17904_v6 = vld [vmem:[#allocation8 + $0x4b8] sm:$0xf0]  ;;  %v12107_v7 = vor.u32 %v17757_v59, %v12106_v56 }
  0xf8   :  { %3315 = vmatpush.bf16.msrb.mxu2 %v12527_v29  ;;  %3275 = vmatpush.bf16.msra.mxu3 %v13363_v36  ;;  %v13220_v29 = vld [vmem:[#allocation8 + $0x8dc] sm:$0xf0]  ;;  %v12750_v36 = vld [vmem:[#allocation8 + $0x510] sm:$0xf]  ;;  %v13447_v47 = vor.u32 %v18089_v31, %v13444_v32  ;;  %v17960_v12 = vld [vmem:[#allocation8 + $0x678] sm:$0xf0] }
  0xf9   :  { %3289 = vmatpush.bf16.msrb.mxu0 %v13587_v37  ;;  %v17918_v37 = vld [vmem:[#allocation8 + $0x528] sm:$0xf0]  ;;  %v13223_v44 = vor.u32 %v18033_v42, %v13220_v29  ;;  %v13198_v0 = vld [vmem:[#allocation8 + $0x890] sm:$0xf]  ;;  %v12918_v11 = vld [vmem:[#allocation8 + $0x660] sm:$0xf] }
  0xfa   :  { %v12751_v48 = vor.u32 %v17918_v37, %v12750_v36  ;;  %v13394_v14 = vld [vmem:[#allocation8 + $0xa18] sm:$0xf]  ;;  %v18079_v15 = vld [vmem:[#allocation8 + $0xa30] sm:$0xf0]  ;;  %v12666_v20 = vld [vmem:[#allocation8 + $0x468] sm:$0xf] }
  0xfb   :  { %3302 = vmatpush.bf16.msrb.mxu1 %v12275_v46  ;;  %v17764_v46 = vld [vmem:[#allocation8 + $0x58] sm:$0xf0]  ;;  %v13170_v17 = vld [vmem:[#allocation8 + $0x858] sm:$0xf]  ;;  %v18023_v18 = vld [vmem:[#allocation8 + $0x870] sm:$0xf0] }
  0xfc   :  { %3316 = vmatpush.bf16.msrb.mxu2 %v12499_v45  ;;  %3276 = vmatpush.bf16.msra.mxu3 %v13335_v49  ;;  %v12134_v45 = vld [vmem:[#allocation8 + $0x40] sm:$0xf]  ;;  %v12722_v49 = vld [vmem:[#allocation8 + $0x4d8] sm:$0xf]  ;;  %v17897_v21 = vld [vmem:[#allocation8 + $0x480] sm:$0xf0] }
  0xfd   :  { %3290 = vmatpush.bf16.msrb.mxu0 %v13559_v50  ;;  %v12975_v50 = vor.u32 %v17974_v40, %v12974_v38  ;;  %v12723_v63 = vor.u32 %v17911_v52, %v12722_v49  ;;  %v12890_v24 = vld [vmem:[#allocation8 + $0x628] sm:$0xf]  ;;  %v17953_v25 = vld [vmem:[#allocation8 + $0x640] sm:$0xf0]  ;;  %v13366_v27 = vld [vmem:[#allocation8 + $0x9e0] sm:$0xf]  ;;  %v12667_v42 = vor.u32 %v17897_v21, %v12666_v20 }
  0xfe   :  { %3225 = vmatmul.bf16.vlgmr.msrb.gmra.mxu3 %v19543_v10  ;;  %v18072_v28 = vld [vmem:[#allocation8 + $0x9f8] sm:$0xf0]  ;;  %v12891_v31 = vor.u32 %v17953_v25, %v12890_v24  ;;  %v12638_v32 = vld [vmem:[#allocation8 + $0x430] sm:$0xf]  ;;  %v17946_v38 = vld [vmem:[#allocation8 + $0x608] sm:$0xf0] }
  0xff   :  { %3303 = vmatpush.bf16.msrb.mxu1 %v12247_v58  ;;  %3239 = vmatmul.bf16.vlgmr.msra.gmra.mxu0 %v19547_v34  ;;  %v17813_v58 = vld [vmem:[#allocation8 + $0x1e0] sm:$0xf0]  ;;  %v18016_v29 = vld [vmem:[#allocation8 + $0x838] sm:$0xf0]  ;;  %v13367_v36 = vor.u32 %v18072_v28, %v13366_v27  ;;  %v12862_v37 = vld [vmem:[#allocation8 + $0x5f0] sm:$0xf] }
 0x100   :  { %3317 = vmatpush.bf16.msrb.mxu2 %v12471_v55  ;;  %3277 = vmatpush.bf16.msra.mxu3 %v13307_v61  ;;  %v12135_v55 = vor.u32 %v17764_v46, %v12134_v45  ;;  %v18086_v61 = vld [vmem:[#allocation8 + $0xa68] sm:$0xf0]  ;;  %v12331_v3 = vor.u32 %v17813_v58, %v12330_v57  ;;  %v13338_v40 = vld [vmem:[#allocation8 + $0x9a8] sm:$0xf]  ;;  %v18065_v41 = vld [vmem:[#allocation8 + $0x9c0] sm:$0xf0]  ;;  %v12863_v46 = vor.u32 %v17946_v38, %v12862_v37 }
 0x101   :  { %3291 = vmatpush.bf16.msrb.mxu0 %v13531_v1  ;;  %v18030_v1 = vld [vmem:[#allocation8 + $0x8a8] sm:$0xf0]  ;;  %v18009_v45 = vld [vmem:[#allocation8 + $0x800] sm:$0xf0]  ;;  %v13339_v49 = vor.u32 %v18065_v41, %v13338_v40  ;;  %v13310_v53 = vld [vmem:[#allocation8 + $0x970] sm:$0xf] }
 0x102   :  { %v18058_v54 = vld [vmem:[#allocation8 + $0x988] sm:$0xf0]  ;;  %v13086_v56 = vld [vmem:[#allocation8 + $0x7b0] sm:$0xf]  ;;  %v12582_v59 = vld [vmem:[#allocation8 + $0x3c0] sm:$0xf] }
 0x103   :  { %3304 = vmatpush.bf16.msrb.mxu1 %v12219_v8  ;;  %v13423_v8 = vor.u32 %v18086_v61, %v13422_v60  ;;  %v18002_v57 = vld [vmem:[#allocation8 + $0x7c8] sm:$0xf0]  ;;  %v17876_v60 = vld [vmem:[#allocation8 + $0x3d8] sm:$0xf0]  ;;  %v13311_v61 = vor.u32 %v18058_v54, %v13310_v53  ;;  %v12304_v20 = vld [vmem:[#allocation8 + $0x1ac] sm:$0xf0] }
 0x104   :  { %3318 = vmatpush.bf16.msrb.mxu2 %v12443_v5  ;;  %3278 = vmatpush.bf16.msra.mxu3 %v13279_v13  ;;  %v12694_v5 = vld [vmem:[#allocation8 + $0x4a0] sm:$0xf]  ;;  %v13199_v13 = vor.u32 %v18030_v1, %v13198_v0  ;;  %v17932_v0 = vld [vmem:[#allocation8 + $0x598] sm:$0xf0]  ;;  %v13087_v1 = vor.u32 %v18002_v57, %v13086_v56  ;;  %v13002_v37 = vld [vmem:[#allocation8 + $0x708] sm:$0xf] }
 0x105   :  { %3292 = vmatpush.bf16.msrb.mxu0 %v13503_v16  ;;  %v12695_v16 = vor.u32 %v17904_v6, %v12694_v5  ;;  %v12583_v5 = vor.u32 %v17876_v60, %v12582_v59  ;;  %v13058_v6 = vld [vmem:[#allocation8 + $0x778] sm:$0xf]  ;;  %v13254_v21 = vld [vmem:[#allocation8 + $0x900] sm:$0xf]  ;;  %v13226_v38 = vld [vmem:[#allocation8 + $0x8c8] sm:$0xf] }
 0x106   :  { %3253 = vmatmul.bf16.vlgmr.msra.gmra.mxu1 %v19549_v35  ;;  %v13030_v25 = vld [vmem:[#allocation8 + $0x740] sm:$0xf]  ;;  %v17981_v40 = vld [vmem:[#allocation8 + $0x720] sm:$0xf0]  ;;  %v17915_v41 = vld [vmem:[#allocation8 + $0x514] sm:$0xf] }
 0x107   :  { %3305 = vmatpush.bf16.msrb.mxu1 %v12191_v23  ;;  %v13395_v23 = vor.u32 %v18079_v15, %v13394_v14  ;;  %v17925_v14 = vld [vmem:[#allocation8 + $0x560] sm:$0xf0]  ;;  %v12248_v54 = vld [vmem:[#allocation8 + $0x13c] sm:$0xf0]  ;;  %v17908_v56 = vld [vmem:[#allocation8 + $0x4dc] sm:$0xf] }
 0x108   :  { %3319 = vmatpush.bf16.msrb.mxu2 %v12415_v19  ;;  %3279 = vmatpush.bf16.msra.mxu3 %v13251_v26  ;;  %v12919_v19 = vor.u32 %v17960_v12, %v12918_v11  ;;  %v13171_v26 = vor.u32 %v18023_v18, %v13170_v17  ;;  %v17869_v12 = vld [vmem:[#allocation8 + $0x3a0] sm:$0xf0]  ;;  %v18142_v17 = vld [vmem:[#allocation8 + $0xc28] sm:$0xf0]  ;;  %v17803_v18 = vld [vmem:[#allocation8 + $0x194] sm:$0xf] }
 0x109   :  { %3293 = vmatpush.bf16.msrb.mxu0 %v13475_v22  ;;  %v13142_v22 = vld [vmem:[#allocation8 + $0x820] sm:$0xf]  ;;  %v17789_v53 = vld [vmem:[#allocation8 + $0x124] sm:$0xf]  ;;  %v12724_v57 = vld [vmem:[#allocation8 + $0x4f4] sm:$0xf0] }
 0x10a   :  { %v17852_v59 = vld [vmem:[#allocation8 + $0x31c] sm:$0xf]  ;;  %v12500_v60 = vld [vmem:[#allocation8 + $0x334] sm:$0xf0] }
 0x10b   :  { %3306 = vmatpush.bf16.msrb.mxu1 %v12163_v39  ;;  %v13143_v39 = vor.u32 %v18016_v29, %v13142_v22  ;;  %v12307_v22 = vor.u32 %v17803_v18, %v12304_v20  ;;  %v12192_v18 = vld [vmem:[#allocation8 + $0xcc] sm:$0xf0]  ;;  %v17894_v20 = vld [vmem:[#allocation8 + $0x46c] sm:$0xf] }
 0x10c   :  { %3320 = vmatpush.bf16.msrb.mxu2 %v12387_v33  ;;  %3280 = vmatpush.bf16.msra.mxu3 %v13223_v44  ;;  %v17890_v33 = vld [vmem:[#allocation8 + $0x448] sm:$0xf0]  ;;  %v13114_v44 = vld [vmem:[#allocation8 + $0x7e8] sm:$0xf] }
 0x10d   :  { %3294 = vmatpush.bf16.msrb.mxu0 %v13447_v47  ;;  %v12639_v43 = vor.u32 %v17890_v33, %v12638_v32  ;;  %v12610_v47 = vld [vmem:[#allocation8 + $0x3f8] sm:$0xf]  ;;  %v13115_v52 = vor.u32 %v18009_v45, %v13114_v44  ;;  %v17796_v32 = vld [vmem:[#allocation8 + $0x15c] sm:$0xf]  ;;  %v17859_v45 = vld [vmem:[#allocation8 + $0x354] sm:$0xf] }
 0x10e   :  { %v12276_v33 = vld [vmem:[#allocation8 + $0x174] sm:$0xf0] }
 0x10f   :  { %3307 = vmatpush.bf16.msrb.mxu1 %v12135_v55  ;;  %3281 = vmatmul.bf16.vlgmr.msra.gmra.mxu3 %v19561_v4 }
 0x110   :  { %3329 = vmatpush.bf16.msrb.mxu3 %v12751_v48  ;;  %3321 = vmatpush.bf16.msrb.mxu2 %v12359_v51  ;;  %v17883_v48 = vld [vmem:[#allocation8 + $0x410] sm:$0xf0] }
 0x111   :  { %3343 = vmatpush.bf16.msra.mxu0 %v12975_v50  ;;  %v12834_v50 = vld [vmem:[#allocation8 + $0x5b8] sm:$0xf]  ;;  %v17939_v51 = vld [vmem:[#allocation8 + $0x5d0] sm:$0xf0]  ;;  %v12611_v55 = vor.u32 %v17883_v48, %v12610_v47  ;;  %v12279_v47 = vor.u32 %v17796_v32, %v12276_v33  ;;  %v12640_v33 = vld [vmem:[#allocation8 + $0x44c] sm:$0xf0] }
 0x112   :  { %3295 = vmatmul.bf16.vlgmr.msrb.gmra.mxu0 %v19567_v30  ;;  %v12835_v58 = vor.u32 %v17939_v51, %v12834_v50  ;;  %v18128_v50 = vld [vmem:[#allocation8 + $0xbb8] sm:$0xf0]  ;;  %v13003_v51 = vor.u32 %v17981_v40, %v13002_v37  ;;  %v17887_v32 = vld [vmem:[#allocation8 + $0x434] sm:$0xf]  ;;  %v13478_v40 = vld [vmem:[#allocation8 + $0xac0] sm:$0xf] }
 0x113   :  { %3308 = vmatpush.bf16.msrb.mxu1 %v12107_v7  ;;  %v17995_v7 = vld [vmem:[#allocation8 + $0x790] sm:$0xf0] }
 0x114   :  { %3330 = vmatpush.bf16.msrb.mxu3 %v12723_v63  ;;  %3322 = vmatpush.bf16.msrb.mxu2 %v12331_v3  ;;  %v12806_v63 = vld [vmem:[#allocation8 + $0x580] sm:$0xf]  ;;  %v18051_v3 = vld [vmem:[#allocation8 + $0x950] sm:$0xf0] }
 0x115   :  { %3344 = vmatpush.bf16.msra.mxu0 %v12947_v2  ;;  %v13282_v2 = vld [vmem:[#allocation8 + $0x938] sm:$0xf]  ;;  %v12807_v11 = vor.u32 %v17932_v0, %v12806_v63  ;;  %v13562_v63 = vld [vmem:[#allocation8 + $0xb68] sm:$0xf]  ;;  %v18121_v0 = vld [vmem:[#allocation8 + $0xb80] sm:$0xf0] }
 0x116   :  { %3309 = vmatmul.bf16.vlgmr.msrb.gmra.mxu1 %v19541_v9  ;;  %v13283_v15 = vor.u32 %v18051_v3, %v13282_v2  ;;  %v17782_v2 = vld [vmem:[#allocation8 + $0xec] sm:$0xf]  ;;  %v12220_v3 = vld [vmem:[#allocation8 + $0x104] sm:$0xf0]  ;;  %v17831_v37 = vld [vmem:[#allocation8 + $0x274] sm:$0xf] }
 0x117   :  { %3357 = vmatpush.bf16.msra.mxu1 %v13199_v13  ;;  %3323 = vmatmul.bf16.vlgmr.msrb.gmra.mxu2 %v19543_v10  ;;  %v12778_v13 = vld [vmem:[#allocation8 + $0x548] sm:$0xf] }
 0x118   :  { %3371 = vmatpush.bf16.msra.mxu2 %v13423_v8  ;;  %3331 = vmatpush.bf16.msrb.mxu3 %v12695_v16  ;;  %v12554_v8 = vld [vmem:[#allocation8 + $0x388] sm:$0xf]  ;;  %v13646_v16 = vld [vmem:[#allocation8 + $0xc10] sm:$0xf]  ;;  %v12779_v27 = vor.u32 %v17925_v14, %v12778_v13  ;;  %v12223_v13 = vor.u32 %v17782_v2, %v12220_v3  ;;  %v17817_v3 = vld [vmem:[#allocation8 + $0x204] sm:$0xf] }
 0x119   :  { %3345 = vmatpush.bf16.msra.mxu0 %v12919_v19  ;;  %v13059_v19 = vor.u32 %v17995_v7, %v13058_v6  ;;  %v12555_v24 = vor.u32 %v17869_v12, %v12554_v8  ;;  %v13647_v28 = vor.u32 %v18142_v17, %v13646_v16  ;;  %v17901_v6 = vld [vmem:[#allocation8 + $0x4a4] sm:$0xf]  ;;  %v12696_v7 = vld [vmem:[#allocation8 + $0x4bc] sm:$0xf0]  ;;  %v13563_v8 = vor.u32 %v18121_v0, %v13562_v63  ;;  %v13534_v14 = vld [vmem:[#allocation8 + $0xb30] sm:$0xf] }
 0x11a   :  { %v12472_v12 = vld [vmem:[#allocation8 + $0x2fc] sm:$0xf0]  ;;  %v12699_v16 = vor.u32 %v17901_v6, %v12696_v7  ;;  %v17775_v17 = vld [vmem:[#allocation8 + $0xb4] sm:$0xf]  ;;  %v13200_v63 = vld [vmem:[#allocation8 + $0x8ac] sm:$0xf0] }
 0x11b   :  { %3358 = vmatpush.bf16.msra.mxu1 %v13171_v26  ;;  %v17988_v26 = vld [vmem:[#allocation8 + $0x758] sm:$0xf0]  ;;  %v17873_v0 = vld [vmem:[#allocation8 + $0x3c4] sm:$0xf] }
 0x11c   :  { %3372 = vmatpush.bf16.msra.mxu2 %v13395_v23  ;;  %3332 = vmatpush.bf16.msrb.mxu3 %v12667_v42  ;;  %v18044_v23 = vld [vmem:[#allocation8 + $0x918] sm:$0xf0]  ;;  %v13618_v42 = vld [vmem:[#allocation8 + $0xbd8] sm:$0xf] }
 0x11d   :  { %3346 = vmatpush.bf16.msra.mxu0 %v12891_v31  ;;  %v13255_v29 = vor.u32 %v18044_v23, %v13254_v21  ;;  %v18135_v31 = vld [vmem:[#allocation8 + $0xbf0] sm:$0xf0]  ;;  %v12668_v21 = vld [vmem:[#allocation8 + $0x484] sm:$0xf0] }
 0x11e   :  { %v13619_v44 = vor.u32 %v18135_v31, %v13618_v42  ;;  %v12671_v42 = vor.u32 %v17894_v20, %v12668_v21  ;;  %v12332_v20 = vld [vmem:[#allocation8 + $0x1e4] sm:$0xf0]  ;;  %v18139_v21 = vld [vmem:[#allocation8 + $0xc14] sm:$0xf] }
 0x11f   :  { %3359 = vmatpush.bf16.msra.mxu1 %v13143_v39  ;;  %v18037_v39 = vld [vmem:[#allocation8 + $0x8e0] sm:$0xf0] }
 0x120   :  { %3373 = vmatpush.bf16.msra.mxu2 %v13367_v36  ;;  %3333 = vmatpush.bf16.msrb.mxu3 %v12639_v43  ;;  %v13031_v36 = vor.u32 %v17988_v26, %v13030_v25  ;;  %v12752_v43 = vld [vmem:[#allocation8 + $0x52c] sm:$0xf0]  ;;  %v13227_v48 = vor.u32 %v18037_v39, %v13226_v38  ;;  %v12444_v25 = vld [vmem:[#allocation8 + $0x2c4] sm:$0xf0]  ;;  %v12195_v26 = vor.u32 %v17775_v17, %v12192_v18  ;;  %v17810_v17 = vld [vmem:[#allocation8 + $0x1cc] sm:$0xf] }
 0x121   :  { %3347 = vmatpush.bf16.msra.mxu0 %v12863_v46  ;;  %v12528_v46 = vld [vmem:[#allocation8 + $0x36c] sm:$0xf0]  ;;  %v17866_v18 = vld [vmem:[#allocation8 + $0x38c] sm:$0xf] }
 0x122   :  { %v12416_v38 = vld [vmem:[#allocation8 + $0x28c] sm:$0xf0] }
 0x123   :  { %3360 = vmatpush.bf16.msra.mxu1 %v13115_v52  ;;  %v12755_v52 = vor.u32 %v17915_v41, %v12752_v43  ;;  %v18100_v41 = vld [vmem:[#allocation8 + $0xad8] sm:$0xf0]  ;;  %v12643_v43 = vor.u32 %v17887_v32, %v12640_v33  ;;  %v18013_v32 = vld [vmem:[#allocation8 + $0x824] sm:$0xf]  ;;  %v13144_v33 = vld [vmem:[#allocation8 + $0x83c] sm:$0xf0] }
 0x124   :  { %3374 = vmatpush.bf16.msra.mxu2 %v13339_v49  ;;  %3334 = vmatpush.bf16.msrb.mxu3 %v12611_v55  ;;  %v13590_v49 = vld [vmem:[#allocation8 + $0xba0] sm:$0xf]  ;;  %v12531_v55 = vor.u32 %v17859_v45, %v12528_v46  ;;  %v12419_v46 = vor.u32 %v17831_v37, %v12416_v38  ;;  %v18132_v37 = vld [vmem:[#allocation8 + $0xbdc] sm:$0xf]  ;;  %v13620_v38 = vld [vmem:[#allocation8 + $0xbf4] sm:$0xf0] }
 0x125   :  { %3348 = vmatpush.bf16.msra.mxu0 %v12835_v58  ;;  %v13591_v58 = vor.u32 %v18128_v50, %v13590_v49  ;;  %v12136_v45 = vld [vmem:[#allocation8 + $0x5c] sm:$0xf0]  ;;  %v13479_v49 = vor.u32 %v18100_v41, %v13478_v40  ;;  %v17824_v50 = vld [vmem:[#allocation8 + $0x23c] sm:$0xf]  ;;  %v13396_v41 = vld [vmem:[#allocation8 + $0xa34] sm:$0xf0] }
 0x126   :  { %v18076_v40 = vld [vmem:[#allocation8 + $0xa1c] sm:$0xf] }
 0x127   :  { %3361 = vmatpush.bf16.msra.mxu1 %v13087_v1  ;;  %v12727_v1 = vor.u32 %v17908_v56, %v12724_v57  ;;  %v12108_v56 = vld [vmem:[#allocation8 + $0x24] sm:$0xf0] }
 0x128   :  { %3375 = vmatpush.bf16.msra.mxu2 %v13311_v61  ;;  %3335 = vmatpush.bf16.msrb.mxu3 %v12583_v5  ;;  %v12251_v61 = vor.u32 %v17789_v53, %v12248_v54  ;;  %v12503_v5 = vor.u32 %v17852_v59, %v12500_v60  ;;  %v18093_v54 = vld [vmem:[#allocation8 + $0xaa0] sm:$0xf0]  ;;  %v12976_v59 = vld [vmem:[#allocation8 + $0x6ec] sm:$0xf0]  ;;  %v18027_v60 = vld [vmem:[#allocation8 + $0x894] sm:$0xf] }
 0x129   :  { %3349 = vmatpush.bf16.msra.mxu0 %v12807_v11  ;;  %v17845_v11 = vld [vmem:[#allocation8 + $0x2e4] sm:$0xf] }
 0x12b   :  { %3362 = vmatpush.bf16.msra.mxu1 %v13059_v19  ;;  %v12475_v19 = vor.u32 %v17845_v11, %v12472_v12  ;;  %v13203_v11 = vor.u32 %v18027_v60, %v13200_v63  ;;  %v13088_v63 = vld [vmem:[#allocation8 + $0x7cc] sm:$0xf0] }
 0x12c   :  { %3376 = vmatpush.bf16.msra.mxu2 %v13283_v15  ;;  %3336 = vmatpush.bf16.msrb.mxu3 %v12555_v24  ;;  %v18114_v15 = vld [vmem:[#allocation8 + $0xb48] sm:$0xf0] }
 0x12d   :  { %3350 = vmatpush.bf16.msra.mxu0 %v12779_v27  ;;  %v13535_v23 = vor.u32 %v18114_v15, %v13534_v14  ;;  %v17838_v24 = vld [vmem:[#allocation8 + $0x2ac] sm:$0xf]  ;;  %v13506_v27 = vld [vmem:[#allocation8 + $0xaf8] sm:$0xf]  ;;  %v18020_v14 = vld [vmem:[#allocation8 + $0x85c] sm:$0xf] }
 0x12e   :  { %v12447_v31 = vor.u32 %v17838_v24, %v12444_v25  ;;  %v13172_v15 = vld [vmem:[#allocation8 + $0x874] sm:$0xf0]  ;;  %v18083_v25 = vld [vmem:[#allocation8 + $0xa54] sm:$0xf] }
 0x12f   :  { %3363 = vmatpush.bf16.msra.mxu1 %v13031_v36  ;;  %3337 = vmatmul.bf16.vlgmr.msrb.gmra.mxu3 %v19547_v34 }
 0x130   :  { %3385 = vmatpush.bf16.msra.mxu3 %v13647_v28  ;;  %3377 = vmatpush.bf16.msra.mxu2 %v13255_v29  ;;  %v18107_v28 = vld [vmem:[#allocation8 + $0xb10] sm:$0xf0]  ;;  %v12164_v29 = vld [vmem:[#allocation8 + $0x94] sm:$0xf0] }
 0x131   :  { %3399 = vmatpush.bf16.msrb.mxu0 %v12307_v22  ;;  %v17768_v22 = vld [vmem:[#allocation8 + $0x7c] sm:$0xf]  ;;  %v13507_v36 = vor.u32 %v18107_v28, %v13506_v27  ;;  %v13175_v27 = vor.u32 %v18020_v14, %v13172_v15 }
 0x132   :  { %3351 = vmatmul.bf16.vlgmr.msra.gmra.mxu0 %v19549_v35  ;;  %v12167_v39 = vor.u32 %v17768_v22, %v12164_v29  ;;  %v12920_v22 = vld [vmem:[#allocation8 + $0x67c] sm:$0xf0]  ;;  %v12335_v29 = vor.u32 %v17810_v17, %v12332_v20  ;;  %v13060_v17 = vld [vmem:[#allocation8 + $0x794] sm:$0xf0]  ;;  %v18111_v20 = vld [vmem:[#allocation8 + $0xb34] sm:$0xf] }
 0x133   :  { %3364 = vmatpush.bf16.msra.mxu1 %v13003_v51  ;;  %v12388_v51 = vld [vmem:[#allocation8 + $0x254] sm:$0xf0] }
 0x134   :  { %3386 = vmatpush.bf16.msra.mxu3 %v13619_v44  ;;  %3378 = vmatpush.bf16.msra.mxu2 %v13227_v48  ;;  %v17761_v44 = vld [vmem:[#allocation8 + $0x44] sm:$0xf]  ;;  %v12612_v48 = vld [vmem:[#allocation8 + $0x414] sm:$0xf0] }
 0x135   :  { %3400 = vmatpush.bf16.msrb.mxu0 %v12279_v47  ;;  %v17880_v47 = vld [vmem:[#allocation8 + $0x3fc] sm:$0xf]  ;;  %v12139_v53 = vor.u32 %v17761_v44, %v12136_v45  ;;  %v17950_v44 = vld [vmem:[#allocation8 + $0x62c] sm:$0xf]  ;;  %v12892_v45 = vld [vmem:[#allocation8 + $0x644] sm:$0xf0] }
 0x136   :  { %3365 = vmatmul.bf16.vlgmr.msra.gmra.mxu1 %v19559_v62  ;;  %v12615_v57 = vor.u32 %v17880_v47, %v12612_v48  ;;  %v18006_v47 = vld [vmem:[#allocation8 + $0x7ec] sm:$0xf]  ;;  %v13116_v48 = vld [vmem:[#allocation8 + $0x804] sm:$0xf0] }
 0x137   :  { %3413 = vmatpush.bf16.msrb.mxu1 %v12531_v55  ;;  %3379 = vmatmul.bf16.vlgmr.msra.gmra.mxu2 %v19561_v4  ;;  %v17754_v55 = vld [vmem:[#allocation8 + $0xc] sm:$0xf] }
 0x138   :  { %3427 = vmatpush.bf16.msrb.mxu2 %v12755_v52  ;;  %3387 = vmatpush.bf16.msra.mxu3 %v13591_v58  ;;  %v13450_v52 = vld [vmem:[#allocation8 + $0xa88] sm:$0xf]  ;;  %v17971_v58 = vld [vmem:[#allocation8 + $0x6d4] sm:$0xf]  ;;  %v12111_v6 = vor.u32 %v17754_v55, %v12108_v56  ;;  %v13368_v55 = vld [vmem:[#allocation8 + $0x9fc] sm:$0xf0]  ;;  %v13119_v56 = vor.u32 %v18006_v47, %v13116_v48 }
 0x139   :  { %3401 = vmatpush.bf16.msrb.mxu0 %v12251_v61  ;;  %v12391_v61 = vor.u32 %v17824_v50, %v12388_v51  ;;  %v13451_v2 = vor.u32 %v18093_v54, %v13450_v52  ;;  %v12979_v7 = vor.u32 %v17971_v58, %v12976_v59  ;;  %v18125_v50 = vld [vmem:[#allocation8 + $0xba4] sm:$0xf]  ;;  %v13592_v51 = vld [vmem:[#allocation8 + $0xbbc] sm:$0xf0]  ;;  %v12864_v58 = vld [vmem:[#allocation8 + $0x60c] sm:$0xf0] }
 0x13a   :  { %v19584_v52 = vld [vmem:[#allocation10] sm:$0xff]  ;;  %v13595_v59 = vor.u32 %v18125_v50, %v13592_v51  ;;  %v17978_v47 = vld [vmem:[#allocation8 + $0x70c] sm:$0xf]  ;;  %v13004_v48 = vld [vmem:[#allocation8 + $0x724] sm:$0xf0] }
 0x13b   :  { %3414 = vmatpush.bf16.msrb.mxu1 %v12503_v5  ;;  %v12360_v5 = vld [vmem:[#allocation8 + $0x21c] sm:$0xf0]  ;;  %v18069_v54 = vld [vmem:[#allocation8 + $0x9e4] sm:$0xf]  ;;  %v20340_v60 = vperm.slane %v19584_v52, 0 }
 0x13c   :  { %3428 = vmatpush.bf16.msrb.mxu2 %v12727_v1  ;;  %3388 = vmatpush.bf16.msra.mxu3 %v13563_v8  ;;  %v12584_v1 = vld [vmem:[#allocation8 + $0x3dc] sm:$0xf0]  ;;  %v17964_v8 = vld [vmem:[#allocation8 + $0x69c] sm:$0xf]  ;;  %v12310_v50 = vld [vmem:[#allocation8 + $0x198] sm:$0xf] }
 0x13d   :  { %3402 = vmatpush.bf16.msrb.mxu0 %v12223_v13  ;;  %v12587_v12 = vor.u32 %v17873_v0, %v12584_v1  ;;  %v12948_v13 = vld [vmem:[#allocation8 + $0x6b4] sm:$0xf0]  ;;  %v13371_v0 = vor.u32 %v18069_v54, %v13368_v55  ;;  %v18118_v1 = vld [vmem:[#allocation8 + $0xb6c] sm:$0xf]  ;;  %v17807_v51 = vld [vmem:[#allocation8 + $0x1b0] sm:$0xf0] }
 0x13e   :  { %v12951_v24 = vor.u32 %v17964_v8, %v12948_v13  ;;  %v12836_v13 = vld [vmem:[#allocation8 + $0x5d4] sm:$0xf0]  ;;  %v17863_v55 = vld [vmem:[#allocation8 + $0x370] sm:$0xf0] }
 0x13f   :  { %3415 = vmatpush.bf16.msrb.mxu1 %v12475_v19  ;;  %v12556_v19 = vld [vmem:[#allocation8 + $0x3a4] sm:$0xf0] }
 0x140   :  { %3429 = vmatpush.bf16.msrb.mxu2 %v12699_v16  ;;  %3389 = vmatpush.bf16.msra.mxu3 %v13535_v23  ;;  %v12363_v16 = vor.u32 %v17817_v3, %v12360_v5  ;;  %v13648_v23 = vld [vmem:[#allocation8 + $0xc2c] sm:$0xf0]  ;;  %v12559_v28 = vor.u32 %v17866_v18, %v12556_v19  ;;  %v18062_v5 = vld [vmem:[#allocation8 + $0x9ac] sm:$0xf] }
 0x141   :  { %3403 = vmatpush.bf16.msrb.mxu0 %v12195_v26  ;;  %v13424_v26 = vld [vmem:[#allocation8 + $0xa6c] sm:$0xf0] }
 0x143   :  { %3416 = vmatpush.bf16.msrb.mxu1 %v12447_v31  ;;  %v13651_v31 = vor.u32 %v18139_v21, %v13648_v23  ;;  %v13536_v21 = vld [vmem:[#allocation8 + $0xb4c] sm:$0xf0] }
 0x144   :  { %3430 = vmatpush.bf16.msrb.mxu2 %v12671_v42  ;;  %3390 = vmatpush.bf16.msra.mxu3 %v13507_v36  ;;  %v17957_v42 = vld [vmem:[#allocation8 + $0x664] sm:$0xf]  ;;  %v13427_v36 = vor.u32 %v18083_v25, %v13424_v26  ;;  %v18055_v25 = vld [vmem:[#allocation8 + $0x974] sm:$0xf]  ;;  %v13312_v26 = vld [vmem:[#allocation8 + $0x98c] sm:$0xf0] }
 0x145   :  { %3404 = vmatpush.bf16.msrb.mxu0 %v12167_v39  ;;  %v12923_v39 = vor.u32 %v17957_v42, %v12920_v22  ;;  %v12808_v42 = vld [vmem:[#allocation8 + $0x59c] sm:$0xf0] }
 0x147   :  { %3417 = vmatpush.bf16.msrb.mxu1 %v12419_v46  ;;  %v13623_v46 = vor.u32 %v18132_v37, %v13620_v38  ;;  %v13508_v37 = vld [vmem:[#allocation8 + $0xb14] sm:$0xf0] }
 0x148   :  { %3431 = vmatpush.bf16.msrb.mxu2 %v12643_v43  ;;  %3391 = vmatpush.bf16.msra.mxu3 %v13479_v49  ;;  %v13147_v43 = vor.u32 %v18013_v32, %v13144_v33  ;;  %v13399_v49 = vor.u32 %v18076_v40, %v13396_v41  ;;  %v13032_v32 = vld [vmem:[#allocation8 + $0x75c] sm:$0xf0]  ;;  %v13315_v33 = vor.u32 %v18055_v25, %v13312_v26  ;;  %v18048_v40 = vld [vmem:[#allocation8 + $0x93c] sm:$0xf]  ;;  %v13284_v41 = vld [vmem:[#allocation8 + $0x954] sm:$0xf0] }
 0x149   :  { %3405 = vmatpush.bf16.msrb.mxu0 %v12139_v53  ;;  %v12895_v53 = vor.u32 %v17950_v44, %v12892_v45  ;;  %v13287_v54 = vor.u32 %v18048_v40, %v13284_v41 }
 0x14b   :  { %3418 = vmatpush.bf16.msrb.mxu1 %v12391_v61  ;;  %v17999_v61 = vld [vmem:[#allocation8 + $0x7b4] sm:$0xf] }
 0x14c   :  { %3432 = vmatpush.bf16.msrb.mxu2 %v12615_v57  ;;  %3392 = vmatpush.bf16.msra.mxu3 %v13451_v2  ;;  %v17943_v57 = vld [vmem:[#allocation8 + $0x5f4] sm:$0xf]  ;;  %v13564_v2 = vld [vmem:[#allocation8 + $0xb84] sm:$0xf0]  ;;  %v13091_v8 = vor.u32 %v17999_v61, %v13088_v63  ;;  %v13256_v61 = vld [vmem:[#allocation8 + $0x91c] sm:$0xf0]  ;;  %v13007_v63 = vor.u32 %v17978_v47, %v13004_v48 }
 0x14d   :  { %3406 = vmatpush.bf16.msrb.mxu0 %v12111_v6  ;;  %v12867_v3 = vor.u32 %v17943_v57, %v12864_v58  ;;  %v13340_v6 = vld [vmem:[#allocation8 + $0x9c4] sm:$0xf0]  ;;  %v13567_v15 = vor.u32 %v18118_v1, %v13564_v2  ;;  %v13480_v57 = vld [vmem:[#allocation8 + $0xadc] sm:$0xf0] }
 0x14e   :  { %v13343_v18 = vor.u32 %v18062_v5, %v13340_v6  ;;  %v12282_v1 = vld [vmem:[#allocation8 + $0x160] sm:$0xf]  ;;  %v17800_v5 = vld [vmem:[#allocation8 + $0x178] sm:$0xf0]  ;;  %v12926_v48 = vld [vmem:[#allocation8 + $0x668] sm:$0xf] }
 0x14f   :  { %3419 = vmatpush.bf16.msrb.mxu1 %v12363_v16  ;;  %3393 = vmatmul.bf16.vlgmr.msra.gmra.mxu3 %v19567_v30  ;;  %v17992_v16 = vld [vmem:[#allocation8 + $0x77c] sm:$0xf]  ;;  %v12506_v6 = vld [vmem:[#allocation8 + $0x320] sm:$0xf] }
 0x150   :  { %3441 = vmatpush.bf16.msrb.mxu3 %v12979_v7  ;;  %3433 = vmatpush.bf16.msrb.mxu2 %v12587_v12  ;;  %v17936_v12 = vld [vmem:[#allocation8 + $0x5bc] sm:$0xf] }
 0x151   :  { %3455 = vmatpush.bf16.msra.mxu0 %v13203_v11  ;;  %v3114_v7 = vpop.f32.mrf.mxu3  ;;  %v3128_v11 = vpop.f32.mrf.mxu0 }
 0x152   :  { %3407 = vmatmul.bf16.vlgmr.msrb.gmra.mxu0 %v19541_v9  ;;  %v3115_v14 = vadd.f32 %v3114_v7, %v20340_v60  ;;  %v17856_v7 = vld [vmem:[#allocation8 + $0x338] sm:$0xf0]  ;;  %v13046_v60 = vld [vmem:[#allocation8 + $0x750] sm:$0xf] }
 0x153   :  { %3420 = vmatpush.bf16.msrb.mxu1 %v12335_v29  ;;  %v3142_v19 = vpop.f32.mrf.mxu1  ;;  %v13539_v29 = vor.u32 %v18111_v20, %v13536_v21  ;;  %v12507_v20 = vor.u32 %v17856_v7, %v12506_v6  ;;  %v12170_v7 = vld [vmem:[#allocation8 + $0x80] sm:$0xf] }
 0x154   :  { %3442 = vmatpush.bf16.msrb.mxu3 %v12951_v24  ;;  %3434 = vmatpush.bf16.msrb.mxu2 %v12559_v28  ;;  %v3129_v23 = vadd.f32 %v3128_v11, %v3115_v14  ;;  %v12839_v24 = vor.u32 %v17936_v12, %v12836_v13  ;;  %v17929_v28 = vld [vmem:[#allocation8 + $0x584] sm:$0xf]  ;;  %v18034_v11 = vld [vmem:[#allocation8 + $0x8cc] sm:$0xf]  ;;  %v13452_v13 = vld [vmem:[#allocation8 + $0xaa4] sm:$0xf0] }
 0x155   :  { %3456 = vmatpush.bf16.msra.mxu0 %v13175_v27  ;;  %v13063_v27 = vor.u32 %v17992_v16, %v13060_v17  ;;  %v18090_v12 = vld [vmem:[#allocation8 + $0xa8c] sm:$0xf]  ;;  %v13228_v14 = vld [vmem:[#allocation8 + $0x8e4] sm:$0xf0]  ;;  %v17975_v16 = vld [vmem:[#allocation8 + $0x6f0] sm:$0xf0]  ;;  %v12283_v17 = vor.u32 %v17800_v5, %v12282_v1 }
 0x156   :  { %3421 = vmatmul.bf16.vlgmr.msrb.gmra.mxu1 %v19543_v10  ;;  %v3143_v22 = vadd.f32 %v3142_v19, %v3129_v23  ;;  %v17919_v19 = vld [vmem:[#allocation8 + $0x530] sm:$0xf0]  ;;  %v13455_v21 = vor.u32 %v18090_v12, %v13452_v13  ;;  %v12254_v23 = vld [vmem:[#allocation8 + $0x128] sm:$0xf]  ;;  %v13231_v25 = vor.u32 %v18034_v11, %v13228_v14  ;;  %v17898_v5 = vld [vmem:[#allocation8 + $0x488] sm:$0xf0] }
 0x157   :  { %3469 = vmatpush.bf16.msra.mxu1 %v13427_v36  ;;  %3435 = vmatmul.bf16.vlgmr.msrb.gmra.mxu2 %v19547_v34  ;;  %v18104_v36 = vld [vmem:[#allocation8 + $0xafc] sm:$0xf]  ;;  %v12394_v13 = vld [vmem:[#allocation8 + $0x240] sm:$0xf] }
 0x158   :  { %3483 = vmatpush.bf16.msra.mxu2 %v13651_v31  ;;  %3443 = vmatpush.bf16.msrb.mxu3 %v12923_v39  ;;  %v17985_v31 = vld [vmem:[#allocation8 + $0x744] sm:$0xf]  ;;  %v12811_v39 = vor.u32 %v17929_v28, %v12808_v42  ;;  %v17828_v14 = vld [vmem:[#allocation8 + $0x258] sm:$0xf0] }
 0x159   :  { %3457 = vmatpush.bf16.msra.mxu0 %v13147_v43  ;;  %v17922_v43 = vld [vmem:[#allocation8 + $0x54c] sm:$0xf]  ;;  %v13035_v45 = vor.u32 %v17985_v31, %v13032_v32  ;;  %v17849_v28 = vld [vmem:[#allocation8 + $0x300] sm:$0xf0]  ;;  %v19595_v31 = vpop.f32.mrf.mxu0  ;;  %v19597_v40 = vpop.f32.mrf.mxu3 }
 0x15a   :  { %v3156_v38 = vpop.f32.mrf.mxu2 }
 0x15b   :  { %3470 = vmatpush.bf16.msra.mxu1 %v13399_v49  ;;  %v19591_v44 = vadd.f32 %v3156_v38, %v3143_v22  ;;  %v13511_v49 = vor.u32 %v18104_v36, %v13508_v37  ;;  %v12954_v22 = vld [vmem:[#allocation8 + $0x6a0] sm:$0xf]  ;;  %v17912_v36 = vld [vmem:[#allocation8 + $0x4f8] sm:$0xf0]  ;;  %v12226_v38 = vld [vmem:[#allocation8 + $0xf0] sm:$0xf] }
 0x15c   :  { %3484 = vmatpush.bf16.msra.mxu2 %v13623_v46  ;;  %3444 = vmatpush.bf16.msrb.mxu3 %v12895_v53  ;;  %v12780_v46 = vld [vmem:[#allocation8 + $0x564] sm:$0xf0]  ;;  %v12534_v53 = vld [vmem:[#allocation8 + $0x358] sm:$0xf] }
 0x15d   :  { %3458 = vmatpush.bf16.msra.mxu0 %v13119_v56  ;;  %v18097_v56 = vld [vmem:[#allocation8 + $0xac4] sm:$0xf]  ;;  %v12783_v58 = vor.u32 %v17922_v43, %v12780_v46  ;;  %v12535_v2 = vor.u32 %v17863_v55, %v12534_v53  ;;  %v12450_v43 = vld [vmem:[#allocation8 + $0x2b0] sm:$0xf]  ;;  %v19599_v46 = vpop.f32.mrf.mxu1  ;;  %v12198_v55 = vld [vmem:[#allocation8 + $0xb8] sm:$0xf] }
 0x15e   :  { %v17905_v53 = vld [vmem:[#allocation8 + $0x4c0] sm:$0xf0] }
 0x15f   :  { %3471 = vmatpush.bf16.msra.mxu1 %v13371_v0  ;;  %v12311_v0 = vor.u32 %v17807_v51, %v12310_v50  ;;  %v12702_v51 = vld [vmem:[#allocation8 + $0x4a8] sm:$0xf] }
 0x160   :  { %3485 = vmatpush.bf16.msra.mxu2 %v13595_v59  ;;  %3445 = vmatpush.bf16.msrb.mxu3 %v12867_v3  ;;  %v18041_v59 = vld [vmem:[#allocation8 + $0x904] sm:$0xf]  ;;  %v13483_v3 = vor.u32 %v18097_v56, %v13480_v57  ;;  %v17779_v56 = vld [vmem:[#allocation8 + $0xd0] sm:$0xf0] }
 0x161   :  { %3459 = vmatpush.bf16.msra.mxu0 %v13091_v8  ;;  %v13259_v8 = vor.u32 %v18041_v59, %v13256_v61  ;;  %v17835_v59 = vld [vmem:[#allocation8 + $0x290] sm:$0xf0]  ;;  %v12703_v61 = vor.u32 %v17905_v53, %v12702_v51  ;;  %v13206_v53 = vld [vmem:[#allocation8 + $0x898] sm:$0xf] }
 0x163   :  { %3472 = vmatpush.bf16.msra.mxu1 %v13343_v18  ;;  %v12758_v18 = vld [vmem:[#allocation8 + $0x518] sm:$0xf] }
 0x164   :  { %3486 = vmatpush.bf16.msra.mxu2 %v13567_v15  ;;  %3446 = vmatpush.bf16.msrb.mxu3 %v12839_v24  ;;  %v12982_v15 = vld [vmem:[#allocation8 + $0x6d8] sm:$0xf]  ;;  %v17793_v24 = vld [vmem:[#allocation8 + $0x140] sm:$0xf0]  ;;  %v12759_v42 = vor.u32 %v17919_v19, %v12758_v18  ;;  %v17947_v19 = vld [vmem:[#allocation8 + $0x610] sm:$0xf0] }
 0x165   :  { %3460 = vmatpush.bf16.msra.mxu0 %v13063_v27  ;;  %v12983_v26 = vor.u32 %v17975_v16, %v12982_v15  ;;  %v12478_v27 = vld [vmem:[#allocation8 + $0x2e8] sm:$0xf]  ;;  %v12255_v32 = vor.u32 %v17793_v24, %v12254_v23  ;;  %v12870_v18 = vld [vmem:[#allocation8 + $0x5f8] sm:$0xf]  ;;  %v17891_v24 = vld [vmem:[#allocation8 + $0x450] sm:$0xf0] }
 0x166   :  { %v12479_v37 = vor.u32 %v17849_v28, %v12478_v27  ;;  %v12646_v23 = vld [vmem:[#allocation8 + $0x438] sm:$0xf]  ;;  %v12142_v27 = vld [vmem:[#allocation8 + $0x48] sm:$0xf]  ;;  %v17765_v28 = vld [vmem:[#allocation8 + $0x60] sm:$0xf0] }
 0x167   :  { %3473 = vmatpush.bf16.msra.mxu1 %v13315_v33  ;;  %v12730_v33 = vld [vmem:[#allocation8 + $0x4e0] sm:$0xf] }
 0x168   :  { %3487 = vmatpush.bf16.msra.mxu2 %v13539_v29  ;;  %3447 = vmatpush.bf16.msrb.mxu3 %v12811_v39  ;;  %v17968_v29 = vld [vmem:[#allocation8 + $0x6b8] sm:$0xf0]  ;;  %v17786_v39 = vld [vmem:[#allocation8 + $0x108] sm:$0xf0]  ;;  %v12731_v47 = vor.u32 %v17912_v36, %v12730_v33  ;;  %v12842_v33 = vld [vmem:[#allocation8 + $0x5c0] sm:$0xf] }
 0x169   :  { %3461 = vmatpush.bf16.msra.mxu0 %v13035_v45  ;;  %v12955_v41 = vor.u32 %v17968_v29, %v12954_v22  ;;  %v17842_v45 = vld [vmem:[#allocation8 + $0x2c8] sm:$0xf0]  ;;  %v12227_v50 = vor.u32 %v17786_v39, %v12226_v38  ;;  %v12366_v22 = vld [vmem:[#allocation8 + $0x208] sm:$0xf]  ;;  %v17821_v29 = vld [vmem:[#allocation8 + $0x220] sm:$0xf0] }
 0x16a   :  { %v17940_v36 = vld [vmem:[#allocation8 + $0x5d8] sm:$0xf0]  ;;  %v12618_v38 = vld [vmem:[#allocation8 + $0x400] sm:$0xf] }
 0x16b   :  { %3474 = vmatpush.bf16.msra.mxu1 %v13287_v54  ;;  %v12451_v54 = vor.u32 %v17842_v45, %v12450_v43  ;;  %v17884_v39 = vld [vmem:[#allocation8 + $0x418] sm:$0xf0]  ;;  %v12367_v43 = vor.u32 %v17821_v29, %v12366_v22  ;;  %v17758_v45 = vld [vmem:[#allocation8 + $0x28] sm:$0xf0]  ;;  %v12843_v51 = vor.u32 %v17940_v36, %v12842_v33  ;;  %v13150_v29 = vld [vmem:[#allocation8 + $0x828] sm:$0xf] }
 0x16c   :  { %3488 = vmatpush.bf16.msra.mxu2 %v13511_v49  ;;  %3448 = vmatpush.bf16.msrb.mxu3 %v12783_v58  ;;  %v17961_v49 = vld [vmem:[#allocation8 + $0x680] sm:$0xf0]  ;;  %v12422_v58 = vld [vmem:[#allocation8 + $0x278] sm:$0xf]  ;;  %v3184_v1 = vpop.f32.mrf.mxu0 }
 0x16d   :  { %3462 = vmatpush.bf16.msra.mxu0 %v13007_v63  ;;  %v12927_v57 = vor.u32 %v17961_v49, %v12926_v48  ;;  %v12898_v63 = vld [vmem:[#allocation8 + $0x630] sm:$0xf]  ;;  %v12423_v6 = vor.u32 %v17835_v59, %v12422_v58  ;;  %v17814_v48 = vld [vmem:[#allocation8 + $0x1e8] sm:$0xf0]  ;;  %v12814_v58 = vld [vmem:[#allocation8 + $0x588] sm:$0xf] }
 0x16e   :  { %v17933_v59 = vld [vmem:[#allocation8 + $0x5a0] sm:$0xf0] }
 0x16f   :  { %3475 = vmatpush.bf16.msra.mxu1 %v13259_v8  ;;  %3449 = vmatmul.bf16.vlgmr.msrb.gmra.mxu3 %v19549_v35  ;;  %v17772_v8 = vld [vmem:[#allocation8 + $0x98] sm:$0xf0] }
 0x170   :  { %3497 = vmatpush.bf16.msra.mxu3 %v12311_v0  ;;  %3489 = vmatpush.bf16.msra.mxu2 %v13483_v3  ;;  %v17954_v0 = vld [vmem:[#allocation8 + $0x648] sm:$0xf0]  ;;  %v12674_v3 = vld [vmem:[#allocation8 + $0x470] sm:$0xf] }
 0x171   :  { %3511 = vmatpush.bf16.msrb.mxu0 %v12535_v2  ;;  %v12199_v2 = vor.u32 %v17779_v56, %v12198_v55  ;;  %v3170_v11 = vpop.f32.mrf.mxu3  ;;  %v12899_v12 = vor.u32 %v17954_v0, %v12898_v63  ;;  %v13430_v55 = vld [vmem:[#allocation8 + $0xa58] sm:$0xf]  ;;  %v12619_v56 = vor.u32 %v17884_v39, %v12618_v38  ;;  %v12590_v0 = vld [vmem:[#allocation8 + $0x3c8] sm:$0xf]  ;;  %v18073_v39 = vld [vmem:[#allocation8 + $0xa00] sm:$0xf0] }
 0x172   :  { %3463 = vmatmul.bf16.vlgmr.msra.gmra.mxu0 %v19559_v62  ;;  %v3171_v15 = vadd.f32 %v3170_v11, %v19591_v44  ;;  %v12815_v11 = vor.u32 %v17933_v59, %v12814_v58  ;;  %v13374_v38 = vld [vmem:[#allocation8 + $0x9e8] sm:$0xf]  ;;  %v18010_v58 = vld [vmem:[#allocation8 + $0x808] sm:$0xf0] }
 0x173   :  { %3476 = vmatpush.bf16.msra.mxu1 %v13231_v25  ;;  %v3198_v16 = vpop.f32.mrf.mxu1 }
 0x174   :  { %3498 = vmatpush.bf16.msra.mxu3 %v12283_v17  ;;  %3490 = vmatpush.bf16.msra.mxu2 %v13455_v21  ;;  %v12675_v17 = vor.u32 %v17898_v5, %v12674_v3  ;;  %v12171_v21 = vor.u32 %v17772_v8, %v12170_v7  ;;  %v3185_v25 = vadd.f32 %v3184_v1, %v3171_v15  ;;  %v19608_v49 = vpop.f32.mrf.mxu0  ;;  %v17877_v1 = vld [vmem:[#allocation8 + $0x3e0] sm:$0xf0] }
 0x175   :  { %3512 = vmatpush.bf16.msrb.mxu0 %v12507_v20  ;;  %v19604_v20 = vpop.f32.mrf.mxu2  ;;  %v12591_v15 = vor.u32 %v17877_v1, %v12590_v0  ;;  %v13346_v0 = vld [vmem:[#allocation8 + $0x9b0] sm:$0xf]  ;;  %v18066_v1 = vld [vmem:[#allocation8 + $0x9c8] sm:$0xf0] }
 0x176   :  { %3477 = vmatmul.bf16.vlgmr.msra.gmra.mxu1 %v19561_v4  ;;  %v19606_v44 = vadd.f32 %v3198_v16, %v3185_v25  ;;  %v12562_v16 = vld [vmem:[#allocation8 + $0x390] sm:$0xf] }
 0x177   :  { %3525 = vmatpush.bf16.msrb.mxu1 %v12759_v42  ;;  %3491 = vmatmul.bf16.vlgmr.msra.gmra.mxu2 %v19567_v30  ;;  %v12871_v42 = vor.u32 %v17947_v19, %v12870_v18  ;;  %v17926_v18 = vld [vmem:[#allocation8 + $0x568] sm:$0xf0] }
 0x178   :  { %3539 = vmatpush.bf16.msrb.mxu2 %v12983_v26  ;;  %3499 = vmatpush.bf16.msra.mxu3 %v12255_v32  ;;  %v12395_v26 = vor.u32 %v17828_v14, %v12394_v13  ;;  %v12647_v32 = vor.u32 %v17891_v24, %v12646_v23  ;;  %v13402_v13 = vld [vmem:[#allocation8 + $0xa20] sm:$0xf]  ;;  %v18080_v14 = vld [vmem:[#allocation8 + $0xa38] sm:$0xf0]  ;;  %v17870_v19 = vld [vmem:[#allocation8 + $0x3a8] sm:$0xf0] }
 0x179   :  { %3513 = vmatpush.bf16.msrb.mxu0 %v12479_v37  ;;  %v12143_v37 = vor.u32 %v17765_v28, %v12142_v27  ;;  %v12312_v23 = vld [vmem:[#allocation8 + $0x1b4] sm:$0xf0]  ;;  %v18143_v27 = vld [vmem:[#allocation8 + $0xc30] sm:$0xf0]  ;;  %v12563_v36 = vor.u32 %v17870_v19, %v12562_v16 }
 0x17a   :  { %v13318_v16 = vld [vmem:[#allocation8 + $0x978] sm:$0xf]  ;;  %v17783_v19 = vld [vmem:[#allocation8 + $0xf4] sm:$0xf] }
 0x17b   :  { %3526 = vmatpush.bf16.msrb.mxu1 %v12731_v47  ;;  %v12338_v47 = vld [vmem:[#allocation8 + $0x1d0] sm:$0xf] }
 0x17c   :  { %3540 = vmatpush.bf16.msrb.mxu2 %v12955_v41  ;;  %3500 = vmatpush.bf16.msra.mxu3 %v12227_v50  ;;  %v12114_v41 = vld [vmem:[#allocation8 + $0x10] sm:$0xf]  ;;  %v19610_v50 = vpop.f32.mrf.mxu3  ;;  %v12339_v3 = vor.u32 %v17814_v48, %v12338_v47  ;;  %v12284_v47 = vld [vmem:[#allocation8 + $0x17c] sm:$0xf0] }
 0x17d   :  { %3514 = vmatpush.bf16.msrb.mxu0 %v12451_v54  ;;  %v18031_v54 = vld [vmem:[#allocation8 + $0x8b0] sm:$0xf0]  ;;  %v12115_v63 = vor.u32 %v17758_v45, %v12114_v41  ;;  %v3212_v7 = vpop.f32.mrf.mxu2  ;;  %v3240_v41 = vpop.f32.mrf.mxu0  ;;  %v17797_v45 = vld [vmem:[#allocation8 + $0x164] sm:$0xf] }
 0x17e   :  { %v13207_v5 = vor.u32 %v18031_v54, %v13206_v53  ;;  %v13626_v53 = vld [vmem:[#allocation8 + $0xbe0] sm:$0xf]  ;;  %v18136_v54 = vld [vmem:[#allocation8 + $0xbf8] sm:$0xf0] }
 0x17f   :  { %3527 = vmatpush.bf16.msrb.mxu1 %v12703_v61  ;;  %v19612_v61 = vpop.f32.mrf.mxu1 }
 0x180   :  { %3541 = vmatpush.bf16.msrb.mxu2 %v12927_v57  ;;  %3501 = vmatpush.bf16.msra.mxu3 %v12199_v2  ;;  %v18087_v57 = vld [vmem:[#allocation8 + $0xa70] sm:$0xf0]  ;;  %v20339_v2 = vperm.slane %v19584_v52, 1 }
 0x181   :  { %3515 = vmatpush.bf16.msrb.mxu0 %v12423_v6  ;;  %v13178_v6 = vld [vmem:[#allocation8 + $0x860] sm:$0xf]  ;;  %v13431_v8 = vor.u32 %v18087_v57, %v13430_v55  ;;  %v13122_v57 = vld [vmem:[#allocation8 + $0x7f0] sm:$0xf] }
 0x182   :  { %v3213_v24 = vadd.f32 %v3212_v7, %v20339_v2  ;;  %v13123_v7 = vor.u32 %v18010_v58, %v13122_v57  ;;  %v13514_v57 = vld [vmem:[#allocation8 + $0xb00] sm:$0xf]  ;;  %v18108_v58 = vld [vmem:[#allocation8 + $0xb18] sm:$0xf0] }
 0x183   :  { %3528 = vmatpush.bf16.msrb.mxu1 %v12675_v17  ;;  %v12786_v17 = vld [vmem:[#allocation8 + $0x550] sm:$0xf] }
 0x184   :  { %3542 = vmatpush.bf16.msrb.mxu2 %v12899_v12  ;;  %3502 = vmatpush.bf16.msra.mxu3 %v12171_v21  ;;  %v18024_v12 = vld [vmem:[#allocation8 + $0x878] sm:$0xf0]  ;;  %v3226_v28 = vpop.f32.mrf.mxu3  ;;  %v12787_v22 = vor.u32 %v17926_v18, %v12786_v17  ;;  %v18059_v17 = vld [vmem:[#allocation8 + $0x990] sm:$0xf0] }
 0x185   :  { %3516 = vmatpush.bf16.msrb.mxu0 %v12395_v26  ;;  %v17804_v21 = vld [vmem:[#allocation8 + $0x19c] sm:$0xf]  ;;  %v13179_v25 = vor.u32 %v18024_v12, %v13178_v6  ;;  %v13654_v26 = vld [vmem:[#allocation8 + $0xc18] sm:$0xf]  ;;  %v3227_v33 = vadd.f32 %v3226_v28, %v3213_v24  ;;  %v12256_v6 = vld [vmem:[#allocation8 + $0x144] sm:$0xf0]  ;;  %v13347_v12 = vor.u32 %v18066_v1, %v13346_v0 }
 0x186   :  { %v13570_v24 = vld [vmem:[#allocation8 + $0xb70] sm:$0xf]  ;;  %v17996_v28 = vld [vmem:[#allocation8 + $0x798] sm:$0xf0]  ;;  %v17982_v1 = vld [vmem:[#allocation8 + $0x728] sm:$0xf0] }
 0x187   :  { %3529 = vmatpush.bf16.msrb.mxu1 %v12647_v32  ;;  %v18017_v32 = vld [vmem:[#allocation8 + $0x840] sm:$0xf0]  ;;  %v3241_v48 = vadd.f32 %v3240_v41, %v3227_v33  ;;  %v3254_v55 = vpop.f32.mrf.mxu1  ;;  %v17776_v33 = vld [vmem:[#allocation8 + $0xbc] sm:$0xf] }
 0x188   :  { %3543 = vmatpush.bf16.msrb.mxu2 %v12871_v42  ;;  %3503 = vmatpush.bf16.msra.mxu3 %v12143_v37  ;;  %v13403_v42 = vor.u32 %v18080_v14, %v13402_v13  ;;  %v12315_v37 = vor.u32 %v17804_v21, %v12312_v23  ;;  %v13094_v13 = vld [vmem:[#allocation8 + $0x7b8] sm:$0xf]  ;;  %v18003_v14 = vld [vmem:[#allocation8 + $0x7d0] sm:$0xf0]  ;;  %v12228_v21 = vld [vmem:[#allocation8 + $0x10c] sm:$0xf0] }
 0x189   :  { %3517 = vmatpush.bf16.msrb.mxu0 %v12367_v43  ;;  %v13655_v43 = vor.u32 %v18143_v27, %v13654_v26  ;;  %v19619_v59 = vadd.f32 %v3254_v55, %v3241_v48  ;;  %v13095_v23 = vor.u32 %v18003_v14, %v13094_v13  ;;  %v13319_v26 = vor.u32 %v18059_v17, %v13318_v16  ;;  %v13066_v27 = vld [vmem:[#allocation8 + $0x780] sm:$0xf]  ;;  %v13262_v48 = vld [vmem:[#allocation8 + $0x908] sm:$0xf]  ;;  %v12760_v13 = vld [vmem:[#allocation8 + $0x534] sm:$0xf0] }
 0x18a   :  { %v12172_v55 = vld [vmem:[#allocation8 + $0x9c] sm:$0xf0]  ;;  %v17762_v14 = vld [vmem:[#allocation8 + $0x4c] sm:$0xf]  ;;  %v13486_v17 = vld [vmem:[#allocation8 + $0xac8] sm:$0xf] }
 0x18b   :  { %3530 = vmatpush.bf16.msrb.mxu1 %v12619_v56  ;;  %v13375_v56 = vor.u32 %v18073_v39, %v13374_v38  ;;  %v13542_v38 = vld [vmem:[#allocation8 + $0xb38] sm:$0xf]  ;;  %v18115_v39 = vld [vmem:[#allocation8 + $0xb50] sm:$0xf0] }
 0x18c   :  { %3544 = vmatpush.bf16.msrb.mxu2 %v12843_v51  ;;  %3504 = vmatpush.bf16.msra.mxu3 %v12115_v63  ;;  %v13151_v51 = vor.u32 %v18017_v32, %v13150_v29  ;;  %v12287_v63 = vor.u32 %v17797_v45, %v12284_v47  ;;  %v18052_v29 = vld [vmem:[#allocation8 + $0x958] sm:$0xf0]  ;;  %v17989_v45 = vld [vmem:[#allocation8 + $0x760] sm:$0xf0] }
 0x18d   :  { %3518 = vmatpush.bf16.msrb.mxu0 %v12339_v3  ;;  %v13627_v3 = vor.u32 %v18136_v54, %v13626_v53  ;;  %v13543_v53 = vor.u32 %v18115_v39, %v13542_v38  ;;  %v17769_v54 = vld [vmem:[#allocation8 + $0x84] sm:$0xf]  ;;  %v17972_v39 = vld [vmem:[#allocation8 + $0x6dc] sm:$0xf] }
 0x18f   :  { %3531 = vmatpush.bf16.msrb.mxu1 %v12591_v15  ;;  %3505 = vmatmul.bf16.vlgmr.msra.gmra.mxu3 %v19541_v9 }
 0x190   :  { %3553 = vmatpush.bf16.msrb.mxu3 %v13207_v5  ;;  %3545 = vmatpush.bf16.msrb.mxu2 %v12815_v11  ;;  %v17790_v5 = vld [vmem:[#allocation8 + $0x12c] sm:$0xf]  ;;  %v18129_v11 = vld [vmem:[#allocation8 + $0xbc0] sm:$0xf0] }
 0x191   :  { %3567 = vmatpush.bf16.msra.mxu0 %v13431_v8  ;;  %v13598_v8 = vld [vmem:[#allocation8 + $0xba8] sm:$0xf]  ;;  %v12259_v15 = vor.u32 %v17790_v5, %v12256_v6  ;;  %v18038_v5 = vld [vmem:[#allocation8 + $0x8e8] sm:$0xf0]  ;;  %v12175_v6 = vor.u32 %v17769_v54, %v12172_v55 }
 0x192   :  { %3519 = vmatmul.bf16.vlgmr.msrb.gmra.mxu0 %v19543_v10  ;;  %v13599_v18 = vor.u32 %v18129_v11, %v13598_v8  ;;  %v12536_v8 = vld [vmem:[#allocation8 + $0x374] sm:$0xf0]  ;;  %v17916_v11 = vld [vmem:[#allocation8 + $0x51c] sm:$0xf]  ;;  %v17902_v54 = vld [vmem:[#allocation8 + $0x4ac] sm:$0xf] }
 0x193   :  { %3532 = vmatpush.bf16.msrb.mxu1 %v12563_v36  ;;  %v12200_v36 = vld [vmem:[#allocation8 + $0xd4] sm:$0xf0]  ;;  %v12704_v55 = vld [vmem:[#allocation8 + $0x4c4] sm:$0xf0] }
 0x194   :  { %3554 = vmatpush.bf16.msrb.mxu3 %v13179_v25  ;;  %3546 = vmatpush.bf16.msrb.mxu2 %v12787_v22  ;;  %v18122_v25 = vld [vmem:[#allocation8 + $0xb88] sm:$0xf0]  ;;  %v13290_v22 = vld [vmem:[#allocation8 + $0x940] sm:$0xf]  ;;  %v12203_v47 = vor.u32 %v17776_v33, %v12200_v36  ;;  %v18028_v36 = vld [vmem:[#allocation8 + $0x89c] sm:$0xf] }
 0x195   :  { %3568 = vmatpush.bf16.msra.mxu0 %v13403_v42  ;;  %v12231_v42 = vor.u32 %v17783_v19, %v12228_v21  ;;  %v13571_v32 = vor.u32 %v18122_v25, %v13570_v24  ;;  %v13291_v41 = vor.u32 %v18052_v29, %v13290_v22  ;;  %v12763_v24 = vor.u32 %v17916_v11, %v12760_v13  ;;  %v13458_v22 = vld [vmem:[#allocation8 + $0xa90] sm:$0xf]  ;;  %v17755_v29 = vld [vmem:[#allocation8 + $0x14] sm:$0xf]  ;;  %v18094_v33 = vld [vmem:[#allocation8 + $0xaa8] sm:$0xf0] }
 0x196   :  { %3533 = vmatmul.bf16.vlgmr.msrb.gmra.mxu1 %v19547_v34  ;;  %v12676_v11 = vld [vmem:[#allocation8 + $0x48c] sm:$0xf0]  ;;  %v18014_v13 = vld [vmem:[#allocation8 + $0x82c] sm:$0xf] }
 0x197   :  { %3581 = vmatpush.bf16.msra.mxu1 %v13655_v43  ;;  %3547 = vmatmul.bf16.vlgmr.msrb.gmra.mxu2 %v19549_v35  ;;  %v13038_v43 = vld [vmem:[#allocation8 + $0x748] sm:$0xf] }
 0x198   :  { %3595 = vmatpush.bf16.msra.mxu2 %v12315_v37  ;;  %3555 = vmatpush.bf16.msrb.mxu3 %v13151_v51  ;;  %v13067_v37 = vor.u32 %v17996_v28, %v13066_v27  ;;  %v18045_v51 = vld [vmem:[#allocation8 + $0x920] sm:$0xf0]  ;;  %v12732_v28 = vld [vmem:[#allocation8 + $0x4fc] sm:$0xf0] }
 0x199   :  { %3569 = vmatpush.bf16.msra.mxu0 %v13375_v56  ;;  %v13039_v56 = vor.u32 %v17989_v45, %v13038_v43  ;;  %v13263_v0 = vor.u32 %v18045_v51, %v13262_v48  ;;  %v17909_v27 = vld [vmem:[#allocation8 + $0x4e4] sm:$0xf]  ;;  %v12480_v48 = vld [vmem:[#allocation8 + $0x304] sm:$0xf0]  ;;  %v13459_v51 = vor.u32 %v18094_v33, %v13458_v22  ;;  %v17951_v22 = vld [vmem:[#allocation8 + $0x634] sm:$0xf] }
 0x19a   :  { %v12735_v43 = vor.u32 %v17909_v27, %v12732_v28  ;;  %v18007_v27 = vld [vmem:[#allocation8 + $0x7f4] sm:$0xf]  ;;  %v13124_v28 = vld [vmem:[#allocation8 + $0x80c] sm:$0xf0]  ;;  %v17825_v33 = vld [vmem:[#allocation8 + $0x244] sm:$0xf] }
 0x19b   :  { %3582 = vmatpush.bf16.msra.mxu1 %v13627_v3  ;;  %v13234_v3 = vld [vmem:[#allocation8 + $0x8d0] sm:$0xf] }
 0x19c   :  { %3596 = vmatpush.bf16.msra.mxu2 %v12287_v63  ;;  %3556 = vmatpush.bf16.msrb.mxu3 %v13123_v7  ;;  %v13010_v63 = vld [vmem:[#allocation8 + $0x710] sm:$0xf]  ;;  %v17860_v7 = vld [vmem:[#allocation8 + $0x35c] sm:$0xf]  ;;  %v13235_v19 = vor.u32 %v18038_v5, %v13234_v3  ;;  %v12707_v3 = vor.u32 %v17902_v54, %v12704_v55  ;;  %v17839_v5 = vld [vmem:[#allocation8 + $0x2b4] sm:$0xf] }
 0x19d   :  { %3570 = vmatpush.bf16.msra.mxu0 %v13347_v12  ;;  %v13515_v12 = vor.u32 %v18108_v58, %v13514_v57  ;;  %v13011_v16 = vor.u32 %v17982_v1, %v13010_v63  ;;  %v12539_v21 = vor.u32 %v17860_v7, %v12536_v8  ;;  %v18021_v57 = vld [vmem:[#allocation8 + $0x864] sm:$0xf]  ;;  %v13180_v58 = vld [vmem:[#allocation8 + $0x87c] sm:$0xf0]  ;;  %v17895_v8 = vld [vmem:[#allocation8 + $0x474] sm:$0xf] }
 0x19e   :  { %v12956_v1 = vld [vmem:[#allocation8 + $0x6bc] sm:$0xf0]  ;;  %v13183_v7 = vor.u32 %v18021_v57, %v13180_v58  ;;  %v17818_v54 = vld [vmem:[#allocation8 + $0x20c] sm:$0xf]  ;;  %v12368_v55 = vld [vmem:[#allocation8 + $0x224] sm:$0xf0] }
 0x19f   :  { %3583 = vmatpush.bf16.msra.mxu1 %v13599_v18  ;;  %v18101_v18 = vld [vmem:[#allocation8 + $0xae0] sm:$0xf0]  ;;  %v17874_v57 = vld [vmem:[#allocation8 + $0x3cc] sm:$0xf]  ;;  %v12592_v58 = vld [vmem:[#allocation8 + $0x3e4] sm:$0xf0] }
 0x1a0   :  { %3597 = vmatpush.bf16.msra.mxu2 %v12259_v15  ;;  %3557 = vmatpush.bf16.msrb.mxu3 %v13095_v23  ;;  %v12144_v15 = vld [vmem:[#allocation8 + $0x64] sm:$0xf0]  ;;  %v17853_v23 = vld [vmem:[#allocation8 + $0x324] sm:$0xf] }
 0x1a1   :  { %3571 = vmatpush.bf16.msra.mxu0 %v13319_v26  ;;  %v12147_v25 = vor.u32 %v17762_v14, %v12144_v15  ;;  %v12508_v26 = vld [vmem:[#allocation8 + $0x33c] sm:$0xf0]  ;;  %v13152_v14 = vld [vmem:[#allocation8 + $0x844] sm:$0xf0] }
 0x1a2   :  { %v12511_v38 = vor.u32 %v17853_v23, %v12508_v26  ;;  %v13155_v23 = vor.u32 %v18014_v13, %v13152_v14  ;;  %v12564_v13 = vld [vmem:[#allocation8 + $0x3ac] sm:$0xf0] }
 0x1a3   :  { %3584 = vmatpush.bf16.msra.mxu1 %v13571_v32  ;;  %v12116_v32 = vld [vmem:[#allocation8 + $0x2c] sm:$0xf0] }
 0x1a4   :  { %3598 = vmatpush.bf16.msra.mxu2 %v12231_v42  ;;  %3558 = vmatpush.bf16.msrb.mxu3 %v13067_v37  ;;  %v13487_v42 = vor.u32 %v18101_v18, %v13486_v17  ;;  %v13208_v37 = vld [vmem:[#allocation8 + $0x8b4] sm:$0xf0]  ;;  %v12119_v45 = vor.u32 %v17755_v29, %v12116_v32  ;;  %v12928_v17 = vld [vmem:[#allocation8 + $0x684] sm:$0xf0]  ;;  %v12679_v18 = vor.u32 %v17895_v8, %v12676_v11  ;;  %v12900_v29 = vld [vmem:[#allocation8 + $0x64c] sm:$0xf0] }
 0x1a5   :  { %3572 = vmatpush.bf16.msra.mxu0 %v13291_v41  ;;  %v12984_v41 = vld [vmem:[#allocation8 + $0x6f4] sm:$0xf0]  ;;  %v12595_v8 = vor.u32 %v17874_v57, %v12592_v58  ;;  %v12340_v11 = vld [vmem:[#allocation8 + $0x1ec] sm:$0xf0]  ;;  %v18070_v57 = vld [vmem:[#allocation8 + $0x9ec] sm:$0xf] }
 0x1a6   :  { %v13376_v58 = vld [vmem:[#allocation8 + $0xa04] sm:$0xf0] }
 0x1a7   :  { %3585 = vmatpush.bf16.msra.mxu1 %v13543_v53  ;;  %v13211_v53 = vor.u32 %v18028_v36, %v13208_v37  ;;  %v12396_v36 = vld [vmem:[#allocation8 + $0x25c] sm:$0xf0]  ;;  %v13127_v37 = vor.u32 %v18007_v27, %v13124_v28 }
 0x1a8   :  { %3599 = vmatpush.bf16.msra.mxu2 %v12203_v47  ;;  %3559 = vmatpush.bf16.msrb.mxu3 %v13039_v56  ;;  %v17846_v47 = vld [vmem:[#allocation8 + $0x2ec] sm:$0xf]  ;;  %v12987_v56 = vor.u32 %v17972_v39, %v12984_v41  ;;  %v12620_v39 = vld [vmem:[#allocation8 + $0x41c] sm:$0xf0]  ;;  %v12903_v41 = vor.u32 %v17951_v22, %v12900_v29 }
 0x1a9   :  { %3573 = vmatpush.bf16.msra.mxu0 %v13263_v0  ;;  %v12483_v63 = vor.u32 %v17846_v47, %v12480_v48  ;;  %v17965_v0 = vld [vmem:[#allocation8 + $0x6a4] sm:$0xf]  ;;  %v12399_v47 = vor.u32 %v17825_v33, %v12396_v36  ;;  %v17944_v48 = vld [vmem:[#allocation8 + $0x5fc] sm:$0xf]  ;;  %v13628_v36 = vld [vmem:[#allocation8 + $0xbfc] sm:$0xf0] }
 0x1aa   :  { %v18133_v33 = vld [vmem:[#allocation8 + $0xbe4] sm:$0xf] }
 0x1ab   :  { %3586 = vmatpush.bf16.msra.mxu1 %v13515_v12  ;;  %v12959_v12 = vor.u32 %v17965_v0, %v12956_v1  ;;  %v17993_v0 = vld [vmem:[#allocation8 + $0x784] sm:$0xf]  ;;  %v13068_v1 = vld [vmem:[#allocation8 + $0x79c] sm:$0xf0] }
 0x1ac   :  { %3600 = vmatpush.bf16.msra.mxu2 %v12175_v6  ;;  %3560 = vmatpush.bf16.msrb.mxu3 %v13011_v16  ;;  %v12452_v6 = vld [vmem:[#allocation8 + $0x2cc] sm:$0xf0]  ;;  %v17958_v16 = vld [vmem:[#allocation8 + $0x66c] sm:$0xf]  ;;  %v13071_v14 = vor.u32 %v17993_v0, %v13068_v1 }
 0x1ad   :  { %3574 = vmatpush.bf16.msra.mxu0 %v13235_v19  ;;  %v12455_v15 = vor.u32 %v17839_v5, %v12452_v6  ;;  %v17832_v19 = vld [vmem:[#allocation8 + $0x27c] sm:$0xf]  ;;  %v12931_v26 = vor.u32 %v17958_v16, %v12928_v17  ;;  %v17937_v5 = vld [vmem:[#allocation8 + $0x5c4] sm:$0xf]  ;;  %v12844_v6 = vld [vmem:[#allocation8 + $0x5dc] sm:$0xf0] }
 0x1ae   :  { %v13432_v16 = vld [vmem:[#allocation8 + $0xa74] sm:$0xf0]  ;;  %v18140_v17 = vld [vmem:[#allocation8 + $0xc1c] sm:$0xf]  ;;  %v18126_v1 = vld [vmem:[#allocation8 + $0xbac] sm:$0xf] }
 0x1af   :  { %3587 = vmatpush.bf16.msra.mxu1 %v13487_v42  ;;  %3561 = vmatmul.bf16.vlgmr.msrb.gmra.mxu3 %v19559_v62 }
 0x1b0   :  { %3609 = vmatpush.bf16.msra.mxu3 %v12539_v21  ;;  %3601 = vmatpush.bf16.msra.mxu2 %v12147_v25  ;;  %v12424_v21 = vld [vmem:[#allocation8 + $0x294] sm:$0xf0] }
 0x1b1   :  { %3623 = vmatpush.bf16.msrb.mxu0 %v12763_v24  ;;  %v17888_v24 = vld [vmem:[#allocation8 + $0x43c] sm:$0xf]  ;;  %v12648_v25 = vld [vmem:[#allocation8 + $0x454] sm:$0xf0]  ;;  %v12427_v42 = vor.u32 %v17832_v19, %v12424_v21  ;;  %v17986_v21 = vld [vmem:[#allocation8 + $0x74c] sm:$0xf] }
 0x1b2   :  { %3575 = vmatmul.bf16.vlgmr.msra.gmra.mxu0 %v19561_v4  ;;  %v12651_v32 = vor.u32 %v17888_v24, %v12648_v25  ;;  %v13656_v19 = vld [vmem:[#allocation8 + $0xc34] sm:$0xf0]  ;;  %v17930_v25 = vld [vmem:[#allocation8 + $0x58c] sm:$0xf] }
 0x1b3   :  { %3588 = vmatpush.bf16.msra.mxu1 %v13459_v51  ;;  %v12872_v51 = vld [vmem:[#allocation8 + $0x614] sm:$0xf0]  ;;  %v13659_v22 = vor.u32 %v18140_v17, %v13656_v19  ;;  %v13348_v17 = vld [vmem:[#allocation8 + $0x9cc] sm:$0xf0] }
 0x1b4   :  { %3610 = vmatpush.bf16.msra.mxu3 %v12511_v38  ;;  %3602 = vmatpush.bf16.msra.mxu2 %v12119_v45  ;;  %v17881_v38 = vld [vmem:[#allocation8 + $0x404] sm:$0xf]  ;;  %v13096_v45 = vld [vmem:[#allocation8 + $0x7d4] sm:$0xf0] }
 0x1b5   :  { %3624 = vmatpush.bf16.msrb.mxu0 %v12735_v43  ;;  %v18000_v43 = vld [vmem:[#allocation8 + $0x7bc] sm:$0xf] }
 0x1b6   :  { %3589 = vmatmul.bf16.vlgmr.msra.gmra.mxu1 %v19567_v30 }
 0x1b7   :  { %3637 = vmatpush.bf16.msrb.mxu1 %v12987_v56  ;;  %3603 = vmatmul.bf16.vlgmr.msra.gmra.mxu2 %v19541_v9  ;;  %v13099_v56 = vor.u32 %v18000_v43, %v13096_v45  ;;  %v13012_v43 = vld [vmem:[#allocation8 + $0x72c] sm:$0xf0] }
 0x1b8   :  { %3651 = vmatpush.bf16.msrb.mxu2 %v13211_v53  ;;  %3611 = vmatpush.bf16.msra.mxu3 %v12483_v63  ;;  %v12623_v53 = vor.u32 %v17881_v38, %v12620_v39  ;;  %v12875_v63 = vor.u32 %v17944_v48, %v12872_v51  ;;  %v17923_v39 = vld [vmem:[#allocation8 + $0x554] sm:$0xf]  ;;  %v12788_v45 = vld [vmem:[#allocation8 + $0x56c] sm:$0xf0]  ;;  %v17864_v48 = vld [vmem:[#allocation8 + $0x378] sm:$0xf0] }
 0x1b9   :  { %3625 = vmatpush.bf16.msrb.mxu0 %v12707_v3  ;;  %v12371_v3 = vor.u32 %v17818_v54, %v12368_v55  ;;  %v17808_v54 = vld [vmem:[#allocation8 + $0x1b8] sm:$0xf0]  ;;  %v13631_v55 = vor.u32 %v18133_v33, %v13628_v36  ;;  %v13320_v33 = vld [vmem:[#allocation8 + $0x994] sm:$0xf0] }
 0x1bb   :  { %3638 = vmatpush.bf16.msrb.mxu1 %v12959_v12  ;;  %v17867_v12 = vld [vmem:[#allocation8 + $0x394] sm:$0xf] }
 0x1bc   :  { %3652 = vmatpush.bf16.msrb.mxu2 %v13183_v7  ;;  %3612 = vmatpush.bf16.msra.mxu3 %v12455_v15  ;;  %v17811_v7 = vld [vmem:[#allocation8 + $0x1d4] sm:$0xf]  ;;  %v18084_v15 = vld [vmem:[#allocation8 + $0xa5c] sm:$0xf]  ;;  %v12567_v27 = vor.u32 %v17867_v12, %v12564_v13  ;;  %v13379_v12 = vor.u32 %v18070_v57, %v13376_v58  ;;  %v12290_v13 = vld [vmem:[#allocation8 + $0x168] sm:$0xf] }
 0x1bd   :  { %3626 = vmatpush.bf16.msrb.mxu0 %v12679_v18  ;;  %v12847_v18 = vor.u32 %v17937_v5, %v12844_v6  ;;  %v12343_v24 = vor.u32 %v17811_v7, %v12340_v11  ;;  %v13435_v28 = vor.u32 %v18084_v15, %v13432_v16  ;;  %v12514_v6 = vld [vmem:[#allocation8 + $0x328] sm:$0xf]  ;;  %v17857_v7 = vld [vmem:[#allocation8 + $0x340] sm:$0xf0]  ;;  %v19633_v11 = vpop.f32.mrf.mxu3  ;;  %v18063_v16 = vld [vmem:[#allocation8 + $0x9b4] sm:$0xf] }
 0x1be   :  { %v12515_v19 = vor.u32 %v17857_v7, %v12514_v6 }
 0x1bf   :  { %3639 = vmatpush.bf16.msrb.mxu1 %v12931_v26  ;;  %v12816_v26 = vld [vmem:[#allocation8 + $0x5a4] sm:$0xf0] }
 0x1c0   :  { %3653 = vmatpush.bf16.msrb.mxu2 %v13155_v23  ;;  %3613 = vmatpush.bf16.msra.mxu3 %v12427_v42  ;;  %v13040_v23 = vld [vmem:[#allocation8 + $0x764] sm:$0xf0]  ;;  %v18077_v42 = vld [vmem:[#allocation8 + $0xa24] sm:$0xf]  ;;  %v12819_v38 = vor.u32 %v17930_v25, %v12816_v26  ;;  %v12486_v25 = vld [vmem:[#allocation8 + $0x2f0] sm:$0xf] }
 0x1c1   :  { %3627 = vmatpush.bf16.msrb.mxu0 %v12651_v32  ;;  %v13043_v29 = vor.u32 %v17986_v21, %v13040_v23  ;;  %v13404_v32 = vld [vmem:[#allocation8 + $0xa3c] sm:$0xf0]  ;;  %v18119_v21 = vld [vmem:[#allocation8 + $0xb74] sm:$0xf]  ;;  %v13572_v23 = vld [vmem:[#allocation8 + $0xb8c] sm:$0xf0] }
 0x1c2   :  { %v13407_v51 = vor.u32 %v18077_v42, %v13404_v32  ;;  %v17850_v26 = vld [vmem:[#allocation8 + $0x308] sm:$0xf0]  ;;  %v12262_v42 = vld [vmem:[#allocation8 + $0x130] sm:$0xf]  ;;  %v18056_v32 = vld [vmem:[#allocation8 + $0x97c] sm:$0xf] }
 0x1c3   :  { %3640 = vmatpush.bf16.msrb.mxu1 %v12903_v41  ;;  %v17979_v41 = vld [vmem:[#allocation8 + $0x714] sm:$0xf]  ;;  %v12487_v36 = vor.u32 %v17850_v26, %v12486_v25  ;;  %v12402_v25 = vld [vmem:[#allocation8 + $0x248] sm:$0xf]  ;;  %v17829_v26 = vld [vmem:[#allocation8 + $0x260] sm:$0xf0] }
 0x1c4   :  { %3654 = vmatpush.bf16.msrb.mxu2 %v13127_v37  ;;  %3614 = vmatpush.bf16.msra.mxu3 %v12399_v47  ;;  %v19627_v37 = vpop.f32.mrf.mxu2  ;;  %v12542_v47 = vld [vmem:[#allocation8 + $0x360] sm:$0xf] }
 0x1c5   :  { %3628 = vmatpush.bf16.msrb.mxu0 %v12623_v53  ;;  %v12318_v53 = vld [vmem:[#allocation8 + $0x1a0] sm:$0xf]  ;;  %v12543_v0 = vor.u32 %v17864_v48, %v12542_v47  ;;  %v13323_v47 = vor.u32 %v18056_v32, %v13320_v33  ;;  %v12234_v48 = vld [vmem:[#allocation8 + $0xf8] sm:$0xf]  ;;  %v19643_v57 = vpop.f32.mrf.mxu3  ;;  %v13236_v33 = vld [vmem:[#allocation8 + $0x8ec] sm:$0xf0] }
 0x1c6   :  { %v12319_v5 = vor.u32 %v17808_v54, %v12318_v53  ;;  %v18049_v54 = vld [vmem:[#allocation8 + $0x944] sm:$0xf] }
 0x1c7   :  { %3641 = vmatpush.bf16.msrb.mxu1 %v12875_v63  ;;  %v12791_v63 = vor.u32 %v17923_v39, %v12788_v45  ;;  %v13544_v39 = vld [vmem:[#allocation8 + $0xb54] sm:$0xf0]  ;;  %v17843_v45 = vld [vmem:[#allocation8 + $0x2d0] sm:$0xf0] }
 0x1c8   :  { %3655 = vmatpush.bf16.msrb.mxu2 %v13099_v56  ;;  %3615 = vmatpush.bf16.msra.mxu3 %v12371_v3  ;;  %v13015_v56 = vor.u32 %v17979_v41, %v13012_v43  ;;  %v13600_v3 = vld [vmem:[#allocation8 + $0xbc4] sm:$0xf0]  ;;  %v12458_v43 = vld [vmem:[#allocation8 + $0x2b8] sm:$0xf] }
 0x1c9   :  { %3629 = vmatpush.bf16.msrb.mxu0 %v12595_v8  ;;  %v19631_v8 = vpop.f32.mrf.mxu0  ;;  %v13603_v15 = vor.u32 %v18126_v1, %v13600_v3  ;;  %v12459_v58 = vor.u32 %v17843_v45, %v12458_v43  ;;  %v12430_v3 = vld [vmem:[#allocation8 + $0x280] sm:$0xf]  ;;  %v17920_v43 = vld [vmem:[#allocation8 + $0x538] sm:$0xf0] }
 0x1ca   :  { %v12990_v45 = vld [vmem:[#allocation8 + $0x6e0] sm:$0xf] }
 0x1cb   :  { %3642 = vmatpush.bf16.msrb.mxu1 %v12847_v18  ;;  %v19635_v18 = vpop.f32.mrf.mxu1 }
 0x1cc   :  { %3656 = vmatpush.bf16.msrb.mxu2 %v13071_v14  ;;  %3616 = vmatpush.bf16.msra.mxu3 %v12343_v24  ;;  %v17801_v14 = vld [vmem:[#allocation8 + $0x180] sm:$0xf0] }
 0x1cd   :  { %3630 = vmatpush.bf16.msrb.mxu0 %v12567_v27  ;;  %v12291_v24 = vor.u32 %v17801_v14, %v12290_v13  ;;  %v19637_v27 = vpop.f32.mrf.mxu2  ;;  %v17780_v13 = vld [vmem:[#allocation8 + $0xd8] sm:$0xf0] }
 0x1cf   :  { %3643 = vmatpush.bf16.msrb.mxu1 %v12819_v38  ;;  %3617 = vmatmul.bf16.vlgmr.msra.gmra.mxu3 %v19543_v10  ;;  %v18112_v38 = vld [vmem:[#allocation8 + $0xb3c] sm:$0xf] }
 0x1d0   :  { %3665 = vmatpush.bf16.msrb.mxu3 %v13435_v28  ;;  %3657 = vmatpush.bf16.msrb.mxu2 %v13043_v29  ;;  %v13351_v28 = vor.u32 %v18063_v16, %v13348_v17  ;;  %v13575_v29 = vor.u32 %v18119_v21, %v13572_v23  ;;  %v13547_v53 = vor.u32 %v18112_v38, %v13544_v39  ;;  %v13264_v16 = vld [vmem:[#allocation8 + $0x924] sm:$0xf0]  ;;  %v18098_v21 = vld [vmem:[#allocation8 + $0xacc] sm:$0xf]  ;;  %v13460_v38 = vld [vmem:[#allocation8 + $0xaac] sm:$0xf0] }
 0x1d1   :  { %3679 = vmatpush.bf16.msra.mxu0 %v13659_v22  ;;  %v17794_v22 = vld [vmem:[#allocation8 + $0x148] sm:$0xf0]  ;;  %v13488_v23 = vld [vmem:[#allocation8 + $0xae4] sm:$0xf0]  ;;  %v12403_v39 = vor.u32 %v17829_v26, %v12402_v25  ;;  %v17815_v25 = vld [vmem:[#allocation8 + $0x1f0] sm:$0xf0] }
 0x1d2   :  { %3631 = vmatmul.bf16.vlgmr.msrb.gmra.mxu0 %v19547_v34  ;;  %v12263_v41 = vor.u32 %v17794_v22, %v12262_v42  ;;  %v12178_v42 = vld [vmem:[#allocation8 + $0x88] sm:$0xf]  ;;  %v17773_v22 = vld [vmem:[#allocation8 + $0xa0] sm:$0xf0]  ;;  %v13491_v32 = vor.u32 %v18098_v21, %v13488_v23  ;;  %v12122_v23 = vld [vmem:[#allocation8 + $0x18] sm:$0xf] }
 0x1d3   :  { %3644 = vmatpush.bf16.msrb.mxu1 %v12791_v63  ;;  %v18105_v63 = vld [vmem:[#allocation8 + $0xb04] sm:$0xf]  ;;  %v19645_v6 = vpop.f32.mrf.mxu1  ;;  %v17759_v26 = vld [vmem:[#allocation8 + $0x30] sm:$0xf0] }
 0x1d4   :  { %3666 = vmatpush.bf16.msrb.mxu3 %v13407_v51  ;;  %3658 = vmatpush.bf16.msrb.mxu2 %v13015_v56  ;;  %v17787_v51 = vld [vmem:[#allocation8 + $0x110] sm:$0xf0]  ;;  %v19641_v56 = vpop.f32.mrf.mxu0 }
 0x1d5   :  { %3680 = vmatpush.bf16.msra.mxu0 %v13631_v55  ;;  %v13292_v55 = vld [vmem:[#allocation8 + $0x95c] sm:$0xf0]  ;;  %20343 = vst [vmem:[#allocation21_spill] sm:$0xff] %v19641_v56  ;;  %v12235_v1 = vor.u32 %v17787_v51, %v12234_v48  ;;  %v19647_v17 = vpop.f32.mrf.mxu2  ;;  %v17976_v48 = vld [vmem:[#allocation8 + $0x6f8] sm:$0xf0] }
 0x1d6   :  { %3645 = vmatmul.bf16.vlgmr.msrb.gmra.mxu1 %v19549_v35  ;;  %v13295_v7 = vor.u32 %v18049_v54, %v13292_v55  ;;  %v12374_v51 = vld [vmem:[#allocation8 + $0x210] sm:$0xf]  ;;  %v19651_v55 = vpop.f32.mrf.mxu3  ;;  %v13242_v56 = vld [vmem:[#allocation8 + $0x8d8] sm:$0xf] }
 0x1d7   :  { %3693 = vmatpush.bf16.msra.mxu1 %v12319_v5  ;;  %3659 = vmatmul.bf16.vlgmr.msrb.gmra.mxu2 %v19559_v62  ;;  %v17836_v5 = vld [vmem:[#allocation8 + $0x298] sm:$0xf0] }
 0x1d8   :  { %3707 = vmatpush.bf16.msra.mxu2 %v12543_v0  ;;  %3667 = vmatpush.bf16.msrb.mxu3 %v13379_v12  ;;  %v13516_v0 = vld [vmem:[#allocation8 + $0xb1c] sm:$0xf0] }
 0x1d9   :  { %3681 = vmatpush.bf16.msra.mxu0 %v13603_v15  ;;  %v12206_v12 = vld [vmem:[#allocation8 + $0xc0] sm:$0xf]  ;;  %v13519_v14 = vor.u32 %v18105_v63, %v13516_v0  ;;  %v18042_v15 = vld [vmem:[#allocation8 + $0x90c] sm:$0xf]  ;;  %v12150_v63 = vld [vmem:[#allocation8 + $0x50] sm:$0xf] }
 0x1da   :  { %v17766_v0 = vld [vmem:[#allocation8 + $0x68] sm:$0xf0] }
 0x1db   :  { %3694 = vmatpush.bf16.msra.mxu1 %v12291_v24  ;;  %v12207_v24 = vor.u32 %v17780_v13, %v12206_v12  ;;  %v19655_v12 = vpop.f32.mrf.mxu1  ;;  %v12991_v13 = vor.u32 %v17976_v48, %v12990_v45  ;;  %v12151_v21 = vor.u32 %v17766_v0, %v12150_v63  ;;  %v12934_v45 = vld [vmem:[#allocation8 + $0x670] sm:$0xf]  ;;  %v18081_v63 = vld [vmem:[#allocation8 + $0xa40] sm:$0xf0] }
 0x1dc   :  { %3708 = vmatpush.bf16.msra.mxu2 %v12515_v19  ;;  %3668 = vmatpush.bf16.msrb.mxu3 %v13351_v28  ;;  %v12431_v19 = vor.u32 %v17836_v5, %v12430_v3  ;;  %v13267_v28 = vor.u32 %v18042_v15, %v13264_v16  ;;  %v19649_v54 = vpop.f32.mrf.mxu0  ;;  %v12738_v5 = vld [vmem:[#allocation8 + $0x4e8] sm:$0xf]  ;;  %v17913_v15 = vld [vmem:[#allocation8 + $0x500] sm:$0xf0] }
 0x1dd   :  { %3682 = vmatpush.bf16.msra.mxu0 %v13575_v29  ;;  %v18035_v29 = vld [vmem:[#allocation8 + $0x8d4] sm:$0xf]  ;;  %v12962_v16 = vld [vmem:[#allocation8 + $0x6a8] sm:$0xf] }
 0x1df   :  { %3695 = vmatpush.bf16.msra.mxu1 %v12263_v41  ;;  %v12766_v41 = vld [vmem:[#allocation8 + $0x520] sm:$0xf] }
 0x1e0   :  { %3709 = vmatpush.bf16.msra.mxu2 %v12487_v36  ;;  %3669 = vmatpush.bf16.msrb.mxu3 %v13323_v47  ;;  %v18091_v36 = vld [vmem:[#allocation8 + $0xa94] sm:$0xf]  ;;  %v12179_v47 = vor.u32 %v17773_v22, %v12178_v42  ;;  %v12767_v3 = vor.u32 %v17920_v43, %v12766_v41  ;;  %v18088_v42 = vld [vmem:[#allocation8 + $0xa78] sm:$0xf0]  ;;  %v12739_v22 = vor.u32 %v17913_v15, %v12738_v5 }
 0x1e1   :  { %3683 = vmatpush.bf16.msra.mxu0 %v13547_v53  ;;  %v17822_v53 = vld [vmem:[#allocation8 + $0x228] sm:$0xf0]  ;;  %v12123_v41 = vor.u32 %v17759_v26, %v12122_v23  ;;  %v17899_v15 = vld [vmem:[#allocation8 + $0x490] sm:$0xf0] }
 0x1e2   :  { %v18074_v26 = vld [vmem:[#allocation8 + $0xa08] sm:$0xf0] }
 0x1e3   :  { %3696 = vmatpush.bf16.msra.mxu1 %v12235_v1  ;;  %v13463_v1 = vor.u32 %v18091_v36, %v13460_v38  ;;  %v12710_v38 = vld [vmem:[#allocation8 + $0x4b0] sm:$0xf]  ;;  %v19663_v5 = vpop.f32.mrf.mxu1 }
 0x1e4   :  { %3710 = vmatpush.bf16.msra.mxu2 %v12459_v58  ;;  %3670 = vmatpush.bf16.msrb.mxu3 %v13295_v7  ;;  %v13239_v58 = vor.u32 %v18035_v29, %v13236_v33  ;;  %v19653_v7 = vpop.f32.mrf.mxu2  ;;  %v13214_v29 = vld [vmem:[#allocation8 + $0x8a0] sm:$0xf]  ;;  %v19658_v48 = vpop.f32.mrf.mxu0 }
 0x1e5   :  { %3684 = vmatpush.bf16.msra.mxu0 %v13519_v14  ;;  %v12375_v14 = vor.u32 %v17822_v53, %v12374_v51  ;;  %v19660_v51 = vpop.f32.mrf.mxu3 }
 0x1e7   :  { %3697 = vmatpush.bf16.msra.mxu1 %v12207_v24  ;;  %v12346_v24 = vld [vmem:[#allocation8 + $0x1d8] sm:$0xf] }
 0x1e8   :  { %3711 = vmatpush.bf16.msra.mxu2 %v12431_v19  ;;  %3671 = vmatpush.bf16.msrb.mxu3 %v13267_v28  ;;  %v17969_v19 = vld [vmem:[#allocation8 + $0x6c0] sm:$0xf0]  ;;  %v13438_v28 = vld [vmem:[#allocation8 + $0xa60] sm:$0xf]  ;;  %v12347_v36 = vor.u32 %v17815_v25, %v12346_v24  ;;  %v13382_v25 = vld [vmem:[#allocation8 + $0x9f0] sm:$0xf] }
 0x1e9   :  { %3685 = vmatpush.bf16.msra.mxu0 %v13491_v32  ;;  %v18032_v32 = vld [vmem:[#allocation8 + $0x8b8] sm:$0xf0]  ;;  %v12963_v33 = vor.u32 %v17969_v19, %v12962_v16  ;;  %v13439_v43 = vor.u32 %v18088_v42, %v13438_v28  ;;  %v12906_v19 = vld [vmem:[#allocation8 + $0x638] sm:$0xf]  ;;  %v13158_v42 = vld [vmem:[#allocation8 + $0x830] sm:$0xf] }
 0x1ea   :  { %v13215_v53 = vor.u32 %v18032_v32, %v13214_v29  ;;  %v12654_v32 = vld [vmem:[#allocation8 + $0x440] sm:$0xf] }
 0x1eb   :  { %3698 = vmatpush.bf16.msra.mxu1 %v12179_v47  ;;  %v17962_v47 = vld [vmem:[#allocation8 + $0x688] sm:$0xf0] }
 0x1ec   :  { %3712 = vmatpush.bf16.msra.mxu2 %v12403_v39  ;;  %3672 = vmatpush.bf16.msrb.mxu3 %v13239_v58  ;;  %v17906_v39 = vld [vmem:[#allocation8 + $0x4c8] sm:$0xf0]  ;;  %v13410_v58 = vld [vmem:[#allocation8 + $0xa28] sm:$0xf]  ;;  %v19665_v23 = vpop.f32.mrf.mxu2 }
 0x1ed   :  { %3686 = vmatpush.bf16.msra.mxu0 %v13463_v1  ;;  %v12711_v0 = vor.u32 %v17906_v39, %v12710_v38  ;;  %v13186_v1 = vld [vmem:[#allocation8 + $0x868] sm:$0xf]  ;;  %v13411_v16 = vor.u32 %v18081_v63, %v13410_v58  ;;  %v12878_v38 = vld [vmem:[#allocation8 + $0x600] sm:$0xf]  ;;  %v17948_v39 = vld [vmem:[#allocation8 + $0x618] sm:$0xf0]  ;;  %v19669_v58 = vpop.f32.mrf.mxu0  ;;  %v19671_v63 = vpop.f32.mrf.mxu3 }
 0x1ef   :  { %3699 = vmatpush.bf16.msra.mxu1 %v12151_v21  ;;  %3673 = vmatmul.bf16.vlgmr.msrb.gmra.mxu3 %v19561_v4  ;;  %v17955_v21 = vld [vmem:[#allocation8 + $0x650] sm:$0xf0] }
 0x1f0   :  { %3721 = vmatpush.bf16.msra.mxu3 %v12767_v3  ;;  %3713 = vmatpush.bf16.msra.mxu2 %v12375_v14  ;;  %v18025_v3 = vld [vmem:[#allocation8 + $0x880] sm:$0xf0]  ;;  %v12682_v14 = vld [vmem:[#allocation8 + $0x478] sm:$0xf]  ;;  %v12907_v29 = vor.u32 %v17955_v21, %v12906_v19  ;;  %v13326_v21 = vld [vmem:[#allocation8 + $0x980] sm:$0xf] }
 0x1f1   :  { %3735 = vmatpush.bf16.msrb.mxu0 %v12991_v13  ;;  %v12935_v13 = vor.u32 %v17962_v47, %v12934_v45  ;;  %v13187_v24 = vor.u32 %v18025_v3, %v13186_v1  ;;  %v12683_v28 = vor.u32 %v17899_v15, %v12682_v14  ;;  %v18067_v45 = vld [vmem:[#allocation8 + $0x9d0] sm:$0xf0]  ;;  %v13130_v47 = vld [vmem:[#allocation8 + $0x7f8] sm:$0xf]  ;;  %v17885_v1 = vld [vmem:[#allocation8 + $0x420] sm:$0xf0] }
 0x1f2   :  { %3687 = vmatmul.bf16.vlgmr.msra.gmra.mxu0 %v19567_v30  ;;  %v17941_v14 = vld [vmem:[#allocation8 + $0x5e0] sm:$0xf0] }
 0x1f3   :  { %3700 = vmatpush.bf16.msra.mxu1 %v12123_v41  ;;  %v18137_v30 = vld [vmem:[#allocation8 + $0xc00] sm:$0xf0] }
 0x1f4   :  { %3722 = vmatpush.bf16.msra.mxu3 %v12739_v22  ;;  %3714 = vmatpush.bf16.msra.mxu2 %v12347_v36  ;;  %v18018_v22 = vld [vmem:[#allocation8 + $0x848] sm:$0xf0]  ;;  %v13383_v36 = vor.u32 %v18074_v26, %v13382_v25  ;;  %v19673_v15 = vpop.f32.mrf.mxu2  ;;  %v13102_v26 = vld [vmem:[#allocation8 + $0x7c0] sm:$0xf] }
 0x1f5   :  { %3736 = vmatpush.bf16.msrb.mxu0 %v12963_v33  ;;  %v17892_v33 = vld [vmem:[#allocation8 + $0x458] sm:$0xf0]  ;;  %v13159_v41 = vor.u32 %v18018_v22, %v13158_v42  ;;  %v12598_v22 = vld [vmem:[#allocation8 + $0x3d0] sm:$0xf] }
 0x1f6   :  { %3701 = vmatmul.bf16.vlgmr.msra.gmra.mxu1 %v19541_v9  ;;  %v12879_v9 = vor.u32 %v17948_v39, %v12878_v38  ;;  %v13298_v39 = vld [vmem:[#allocation8 + $0x948] sm:$0xf] }
 0x1f7   :  { %3749 = vmatpush.bf16.msrb.mxu1 %v13215_v53  ;;  %3715 = vmatmul.bf16.vlgmr.msra.gmra.mxu2 %v19543_v10  ;;  %v12655_v10 = vor.u32 %v17892_v33, %v12654_v32  ;;  %v18011_v53 = vld [vmem:[#allocation8 + $0x810] sm:$0xf0]  ;;  %v12822_v33 = vld [vmem:[#allocation8 + $0x590] sm:$0xf] }
 0x1f8   :  { %3763 = vmatpush.bf16.msrb.mxu2 %v13439_v43  ;;  %3723 = vmatpush.bf16.msra.mxu3 %v12711_v0  ;;  %v13354_v43 = vld [vmem:[#allocation8 + $0x9b8] sm:$0xf]  ;;  %v12626_v0 = vld [vmem:[#allocation8 + $0x408] sm:$0xf]  ;;  %v13131_v19 = vor.u32 %v18011_v53, %v13130_v47  ;;  %v17997_v47 = vld [vmem:[#allocation8 + $0x7a0] sm:$0xf0]  ;;  %v19677_v53 = vpop.f32.mrf.mxu0 }
 0x1f9   :  { %3737 = vmatpush.bf16.msrb.mxu0 %v12935_v13  ;;  %v13355_v3 = vor.u32 %v18067_v45, %v13354_v43  ;;  %v12850_v13 = vld [vmem:[#allocation8 + $0x5c8] sm:$0xf]  ;;  %v12627_v25 = vor.u32 %v17885_v1, %v12626_v0  ;;  %v18053_v43 = vld [vmem:[#allocation8 + $0x960] sm:$0xf0]  ;;  %20344 = vst [vmem:[#allocation22_spill] sm:$0xff] %v19677_v53  ;;  %v19679_v0 = vpop.f32.mrf.mxu3 }
 0x1fa   :  { %v12851_v42 = vor.u32 %v17941_v14, %v12850_v13  ;;  %v13074_v45 = vld [vmem:[#allocation8 + $0x788] sm:$0xf]  ;;  %v17871_v1 = vld [vmem:[#allocation8 + $0x3b0] sm:$0xf0]  ;;  %v13299_v14 = vor.u32 %v18053_v43, %v13298_v39 }
 0x1fb   :  { %3750 = vmatpush.bf16.msrb.mxu1 %v13187_v24  ;;  %v18060_v24 = vld [vmem:[#allocation8 + $0x998] sm:$0xf0]  ;;  %v17927_v13 = vld [vmem:[#allocation8 + $0x570] sm:$0xf0]  ;;  %v13634_v39 = vld [vmem:[#allocation8 + $0xbe8] sm:$0xf] }
 0x1fc   :  { %3764 = vmatpush.bf16.msrb.mxu2 %v13411_v16  ;;  %3724 = vmatpush.bf16.msra.mxu3 %v12683_v28  ;;  %v19675_v16 = vpop.f32.mrf.mxu1  ;;  %v18004_v28 = vld [vmem:[#allocation8 + $0x7d8] sm:$0xf0]  ;;  %v13327_v32 = vor.u32 %v18060_v24, %v13326_v21  ;;  %v14170_v24 = vld [vmem:[#allocation11 + $0x3f0] sm:$0xf] }
 0x1fd   :  { %3738 = vmatpush.bf16.msrb.mxu0 %v12907_v29  ;;  %v17878_v29 = vld [vmem:[#allocation8 + $0x3e8] sm:$0xf0]  ;;  %v13103_v38 = vor.u32 %v18004_v28, %v13102_v26  ;;  %v18144_v21 = vld [vmem:[#allocation8 + $0xc38] sm:$0xf0]  ;;  %v18280_v28 = vld [vmem:[#allocation11 + $0x434] sm:$0xf0] }
 0x1fe   :  { %v14171_v43 = vor.u32 %v18280_v28, %v14170_v24  ;;  %v18130_v28 = vld [vmem:[#allocation8 + $0xbc8] sm:$0xf0] }
 0x1ff   :  { %3751 = vmatpush.bf16.msrb.mxu1 %v13159_v41  ;;  %v12599_v41 = vor.u32 %v17878_v29, %v12598_v22  ;;  %v13270_v22 = vld [vmem:[#allocation8 + $0x910] sm:$0xf]  ;;  %v18046_v29 = vld [vmem:[#allocation8 + $0x928] sm:$0xf0] }
 0x200   :  { %3765 = vmatpush.bf16.msrb.mxu2 %v13383_v36  ;;  %3725 = vmatpush.bf16.msra.mxu3 %v12655_v10  ;;  %v17934_v36 = vld [vmem:[#allocation8 + $0x5a8] sm:$0xf0]  ;;  %v12570_v10 = vld [vmem:[#allocation8 + $0x398] sm:$0xf]  ;;  %v13271_v53 = vor.u32 %v18046_v29, %v13270_v22  ;;  %v19688_v22 = vpop.f32.mrf.mxu0 }
 0x201   :  { %3739 = vmatpush.bf16.msrb.mxu0 %v12879_v9  ;;  %v12823_v9 = vor.u32 %v17934_v36, %v12822_v33  ;;  %v12571_v2 = vor.u32 %v17871_v1, %v12570_v10  ;;  %v19683_v33 = vpop.f32.mrf.mxu2  ;;  %v20346_v10 = vperm.slane %v19584_v52, 0  ;;  %v19690_v29 = vpop.f32.mrf.mxu3 }
 0x203   :  { %3752 = vmatpush.bf16.msrb.mxu1 %v13131_v19  ;;  %v13662_v19 = vld [vmem:[#allocation8 + $0xc20] sm:$0xf]  ;;  %v3117_v1 = vadd.f32 %v19597_v40, %v20346_v10  ;;  %v18226_v10 = vld [vmem:[#allocation11 + $0x284] sm:$0xf0] }
 0x204   :  { %3766 = vmatpush.bf16.msrb.mxu2 %v13355_v3  ;;  %3726 = vmatpush.bf16.msra.mxu3 %v12627_v25  ;;  %v12794_v3 = vld [vmem:[#allocation8 + $0x558] sm:$0xf]  ;;  %v19681_v26 = vpop.f32.mrf.mxu1  ;;  %v13075_v25 = vor.u32 %v17997_v47, %v13074_v45 }
 0x205   :  { %3740 = vmatpush.bf16.msrb.mxu0 %v12851_v42  ;;  %20345 = vst [vmem:[#allocation23_spill] sm:$0xff] %v19681_v26  ;;  %v17990_v42 = vld [vmem:[#allocation8 + $0x768] sm:$0xf0]  ;;  %v12795_v36 = vor.u32 %v17927_v13, %v12794_v3  ;;  %v14098_v26 = vld [vmem:[#allocation11 + $0x360] sm:$0xf] }
 0x206   :  { %v13047_v45 = vor.u32 %v17990_v42, %v13046_v60  ;;  %v13018_v47 = vld [vmem:[#allocation8 + $0x718] sm:$0xf]  ;;  %v18568_v13 = vld [vmem:[#allocation11 + $0xd34] sm:$0xf0] }
 0x207   :  { %3753 = vmatpush.bf16.msrb.mxu1 %v13103_v38  ;;  %v18262_v38 = vld [vmem:[#allocation11 + $0x3a4] sm:$0xf0]  ;;  %v15322_v3 = vld [vmem:[#allocation11 + $0xcf0] sm:$0xf] }
 0x208   :  { %3767 = vmatpush.bf16.msrb.mxu2 %v13327_v32  ;;  %3727 = vmatpush.bf16.msra.mxu3 %v12599_v41  ;;  %v13663_v32 = vor.u32 %v18144_v21, %v13662_v19  ;;  %v18039_v41 = vld [vmem:[#allocation8 + $0x8f0] sm:$0xf0]  ;;  %v14746_v19 = vld [vmem:[#allocation11 + $0x870] sm:$0xf]  ;;  %v18424_v21 = vld [vmem:[#allocation11 + $0x8b4] sm:$0xf0]  ;;  %v14099_v24 = vor.u32 %v18262_v38, %v14098_v26 }
 0x209   :  { %3741 = vmatpush.bf16.msrb.mxu0 %v12823_v9  ;;  %v17983_v9 = vld [vmem:[#allocation8 + $0x730] sm:$0xf0]  ;;  %v13243_v60 = vor.u32 %v18039_v41, %v13242_v56  ;;  %v14026_v42 = vld [vmem:[#allocation11 + $0x2d0] sm:$0xf]  ;;  %v15250_v26 = vld [vmem:[#allocation11 + $0xc60] sm:$0xf] }
 0x20a   :  { %v13019_v40 = vor.u32 %v17983_v9, %v13018_v47  ;;  %v18550_v56 = vld [vmem:[#allocation11 + $0xca4] sm:$0xf0]  ;;  %v14674_v38 = vld [vmem:[#allocation11 + $0x7e0] sm:$0xf]  ;;  %v13578_v47 = vld [vmem:[#allocation8 + $0xb78] sm:$0xf] }
 0x20b   :  { %3754 = vmatpush.bf16.msrb.mxu1 %v13075_v25  ;;  %v13606_v25 = vld [vmem:[#allocation8 + $0xbb0] sm:$0xf]  ;;  %v18123_v41 = vld [vmem:[#allocation8 + $0xb90] sm:$0xf0]  ;;  %v19700_v9 = vld [vmem:[#allocation10] sm:$0xff] }
 0x20c   :  { %3768 = vmatpush.bf16.msrb.mxu2 %v13299_v14  ;;  %3728 = vmatpush.bf16.msra.mxu3 %v12571_v2  ;;  %v13635_v14 = vor.u32 %v18137_v30, %v13634_v39  ;;  %v15323_v2 = vor.u32 %v18568_v13, %v15322_v3  ;;  %v3131_v30 = vadd.f32 %v19595_v31, %v3117_v1  ;;  %v19697_v39 = vpop.f32.mrf.mxu1  ;;  %v1077_v3 = vperm.slane %v19700_v9, 2 }
 0x20d   :  { %3742 = vmatpush.bf16.msrb.mxu0 %v12795_v36  ;;  %v18244_v36 = vld [vmem:[#allocation11 + $0x314] sm:$0xf0]  ;;  %v15251_v31 = vor.u32 %v18550_v56, %v15250_v26 }
 0x20e   :  { %v3145_v1 = vadd.f32 %v19599_v46, %v3131_v30  ;;  %v3313_v46 = vadd.f32 %v19655_v12, %v1077_v3  ;;  %v19710_v30 = vpop.f32.mrf.mxu0  ;;  %v3311_v12 = vadd.f32 %v19645_v6, %v1077_v3 }
 0x20f   :  { %3755 = vmatpush.bf16.msrb.mxu1 %v13047_v45  ;;  %3729 = vmatmul.bf16.vlgmr.msra.gmra.mxu3 %v19547_v34  ;;  %v18406_v45 = vld [vmem:[#allocation11 + $0x824] sm:$0xf0]  ;;  %v14027_v34 = vor.u32 %v18244_v36, %v14026_v42  ;;  %v18116_v42 = vld [vmem:[#allocation8 + $0xb58] sm:$0xf0] }
 0x210   :  { %3777 = vmatpush.bf16.msrb.mxu3 %v13663_v32  ;;  %3769 = vmatpush.bf16.msrb.mxu2 %v13271_v53  ;;  %v14747_v53 = vor.u32 %v18424_v21, %v14746_v19  ;;  %v19695_v32 = vpop.f32.mrf.mxu2  ;;  %v14675_v13 = vor.u32 %v18406_v45, %v14674_v38  ;;  %v18532_v19 = vld [vmem:[#allocation11 + $0xc14] sm:$0xf0]  ;;  %v20347_v21 = vperm.slane %v19584_v52, 1  ;;  %v19712_v52 = vpop.f32.mrf.mxu3  ;;  %v3159_v26 = vadd.f32 %v19604_v20, %v3145_v1  ;;  %v18514_v38 = vld [vmem:[#allocation11 + $0xb84] sm:$0xf0] }
 0x211   :  { %9902 = vmatpush.bf16.msra.mxu0 %v14171_v43  ;;  %v13607_v43 = vor.u32 %v18130_v28, %v13606_v25  ;;  %v14602_v25 = vld [vmem:[#allocation11 + $0x750] sm:$0xf]  ;;  %v18388_v28 = vld [vmem:[#allocation11 + $0x794] sm:$0xf0] }
 0x212   :  { %3743 = vmatmul.bf16.vlgmr.msrb.gmra.mxu0 %v19549_v35  ;;  %v13954_v35 = vld [vmem:[#allocation11 + $0x240] sm:$0xf]  ;;  %v14603_v56 = vor.u32 %v18388_v28, %v14602_v25 }
 0x213   :  { %3756 = vmatpush.bf16.msrb.mxu1 %v13019_v40  ;;  %v13955_v40 = vor.u32 %v18226_v10, %v13954_v35  ;;  %v13522_v35 = vld [vmem:[#allocation8 + $0xb08] sm:$0xf] }
 0x214   :  { %3778 = vmatpush.bf16.msrb.mxu3 %v13635_v14  ;;  %3770 = vmatpush.bf16.msrb.mxu2 %v13243_v60  ;;  %v15178_v14 = vld [vmem:[#allocation11 + $0xbd0] sm:$0xf]  ;;  %v13579_v60 = vor.u32 %v18123_v41, %v13578_v47  ;;  %v19717_v45 = vpop.f32.mrf.mxu1  ;;  %v18370_v47 = vld [vmem:[#allocation11 + $0x704] sm:$0xf0]  ;;  %v3173_v41 = vadd.f32 %v19610_v50, %v3159_v26 }
 0x215   :  { %9903 = vmatpush.bf16.msra.mxu0 %v14099_v24  ;;  %v3215_v24 = vadd.f32 %v19627_v37, %v20347_v21  ;;  %v13882_v37 = vld [vmem:[#allocation11 + $0x1b0] sm:$0xf]  ;;  %v18478_v26 = vld [vmem:[#allocation11 + $0xa64] sm:$0xf0] }
 0x216   :  { %3757 = vmatmul.bf16.vlgmr.msrb.gmra.mxu1 %v19559_v62  ;;  %v3327_v62 = vadd.f32 %v19665_v23, %v3313_v46  ;;  %v18109_v23 = vld [vmem:[#allocation8 + $0xb20] sm:$0xf0]  ;;  %v15034_v21 = vld [vmem:[#allocation11 + $0xab0] sm:$0xf]  ;;  %v3187_v25 = vadd.f32 %v19608_v49, %v3173_v41  ;;  %v13494_v46 = vld [vmem:[#allocation8 + $0xad0] sm:$0xf] }
 0x217   :  { %9916 = vmatpush.bf16.msra.mxu1 %v14747_v53  ;;  %3771 = vmatmul.bf16.vlgmr.msrb.gmra.mxu2 %v19561_v4  ;;  %v3229_v36 = vadd.f32 %v19633_v11, %v3215_v24  ;;  %v15179_v4 = vor.u32 %v18532_v19, %v15178_v14  ;;  %v18208_v53 = vld [vmem:[#allocation11 + $0x1f4] sm:$0xf0]  ;;  %v18190_v14 = vld [vmem:[#allocation11 + $0x164] sm:$0xf0]  ;;  %v14458_v24 = vld [vmem:[#allocation11 + $0x630] sm:$0xf] }
 0x218   :  { %9930 = vmatpush.bf16.msra.mxu2 %v15323_v2  ;;  %3779 = vmatpush.bf16.msrb.mxu3 %v13607_v43  ;;  %v13550_v2 = vld [vmem:[#allocation8 + $0xb40] sm:$0xf]  ;;  %v15106_v43 = vld [vmem:[#allocation11 + $0xb40] sm:$0xf]  ;;  %v3341_v20 = vadd.f32 %v19671_v63, %v3327_v62  ;;  %v13883_v6 = vor.u32 %v18208_v53, %v13882_v37  ;;  %v19723_v1 = vpop.f32.mrf.mxu2  ;;  %v13523_v63 = vor.u32 %v18109_v23, %v13522_v35  ;;  %v19732_v49 = vpop.f32.mrf.mxu3  ;;  %v15898_v35 = vld [vmem:[#allocation11 + $0x1170] sm:$0xf] }
 0x219   :  { %9904 = vmatpush.bf16.msra.mxu0 %v14027_v34  ;;  %v13551_v11 = vor.u32 %v18116_v42, %v13550_v2  ;;  %v14530_v34 = vld [vmem:[#allocation11 + $0x6c0] sm:$0xf]  ;;  %v3243_v10 = vadd.f32 %v19631_v8, %v3229_v36  ;;  %v15107_v3 = vor.u32 %v18514_v38, %v15106_v43  ;;  %v13738_v42 = vld [vmem:[#allocation11 + $0x90] sm:$0xf]  ;;  %v18172_v36 = vld [vmem:[#allocation11 + $0xd4] sm:$0xf0] }
 0x21a   :  { %v14531_v50 = vor.u32 %v18370_v47, %v14530_v34  ;;  %v3355_v8 = vadd.f32 %v19669_v58, %v3341_v20  ;;  %v14962_v53 = vld [vmem:[#allocation11 + $0xa20] sm:$0xf]  ;;  %v13466_v43 = vld [vmem:[#allocation8 + $0xa98] sm:$0xf]  ;;  %v18154_v47 = vld [vmem:[#allocation11 + $0x44] sm:$0xf0] }
 0x21b   :  { %9917 = vmatpush.bf16.msra.mxu1 %v14675_v13  ;;  %v13810_v13 = vld [vmem:[#allocation11 + $0x120] sm:$0xf]  ;;  %v3257_v2 = vadd.f32 %v19635_v18, %v3243_v10  ;;  %v3201_v18 = vadd.f32 %v19612_v61, %v3187_v25  ;;  %v18712_v23 = vld [vmem:[#allocation11 + $0x11b4] sm:$0xf0]  ;;  %v16474_v10 = vld [vmem:[#allocation11 + $0x15f0] sm:$0xf] }
 0x21c   :  { %9931 = vmatpush.bf16.msra.mxu2 %v15251_v31  ;;  %3780 = vmatpush.bf16.msrb.mxu3 %v13579_v60  ;;  %v3325_v31 = vadd.f32 %v19653_v7, %v3311_v12  ;;  %v18496_v7 = vld [vmem:[#allocation11 + $0xaf4] sm:$0xf0]  ;;  %v13811_v28 = vor.u32 %v18190_v14, %v13810_v13  ;;  %v19730_v12 = vpop.f32.mrf.mxu0  ;;  %v14386_v62 = vld [vmem:[#allocation11 + $0x5a0] sm:$0xf]  ;;  %v3369_v38 = vadd.f32 %v19675_v16, %v3355_v8  ;;  %v19739_v20 = vpop.f32.mrf.mxu1  ;;  %v14890_v13 = vld [vmem:[#allocation11 + $0x990] sm:$0xf] }
 0x21d   :  { %9905 = vmatpush.bf16.msra.mxu0 %v13955_v40  ;;  %v18352_v60 = vld [vmem:[#allocation11 + $0x674] sm:$0xf0]  ;;  %v18102_v40 = vld [vmem:[#allocation8 + $0xae8] sm:$0xf0]  ;;  %v13666_v34 = vld [vmem:[#allocation11] sm:$0xf]  ;;  %v3271_v41 = vadd.f32 %v19647_v17, %v3257_v2  ;;  %v3269_v17 = vadd.f32 %v19637_v27, %v19619_v59  ;;  %v15899_v25 = vor.u32 %v18712_v23, %v15898_v35 }
 0x21e   :  { %v3339_v19 = vadd.f32 %v19660_v51, %v3325_v31  ;;  %v15035_v51 = vor.u32 %v18496_v7, %v15034_v21  ;;  %v14459_v37 = vor.u32 %v18352_v60, %v14458_v24  ;;  %v13495_v58 = vor.u32 %v18102_v40, %v13494_v46  ;;  %v18460_v14 = vld [vmem:[#allocation11 + $0x9d4] sm:$0xf0]  ;;  %v14314_v7 = vld [vmem:[#allocation11 + $0x510] sm:$0xf]  ;;  %v15826_v46 = vld [vmem:[#allocation11 + $0x10e0] sm:$0xf] }
 0x21f   :  { %9918 = vmatpush.bf16.msra.mxu1 %v14603_v56  ;;  %v18334_v56 = vld [vmem:[#allocation11 + $0x5e4] sm:$0xf0]  ;;  %v3798_v24 = vmax.f32 %v3201_v18, 0.0  ;;  %v3383_v60 = vadd.f32 %v19683_v33, %v3369_v38  ;;  %v3283_v8 = vadd.f32 %v19643_v57, %v3269_v17  ;;  %v16402_v59 = vld [vmem:[#allocation11 + $0x1560] sm:$0xf]  ;;  %v1078_v18 = vperm.slane %v19700_v9, 3 }
 0x220   :  { %9932 = vmatpush.bf16.msra.mxu2 %v15179_v4  ;;  %3781 = vmatpush.bf16.msrb.mxu3 %v13551_v11  ;;  %v3353_v4 = vadd.f32 %v19658_v48, %v3339_v19  ;;  %v13739_v11 = vor.u32 %v18172_v36, %v13738_v42  ;;  %v18095_v48 = vld [vmem:[#allocation8 + $0xab0] sm:$0xf0]  ;;  %v19737_v31 = vpop.f32.mrf.mxu2  ;;  %v14387_v16 = vor.u32 %v18334_v56, %v14386_v62  ;;  %v3791_v19 = vmax.f32 %v19606_v44, 0.0  ;;  %v18694_v40 = vld [vmem:[#allocation11 + $0x1124] sm:$0xf0]  ;;  %v3506_v57 = vpop.f32.mrf.mxu3 }
 0x221   :  { %9906 = vmatpush.bf16.msra.mxu0 %v13883_v6  ;;  %v14963_v6 = vor.u32 %v18478_v26, %v14962_v53  ;;  %v13467_v21 = vor.u32 %v18095_v48, %v13466_v43  ;;  %v14891_v44 = vor.u32 %v18460_v14, %v14890_v13  ;;  %v14818_v42 = vld [vmem:[#allocation11 + $0x900] sm:$0xf]  ;;  %v18442_v33 = vld [vmem:[#allocation11 + $0x944] sm:$0xf0]  ;;  %v19000_v62 = vld [vmem:[#allocation11 + $0x1ab4] sm:$0xf0] }
 0x222   :  { %v3367_v61 = vadd.f32 %v19663_v5, %v3353_v4  ;;  %v13667_v5 = vor.u32 %v18154_v47, %v13666_v34  ;;  %v18298_v53 = vld [vmem:[#allocation11 + $0x4c4] sm:$0xf0]  ;;  %v19753_v26 = vpack.c.bf16 %v3798_v24, %v3791_v19  ;;  %v15754_v48 = vld [vmem:[#allocation11 + $0x1050] sm:$0xf]  ;;  %v18676_v34 = vld [vmem:[#allocation11 + $0x1094] sm:$0xf0] }
 0x223   :  { %9919 = vmatpush.bf16.msra.mxu1 %v14531_v50  ;;  %v3285_v50 = vadd.f32 %v19651_v55, %v3271_v41  ;;  %v3397_v55 = vadd.f32 %v19690_v29, %v3383_v60  ;;  %v17050_v29 = vld [vmem:[#allocation11 + $0x1a70] sm:$0xf]  ;;  %v20349_v41 = vld [vmem:[#allocation20_spill] sm:$0xff]  ;;  %v18820_v23 = vld [vmem:[#allocation11 + $0x1514] sm:$0xf0]  ;;  %v15755_v14 = vor.u32 %v18676_v34, %v15754_v48 }
 0x224   :  { %9933 = vmatpush.bf16.msra.mxu2 %v15107_v3  ;;  %3782 = vmatpush.bf16.msrb.mxu3 %v13523_v63  ;;  %v18856_v3 = vld [vmem:[#allocation11 + $0x1634] sm:$0xf0]  ;;  %v3381_v27 = vadd.f32 %v19673_v15, %v3367_v61  ;;  %v19751_v4 = vpop.f32.mrf.mxu0  ;;  %v15827_v15 = vor.u32 %v18694_v40, %v15826_v46  ;;  %v20348_v56 = vld [vmem:[#allocation21_spill] sm:$0xff]  ;;  %v3411_v61 = vadd.f32 %v19688_v22, %v1078_v18  ;;  %v16978_v19 = vld [vmem:[#allocation11 + $0x19e0] sm:$0xf] }
 0x225   :  { %9907 = vmatpush.bf16.msra.mxu0 %v13811_v28  ;;  %v18316_v63 = vld [vmem:[#allocation11 + $0x554] sm:$0xf0]  ;;  %v16475_v28 = vor.u32 %v18856_v3, %v16474_v10  ;;  %v3299_v36 = vadd.f32 %v19649_v54, %v3285_v50  ;;  %v3297_v43 = vadd.f32 %v20348_v56, %v3283_v8  ;;  %v19758_v54 = vpop.f32.mrf.mxu1  ;;  %v3800_v47 = vmax.f32 %v3397_v55, 0.0  ;;  %v16330_v35 = vld [vmem:[#allocation11 + $0x14d0] sm:$0xf] }
 0x226   :  { %v14315_v2 = vor.u32 %v18316_v63, %v14314_v7  ;;  %v17051_v3 = vor.u32 %v19000_v62, %v17050_v29  ;;  %v18982_v17 = vld [vmem:[#allocation11 + $0x1a24] sm:$0xf0]  ;;  %v3425_v63 = vadd.f32 %v19697_v39, %v3411_v61  ;;  %v16331_v24 = vor.u32 %v18820_v23, %v16330_v35  ;;  %v15682_v60 = vld [vmem:[#allocation11 + $0xfc0] sm:$0xf]  ;;  %v16906_v55 = vld [vmem:[#allocation11 + $0x1950] sm:$0xf] }
 0x227   :  { %9920 = vmatpush.bf16.msra.mxu1 %v14459_v37  ;;  %v14242_v37 = vld [vmem:[#allocation11 + $0x480] sm:$0xf]  ;;  %v3799_v10 = vmax.f32 %v3299_v36, 0.0  ;;  %v3792_v50 = vmax.f32 %v3297_v43, 0.0  ;;  %v18658_v22 = vld [vmem:[#allocation11 + $0x1004] sm:$0xf0] }
 0x228   :  { %9934 = vmatpush.bf16.msra.mxu2 %v15035_v51  ;;  %3783 = vmatpush.bf16.msrb.mxu3 %v13495_v58  ;;  %v18838_v51 = vld [vmem:[#allocation11 + $0x15a4] sm:$0xf0]  ;;  %v3395_v58 = vadd.f32 %v19679_v0, %v3381_v27  ;;  %v1079_v0 = vperm.slane %v19700_v9, 4  ;;  %v16258_v8 = vld [vmem:[#allocation11 + $0x1440] sm:$0xf]  ;;  %v16979_v27 = vor.u32 %v18982_v17, %v16978_v19  ;;  %v15683_v39 = vor.u32 %v18658_v22, %v15682_v60  ;;  %v3508_v36 = vpop.f32.mrf.mxu3 }
 0x229   :  { %9908 = vmatpush.bf16.msra.mxu0 %v13739_v11  ;;  %v16403_v38 = vor.u32 %v18838_v51, %v16402_v59  ;;  %v14819_v11 = vor.u32 %v18442_v33, %v14818_v42  ;;  %v20351_v46 = vld [vmem:[#allocation23_spill] sm:$0xff]  ;;  %v3439_v59 = vadd.f32 %v19723_v1, %v3425_v63  ;;  %v15466_v19 = vld [vmem:[#allocation11 + $0xe10] sm:$0xf] }
 0x22a   :  { %v3793_v13 = vmax.f32 %v3395_v58, 0.0  ;;  %v18640_v1 = vld [vmem:[#allocation11 + $0xf74] sm:$0xf0]  ;;  %v16186_v58 = vld [vmem:[#allocation11 + $0x13b0] sm:$0xf]  ;;  %v3509_v43 = vadd.f32 %v3508_v36, %v1079_v0 }
 0x22b   :  { %9921 = vmatpush.bf16.msra.mxu1 %v14387_v16  ;;  %v19763_v16 = vpop.f32.mrf.mxu2  ;;  %v3453_v42 = vadd.f32 %v19732_v49, %v3439_v59  ;;  %v15538_v34 = vld [vmem:[#allocation11 + $0xea0] sm:$0xf]  ;;  %v18928_v61 = vld [vmem:[#allocation11 + $0x1874] sm:$0xf0]  ;;  %v18586_v59 = vld [vmem:[#allocation11 + $0xdc4] sm:$0xf0] }
 0x22c   :  { %9935 = vmatpush.bf16.msra.mxu2 %v14963_v6  ;;  %3784 = vmatpush.bf16.msrb.mxu3 %v13467_v21  ;;  %v14243_v6 = vor.u32 %v18298_v53, %v14242_v37  ;;  %v20350_v21 = vld [vmem:[#allocation22_spill] sm:$0xff]  ;;  %v3522_v33 = vpop.f32.mrf.mxu0 }
 0x22d   :  { %9909 = vmatpush.bf16.msra.mxu0 %v13667_v5  ;;  %v3409_v7 = vadd.f32 %v20350_v21, %v1078_v18  ;;  %v19768_v5 = vpack.c.bf16 %v3800_v47, %v3793_v13  ;;  %v15610_v37 = vld [vmem:[#allocation11 + $0xf30] sm:$0xf]  ;;  %v3536_v56 = vpop.f32.mrf.mxu1  ;;  %v16834_v18 = vld [vmem:[#allocation11 + $0x18c0] sm:$0xf]  ;;  %v18622_v47 = vld [vmem:[#allocation11 + $0xee4] sm:$0xf0]  ;;  %v3523_v23 = vadd.f32 %v3522_v33, %v3509_v43 }
 0x22e   :  { %v15611_v49 = vor.u32 %v18640_v1, %v15610_v37  ;;  %v18604_v17 = vld [vmem:[#allocation11 + $0xe54] sm:$0xf0]  ;;  %v14100_v43 = vld [vmem:[#allocation11 + $0x3a8] sm:$0xf0] }
 0x22f   :  { %9922 = vmatpush.bf16.msra.mxu1 %v14315_v2  ;;  %3785 = vmatmul.bf16.vlgmr.msrb.gmra.mxu3 %v20349_v41  ;;  %v3423_v40 = vadd.f32 %v20351_v46, %v3409_v7  ;;  %v18964_v2 = vld [vmem:[#allocation11 + $0x1994] sm:$0xf0]  ;;  %v16114_v41 = vld [vmem:[#allocation11 + $0x1320] sm:$0xf]  ;;  %v15467_v22 = vor.u32 %v18604_v17, %v15466_v19 }
 0x230   :  { %9944 = vmatpush.bf16.msra.mxu3 %v15899_v25  ;;  %9936 = vmatpush.bf16.msra.mxu2 %v14891_v44  ;;  %v3507_v25 = vadd.f32 %v3506_v57, %v1079_v0  ;;  %v19770_v44 = vpack.c.bf16 %v3799_v10, %v3792_v50  ;;  %v15539_v0 = vor.u32 %v18622_v47, %v15538_v34  ;;  %v16762_v10 = vld [vmem:[#allocation11 + $0x1830] sm:$0xf]  ;;  %v18748_v21 = vld [vmem:[#allocation11 + $0x12d4] sm:$0xf0]  ;;  %v16546_v47 = vld [vmem:[#allocation11 + $0x1680] sm:$0xf] }
 0x231   :  { %9958 = vmatpush.bf16.msrb.mxu0 %v16475_v28  ;;  %v18802_v28 = vld [vmem:[#allocation11 + $0x1484] sm:$0xf0]  ;;  %v3437_v51 = vadd.f32 %v19695_v32, %v3423_v40  ;;  %v16907_v32 = vor.u32 %v18964_v2, %v16906_v55  ;;  %v16042_v50 = vld [vmem:[#allocation11 + $0x1290] sm:$0xf]  ;;  %v16763_v63 = vor.u32 %v18928_v61, %v16762_v10  ;;  %v15394_v40 = vld [vmem:[#allocation11 + $0xd80] sm:$0xf] }
 0x232   :  { %9910 = vmatmul.bf16.vlgmr.msra.gmra.mxu0 %v19753_v26  ;;  %v16259_v57 = vor.u32 %v18802_v28, %v16258_v8  ;;  %v3521_v53 = vadd.f32 %v19751_v4, %v3507_v25  ;;  %v3562_v13 = vpop.f32.mrf.mxu3  ;;  %v16690_v25 = vld [vmem:[#allocation11 + $0x17a0] sm:$0xf]  ;;  %v16043_v46 = vor.u32 %v18748_v21, %v16042_v50  ;;  %v18271_v55 = vld [vmem:[#allocation11 + $0x3f4] sm:$0xf]  ;;  %v15395_v37 = vor.u32 %v18586_v59, %v15394_v40  ;;  %v14028_v10 = vld [vmem:[#allocation11 + $0x318] sm:$0xf0] }
 0x233   :  { %9923 = vmatpush.bf16.msra.mxu1 %v14243_v6  ;;  %v3451_v29 = vadd.f32 %v19712_v52, %v3437_v51  ;;  %v3548_v62 = vpop.f32.mrf.mxu2  ;;  %v18766_v6 = vld [vmem:[#allocation11 + $0x1364] sm:$0xf0]  ;;  %v18415_v51 = vld [vmem:[#allocation11 + $0x874] sm:$0xf]  ;;  %v18541_v21 = vld [vmem:[#allocation11 + $0xc64] sm:$0xf] }
 0x234   :  { %9945 = vmatpush.bf16.msra.mxu3 %v15827_v15  ;;  %9937 = vmatpush.bf16.msra.mxu2 %v14819_v11  ;;  %v18784_v15 = vld [vmem:[#allocation11 + $0x13f4] sm:$0xf0]  ;;  %v3467_v11 = vadd.f32 %v19730_v12, %v3453_v42  ;;  %v3535_v4 = vadd.f32 %v19758_v54, %v3521_v53  ;;  %v3576_v12 = vpop.f32.mrf.mxu0  ;;  %v14748_v42 = vld [vmem:[#allocation11 + $0x8b8] sm:$0xf0]  ;;  %v18559_v61 = vld [vmem:[#allocation11 + $0xcf4] sm:$0xf] }
 0x235   :  { %9959 = vmatpush.bf16.msrb.mxu0 %v16403_v38  ;;  %v18946_v38 = vld [vmem:[#allocation11 + $0x1904] sm:$0xf0]  ;;  %v16187_v48 = vor.u32 %v18784_v15, %v16186_v58  ;;  %v3465_v52 = vadd.f32 %v19710_v30, %v3451_v29  ;;  %v3590_v7 = vpop.f32.mrf.mxu1  ;;  %v18892_v29 = vld [vmem:[#allocation11 + $0x1754] sm:$0xf0]  ;;  %v18199_v59 = vld [vmem:[#allocation11 + $0x1b4] sm:$0xf] }
 0x236   :  { %9924 = vmatmul.bf16.vlgmr.msra.gmra.mxu1 %v19770_v44  ;;  %v16835_v35 = vor.u32 %v18946_v38, %v16834_v18  ;;  %v3549_v54 = vadd.f32 %v3548_v62, %v3535_v4  ;;  %v18397_v18 = vld [vmem:[#allocation11 + $0x7e4] sm:$0xf]  ;;  %v14676_v38 = vld [vmem:[#allocation11 + $0x828] sm:$0xf0]  ;;  %v18874_v4 = vld [vmem:[#allocation11 + $0x16c4] sm:$0xf0] }
 0x237   :  { %9972 = vmatpush.bf16.msrb.mxu1 %v17051_v3  ;;  %9938 = vmatmul.bf16.vlgmr.msra.gmra.mxu2 %v19768_v5  ;;  %v3481_v3 = vadd.f32 %v19739_v20, %v3467_v11  ;;  %v3479_v30 = vadd.f32 %v19717_v45, %v3465_v52  ;;  %v18910_v20 = vld [vmem:[#allocation11 + $0x17e4] sm:$0xf0]  ;;  %v14172_v45 = vld [vmem:[#allocation11 + $0x438] sm:$0xf0] }
 0x238   :  { %9946 = vmatpush.bf16.msra.mxu3 %v15755_v14  ;;  %v16115_v14 = vor.u32 %v18766_v6, %v16114_v41  ;;  %v3563_v60 = vadd.f32 %v3562_v13, %v3549_v54  ;;  %v16691_v33 = vor.u32 %v18910_v20, %v16690_v25  ;;  %v14175_v15 = vor.u32 %v18271_v55, %v14172_v45  ;;  %v14604_v13 = vld [vmem:[#allocation11 + $0x798] sm:$0xf0]  ;;  %v14532_v25 = vld [vmem:[#allocation11 + $0x708] sm:$0xf0] }
 0x239   :  { %9960 = vmatpush.bf16.msrb.mxu0 %v16331_v24  ;;  %v3537_v24 = vadd.f32 %v3536_v56, %v3523_v23  ;;  %v3495_v8 = vadd.f32 %v19763_v16, %v3481_v3  ;;  %v3493_v2 = vadd.f32 %v19737_v31, %v3479_v30  ;;  %v16618_v16 = vld [vmem:[#allocation11 + $0x1710] sm:$0xf]  ;;  %v14751_v56 = vor.u32 %v18415_v51, %v14748_v42  ;;  %v15324_v3 = vld [vmem:[#allocation11 + $0xd38] sm:$0xf0]  ;;  %v15252_v30 = vld [vmem:[#allocation11 + $0xca8] sm:$0xf0] }
 0x23a   :  { %v3564_v53 = vpop.f32.mrf.mxu3  ;;  %v16619_v11 = vor.u32 %v18892_v29, %v16618_v16  ;;  %v15327_v54 = vor.u32 %v18559_v61, %v15324_v3  ;;  %v15255_v20 = vor.u32 %v18541_v21, %v15252_v30  ;;  %v14460_v55 = vld [vmem:[#allocation11 + $0x678] sm:$0xf0]  ;;  %v18505_v51 = vld [vmem:[#allocation11 + $0xb44] sm:$0xf]  ;;  %v15108_v42 = vld [vmem:[#allocation11 + $0xb88] sm:$0xf0] }
 0x23b   :  { %9973 = vmatpush.bf16.msrb.mxu1 %v16979_v27  ;;  %v3550_v28 = vpop.f32.mrf.mxu2  ;;  %v15970_v27 = vld [vmem:[#allocation11 + $0x1200] sm:$0xf]  ;;  %v3801_v1 = vmax.f32 %v3495_v8, 0.0  ;;  %v3794_v31 = vmax.f32 %v3493_v2, 0.0  ;;  %v14388_v16 = vld [vmem:[#allocation11 + $0x5e8] sm:$0xf0] }
 0x23c   :  { %9947 = vmatpush.bf16.msra.mxu3 %v15683_v39  ;;  %v18730_v39 = vld [vmem:[#allocation11 + $0x1244] sm:$0xf0]  ;;  %v3551_v36 = vadd.f32 %v3550_v28, %v3537_v24  ;;  %v18217_v24 = vld [vmem:[#allocation11 + $0x244] sm:$0xf]  ;;  %v18523_v28 = vld [vmem:[#allocation11 + $0xbd4] sm:$0xf] }
 0x23d   :  { %9961 = vmatpush.bf16.msrb.mxu0 %v16259_v57  ;;  %v3577_v57 = vadd.f32 %v3576_v12, %v3563_v60  ;;  %v15971_v58 = vor.u32 %v18730_v39, %v15970_v27  ;;  %v19787_v41 = vpack.c.bf16 %v3801_v1, %v3794_v31  ;;  %v3592_v6 = vpop.f32.mrf.mxu1  ;;  %v18379_v12 = vld [vmem:[#allocation11 + $0x754] sm:$0xf]  ;;  %v13956_v60 = vld [vmem:[#allocation11 + $0x288] sm:$0xf0]  ;;  %v13884_v27 = vld [vmem:[#allocation11 + $0x1f8] sm:$0xf0]  ;;  %v15111_v1 = vor.u32 %v18505_v51, %v15108_v42 }
 0x23e   :  { %v3565_v62 = vadd.f32 %v3564_v53, %v3551_v36  ;;  %v13959_v8 = vor.u32 %v18217_v24, %v13956_v60  ;;  %v18343_v39 = vld [vmem:[#allocation11 + $0x634] sm:$0xf]  ;;  %v13887_v2 = vor.u32 %v18199_v59, %v13884_v27  ;;  %v18181_v36 = vld [vmem:[#allocation11 + $0x124] sm:$0xf]  ;;  %v16980_v21 = vld [vmem:[#allocation11 + $0x1a28] sm:$0xf0] }
 0x23f   :  { %9974 = vmatpush.bf16.msrb.mxu1 %v16907_v32  ;;  %v18253_v32 = vld [vmem:[#allocation11 + $0x364] sm:$0xf]  ;;  %v18451_v3 = vld [vmem:[#allocation11 + $0x994] sm:$0xf]  ;;  %v19144_v24 = vld [vmem:[#allocation11 + $0x1f34] sm:$0xf0] }
 0x240   :  { %9948 = vmatpush.bf16.msra.mxu3 %v15611_v49  ;;  %v3578_v49 = vpop.f32.mrf.mxu0  ;;  %v14103_v52 = vor.u32 %v18253_v32, %v14100_v43  ;;  %v18307_v32 = vld [vmem:[#allocation11 + $0x514] sm:$0xf]  ;;  %v14316_v43 = vld [vmem:[#allocation11 + $0x558] sm:$0xf0]  ;;  %v19126_v51 = vld [vmem:[#allocation11 + $0x1ea4] sm:$0xf0] }
 0x241   :  { %9962 = vmatpush.bf16.msrb.mxu0 %v16187_v48  ;;  %v3591_v48 = vadd.f32 %v3590_v7, %v3577_v57  ;;  %v3579_v34 = vadd.f32 %v3578_v49, %v3565_v62  ;;  %v13812_v57 = vld [vmem:[#allocation11 + $0x168] sm:$0xf0]  ;;  %v18163_v62 = vld [vmem:[#allocation11 + $0x94] sm:$0xf]  ;;  %v16332_v27 = vld [vmem:[#allocation11 + $0x1518] sm:$0xf0] }
 0x242   :  { %v13815_v53 = vor.u32 %v18181_v36, %v13812_v57  ;;  %v18811_v59 = vld [vmem:[#allocation11 + $0x14d4] sm:$0xf]  ;;  %v18793_v57 = vld [vmem:[#allocation11 + $0x1444] sm:$0xf] }
 0x243   :  { %9975 = vmatpush.bf16.msrb.mxu1 %v16835_v35  ;;  %v18235_v35 = vld [vmem:[#allocation11 + $0x2d4] sm:$0xf]  ;;  %v3593_v23 = vadd.f32 %v3592_v6, %v3579_v34  ;;  %v3795_v19 = vmax.f32 %v3591_v48, 0.0  ;;  %v18145_v48 = vld [vmem:[#allocation11 + $0x4] sm:$0xf] }
 0x244   :  { %9949 = vmatpush.bf16.msra.mxu3 %v15539_v0  ;;  %v14679_v0 = vor.u32 %v18397_v18, %v14676_v38  ;;  %v14031_v50 = vor.u32 %v18235_v35, %v14028_v10  ;;  %v18469_v18 = vld [vmem:[#allocation11 + $0xa24] sm:$0xf]  ;;  %v14964_v38 = vld [vmem:[#allocation11 + $0xa68] sm:$0xf0]  ;;  %v16476_v35 = vld [vmem:[#allocation11 + $0x1638] sm:$0xf0] }
 0x245   :  { %9963 = vmatpush.bf16.msrb.mxu0 %v16115_v14  ;;  %v16547_v14 = vor.u32 %v18874_v4, %v16546_v47  ;;  %v3802_v17 = vmax.f32 %v3593_v23, 0.0  ;;  %v13668_v34 = vld [vmem:[#allocation11 + $0x48] sm:$0xf0]  ;;  %v18289_v47 = vld [vmem:[#allocation11 + $0x484] sm:$0xf]  ;;  %v3604_v4 = vpop.f32.mrf.mxu2  ;;  %v14967_v10 = vor.u32 %v18469_v18, %v14964_v38 }
 0x246   :  { %v14244_v6 = vld [vmem:[#allocation11 + $0x4c8] sm:$0xf0]  ;;  %v18991_v23 = vld [vmem:[#allocation11 + $0x1a74] sm:$0xf]  ;;  %v13671_v61 = vor.u32 %v18145_v48, %v13668_v34  ;;  %v16188_v38 = vld [vmem:[#allocation11 + $0x13f8] sm:$0xf0] }
 0x247   :  { %9976 = vmatpush.bf16.msrb.mxu1 %v16763_v63  ;;  %v19790_v7 = vpack.c.bf16 %v3802_v17, %v3795_v19  ;;  %v14607_v63 = vor.u32 %v18379_v12, %v14604_v13  ;;  %v14892_v12 = vld [vmem:[#allocation11 + $0x9d8] sm:$0xf0]  ;;  %v14247_v13 = vor.u32 %v18289_v47, %v14244_v6  ;;  %v18829_v17 = vld [vmem:[#allocation11 + $0x1564] sm:$0xf]  ;;  %v18775_v18 = vld [vmem:[#allocation11 + $0x13b4] sm:$0xf] }
 0x248   :  { %9950 = vmatpush.bf16.msra.mxu3 %v15467_v22  ;;  %v18361_v22 = vld [vmem:[#allocation11 + $0x6c4] sm:$0xf]  ;;  %v14895_v30 = vor.u32 %v18451_v3, %v14892_v12  ;;  %v16764_v34 = vld [vmem:[#allocation11 + $0x1878] sm:$0xf0]  ;;  %v17410_v47 = vld [vmem:[#allocation11 + $0x1d40] sm:$0xf] }
 0x249   :  { %9964 = vmatpush.bf16.msrb.mxu0 %v16043_v46  ;;  %v15180_v46 = vld [vmem:[#allocation11 + $0xc18] sm:$0xf0]  ;;  %v14535_v40 = vor.u32 %v18361_v22, %v14532_v25  ;;  %v16116_v3 = vld [vmem:[#allocation11 + $0x1368] sm:$0xf0]  ;;  %v18901_v12 = vld [vmem:[#allocation11 + $0x17a4] sm:$0xf] }
 0x24a   :  { %v15183_v45 = vor.u32 %v18523_v28, %v15180_v46  ;;  %v1080_v28 = vperm.slane %v19700_v9, 5 }
 0x24b   :  { %9977 = vmatpush.bf16.msrb.mxu1 %v16691_v33  ;;  %v14463_v33 = vor.u32 %v18343_v39, %v14460_v55  ;;  %v18955_v39 = vld [vmem:[#allocation11 + $0x1954] sm:$0xf]  ;;  %v16908_v55 = vld [vmem:[#allocation11 + $0x1998] sm:$0xf0] }
 0x24c   :  { %9951 = vmatpush.bf16.msra.mxu3 %v15395_v37  ;;  %v18325_v37 = vld [vmem:[#allocation11 + $0x5a4] sm:$0xf]  ;;  %v16911_v36 = vor.u32 %v18955_v39, %v16908_v55 }
 0x24d   :  { %9965 = vmatpush.bf16.msrb.mxu0 %v15971_v58  ;;  %v18487_v58 = vld [vmem:[#allocation11 + $0xab4] sm:$0xf]  ;;  %v14391_v29 = vor.u32 %v18325_v37, %v14388_v16  ;;  %v3606_v42 = vpop.f32.mrf.mxu2  ;;  %v16260_v37 = vld [vmem:[#allocation11 + $0x1488] sm:$0xf0]  ;;  %v18937_v16 = vld [vmem:[#allocation11 + $0x18c4] sm:$0xf] }
 0x24e   :  { %v3607_v48 = vadd.f32 %v3606_v42, %v1080_v28  ;;  %v18721_v55 = vld [vmem:[#allocation11 + $0x1204] sm:$0xf] }
 0x24f   :  { %9952 = vmatmul.bf16.vlgmr.msra.gmra.mxu3 %v19787_v41  ;;  %9978 = vmatpush.bf16.msrb.mxu1 %v16619_v11  ;;  %v14319_v11 = vor.u32 %v18307_v32, %v14316_v43  ;;  %v3632_v60 = vpop.f32.mrf.mxu0  ;;  %v16263_v32 = vor.u32 %v18793_v57, %v16260_v37  ;;  %v18865_v42 = vld [vmem:[#allocation11 + $0x1684] sm:$0xf]  ;;  %v18425_v57 = vld [vmem:[#allocation11 + $0x8bc] sm:$0xf0]  ;;  %v17194_v37 = vld [vmem:[#allocation11 + $0x1b90] sm:$0xf] }
 0x250   :  { %10000 = vmatpush.bf16.msrb.mxu3 %v14175_v15  ;;  %9966 = vmatmul.bf16.vlgmr.msrb.gmra.mxu0 %v19790_v7  ;;  %v15036_v15 = vld [vmem:[#allocation11 + $0xaf8] sm:$0xf0] }
 0x251   :  { %10014 = vmatpush.bf16.msra.mxu0 %v14751_v56  ;;  %v13740_v56 = vld [vmem:[#allocation11 + $0xd8] sm:$0xf0]  ;;  %v15039_v31 = vor.u32 %v18487_v58, %v15036_v15  ;;  %v17482_v58 = vld [vmem:[#allocation11 + $0x1dd0] sm:$0xf]  ;;  %v19108_v15 = vld [vmem:[#allocation11 + $0x1e14] sm:$0xf0] }
 0x252   :  { %v13743_v49 = vor.u32 %v18163_v62, %v13740_v56  ;;  %v3618_v22 = vpop.f32.mrf.mxu3 }
 0x253   :  { %9979 = vmatpush.bf16.msrb.mxu1 %v16547_v14  ;;  %v3646_v56 = vpop.f32.mrf.mxu1 }
 0x254   :  { %10001 = vmatpush.bf16.msrb.mxu3 %v14103_v52  ;;  %v18847_v52 = vld [vmem:[#allocation11 + $0x15f4] sm:$0xf] }
 0x255   :  { %10015 = vmatpush.bf16.msra.mxu0 %v14679_v0  ;;  %v17052_v0 = vld [vmem:[#allocation11 + $0x1ab8] sm:$0xf0]  ;;  %v16479_v14 = vor.u32 %v18847_v52, %v16476_v35 }
 0x256   :  { %v17055_v19 = vor.u32 %v18991_v23, %v17052_v0  ;;  %v16191_v0 = vor.u32 %v18775_v18, %v16188_v38 }
 0x257   :  { %10028 = vmatpush.bf16.msra.mxu1 %v15327_v54  ;;  %v16404_v54 = vld [vmem:[#allocation11 + $0x15a8] sm:$0xf0]  ;;  %v3634_v43 = vpop.f32.mrf.mxu0 }
 0x258   :  { %10002 = vmatpush.bf16.msrb.mxu3 %v14031_v50  ;;  %v18973_v50 = vld [vmem:[#allocation11 + $0x19e4] sm:$0xf]  ;;  %v16407_v46 = vor.u32 %v18829_v17, %v16404_v54 }
 0x259   :  { %10016 = vmatpush.bf16.msra.mxu0 %v14607_v63  ;;  %v17626_v63 = vld [vmem:[#allocation11 + $0x1ef0] sm:$0xf] }
 0x25a   :  { %v17627_v25 = vor.u32 %v19144_v24, %v17626_v63  ;;  %v3660_v6 = vpop.f32.mrf.mxu2 }
 0x25b   :  { %10029 = vmatpush.bf16.msra.mxu1 %v15255_v20  ;;  %v18433_v20 = vld [vmem:[#allocation11 + $0x904] sm:$0xf] }
 0x25c   :  { %10003 = vmatpush.bf16.msrb.mxu3 %v13959_v8  ;;  %v14820_v8 = vld [vmem:[#allocation11 + $0x948] sm:$0xf0]  ;;  %9986 = vmatpush.bf16.msrb.mxu2 %v17627_v25  ;;  %v18883_v25 = vld [vmem:[#allocation11 + $0x1714] sm:$0xf] }
 0x25d   :  { %10017 = vmatpush.bf16.msra.mxu0 %v14535_v40  ;;  %v16983_v40 = vor.u32 %v18973_v50, %v16980_v21 }
 0x25f   :  { %10030 = vmatpush.bf16.msra.mxu1 %v15183_v45  ;;  %v14823_v45 = vor.u32 %v18433_v20, %v14820_v8  ;;  %v16620_v20 = vld [vmem:[#allocation11 + $0x1758] sm:$0xf0]  ;;  %v17266_v8 = vld [vmem:[#allocation11 + $0x1c20] sm:$0xf] }
 0x260   :  { %10004 = vmatpush.bf16.msrb.mxu3 %v13887_v2  ;;  %v17554_v2 = vld [vmem:[#allocation11 + $0x1e60] sm:$0xf] }
 0x261   :  { %10018 = vmatpush.bf16.msra.mxu0 %v14463_v33  ;;  %v17555_v9 = vor.u32 %v19126_v51, %v17554_v2  ;;  %v16335_v33 = vor.u32 %v18811_v59, %v16332_v27  ;;  %v16623_v51 = vor.u32 %v18883_v25, %v16620_v20 }
 0x262   :  { %v3662_v2 = vpop.f32.mrf.mxu2 }
 0x263   :  { %10031 = vmatpush.bf16.msra.mxu1 %v15111_v1  ;;  %9987 = vmatpush.bf16.msrb.mxu2 %v17555_v9  ;;  %v3605_v1 = vadd.f32 %v3604_v4, %v1080_v28  ;;  %v19090_v4 = vld [vmem:[#allocation11 + $0x1d84] sm:$0xf0]  ;;  %v16548_v9 = vld [vmem:[#allocation11 + $0x16c8] sm:$0xf0] }
 0x264   :  { %10005 = vmatpush.bf16.msrb.mxu3 %v13815_v53  ;;  %v16836_v53 = vld [vmem:[#allocation11 + $0x1908] sm:$0xf0]  ;;  %v17411_v52 = vor.u32 %v19090_v4, %v17410_v47  ;;  %v19054_v28 = vld [vmem:[#allocation11 + $0x1c64] sm:$0xf0]  ;;  %v18551_v4 = vld [vmem:[#allocation11 + $0xcac] sm:$0xf0] }
 0x265   :  { %10019 = vmatpush.bf16.msra.mxu0 %v14391_v29  ;;  %v17483_v29 = vor.u32 %v19108_v15, %v17482_v58  ;;  %v3619_v62 = vadd.f32 %v3618_v22, %v3605_v1  ;;  %v16044_v22 = vld [vmem:[#allocation11 + $0x12d8] sm:$0xf0]  ;;  %v15330_v1 = vld [vmem:[#allocation11 + $0xcf8] sm:$0xf] }
 0x267   :  { %10032 = vmatpush.bf16.msra.mxu1 %v15039_v31  ;;  %v3620_v31 = vpop.f32.mrf.mxu3  ;;  %9988 = vmatpush.bf16.msrb.mxu2 %v17483_v29  ;;  %v3633_v35 = vadd.f32 %v3632_v60, %v3619_v62  ;;  %v18739_v60 = vld [vmem:[#allocation11 + $0x1294] sm:$0xf] }
 0x268   :  { %10006 = vmatpush.bf16.msrb.mxu3 %v13743_v49  ;;  %v16839_v49 = vor.u32 %v18937_v16, %v16836_v53  ;;  %v3621_v23 = vadd.f32 %v3620_v31, %v3607_v48  ;;  %v16047_v39 = vor.u32 %v18739_v60, %v16044_v22  ;;  %v19036_v16 = vld [vmem:[#allocation11 + $0x1bd4] sm:$0xf0]  ;;  %v18569_v53 = vld [vmem:[#allocation11 + $0xd3c] sm:$0xf0]  ;;  %v18407_v31 = vld [vmem:[#allocation11 + $0x82c] sm:$0xf0] }
 0x269   :  { %10020 = vmatpush.bf16.msra.mxu0 %v14319_v11  ;;  %v18919_v11 = vld [vmem:[#allocation11 + $0x1834] sm:$0xf]  ;;  %v3647_v54 = vadd.f32 %v3646_v56, %v3633_v35  ;;  %v17195_v58 = vor.u32 %v19036_v16, %v17194_v37  ;;  %v16551_v56 = vor.u32 %v18865_v42, %v16548_v9  ;;  %v15331_v38 = vor.u32 %v18569_v53, %v15330_v1  ;;  %v17122_v48 = vld [vmem:[#allocation11 + $0x1b00] sm:$0xf]  ;;  %v15900_v35 = vld [vmem:[#allocation11 + $0x11b8] sm:$0xf0] }
 0x26a   :  { %v3635_v50 = vadd.f32 %v3634_v43, %v3621_v23  ;;  %v14682_v43 = vld [vmem:[#allocation11 + $0x7e8] sm:$0xf]  ;;  %v19117_v60 = vld [vmem:[#allocation11 + $0x1e64] sm:$0xf]  ;;  %v17556_v22 = vld [vmem:[#allocation11 + $0x1ea8] sm:$0xf0] }
 0x26b   :  { %10033 = vmatpush.bf16.msra.mxu1 %v14967_v10  ;;  %v16767_v10 = vor.u32 %v18919_v11, %v16764_v34  ;;  %9989 = vmatpush.bf16.msrb.mxu2 %v17411_v52  ;;  %v3661_v59 = vadd.f32 %v3660_v6, %v3647_v54  ;;  %v15258_v11 = vld [vmem:[#allocation11 + $0xc68] sm:$0xf]  ;;  %v18703_v52 = vld [vmem:[#allocation11 + $0x1174] sm:$0xf]  ;;  %v15186_v54 = vld [vmem:[#allocation11 + $0xbd8] sm:$0xf] }
 0x26c   :  { %10007 = vmatpush.bf16.msrb.mxu3 %v13671_v61  ;;  %v18757_v61 = vld [vmem:[#allocation11 + $0x1324] sm:$0xf]  ;;  %v19018_v34 = vld [vmem:[#allocation11 + $0x1b44] sm:$0xf0]  ;;  %v18497_v16 = vld [vmem:[#allocation11 + $0xafc] sm:$0xf0] }
 0x26d   :  { %10021 = vmatpush.bf16.msra.mxu0 %v14247_v13  ;;  %v16692_v13 = vld [vmem:[#allocation11 + $0x17e8] sm:$0xf0]  ;;  %v16119_v21 = vor.u32 %v18757_v61, %v16116_v3  ;;  %v17123_v6 = vor.u32 %v19018_v34, %v17122_v48  ;;  %v15903_v61 = vor.u32 %v18703_v52, %v15900_v35  ;;  %v14683_v3 = vor.u32 %v18407_v31, %v14682_v43  ;;  %v18649_v1 = vld [vmem:[#allocation11 + $0xfc4] sm:$0xf]  ;;  %v18335_v43 = vld [vmem:[#allocation11 + $0x5ec] sm:$0xf0] }
 0x26e   :  { %v16695_v24 = vor.u32 %v18901_v12, %v16692_v13  ;;  %v14610_v12 = vld [vmem:[#allocation11 + $0x758] sm:$0xf]  ;;  %v15684_v53 = vld [vmem:[#allocation11 + $0x1008] sm:$0xf0]  ;;  %v14970_v31 = vld [vmem:[#allocation11 + $0xa28] sm:$0xf] }
 0x26f   :  { %10008 = vmatmul.bf16.vlgmr.msrb.gmra.mxu3 %v19753_v26  ;;  %10034 = vmatpush.bf16.msra.mxu1 %v14895_v30  ;;  %v3688_v30 = vpop.f32.mrf.mxu0  ;;  %v19063_v48 = vld [vmem:[#allocation11 + $0x1cb4] sm:$0xf]  ;;  %v17340_v34 = vld [vmem:[#allocation11 + $0x1cf8] sm:$0xf0]  ;;  %v14322_v52 = vld [vmem:[#allocation11 + $0x518] sm:$0xf] }
 0x270   :  { %10056 = vmatpush.bf16.msra.mxu3 %v16479_v14  ;;  %10022 = vmatmul.bf16.vlgmr.msra.gmra.mxu0 %v19770_v44  ;;  %v17338_v14 = vld [vmem:[#allocation11 + $0x1cb0] sm:$0xf]  ;;  %v18317_v35 = vld [vmem:[#allocation11 + $0x55c] sm:$0xf0] }
 0x271   :  { %10070 = vmatpush.bf16.msrb.mxu0 %v17055_v19  ;;  %v19072_v19 = vld [vmem:[#allocation11 + $0x1cf4] sm:$0xf0] }
 0x272   :  { %v17339_v17 = vor.u32 %v19072_v19, %v17338_v14  ;;  %v3674_v63 = vpop.f32.mrf.mxu3  ;;  %v15259_v19 = vor.u32 %v18551_v4, %v15258_v11  ;;  %v15612_v11 = vld [vmem:[#allocation11 + $0xf78] sm:$0xf0] }
 0x273   :  { %10035 = vmatpush.bf16.msra.mxu1 %v14823_v45  ;;  %v15972_v45 = vld [vmem:[#allocation11 + $0x1248] sm:$0xf0] }
 0x274   :  { %10057 = vmatpush.bf16.msra.mxu3 %v16407_v46  ;;  %9990 = vmatpush.bf16.msrb.mxu2 %v17339_v17  ;;  %v3648_v46 = vpop.f32.mrf.mxu1  ;;  %v15975_v29 = vor.u32 %v18721_v55, %v15972_v45  ;;  %v18389_v17 = vld [vmem:[#allocation11 + $0x79c] sm:$0xf0]  ;;  %v15756_v55 = vld [vmem:[#allocation11 + $0x1098] sm:$0xf0]  ;;  %v19099_v45 = vld [vmem:[#allocation11 + $0x1dd4] sm:$0xf] }
 0x275   :  { %10071 = vmatpush.bf16.msrb.mxu0 %v16983_v40  ;;  %v17267_v40 = vor.u32 %v19054_v28, %v17266_v8  ;;  %v3649_v27 = vadd.f32 %v3648_v46, %v3635_v50  ;;  %v14611_v20 = vor.u32 %v18389_v17, %v14610_v12  ;;  %v14538_v28 = vld [vmem:[#allocation11 + $0x6c8] sm:$0xf]  ;;  %v18371_v46 = vld [vmem:[#allocation11 + $0x70c] sm:$0xf0]  ;;  %v19045_v12 = vld [vmem:[#allocation11 + $0x1c24] sm:$0xf]  ;;  %v14323_v17 = vor.u32 %v18317_v35, %v14322_v52 }
 0x276   :  { %v14539_v42 = vor.u32 %v18371_v46, %v14538_v28  ;;  %v18595_v28 = vld [vmem:[#allocation11 + $0xe14] sm:$0xf]  ;;  %v15468_v46 = vld [vmem:[#allocation11 + $0xe58] sm:$0xf0]  ;;  %v18695_v52 = vld [vmem:[#allocation11 + $0x112c] sm:$0xf0] }
 0x277   :  { %v3663_v15 = vadd.f32 %v3662_v2, %v3649_v27  ;;  %v3690_v47 = vpop.f32.mrf.mxu0  ;;  %v18515_v27 = vld [vmem:[#allocation11 + $0xb8c] sm:$0xf0]  ;;  %v17484_v2 = vld [vmem:[#allocation11 + $0x1e18] sm:$0xf0] }
 0x278   :  { %10058 = vmatpush.bf16.msra.mxu3 %v16335_v33  ;;  %v14754_v33 = vld [vmem:[#allocation11 + $0x878] sm:$0xf]  ;;  %9991 = vmatpush.bf16.msrb.mxu2 %v17267_v40  ;;  %v15114_v40 = vld [vmem:[#allocation11 + $0xb48] sm:$0xf]  ;;  %v17487_v37 = vor.u32 %v19099_v45, %v17484_v2 }
 0x279   :  { %10072 = vmatpush.bf16.msrb.mxu0 %v16911_v36  ;;  %v3675_v36 = vadd.f32 %v3674_v63, %v3661_v59  ;;  %v15828_v63 = vld [vmem:[#allocation11 + $0x1128] sm:$0xf0]  ;;  %v17559_v59 = vor.u32 %v19117_v60, %v17556_v22  ;;  %v15115_v9 = vor.u32 %v18515_v27, %v15114_v40  ;;  %v19027_v60 = vld [vmem:[#allocation11 + $0x1b94] sm:$0xf]  ;;  %v17058_v22 = vld [vmem:[#allocation11 + $0x1a78] sm:$0xf] }
 0x27a   :  { %v3676_v62 = vpop.f32.mrf.mxu3  ;;  %v17196_v40 = vld [vmem:[#allocation11 + $0x1bd8] sm:$0xf0]  ;;  %v19145_v27 = vld [vmem:[#allocation11 + $0x1f3c] sm:$0xf0] }
 0x27b   :  { %v3677_v18 = vadd.f32 %v3676_v62, %v3663_v15  ;;  %v17412_v15 = vld [vmem:[#allocation11 + $0x1d88] sm:$0xf0] }
 0x27c   :  { %10059 = vmatpush.bf16.msra.mxu3 %v16263_v32  ;;  %v14755_v32 = vor.u32 %v18425_v57, %v14754_v33  ;;  %9992 = vmatpush.bf16.msrb.mxu2 %v17195_v58  ;;  %v14466_v33 = vld [vmem:[#allocation11 + $0x638] sm:$0xf]  ;;  %v19081_v58 = vld [vmem:[#allocation11 + $0x1d44] sm:$0xf] }
 0x27d   :  { %10073 = vmatpush.bf16.msrb.mxu0 %v16839_v49  ;;  %v3689_v49 = vadd.f32 %v3688_v30, %v3675_v36  ;;  %v3691_v23 = vadd.f32 %v3690_v47, %v3677_v18  ;;  %v18685_v30 = vld [vmem:[#allocation11 + $0x10e4] sm:$0xf]  ;;  %v18353_v36 = vld [vmem:[#allocation11 + $0x67c] sm:$0xf0]  ;;  %v15042_v57 = vld [vmem:[#allocation11 + $0xab8] sm:$0xf] }
 0x27e   :  { %v15831_v25 = vor.u32 %v18685_v30, %v15828_v63  ;;  %v14467_v62 = vor.u32 %v18353_v36, %v14466_v33  ;;  %v18479_v18 = vld [vmem:[#allocation11 + $0xa6c] sm:$0xf0] }
 0x27f   :  { %v3796_v13 = vmax.f32 %v3689_v49, 0.0  ;;  %v3803_v14 = vmax.f32 %v3691_v23, 0.0  ;;  %v17415_v49 = vor.u32 %v19081_v58, %v17412_v15  ;;  %v14898_v23 = vld [vmem:[#allocation11 + $0x998] sm:$0xf]  ;;  %v18443_v63 = vld [vmem:[#allocation11 + $0x94c] sm:$0xf0] }
 0x280   :  { %10060 = vmatpush.bf16.msra.mxu3 %v16191_v0  ;;  %v19135_v0 = vld [vmem:[#allocation11 + $0x1ef4] sm:$0xf]  ;;  %9993 = vmatpush.bf16.msrb.mxu2 %v17123_v6  ;;  %v14971_v6 = vor.u32 %v18479_v18, %v14970_v31  ;;  %v18983_v36 = vld [vmem:[#allocation11 + $0x1a2c] sm:$0xf0]  ;;  %v18965_v18 = vld [vmem:[#allocation11 + $0x199c] sm:$0xf0] }
 0x281   :  { %10074 = vmatpush.bf16.msrb.mxu0 %v16767_v10  ;;  %v17628_v10 = vld [vmem:[#allocation11 + $0x1f38] sm:$0xf0] }
 0x282   :  { %v17631_v50 = vor.u32 %v19135_v0, %v17628_v10  ;;  %v17343_v0 = vor.u32 %v19063_v48, %v17340_v34  ;;  %v18461_v10 = vld [vmem:[#allocation11 + $0x9dc] sm:$0xf0]  ;;  %v17490_v34 = vld [vmem:[#allocation11 + $0x1dd8] sm:$0xf] }
 0x283   :  { %v14899_v30 = vor.u32 %v18461_v10, %v14898_v23  ;;  %v16842_v10 = vld [vmem:[#allocation11 + $0x18c8] sm:$0xf] }
 0x284   :  { %10061 = vmatpush.bf16.msra.mxu3 %v16119_v21  ;;  %v18533_v21 = vld [vmem:[#allocation11 + $0xc1c] sm:$0xf0]  ;;  %10042 = vmatpush.bf16.msra.mxu2 %v15903_v61  ;;  %v18613_v61 = vld [vmem:[#allocation11 + $0xea4] sm:$0xf] }
 0x285   :  { %10075 = vmatpush.bf16.msrb.mxu0 %v16695_v24  ;;  %v19797_v24 = vpack.c.bf16 %v3803_v14, %v3796_v13  ;;  %v15187_v8 = vor.u32 %v18533_v21, %v15186_v54  ;;  %v17268_v13 = vld [vmem:[#allocation11 + $0x1c68] sm:$0xf0]  ;;  %v14250_v54 = vld [vmem:[#allocation11 + $0x488] sm:$0xf] }
 0x286   :  { %v14826_v21 = vld [vmem:[#allocation11 + $0x908] sm:$0xf] }
 0x287   :  { %9980 = vmatmul.bf16.vlgmr.msrb.gmra.mxu1 %v19797_v24  ;;  %v14827_v45 = vor.u32 %v18443_v63, %v14826_v21 }
 0x288   :  { %10062 = vmatpush.bf16.msra.mxu3 %v16047_v39  ;;  %10084 = vmatpush.bf16.msrb.mxu1 %v17631_v50  ;;  %v18667_v39 = vld [vmem:[#allocation11 + $0x1054] sm:$0xf]  ;;  %v18299_v50 = vld [vmem:[#allocation11 + $0x4cc] sm:$0xf0] }
 0x289   :  { %10076 = vmatpush.bf16.msrb.mxu0 %v16623_v51  ;;  %10043 = vmatpush.bf16.msra.mxu2 %v15831_v25  ;;  %v15759_v51 = vor.u32 %v18667_v39, %v15756_v55  ;;  %v19804_v25 = vpop.f32.mrf.mxu2  ;;  %v15471_v39 = vor.u32 %v18595_v28, %v15468_v46  ;;  %v14251_v55 = vor.u32 %v18299_v50, %v14250_v54  ;;  %v18677_v54 = vld [vmem:[#allocation11 + $0x109c] sm:$0xf0] }
 0x28c   :  { %10063 = vmatpush.bf16.msra.mxu3 %v15975_v29  ;;  %10085 = vmatpush.bf16.msrb.mxu1 %v17559_v59  ;;  %v15687_v29 = vor.u32 %v18649_v1, %v15684_v53  ;;  %v17634_v59 = vld [vmem:[#allocation11 + $0x1ef8] sm:$0xf]  ;;  %v17562_v1 = vld [vmem:[#allocation11 + $0x1e68] sm:$0xf]  ;;  %v19127_v53 = vld [vmem:[#allocation11 + $0x1eac] sm:$0xf0] }
 0x28d   :  { %10077 = vmatpush.bf16.msrb.mxu0 %v16551_v56  ;;  %10044 = vmatpush.bf16.msra.mxu2 %v15759_v51  ;;  %v15043_v56 = vor.u32 %v18497_v16, %v15042_v57  ;;  %v19009_v51 = vld [vmem:[#allocation11 + $0x1b04] sm:$0xf]  ;;  %v17635_v33 = vor.u32 %v19145_v27, %v17634_v59  ;;  %v17124_v16 = vld [vmem:[#allocation11 + $0x1b48] sm:$0xf0]  ;;  %v17563_v31 = vor.u32 %v19127_v53, %v17562_v1  ;;  %v19073_v59 = vld [vmem:[#allocation11 + $0x1cfc] sm:$0xf0] }
 0x28e   :  { %v18577_v57 = vld [vmem:[#allocation11 + $0xd84] sm:$0xf]  ;;  %v18641_v1 = vld [vmem:[#allocation11 + $0xf7c] sm:$0xf0] }
 0x28f   :  { %10064 = vmatmul.bf16.vlgmr.msra.gmra.mxu3 %v19790_v7  ;;  %v3744_v23 = vpop.f32.mrf.mxu0 }
 0x290   :  { %10112 = vmatpush.bf16.msrb.mxu3 %v14755_v32  ;;  %10078 = vmatmul.bf16.vlgmr.msrb.gmra.mxu0 %v19797_v24  ;;  %v14394_v32 = vld [vmem:[#allocation11 + $0x5a8] sm:$0xf] }
 0x291   :  { %10126 = vmatpush.bf16.msra.mxu0 %v15331_v38  ;;  %10086 = vmatpush.bf16.msrb.mxu1 %v17487_v37  ;;  %v18631_v38 = vld [vmem:[#allocation11 + $0xf34] sm:$0xf]  ;;  %v14395_v4 = vor.u32 %v18335_v43, %v14394_v32  ;;  %v15396_v37 = vld [vmem:[#allocation11 + $0xdc8] sm:$0xf0]  ;;  %v17127_v43 = vor.u32 %v19009_v51, %v17124_v16  ;;  %v16698_v51 = vld [vmem:[#allocation11 + $0x17a8] sm:$0xf] }
 0x292   :  { %10045 = vmatpush.bf16.msra.mxu2 %v15687_v29  ;;  %v15615_v47 = vor.u32 %v18631_v38, %v15612_v11  ;;  %v15399_v58 = vor.u32 %v18577_v57, %v15396_v37  ;;  %v3730_v15 = vpop.f32.mrf.mxu3  ;;  %v15906_v29 = vld [vmem:[#allocation11 + $0x1178] sm:$0xf]  ;;  %v19055_v57 = vld [vmem:[#allocation11 + $0x1c6c] sm:$0xf0] }
 0x293   :  { %v19240_v38 = vld [vmem:[#allocation10] sm:$0xff] }
 0x294   :  { %10113 = vmatpush.bf16.msrb.mxu3 %v14683_v3  ;;  %v15540_v3 = vld [vmem:[#allocation11 + $0xee8] sm:$0xf0]  ;;  %v1081_v11 = vperm.slane %v19240_v38, 6  ;;  %v15618_v16 = vld [vmem:[#allocation11 + $0xf38] sm:$0xf] }
 0x295   :  { %10127 = vmatpush.bf16.msra.mxu0 %v15259_v19  ;;  %10087 = vmatpush.bf16.msrb.mxu1 %v17415_v49  ;;  %v15543_v14 = vor.u32 %v18613_v61, %v15540_v3  ;;  %v19801_v19 = vpop.f32.mrf.mxu1  ;;  %v16914_v49 = vld [vmem:[#allocation11 + $0x1958] sm:$0xf]  ;;  %v18947_v61 = vld [vmem:[#allocation11 + $0x190c] sm:$0xf0]  ;;  %v15546_v38 = vld [vmem:[#allocation11 + $0xea8] sm:$0xf] }
 0x296   :  { %10046 = vmatpush.bf16.msra.mxu2 %v15615_v47  ;;  %v19109_v47 = vld [vmem:[#allocation11 + $0x1e1c] sm:$0xf0]  ;;  %v16915_v35 = vor.u32 %v18965_v18, %v16914_v49  ;;  %v3703_v3 = vadd.f32 %v19801_v19, %v1081_v11 }
 0x297   :  { %10036 = vmatmul.bf16.vlgmr.msra.gmra.mxu1 %v19768_v5  ;;  %v3746_v37 = vpop.f32.mrf.mxu0  ;;  %v19037_v49 = vld [vmem:[#allocation11 + $0x1bdc] sm:$0xf0] }
 0x298   :  { %10114 = vmatpush.bf16.msrb.mxu3 %v14611_v20  ;;  %v17271_v20 = vor.u32 %v19045_v12, %v17268_v13  ;;  %v17418_v13 = vld [vmem:[#allocation11 + $0x1d48] sm:$0xf]  ;;  %v3717_v50 = vadd.f32 %v19804_v25, %v3703_v3  ;;  %v18560_v3 = vld [vmem:[#allocation11 + $0xcfc] sm:$0xf] }
 0x299   :  { %10128 = vmatpush.bf16.msra.mxu0 %v15187_v8  ;;  %10088 = vmatpush.bf16.msrb.mxu1 %v17343_v0  ;;  %v19001_v8 = vld [vmem:[#allocation11 + $0x1abc] sm:$0xf0]  ;;  %v17491_v0 = vor.u32 %v19109_v47, %v17490_v34  ;;  %v16554_v47 = vld [vmem:[#allocation11 + $0x1688] sm:$0xf] }
 0x29a   :  { %10047 = vmatpush.bf16.msra.mxu2 %v15543_v14  ;;  %v17059_v2 = vor.u32 %v19001_v8, %v17058_v22  ;;  %v19091_v14 = vld [vmem:[#allocation11 + $0x1d8c] sm:$0xf0]  ;;  %v18929_v8 = vld [vmem:[#allocation11 + $0x187c] sm:$0xf0]  ;;  %v3731_v46 = vadd.f32 %v3730_v15, %v3717_v50 }
 0x29b   :  { %v17419_v22 = vor.u32 %v19091_v14, %v17418_v13  ;;  %v18605_v13 = vld [vmem:[#allocation11 + $0xe5c] sm:$0xf0]  ;;  %v18704_v14 = vld [vmem:[#allocation11 + $0x117c] sm:$0xf] }
 0x29c   :  { %10115 = vmatpush.bf16.msrb.mxu3 %v14539_v42  ;;  %v16986_v42 = vld [vmem:[#allocation11 + $0x19e8] sm:$0xf] }
 0x29d   :  { %10129 = vmatpush.bf16.msra.mxu0 %v15115_v9  ;;  %10089 = vmatpush.bf16.msrb.mxu1 %v17271_v20  ;;  %v17199_v9 = vor.u32 %v19027_v60, %v17196_v40  ;;  %v3704_v32 = vpop.f32.mrf.mxu1  ;;  %v3732_v60 = vpop.f32.mrf.mxu3  ;;  %v16770_v20 = vld [vmem:[#allocation11 + $0x1838] sm:$0xf] }
 0x29e   :  { %10048 = vmatpush.bf16.msra.mxu2 %v15471_v39  ;;  %v3705_v21 = vadd.f32 %v3704_v32, %v1081_v11  ;;  %v17346_v40 = vld [vmem:[#allocation11 + $0x1cb8] sm:$0xf]  ;;  %v15690_v39 = vld [vmem:[#allocation11 + $0xfc8] sm:$0xf]  ;;  %v16771_v25 = vor.u32 %v18929_v8, %v16770_v20  ;;  %v18623_v11 = vld [vmem:[#allocation11 + $0xeec] sm:$0xf0] }
 0x29f   :  { %v18281_v20 = vld [vmem:[#allocation11 + $0x43c] sm:$0xf0] }
 0x2a0   :  { %10116 = vmatpush.bf16.msrb.mxu3 %v14467_v62  ;;  %v18713_v62 = vld [vmem:[#allocation11 + $0x11bc] sm:$0xf0] }
 0x2a1   :  { %10130 = vmatpush.bf16.msra.mxu0 %v15043_v56  ;;  %v16987_v56 = vor.u32 %v18983_v36, %v16986_v42  ;;  %10090 = vmatpush.bf16.msrb.mxu1 %v17199_v9  ;;  %v15907_v48 = vor.u32 %v18713_v62, %v15906_v29  ;;  %v18911_v42 = vld [vmem:[#allocation11 + $0x17ec] sm:$0xf0]  ;;  %v3745_v9 = vadd.f32 %v3744_v23, %v3731_v46  ;;  %v17274_v36 = vld [vmem:[#allocation11 + $0x1c28] sm:$0xf]  ;;  %v16626_v62 = vld [vmem:[#allocation11 + $0x1718] sm:$0xf] }
 0x2a2   :  { %10049 = vmatpush.bf16.msra.mxu2 %v15399_v58  ;;  %v16699_v58 = vor.u32 %v18911_v42, %v16698_v51  ;;  %v17275_v29 = vor.u32 %v19055_v57, %v17274_v36  ;;  %v19019_v23 = vld [vmem:[#allocation11 + $0x1b4c] sm:$0xf0]  ;;  %v14180_v51 = vld [vmem:[#allocation11 + $0x440] sm:$0xf0]  ;;  %v14106_v57 = vld [vmem:[#allocation11 + $0x368] sm:$0xf] }
 0x2a4   :  { %10117 = vmatpush.bf16.msrb.mxu3 %v14395_v4  ;;  %v3718_v4 = vpop.f32.mrf.mxu2 }
 0x2a5   :  { %10131 = vmatpush.bf16.msra.mxu0 %v14971_v6  ;;  %v15834_v6 = vld [vmem:[#allocation11 + $0x10e8] sm:$0xf]  ;;  %10091 = vmatpush.bf16.msrb.mxu1 %v17127_v43  ;;  %v3758_v63 = vpop.f32.mrf.mxu1  ;;  %v3719_v28 = vadd.f32 %v3718_v4, %v3705_v21  ;;  %v15619_v43 = vor.u32 %v18641_v1, %v15618_v16 }
 0x2a6   :  { %v15835_v12 = vor.u32 %v18695_v52, %v15834_v6  ;;  %v3759_v32 = vadd.f32 %v3758_v63, %v3745_v9  ;;  %v18875_v52 = vld [vmem:[#allocation11 + $0x16cc] sm:$0xf0] }
 0x2a7   :  { %v16555_v21 = vor.u32 %v18875_v52, %v16554_v47  ;;  %v15692_v47 = vld [vmem:[#allocation11 + $0x1010] sm:$0xf0] }
 0x2a8   :  { %10118 = vmatpush.bf16.msrb.mxu3 %v14323_v17  ;;  %v15762_v17 = vld [vmem:[#allocation11 + $0x1058] sm:$0xf] }
 0x2a9   :  { %10132 = vmatpush.bf16.msra.mxu0 %v14899_v30  ;;  %10140 = vmatpush.bf16.msra.mxu1 %v15907_v48  ;;  %v16843_v30 = vor.u32 %v18947_v61, %v16842_v10  ;;  %v15763_v19 = vor.u32 %v18677_v54, %v15762_v17  ;;  %v15547_v10 = vor.u32 %v18623_v11, %v15546_v38  ;;  %v15474_v61 = vld [vmem:[#allocation11 + $0xe18] sm:$0xf]  ;;  %v15908_v17 = vld [vmem:[#allocation11 + $0x11c0] sm:$0xf0]  ;;  %v18506_v11 = vld [vmem:[#allocation11 + $0xb4c] sm:$0xf] }
 0x2aa   :  { %v15911_v46 = vor.u32 %v18704_v14, %v15908_v17  ;;  %v15620_v14 = vld [vmem:[#allocation11 + $0xf80] sm:$0xf0]  ;;  %v18218_v17 = vld [vmem:[#allocation11 + $0x24c] sm:$0xf] }
 0x2ac   :  { %10119 = vmatpush.bf16.msrb.mxu3 %v14251_v55  ;;  %v3772_v27 = vpop.f32.mrf.mxu2  ;;  %v18659_v55 = vld [vmem:[#allocation11 + $0x100c] sm:$0xf0] }
 0x2ad   :  { %10133 = vmatpush.bf16.msra.mxu0 %v14827_v45  ;;  %10141 = vmatpush.bf16.msra.mxu1 %v15835_v12  ;;  %v3733_v45 = vadd.f32 %v3732_v60, %v3719_v28  ;;  %v3760_v18 = vpop.f32.mrf.mxu1  ;;  %v15332_v12 = vld [vmem:[#allocation11 + $0xd40] sm:$0xf0]  ;;  %v15475_v28 = vor.u32 %v18605_v13, %v15474_v61  ;;  %v18632_v13 = vld [vmem:[#allocation11 + $0xf3c] sm:$0xf] }
 0x2ae   :  { %v15335_v60 = vor.u32 %v18560_v3, %v15332_v12  ;;  %v18488_v3 = vld [vmem:[#allocation11 + $0xabc] sm:$0xf]  ;;  %v15044_v12 = vld [vmem:[#allocation11 + $0xb00] sm:$0xf0] }
 0x2af   :  { %10120 = vmatmul.bf16.vlgmr.msrb.gmra.mxu3 %v19770_v44  ;;  %v3747_v53 = vadd.f32 %v3746_v37, %v3733_v45  ;;  %v18263_v37 = vld [vmem:[#allocation11 + $0x3ac] sm:$0xf0] }
 0x2b0   :  { %10168 = vmatpush.bf16.msra.mxu3 %v17059_v2  ;;  %10134 = vmatmul.bf16.vlgmr.msra.gmra.mxu0 %v19768_v5  ;;  %v17347_v2 = vor.u32 %v19073_v59, %v17346_v40  ;;  %v18587_v40 = vld [vmem:[#allocation11 + $0xdcc] sm:$0xf0]  ;;  %v18542_v59 = vld [vmem:[#allocation11 + $0xc6c] sm:$0xf] }
 0x2b1   :  { %10182 = vmatpush.bf16.msrb.mxu0 %v17635_v33  ;;  %10142 = vmatpush.bf16.msra.mxu1 %v15763_v19  ;;  %v15691_v33 = vor.u32 %v18659_v55, %v15690_v39  ;;  %v3761_v48 = vadd.f32 %v3760_v18, %v3747_v53  ;;  %v15402_v19 = vld [vmem:[#allocation11 + $0xd88] sm:$0xf]  ;;  %v18686_v39 = vld [vmem:[#allocation11 + $0x10ec] sm:$0xf]  ;;  %v15836_v55 = vld [vmem:[#allocation11 + $0x1130] sm:$0xf0] }
 0x2b2   :  { %v3786_v15 = vpop.f32.mrf.mxu3  ;;  %v15839_v16 = vor.u32 %v18686_v39, %v15836_v55  ;;  %v18524_v53 = vld [vmem:[#allocation11 + $0xbdc] sm:$0xf]  ;;  %v13818_v39 = vld [vmem:[#allocation11 + $0x128] sm:$0xf]  ;;  %v18191_v55 = vld [vmem:[#allocation11 + $0x16c] sm:$0xf0] }
 0x2b4   :  { %10169 = vmatpush.bf16.msra.mxu3 %v16987_v56  ;;  %v18893_v56 = vld [vmem:[#allocation11 + $0x175c] sm:$0xf0]  ;;  %v3774_v4 = vpop.f32.mrf.mxu2 }
 0x2b5   :  { %10183 = vmatpush.bf16.msrb.mxu0 %v17563_v31  ;;  %10143 = vmatpush.bf16.msra.mxu1 %v15691_v33  ;;  %v17202_v31 = vld [vmem:[#allocation11 + $0x1b98] sm:$0xf]  ;;  %v16627_v34 = vor.u32 %v18893_v56, %v16626_v62  ;;  %v3775_v54 = vadd.f32 %v3774_v4, %v3761_v48  ;;  %v15403_v33 = vor.u32 %v18587_v40, %v15402_v19  ;;  %v18254_v62 = vld [vmem:[#allocation11 + $0x36c] sm:$0xf]  ;;  %v14108_v56 = vld [vmem:[#allocation11 + $0x3b0] sm:$0xf0] }
 0x2b6   :  { %v17203_v6 = vor.u32 %v19037_v49, %v17202_v31  ;;  %v14034_v31 = vld [vmem:[#allocation11 + $0x2d8] sm:$0xf]  ;;  %v18245_v49 = vld [vmem:[#allocation11 + $0x31c] sm:$0xf0]  ;;  %v14111_v38 = vor.u32 %v18254_v62, %v14108_v56  ;;  %v15116_v48 = vld [vmem:[#allocation11 + $0xb90] sm:$0xf0] }
 0x2b7   :  { %v18236_v4 = vld [vmem:[#allocation11 + $0x2dc] sm:$0xf]  ;;  %v14035_v52 = vor.u32 %v18245_v49, %v14034_v31  ;;  %v13892_v40 = vld [vmem:[#allocation11 + $0x200] sm:$0xf0]  ;;  %v14828_v62 = vld [vmem:[#allocation11 + $0x950] sm:$0xf0] }
 0x2b8   :  { %10170 = vmatpush.bf16.msra.mxu3 %v16915_v35  ;;  %v17130_v35 = vld [vmem:[#allocation11 + $0x1b08] sm:$0xf]  ;;  %v18200_v19 = vld [vmem:[#allocation11 + $0x1bc] sm:$0xf]  ;;  %v18578_v56 = vld [vmem:[#allocation11 + $0xd8c] sm:$0xf] }
 0x2b9   :  { %10184 = vmatpush.bf16.msrb.mxu0 %v17491_v0  ;;  %v3773_v0 = vadd.f32 %v3772_v27, %v3759_v32  ;;  %10144 = vmatpush.bf16.msra.mxu1 %v15619_v43  ;;  %v17131_v63 = vor.u32 %v19019_v23, %v17130_v35  ;;  %v15260_v27 = vld [vmem:[#allocation11 + $0xcb0] sm:$0xf0]  ;;  %v14107_v32 = vor.u32 %v18263_v37, %v14106_v57  ;;  %v13962_v23 = vld [vmem:[#allocation11 + $0x248] sm:$0xf]  ;;  %v13748_v31 = vld [vmem:[#allocation11 + $0xe0] sm:$0xf0] }
 0x2ba   :  { %v15263_v36 = vor.u32 %v18542_v59, %v15260_v27  ;;  %v15119_v35 = vor.u32 %v18506_v11, %v15116_v48  ;;  %v13820_v57 = vld [vmem:[#allocation11 + $0x170] sm:$0xf0]  ;;  %v13819_v37 = vor.u32 %v18191_v55, %v13818_v39  ;;  %v19136_v49 = vld [vmem:[#allocation11 + $0x1efc] sm:$0xf]  ;;  %v14186_v11 = vld [vmem:[#allocation11 + $0x400] sm:$0xf] }
 0x2bb   :  { %v3787_v50 = vadd.f32 %v3786_v15, %v3773_v0  ;;  %v18668_v15 = vld [vmem:[#allocation11 + $0x105c] sm:$0xf]  ;;  %v18227_v0 = vld [vmem:[#allocation11 + $0x28c] sm:$0xf0]  ;;  %v18282_v48 = vld [vmem:[#allocation11 + $0x444] sm:$0xf0] }
 0x2bc   :  { %10171 = vmatpush.bf16.msra.mxu3 %v16843_v30  ;;  %v3788_v30 = vpop.f32.mrf.mxu3  ;;  %v18830_v39 = vld [vmem:[#allocation11 + $0x156c] sm:$0xf]  ;;  %v16412_v55 = vld [vmem:[#allocation11 + $0x15b0] sm:$0xf0] }
 0x2bd   :  { %10185 = vmatpush.bf16.msrb.mxu0 %v17419_v22  ;;  %v14178_v22 = vld [vmem:[#allocation11 + $0x3f8] sm:$0xf]  ;;  %v3789_v8 = vadd.f32 %v3788_v30, %v3775_v54  ;;  %10145 = vmatpush.bf16.msra.mxu1 %v15547_v10  ;;  %v3797_v45 = vmax.f32 %v3787_v50, 0.0  ;;  %v13964_v54 = vld [vmem:[#allocation11 + $0x290] sm:$0xf0]  ;;  %v13963_v50 = vor.u32 %v18227_v0, %v13962_v23 }
 0x2be   :  { %v14179_v42 = vor.u32 %v18281_v20, %v14178_v22  ;;  %v13890_v30 = vld [vmem:[#allocation11 + $0x1b8] sm:$0xf]  ;;  %v13967_v22 = vor.u32 %v18218_v17, %v13964_v54  ;;  %v18470_v20 = vld [vmem:[#allocation11 + $0xa2c] sm:$0xf]  ;;  %v18857_v23 = vld [vmem:[#allocation11 + $0x163c] sm:$0xf0] }
 0x2bf   :  { %v14114_v17 = vld [vmem:[#allocation11 + $0x370] sm:$0xf]  ;;  %v18264_v54 = vld [vmem:[#allocation11 + $0x3b4] sm:$0xf0] }
 0x2c0   :  { %10172 = vmatpush.bf16.msra.mxu3 %v16771_v25  ;;  %v3804_v25 = vmax.f32 %v3789_v8, 0.0  ;;  %v14972_v8 = vld [vmem:[#allocation11 + $0xa70] sm:$0xf0] }
 0x2c1   :  { %10186 = vmatpush.bf16.msrb.mxu0 %v17347_v2  ;;  %v18272_v2 = vld [vmem:[#allocation11 + $0x3fc] sm:$0xf]  ;;  %10146 = vmatpush.bf16.msra.mxu1 %v15475_v28  ;;  %v18614_v28 = vld [vmem:[#allocation11 + $0xeac] sm:$0xf]  ;;  %v14975_v27 = vor.u32 %v18470_v20, %v14972_v8  ;;  %v14115_v8 = vor.u32 %v18264_v54, %v14114_v17 }
 0x2c2   :  { %v19810_v9 = vpack.c.bf16 %v3804_v25, %v3797_v45  ;;  %v14183_v1 = vor.u32 %v18272_v2, %v14180_v51  ;;  %v13895_v25 = vor.u32 %v18200_v19, %v13892_v40  ;;  %v18452_v2 = vld [vmem:[#allocation11 + $0x99c] sm:$0xf]  ;;  %v14900_v51 = vld [vmem:[#allocation11 + $0x9e0] sm:$0xf0]  ;;  %v14042_v40 = vld [vmem:[#allocation11 + $0x2e0] sm:$0xf] }
 0x2c3   :  { %v17492_v19 = vld [vmem:[#allocation11 + $0x1e20] sm:$0xf0]  ;;  %v19028_v54 = vld [vmem:[#allocation11 + $0x1b9c] sm:$0xf] }
 0x2c4   :  { %10173 = vmatpush.bf16.msra.mxu3 %v16699_v58  ;;  %v15188_v58 = vld [vmem:[#allocation11 + $0xc20] sm:$0xf0]  ;;  %9994 = vmatmul.bf16.vlgmr.msrb.gmra.mxu2 %v19810_v9 }
 0x2c5   :  { %10187 = vmatpush.bf16.msrb.mxu0 %v17275_v29  ;;  %10092 = vmatmul.bf16.vlgmr.msrb.gmra.mxu1 %v19810_v9  ;;  %v15764_v29 = vld [vmem:[#allocation11 + $0x10a0] sm:$0xf0]  ;;  %v15191_v43 = vor.u32 %v18524_v53, %v15188_v58  ;;  %v18173_v53 = vld [vmem:[#allocation11 + $0xdc] sm:$0xf0]  ;;  %v18434_v58 = vld [vmem:[#allocation11 + $0x90c] sm:$0xf] }
 0x2c6   :  { %10098 = vmatpush.bf16.msrb.mxu2 %v14179_v42  ;;  %10147 = vmatpush.bf16.msra.mxu1 %v15403_v33  ;;  %v15767_v18 = vor.u32 %v18668_v15, %v15764_v29  ;;  %v18596_v42 = vld [vmem:[#allocation11 + $0xe1c] sm:$0xf]  ;;  %v15476_v33 = vld [vmem:[#allocation11 + $0xe60] sm:$0xf0] }
 0x2c7   :  { %v15479_v15 = vor.u32 %v18596_v42, %v15476_v33  ;;  %v19082_v42 = vld [vmem:[#allocation11 + $0x1d4c] sm:$0xf]  ;;  %v16415_v33 = vor.u32 %v18830_v39, %v16412_v55  ;;  %v18156_v55 = vld [vmem:[#allocation11 + $0x54] sm:$0xf0] }
 0x2c8   :  { %10174 = vmatpush.bf16.msra.mxu3 %v16627_v34  ;;  %v18650_v34 = vld [vmem:[#allocation11 + $0xfcc] sm:$0xf] }
 0x2c9   :  { %10188 = vmatpush.bf16.msrb.mxu0 %v17203_v6  ;;  %v14036_v6 = vld [vmem:[#allocation11 + $0x320] sm:$0xf0]  ;;  %v15695_v10 = vor.u32 %v18650_v34, %v15692_v47  ;;  %v14831_v34 = vor.u32 %v18434_v58, %v14828_v62  ;;  %v13674_v47 = vld [vmem:[#allocation11 + $0x8] sm:$0xf] }
 0x2ca   :  { %10196 = vmatpush.bf16.msrb.mxu1 %v14183_v1  ;;  %10099 = vmatpush.bf16.msrb.mxu2 %v14107_v32  ;;  %v14039_v61 = vor.u32 %v18236_v4, %v14036_v6  ;;  %v13746_v1 = vld [vmem:[#allocation11 + $0x98] sm:$0xf]  ;;  %v15404_v32 = vld [vmem:[#allocation11 + $0xdd0] sm:$0xf0]  ;;  %v18155_v4 = vld [vmem:[#allocation11 + $0x4c] sm:$0xf0] }
 0x2cb   :  { %v15407_v6 = vor.u32 %v18578_v56, %v15404_v32  ;;  %v16266_v58 = vld [vmem:[#allocation11 + $0x1448] sm:$0xf]  ;;  %v19064_v56 = vld [vmem:[#allocation11 + $0x1cbc] sm:$0xf] }
 0x2cc   :  { %10175 = vmatpush.bf16.msra.mxu3 %v16555_v21  ;;  %v15047_v21 = vor.u32 %v18488_v3, %v15044_v12  ;;  %v13676_v3 = vld [vmem:[#allocation11 + $0x50] sm:$0xf0]  ;;  %v19118_v12 = vld [vmem:[#allocation11 + $0x1e6c] sm:$0xf] }
 0x2cd   :  { %10189 = vmatpush.bf16.msrb.mxu0 %v17131_v63  ;;  %v18209_v63 = vld [vmem:[#allocation11 + $0x1fc] sm:$0xf0] }
 0x2ce   :  { %10197 = vmatpush.bf16.msrb.mxu1 %v14111_v38  ;;  %10100 = vmatpush.bf16.msrb.mxu2 %v14035_v52  ;;  %v13891_v59 = vor.u32 %v18209_v63, %v13890_v30  ;;  %v17636_v38 = vld [vmem:[#allocation11 + $0x1f40] sm:$0xf0] }
 0x2cf   :  { %10176 = vmatmul.bf16.vlgmr.msra.gmra.mxu3 %v19797_v24  ;;  %v17639_v0 = vor.u32 %v19136_v49, %v17636_v38  ;;  %v16484_v30 = vld [vmem:[#allocation11 + $0x1640] sm:$0xf0]  ;;  %v18210_v49 = vld [vmem:[#allocation11 + $0x204] sm:$0xf0]  ;;  %v18794_v38 = vld [vmem:[#allocation11 + $0x144c] sm:$0xf] }
 0x2d0   :  { %10224 = vmatpush.bf16.msrb.mxu3 %v15335_v60  ;;  %10190 = vmatmul.bf16.vlgmr.msrb.gmra.mxu0 %v19810_v9  ;;  %v15623_v60 = vor.u32 %v18632_v13, %v15620_v14  ;;  %v13675_v13 = vor.u32 %v18155_v4, %v13674_v47  ;;  %v17564_v14 = vld [vmem:[#allocation11 + $0x1eb0] sm:$0xf0] }
 0x2d1   :  { %10238 = vmatpush.bf16.msra.mxu0 %v15911_v46  ;;  %v15548_v46 = vld [vmem:[#allocation11 + $0xef0] sm:$0xf0]  ;;  %v17567_v20 = vor.u32 %v19118_v12, %v17564_v14  ;;  %v16122_v12 = vld [vmem:[#allocation11 + $0x1328] sm:$0xf] }
 0x2d2   :  { %10198 = vmatpush.bf16.msrb.mxu1 %v14039_v61  ;;  %10101 = vmatpush.bf16.msrb.mxu2 %v13963_v50  ;;  %v15551_v45 = vor.u32 %v18614_v28, %v15548_v46  ;;  %v18146_v61 = vld [vmem:[#allocation11 + $0xc] sm:$0xf]  ;;  %v19100_v28 = vld [vmem:[#allocation11 + $0x1ddc] sm:$0xf] }
 0x2d3   :  { %v13679_v63 = vor.u32 %v18146_v61, %v13676_v3  ;;  %v18776_v61 = vld [vmem:[#allocation11 + $0x13bc] sm:$0xf]  ;;  %v16196_v3 = vld [vmem:[#allocation11 + $0x1400] sm:$0xf0] }
 0x2d4   :  { %10225 = vmatpush.bf16.msrb.mxu3 %v15263_v36  ;;  %10050 = vmatmul.bf16.vlgmr.msra.gmra.mxu2 %v19787_v41  ;;  %v18182_v36 = vld [vmem:[#allocation11 + $0x12c] sm:$0xf] }
 0x2d5   :  { %10239 = vmatpush.bf16.msra.mxu0 %v15839_v16  ;;  %10148 = vmatmul.bf16.vlgmr.msra.gmra.mxu1 %v19787_v41  ;;  %v14903_v16 = vor.u32 %v18452_v2, %v14900_v51  ;;  %v13823_v29 = vor.u32 %v18182_v36, %v13820_v57  ;;  %v17495_v2 = vor.u32 %v19100_v28, %v17492_v19  ;;  %v17420_v36 = vld [vmem:[#allocation11 + $0x1d90] sm:$0xf0]  ;;  %v13970_v57 = vld [vmem:[#allocation11 + $0x250] sm:$0xf]  ;;  %v18749_v28 = vld [vmem:[#allocation11 + $0x12dc] sm:$0xf0] }
 0x2d6   :  { %10199 = vmatpush.bf16.msrb.mxu1 %v13967_v22  ;;  %10102 = vmatpush.bf16.msrb.mxu2 %v13891_v59  ;;  %v18839_v22 = vld [vmem:[#allocation11 + $0x15ac] sm:$0xf0]  ;;  %v18246_v59 = vld [vmem:[#allocation11 + $0x324] sm:$0xf0] }
 0x2d7   :  { %v14043_v51 = vor.u32 %v18246_v59, %v14042_v40  ;;  %v19010_v40 = vld [vmem:[#allocation11 + $0x1b0c] sm:$0xf]  ;;  %v17132_v59 = vld [vmem:[#allocation11 + $0x1b50] sm:$0xf0] }
 0x2d8   :  { %10226 = vmatpush.bf16.msrb.mxu3 %v15191_v43  ;;  %v18164_v43 = vld [vmem:[#allocation11 + $0x9c] sm:$0xf] }
 0x2d9   :  { %10240 = vmatpush.bf16.msra.mxu0 %v15767_v18  ;;  %v13747_v18 = vor.u32 %v18173_v53, %v13746_v1  ;;  %v13751_v52 = vor.u32 %v18164_v43, %v13748_v31  ;;  %v18812_v1 = vld [vmem:[#allocation11 + $0x14dc] sm:$0xf]  ;;  %v16340_v53 = vld [vmem:[#allocation11 + $0x1520] sm:$0xf0]  ;;  %v13898_v31 = vld [vmem:[#allocation11 + $0x1c0] sm:$0xf] }
 0x2da   :  { %10200 = vmatpush.bf16.msrb.mxu1 %v13895_v25  ;;  %10103 = vmatpush.bf16.msrb.mxu2 %v13819_v37  ;;  %v18821_v25 = vld [vmem:[#allocation11 + $0x151c] sm:$0xf0]  ;;  %v18228_v37 = vld [vmem:[#allocation11 + $0x294] sm:$0xf0]  ;;  %v16343_v32 = vor.u32 %v18812_v1, %v16340_v53  ;;  %v17348_v43 = vld [vmem:[#allocation11 + $0x1d00] sm:$0xf0]  ;;  %v13899_v4 = vor.u32 %v18210_v49, %v13898_v31 }
 0x2db   :  { %v13971_v62 = vor.u32 %v18228_v37, %v13970_v57  ;;  %v17351_v47 = vor.u32 %v19064_v56, %v17348_v43  ;;  %v15978_v57 = vld [vmem:[#allocation11 + $0x1208] sm:$0xf]  ;;  %v18731_v37 = vld [vmem:[#allocation11 + $0x124c] sm:$0xf0]  ;;  %v15980_v43 = vld [vmem:[#allocation11 + $0x1250] sm:$0xf0] }
 0x2dc   :  { %10227 = vmatpush.bf16.msrb.mxu3 %v15119_v35  ;;  %v16482_v35 = vld [vmem:[#allocation11 + $0x15f8] sm:$0xf]  ;;  %v15842_v31 = vld [vmem:[#allocation11 + $0x10f0] sm:$0xf] }
 0x2dd   :  { %10241 = vmatpush.bf16.msra.mxu0 %v15695_v10  ;;  %v14187_v10 = vor.u32 %v18282_v48, %v14186_v11  ;;  %v16483_v50 = vor.u32 %v18857_v23, %v16482_v35  ;;  %v16268_v11 = vld [vmem:[#allocation11 + $0x1490] sm:$0xf0]  ;;  %v16194_v48 = vld [vmem:[#allocation11 + $0x13b8] sm:$0xf]  ;;  %v13826_v23 = vld [vmem:[#allocation11 + $0x130] sm:$0xf] }
 0x2de   :  { %10201 = vmatpush.bf16.msrb.mxu1 %v13823_v29  ;;  %10104 = vmatpush.bf16.msrb.mxu2 %v13747_v18  ;;  %v17423_v29 = vor.u32 %v19082_v42, %v17420_v36  ;;  %v17276_v35 = vld [vmem:[#allocation11 + $0x1c70] sm:$0xf0]  ;;  %v18714_v42 = vld [vmem:[#allocation11 + $0x11c4] sm:$0xf0]  ;;  %v18696_v49 = vld [vmem:[#allocation11 + $0x1134] sm:$0xf0] }
 0x2df   :  { %v18858_v36 = vld [vmem:[#allocation11 + $0x1644] sm:$0xf0] }
 0x2e0   :  { %10228 = vmatpush.bf16.msrb.mxu3 %v15047_v21  ;;  %v18848_v21 = vld [vmem:[#allocation11 + $0x15fc] sm:$0xf] }
 0x2e1   :  { %10242 = vmatpush.bf16.msra.mxu0 %v15623_v60  ;;  %v16410_v60 = vld [vmem:[#allocation11 + $0x1568] sm:$0xf]  ;;  %v16487_v46 = vor.u32 %v18848_v21, %v16484_v30  ;;  %v17204_v21 = vld [vmem:[#allocation11 + $0x1be0] sm:$0xf0]  ;;  %v13754_v30 = vld [vmem:[#allocation11 + $0xa0] sm:$0xf] }
 0x2e2   :  { %10202 = vmatpush.bf16.msrb.mxu1 %v13751_v52  ;;  %10105 = vmatpush.bf16.msrb.mxu2 %v13675_v13  ;;  %v16271_v52 = vor.u32 %v18794_v38, %v16268_v11  ;;  %v18767_v13 = vld [vmem:[#allocation11 + $0x136c] sm:$0xf0]  ;;  %v18840_v38 = vld [vmem:[#allocation11 + $0x15b4] sm:$0xf0] }
 0x2e4   :  { %10229 = vmatpush.bf16.msrb.mxu3 %v14975_v27  ;;  %v16411_v27 = vor.u32 %v18839_v22, %v16410_v60  ;;  %v16123_v60 = vor.u32 %v18767_v13, %v16122_v12  ;;  %v18758_v22 = vld [vmem:[#allocation11 + $0x132c] sm:$0xf]  ;;  %v14690_v13 = vld [vmem:[#allocation11 + $0x7f0] sm:$0xf] }
 0x2e5   :  { %10243 = vmatpush.bf16.msra.mxu0 %v15551_v45  ;;  %v16338_v45 = vld [vmem:[#allocation11 + $0x14d8] sm:$0xf]  ;;  %10106 = vmatmul.bf16.vlgmr.msrb.gmra.mxu2 %v19753_v26 }
 0x2e6   :  { %10154 = vmatpush.bf16.msra.mxu2 %v16483_v50  ;;  %10203 = vmatpush.bf16.msrb.mxu1 %v13679_v63  ;;  %v16199_v50 = vor.u32 %v18776_v61, %v16196_v3  ;;  %v18174_v63 = vld [vmem:[#allocation11 + $0xe4] sm:$0xf0]  ;;  %v16346_v61 = vld [vmem:[#allocation11 + $0x14e0] sm:$0xf] }
 0x2e7   :  { %v13755_v19 = vor.u32 %v18174_v63, %v13754_v30  ;;  %v18822_v3 = vld [vmem:[#allocation11 + $0x1524] sm:$0xf0]  ;;  %v15698_v30 = vld [vmem:[#allocation11 + $0xfd0] sm:$0xf]  ;;  %v18660_v63 = vld [vmem:[#allocation11 + $0x1014] sm:$0xf0] }
 0x2e8   :  { %10230 = vmatpush.bf16.msrb.mxu3 %v14903_v16  ;;  %v16339_v16 = vor.u32 %v18821_v25, %v16338_v45  ;;  %v18740_v45 = vld [vmem:[#allocation11 + $0x129c] sm:$0xf]  ;;  %v16052_v25 = vld [vmem:[#allocation11 + $0x12e0] sm:$0xf0] }
 0x2e9   :  { %10244 = vmatpush.bf16.msra.mxu0 %v15479_v15  ;;  %10204 = vmatmul.bf16.vlgmr.msrb.gmra.mxu1 %v19753_v26  ;;  %v18803_v15 = vld [vmem:[#allocation11 + $0x148c] sm:$0xf0]  ;;  %v16055_v53 = vor.u32 %v18740_v45, %v16052_v25  ;;  %v16202_v25 = vld [vmem:[#allocation11 + $0x13c0] sm:$0xf] }
 0x2ea   :  { %10252 = vmatpush.bf16.msra.mxu1 %v16487_v46  ;;  %10155 = vmatpush.bf16.msra.mxu2 %v16411_v27  ;;  %v16267_v18 = vor.u32 %v18803_v15, %v16266_v58  ;;  %v17207_v46 = vor.u32 %v19028_v54, %v17204_v21  ;;  %v13682_v27 = vld [vmem:[#allocation11 + $0x10] sm:$0xf]  ;;  %v18416_v15 = vld [vmem:[#allocation11 + $0x87c] sm:$0xf]  ;;  %v16347_v21 = vor.u32 %v18822_v3, %v16346_v61  ;;  %v18588_v3 = vld [vmem:[#allocation11 + $0xdd4] sm:$0xf0] }
 0x2eb   :  { %v13683_v1 = vor.u32 %v18156_v55, %v13682_v27  ;;  %v18380_v54 = vld [vmem:[#allocation11 + $0x75c] sm:$0xf]  ;;  %v18642_v55 = vld [vmem:[#allocation11 + $0xf84] sm:$0xf0] }
 0x2ec   :  { %10231 = vmatpush.bf16.msrb.mxu3 %v14831_v34  ;;  %v18785_v34 = vld [vmem:[#allocation11 + $0x13fc] sm:$0xf0] }
 0x2ed   :  { %10245 = vmatpush.bf16.msra.mxu0 %v15407_v6  ;;  %v19046_v6 = vld [vmem:[#allocation11 + $0x1c2c] sm:$0xf] }
 0x2ee   :  { %10253 = vmatpush.bf16.msra.mxu1 %v16415_v33  ;;  %10156 = vmatpush.bf16.msra.mxu2 %v16339_v16  ;;  %v17279_v14 = vor.u32 %v19046_v6, %v17276_v35  ;;  %v16490_v33 = vld [vmem:[#allocation11 + $0x1600] sm:$0xf]  ;;  %v17135_v16 = vor.u32 %v19010_v40, %v17132_v59  ;;  %v18398_v6 = vld [vmem:[#allocation11 + $0x7ec] sm:$0xf]  ;;  %v14540_v59 = vld [vmem:[#allocation11 + $0x710] sm:$0xf0] }
 0x2ef   :  { %10232 = vmatmul.bf16.vlgmr.msrb.gmra.mxu3 %v19768_v5  ;;  %v16491_v56 = vor.u32 %v18858_v36, %v16490_v33  ;;  %v18362_v40 = vld [vmem:[#allocation11 + $0x6cc] sm:$0xf]  ;;  %v18372_v33 = vld [vmem:[#allocation11 + $0x714] sm:$0xf0] }
 0x2f0   :  { %10280 = vmatpush.bf16.msra.mxu3 %v17639_v0  ;;  %10246 = vmatmul.bf16.vlgmr.msra.gmra.mxu0 %v19787_v41  ;;  %v18192_v0 = vld [vmem:[#allocation11 + $0x174] sm:$0xf0] }
 0x2f1   :  { %10294 = vmatpush.bf16.msrb.mxu0 %v14187_v10  ;;  %v16195_v10 = vor.u32 %v18785_v34, %v16194_v48  ;;  %v13827_v17 = vor.u32 %v18192_v0, %v13826_v23  ;;  %v14762_v48 = vld [vmem:[#allocation11 + $0x880] sm:$0xf]  ;;  %v18426_v34 = vld [vmem:[#allocation11 + $0x8c4] sm:$0xf0] }
 0x2f2   :  { %10254 = vmatpush.bf16.msra.mxu1 %v16343_v32  ;;  %10157 = vmatpush.bf16.msra.mxu2 %v16267_v18  ;;  %v15979_v32 = vor.u32 %v18731_v37, %v15978_v57  ;;  %v16418_v18 = vld [vmem:[#allocation11 + $0x1570] sm:$0xf]  ;;  %v15770_v23 = vld [vmem:[#allocation11 + $0x1060] sm:$0xf]  ;;  %v18678_v0 = vld [vmem:[#allocation11 + $0x10a4] sm:$0xf0] }
 0x2f3   :  { %v16419_v35 = vor.u32 %v18840_v38, %v16418_v18  ;;  %v18344_v57 = vld [vmem:[#allocation11 + $0x63c] sm:$0xf]  ;;  %v14468_v37 = vld [vmem:[#allocation11 + $0x680] sm:$0xf0]  ;;  %v15482_v38 = vld [vmem:[#allocation11 + $0xe20] sm:$0xf] }
 0x2f4   :  { %10281 = vmatpush.bf16.msra.mxu3 %v17567_v20  ;;  %v16124_v20 = vld [vmem:[#allocation11 + $0x1370] sm:$0xf0] }
 0x2f5   :  { %10295 = vmatpush.bf16.msrb.mxu0 %v14115_v8  ;;  %v16050_v8 = vld [vmem:[#allocation11 + $0x1298] sm:$0xf]  ;;  %v16127_v39 = vor.u32 %v18758_v22, %v16124_v20  ;;  %v16274_v22 = vld [vmem:[#allocation11 + $0x1450] sm:$0xf] }
 0x2f6   :  { %10255 = vmatpush.bf16.msra.mxu1 %v16271_v52  ;;  %10158 = vmatpush.bf16.msra.mxu2 %v16195_v10  ;;  %v14684_v52 = vld [vmem:[#allocation11 + $0x830] sm:$0xf0]  ;;  %v14763_v10 = vor.u32 %v18426_v34, %v14762_v48  ;;  %v18804_v20 = vld [vmem:[#allocation11 + $0x1494] sm:$0xf0]  ;;  %v16058_v34 = vld [vmem:[#allocation11 + $0x12a0] sm:$0xf] }
 0x2f7   :  { %v14687_v12 = vor.u32 %v18398_v6, %v14684_v52  ;;  %v16275_v27 = vor.u32 %v18804_v20, %v16274_v22  ;;  %v14402_v6 = vld [vmem:[#allocation11 + $0x5b0] sm:$0xf]  ;;  %v18336_v52 = vld [vmem:[#allocation11 + $0x5f4] sm:$0xf0]  ;;  %v18290_v20 = vld [vmem:[#allocation11 + $0x48c] sm:$0xf] }
 0x2f8   :  { %10282 = vmatpush.bf16.msra.mxu3 %v17495_v2  ;;  %v16051_v2 = vor.u32 %v18749_v28, %v16050_v8  ;;  %v14618_v28 = vld [vmem:[#allocation11 + $0x760] sm:$0xf] }
 0x2f9   :  { %10296 = vmatpush.bf16.msrb.mxu0 %v14043_v51  ;;  %v15914_v51 = vld [vmem:[#allocation11 + $0x1180] sm:$0xf] }
 0x2fa   :  { %10256 = vmatpush.bf16.msra.mxu1 %v16199_v50  ;;  %10159 = vmatpush.bf16.msra.mxu2 %v16123_v60  ;;  %v15915_v58 = vor.u32 %v18714_v42, %v15914_v51  ;;  %v14612_v50 = vld [vmem:[#allocation11 + $0x7a0] sm:$0xf0]  ;;  %v14543_v51 = vor.u32 %v18362_v40, %v14540_v59  ;;  %v14546_v42 = vld [vmem:[#allocation11 + $0x6d0] sm:$0xf] }
 0x2fb   :  { %v14615_v8 = vor.u32 %v18380_v54, %v14612_v50  ;;  %v18273_v54 = vld [vmem:[#allocation11 + $0x404] sm:$0xf]  ;;  %v14188_v50 = vld [vmem:[#allocation11 + $0x448] sm:$0xf0] }
 0x2fc   :  { %10283 = vmatpush.bf16.msra.mxu3 %v17423_v29  ;;  %v14756_v29 = vld [vmem:[#allocation11 + $0x8c0] sm:$0xf0] }
 0x2fd   :  { %10297 = vmatpush.bf16.msrb.mxu0 %v13971_v62  ;;  %v18722_v62 = vld [vmem:[#allocation11 + $0x120c] sm:$0xf]  ;;  %v14759_v11 = vor.u32 %v18416_v15, %v14756_v29  ;;  %v16130_v15 = vld [vmem:[#allocation11 + $0x1330] sm:$0xf]  ;;  %v18768_v29 = vld [vmem:[#allocation11 + $0x1374] sm:$0xf0] }
 0x2fe   :  { %10257 = vmatpush.bf16.msra.mxu1 %v16127_v39  ;;  %10160 = vmatpush.bf16.msra.mxu2 %v16051_v2  ;;  %v15626_v39 = vld [vmem:[#allocation11 + $0xf40] sm:$0xf]  ;;  %v18786_v2 = vld [vmem:[#allocation11 + $0x1404] sm:$0xf0]  ;;  %v16131_v18 = vor.u32 %v18768_v29, %v16130_v15  ;;  %v17060_v40 = vld [vmem:[#allocation11 + $0x1ac0] sm:$0xf0] }
 0x2ff   :  { %v15627_v36 = vor.u32 %v18642_v55, %v15626_v39  ;;  %v14258_v39 = vld [vmem:[#allocation11 + $0x490] sm:$0xf]  ;;  %v18255_v55 = vld [vmem:[#allocation11 + $0x374] sm:$0xf]  ;;  %v18237_v15 = vld [vmem:[#allocation11 + $0x2e4] sm:$0xf] }
 0x300   :  { %10284 = vmatpush.bf16.msra.mxu3 %v17351_v47  ;;  %v15983_v47 = vor.u32 %v18722_v62, %v15980_v43  ;;  %v14471_v62 = vor.u32 %v18344_v57, %v14468_v37  ;;  %v19002_v57 = vld [vmem:[#allocation11 + $0x1ac4] sm:$0xf0]  ;;  %v14044_v29 = vld [vmem:[#allocation11 + $0x328] sm:$0xf0] }
 0x301   :  { %10298 = vmatpush.bf16.msrb.mxu0 %v13899_v4  ;;  %v15843_v4 = vor.u32 %v18696_v49, %v15842_v31  ;;  %v18326_v31 = vld [vmem:[#allocation11 + $0x5ac] sm:$0xf]  ;;  %v14396_v49 = vld [vmem:[#allocation11 + $0x5f0] sm:$0xf0] }
 0x302   :  { %10258 = vmatpush.bf16.msra.mxu1 %v16055_v53  ;;  %10161 = vmatpush.bf16.msra.mxu2 %v15979_v32  ;;  %v18624_v53 = vld [vmem:[#allocation11 + $0xef4] sm:$0xf0]  ;;  %v18354_v32 = vld [vmem:[#allocation11 + $0x684] sm:$0xf0] }
 0x304   :  { %10285 = vmatpush.bf16.msra.mxu3 %v17279_v14  ;;  %v18408_v14 = vld [vmem:[#allocation11 + $0x834] sm:$0xf0] }
 0x305   :  { %10299 = vmatpush.bf16.msrb.mxu0 %v13827_v17  ;;  %v15771_v17 = vor.u32 %v18678_v0, %v15770_v23  ;;  %10162 = vmatmul.bf16.vlgmr.msra.gmra.mxu2 %v19790_v7  ;;  %v14691_v60 = vor.u32 %v18408_v14, %v14690_v13  ;;  %v18308_v23 = vld [vmem:[#allocation11 + $0x51c] sm:$0xf]  ;;  %v14324_v0 = vld [vmem:[#allocation11 + $0x560] sm:$0xf0]  ;;  %v18732_v13 = vld [vmem:[#allocation11 + $0x1254] sm:$0xf0]  ;;  %v14403_v14 = vor.u32 %v18336_v52, %v14402_v6 }
 0x306   :  { %10210 = vmatpush.bf16.msrb.mxu2 %v14759_v11  ;;  %10259 = vmatpush.bf16.msra.mxu1 %v15983_v47  ;;  %v18606_v11 = vld [vmem:[#allocation11 + $0xe64] sm:$0xf0]  ;;  %v18363_v6 = vld [vmem:[#allocation11 + $0x6d4] sm:$0xf]  ;;  %v14548_v52 = vld [vmem:[#allocation11 + $0x718] sm:$0xf0] }
 0x307   :  { %v18750_v47 = vld [vmem:[#allocation11 + $0x12e4] sm:$0xf0] }
 0x308   :  { %10286 = vmatpush.bf16.msra.mxu3 %v17207_v46  ;;  %v18390_v46 = vld [vmem:[#allocation11 + $0x7a4] sm:$0xf0]  ;;  %v16059_v61 = vor.u32 %v18750_v47, %v16058_v34  ;;  %v18219_v34 = vld [vmem:[#allocation11 + $0x254] sm:$0xf]  ;;  %v13972_v47 = vld [vmem:[#allocation11 + $0x298] sm:$0xf0] }
 0x309   :  { %10300 = vmatpush.bf16.msrb.mxu0 %v13755_v19  ;;  %10260 = vmatmul.bf16.vlgmr.msra.gmra.mxu1 %v19790_v7  ;;  %v15699_v19 = vor.u32 %v18660_v63, %v15698_v30  ;;  %v14619_v45 = vor.u32 %v18390_v46, %v14618_v28  ;;  %v18318_v30 = vld [vmem:[#allocation11 + $0x564] sm:$0xf0]  ;;  %v18417_v63 = vld [vmem:[#allocation11 + $0x884] sm:$0xf]  ;;  %v14191_v46 = vor.u32 %v18273_v54, %v14188_v50  ;;  %v13900_v54 = vld [vmem:[#allocation11 + $0x208] sm:$0xf0] }
 0x30a   :  { %10308 = vmatpush.bf16.msrb.mxu1 %v14763_v10  ;;  %10211 = vmatpush.bf16.msrb.mxu2 %v14687_v12  ;;  %v15410_v10 = vld [vmem:[#allocation11 + $0xd90] sm:$0xf] }
 0x30b   :  { %v15986_v12 = vld [vmem:[#allocation11 + $0x1210] sm:$0xf]  ;;  %v15411_v22 = vor.u32 %v18588_v3, %v15410_v10  ;;  %v13975_v10 = vor.u32 %v18219_v34, %v13972_v47  ;;  %v16844_v3 = vld [vmem:[#allocation11 + $0x1910] sm:$0xf0]  ;;  %v16634_v34 = vld [vmem:[#allocation11 + $0x1720] sm:$0xf] }
 0x30c   :  { %10287 = vmatpush.bf16.msra.mxu3 %v17135_v16  ;;  %v16203_v16 = vor.u32 %v18786_v2, %v16202_v25  ;;  %v15987_v28 = vor.u32 %v18732_v13, %v15986_v12  ;;  %v18300_v2 = vld [vmem:[#allocation11 + $0x4d4] sm:$0xf0]  ;;  %v19830_v12 = vpop.f32.mrf.mxu0  ;;  %v19832_v13 = vpop.f32.mrf.mxu1  ;;  %v18849_v47 = vld [vmem:[#allocation11 + $0x1604] sm:$0xf] }
 0x30d   :  { %10301 = vmatpush.bf16.msrb.mxu0 %v13683_v1  ;;  %v15554_v1 = vld [vmem:[#allocation11 + $0xeb0] sm:$0xf] }
 0x30e   :  { %10309 = vmatpush.bf16.msrb.mxu1 %v14691_v60  ;;  %10212 = vmatpush.bf16.msrb.mxu2 %v14615_v8  ;;  %v15555_v43 = vor.u32 %v18624_v53, %v15554_v1  ;;  %v14764_v60 = vld [vmem:[#allocation11 + $0x8c8] sm:$0xf0]  ;;  %v14252_v8 = vld [vmem:[#allocation11 + $0x4d0] sm:$0xf0]  ;;  %v14259_v53 = vor.u32 %v18300_v2, %v14258_v39  ;;  %v14404_v39 = vld [vmem:[#allocation11 + $0x5f8] sm:$0xf0] }
 0x30f   :  { %10288 = vmatmul.bf16.vlgmr.msra.gmra.mxu3 %v19810_v9  ;;  %v14255_v25 = vor.u32 %v18290_v20, %v14252_v8  ;;  %v16988_v1 = vld [vmem:[#allocation11 + $0x1a30] sm:$0xf0]  ;;  %v18920_v8 = vld [vmem:[#allocation11 + $0x183c] sm:$0xf] }
 0x310   :  { %10336 = vmatpush.bf16.msrb.mxu3 %v15915_v58  ;;  %10302 = vmatmul.bf16.vlgmr.msrb.gmra.mxu0 %v19753_v26  ;;  %v14547_v58 = vor.u32 %v18372_v33, %v14546_v42  ;;  %v14692_v42 = vld [vmem:[#allocation11 + $0x838] sm:$0xf0] }
 0x311   :  { %10350 = vmatpush.bf16.msra.mxu0 %v16491_v56  ;;  %v14474_v56 = vld [vmem:[#allocation11 + $0x640] sm:$0xf] }
 0x312   :  { %10310 = vmatpush.bf16.msrb.mxu1 %v14619_v45  ;;  %10213 = vmatpush.bf16.msrb.mxu2 %v14543_v51  ;;  %v14475_v48 = vor.u32 %v18354_v32, %v14474_v56  ;;  %v14116_v45 = vld [vmem:[#allocation11 + $0x3b8] sm:$0xf0]  ;;  %v18399_v51 = vld [vmem:[#allocation11 + $0x7f4] sm:$0xf]  ;;  %v18381_v56 = vld [vmem:[#allocation11 + $0x764] sm:$0xf] }
 0x313   :  { %v14119_v37 = vor.u32 %v18255_v55, %v14116_v45  ;;  %v14620_v32 = vld [vmem:[#allocation11 + $0x7a8] sm:$0xf0]  ;;  %v16778_v45 = vld [vmem:[#allocation11 + $0x1840] sm:$0xf] }
 0x314   :  { %10337 = vmatpush.bf16.msrb.mxu3 %v15843_v4  ;;  %v14399_v4 = vor.u32 %v18326_v31, %v14396_v49  ;;  %v16994_v31 = vld [vmem:[#allocation11 + $0x19f0] sm:$0xf]  ;;  %v18984_v49 = vld [vmem:[#allocation11 + $0x1a34] sm:$0xf0] }
 0x315   :  { %10351 = vmatpush.bf16.msra.mxu0 %v16419_v35  ;;  %v15483_v35 = vor.u32 %v18606_v11, %v15482_v38  ;;  %v18956_v38 = vld [vmem:[#allocation11 + $0x195c] sm:$0xf]  ;;  %v16916_v11 = vld [vmem:[#allocation11 + $0x19a0] sm:$0xf0] }
 0x316   :  { %10311 = vmatpush.bf16.msrb.mxu1 %v14547_v58  ;;  %10214 = vmatpush.bf16.msrb.mxu2 %v14471_v62  ;;  %v14695_v58 = vor.u32 %v18399_v51, %v14692_v42  ;;  %v18902_v51 = vld [vmem:[#allocation11 + $0x17ac] sm:$0xf]  ;;  %v16700_v42 = vld [vmem:[#allocation11 + $0x17f0] sm:$0xf0] }
 0x318   :  { %10338 = vmatpush.bf16.msrb.mxu3 %v15771_v17  ;;  %v14330_v17 = vld [vmem:[#allocation11 + $0x520] sm:$0xf] }
 0x319   :  { %10352 = vmatpush.bf16.msra.mxu0 %v16347_v21  ;;  %v14327_v21 = vor.u32 %v18308_v23, %v14324_v0  ;;  %v14331_v59 = vor.u32 %v18318_v30, %v14330_v17  ;;  %v16922_v23 = vld [vmem:[#allocation11 + $0x1960] sm:$0xf]  ;;  %v18966_v0 = vld [vmem:[#allocation11 + $0x19a4] sm:$0xf0]  ;;  %v18201_v17 = vld [vmem:[#allocation11 + $0x1c4] sm:$0xf] }
 0x31a   :  { %10312 = vmatpush.bf16.msrb.mxu1 %v14475_v48  ;;  %10215 = vmatpush.bf16.msrb.mxu2 %v14399_v4  ;;  %v14623_v48 = vor.u32 %v18381_v56, %v14620_v32  ;;  %v16995_v4 = vor.u32 %v18984_v49, %v16994_v31  ;;  %v16923_v50 = vor.u32 %v18966_v0, %v16922_v23  ;;  %v14476_v30 = vld [vmem:[#allocation11 + $0x688] sm:$0xf0]  ;;  %v18884_v32 = vld [vmem:[#allocation11 + $0x171c] sm:$0xf]  ;;  %v18147_v31 = vld [vmem:[#allocation11 + $0x14] sm:$0xf] }
 0x31b   :  { %v13903_v20 = vor.u32 %v18201_v17, %v13900_v54  ;;  %v17068_v23 = vld [vmem:[#allocation11 + $0x1ac8] sm:$0xf0]  ;;  %v15338_v54 = vld [vmem:[#allocation11 + $0xd00] sm:$0xf] }
 0x31c   :  { %10339 = vmatpush.bf16.msrb.mxu3 %v15699_v19  ;;  %v18992_v19 = vld [vmem:[#allocation11 + $0x1a7c] sm:$0xf] }
 0x31d   :  { %10353 = vmatpush.bf16.msra.mxu0 %v16275_v27  ;;  %v14767_v27 = vor.u32 %v18417_v63, %v14764_v60  ;;  %v17063_v33 = vor.u32 %v18992_v19, %v17060_v40  ;;  %v16850_v60 = vld [vmem:[#allocation11 + $0x18d0] sm:$0xf]  ;;  %v18183_v19 = vld [vmem:[#allocation11 + $0x134] sm:$0xf]  ;;  %v13828_v40 = vld [vmem:[#allocation11 + $0x178] sm:$0xf0] }
 0x31e   :  { %10313 = vmatpush.bf16.msrb.mxu1 %v14403_v14  ;;  %10216 = vmatpush.bf16.msrb.mxu2 %v14327_v21  ;;  %v14551_v14 = vor.u32 %v18363_v6, %v14548_v52  ;;  %v18345_v21 = vld [vmem:[#allocation11 + $0x644] sm:$0xf]  ;;  %v13831_v2 = vor.u32 %v18183_v19, %v13828_v40  ;;  %v18894_v52 = vld [vmem:[#allocation11 + $0x1764] sm:$0xf0]  ;;  %v18876_v19 = vld [vmem:[#allocation11 + $0x16d4] sm:$0xf0] }
 0x31f   :  { %v18975_v40 = vld [vmem:[#allocation11 + $0x19f4] sm:$0xf] }
 0x320   :  { %10340 = vmatpush.bf16.msrb.mxu3 %v15627_v36  ;;  %v17066_v36 = vld [vmem:[#allocation11 + $0x1a80] sm:$0xf] }
 0x321   :  { %10354 = vmatpush.bf16.msra.mxu0 %v16203_v16  ;;  %v18974_v16 = vld [vmem:[#allocation11 + $0x19ec] sm:$0xf]  ;;  %v17067_v62 = vor.u32 %v19002_v57, %v17066_v36  ;;  %v18165_v36 = vld [vmem:[#allocation11 + $0xa4] sm:$0xf] }
 0x322   :  { %10314 = vmatpush.bf16.msrb.mxu1 %v14331_v59  ;;  %10217 = vmatpush.bf16.msrb.mxu2 %v14255_v25  ;;  %v18930_v25 = vld [vmem:[#allocation11 + $0x1884] sm:$0xf0]  ;;  %v13756_v57 = vld [vmem:[#allocation11 + $0xe8] sm:$0xf0] }
 0x323   :  { %v13759_v56 = vor.u32 %v18165_v36, %v13756_v57  ;;  %v16348_v36 = vld [vmem:[#allocation11 + $0x1528] sm:$0xf0] }
 0x324   :  { %10341 = vmatpush.bf16.msrb.mxu3 %v15555_v43  ;;  %v16991_v43 = vor.u32 %v18974_v16, %v16988_v1  ;;  %v18309_v16 = vld [vmem:[#allocation11 + $0x524] sm:$0xf]  ;;  %v14332_v1 = vld [vmem:[#allocation11 + $0x568] sm:$0xf0] }
 0x325   :  { %10355 = vmatpush.bf16.msra.mxu0 %v16131_v18  ;;  %v14047_v18 = vor.u32 %v18237_v15, %v14044_v29  ;;  %10218 = vmatmul.bf16.vlgmr.msrb.gmra.mxu2 %v19770_v44  ;;  %v16703_v15 = vor.u32 %v18902_v51, %v16700_v42  ;;  %v16706_v29 = vld [vmem:[#allocation11 + $0x17b0] sm:$0xf]  ;;  %v14335_v49 = vor.u32 %v18309_v16, %v14332_v1  ;;  %v16924_v16 = vld [vmem:[#allocation11 + $0x19a8] sm:$0xf0] }
 0x326   :  { %10266 = vmatpush.bf16.msra.mxu2 %v17063_v33  ;;  %10315 = vmatpush.bf16.msrb.mxu1 %v14259_v53  ;;  %v19834_v53 = vpop.f32.mrf.mxu0 }
 0x328   :  { %10342 = vmatpush.bf16.msrb.mxu3 %v15483_v35  ;;  %v16919_v35 = vor.u32 %v18956_v38, %v16916_v11  ;;  %v18291_v38 = vld [vmem:[#allocation11 + $0x494] sm:$0xf]  ;;  %v14260_v11 = vld [vmem:[#allocation11 + $0x4d8] sm:$0xf0] }
 0x329   :  { %10356 = vmatpush.bf16.msra.mxu0 %v16059_v61  ;;  %10316 = vmatmul.bf16.vlgmr.msrb.gmra.mxu1 %v19770_v44  ;;  %v18938_v61 = vld [vmem:[#allocation11 + $0x18cc] sm:$0xf] }
 0x32a   :  { %10364 = vmatpush.bf16.msra.mxu1 %v17067_v62  ;;  %10267 = vmatpush.bf16.msra.mxu2 %v16991_v43  ;;  %v16847_v63 = vor.u32 %v18938_v61, %v16844_v3  ;;  %v18912_v62 = vld [vmem:[#allocation11 + $0x17f4] sm:$0xf0]  ;;  %v16628_v43 = vld [vmem:[#allocation11 + $0x1760] sm:$0xf0]  ;;  %v16556_v61 = vld [vmem:[#allocation11 + $0x16d0] sm:$0xf0]  ;;  %v19838_v3 = vpop.f32.mrf.mxu3 }
 0x32b   :  { %v16631_v6 = vor.u32 %v18884_v32, %v16628_v43  ;;  %v18534_v32 = vld [vmem:[#allocation11 + $0xc24] sm:$0xf0] }
 0x32c   :  { %10343 = vmatpush.bf16.msrb.mxu3 %v15411_v22  ;;  %v18948_v22 = vld [vmem:[#allocation11 + $0x1914] sm:$0xf0] }
 0x32d   :  { %10357 = vmatpush.bf16.msra.mxu0 %v15987_v28  ;;  %v16772_v28 = vld [vmem:[#allocation11 + $0x1880] sm:$0xf0]  ;;  %v16851_v59 = vor.u32 %v18948_v22, %v16850_v60  ;;  %v16562_v60 = vld [vmem:[#allocation11 + $0x1690] sm:$0xf]  ;;  %v18831_v22 = vld [vmem:[#allocation11 + $0x1574] sm:$0xf] }
 0x32e   :  { %10365 = vmatpush.bf16.msra.mxu1 %v16995_v4  ;;  %10268 = vmatpush.bf16.msra.mxu2 %v16919_v35  ;;  %v16775_v55 = vor.u32 %v18920_v8, %v16772_v28  ;;  %v16492_v4 = vld [vmem:[#allocation11 + $0x1648] sm:$0xf0]  ;;  %v18993_v35 = vld [vmem:[#allocation11 + $0x1a84] sm:$0xf]  ;;  %v19842_v8 = vpop.f32.mrf.mxu0  ;;  %v16563_v51 = vor.u32 %v18876_v19, %v16562_v60  ;;  %v15050_v19 = vld [vmem:[#allocation11 + $0xac0] sm:$0xf] }
 0x32f   :  { %10344 = vmatmul.bf16.vlgmr.msrb.gmra.mxu3 %v19787_v41  ;;  %v16495_v17 = vor.u32 %v18849_v47, %v16492_v4  ;;  %v18525_v4 = vld [vmem:[#allocation11 + $0xbe4] sm:$0xf] }
 0x330   :  { %10392 = vmatpush.bf16.msra.mxu3 %v14191_v46  ;;  %10358 = vmatmul.bf16.vlgmr.msra.gmra.mxu0 %v19790_v7  ;;  %v14479_v46 = vor.u32 %v18345_v21, %v14476_v30  ;;  %v19840_v21 = vpop.f32.mrf.mxu2  ;;  %v16635_v30 = vor.u32 %v18894_v52, %v16634_v34 }
 0x331   :  { %10406 = vmatpush.bf16.msrb.mxu0 %v14767_v27  ;;  %v18327_v27 = vld [vmem:[#allocation11 + $0x5b4] sm:$0xf] }
 0x332   :  { %10366 = vmatpush.bf16.msra.mxu1 %v16923_v50  ;;  %10269 = vmatpush.bf16.msra.mxu2 %v16847_v63  ;;  %v14407_v33 = vor.u32 %v18327_v27, %v14404_v39  ;;  %v18570_v50 = vld [vmem:[#allocation11 + $0xd44] sm:$0xf0]  ;;  %v17071_v63 = vor.u32 %v18993_v35, %v17068_v23  ;;  %v18561_v39 = vld [vmem:[#allocation11 + $0xd04] sm:$0xf] }
 0x333   :  { %v15339_v27 = vor.u32 %v18570_v50, %v15338_v54  ;;  %v19858_v54 = vld [vmem:[#allocation13] sm:$0xff] }
 0x334   :  { %10393 = vmatpush.bf16.msra.mxu3 %v14119_v37  ;;  %v16779_v37 = vor.u32 %v18930_v25, %v16778_v45  ;;  %v15266_v25 = vld [vmem:[#allocation11 + $0xc70] sm:$0xf] }
 0x335   :  { %10407 = vmatpush.bf16.msrb.mxu0 %v14695_v58  ;;  %v19836_v58 = vpop.f32.mrf.mxu1 }
 0x336   :  { %10367 = vmatpush.bf16.msra.mxu1 %v16851_v59  ;;  %10270 = vmatpush.bf16.msra.mxu2 %v16775_v55  ;;  %v16996_v59 = vld [vmem:[#allocation11 + $0x1a38] sm:$0xf0]  ;;  %v15340_v55 = vld [vmem:[#allocation11 + $0xd48] sm:$0xf0]  ;;  %v19853_v52 = vpop.f32.mrf.mxu0 }
 0x337   :  { %v16999_v42 = vor.u32 %v18975_v40, %v16996_v59  ;;  %v15343_v57 = vor.u32 %v18561_v39, %v15340_v55  ;;  %v18498_v40 = vld [vmem:[#allocation11 + $0xb04] sm:$0xf0]  ;;  %v4826_v59 = vperm.slane %v19858_v54, 0  ;;  %v18759_v39 = vld [vmem:[#allocation11 + $0x1334] sm:$0xf] }
 0x338   :  { %10394 = vmatpush.bf16.msra.mxu3 %v14047_v18  ;;  %v13684_v18 = vld [vmem:[#allocation11 + $0x58] sm:$0xf0]  ;;  %v19851_v34 = vpop.f32.mrf.mxu2 }
 0x339   :  { %10408 = vmatpush.bf16.msrb.mxu0 %v14623_v48  ;;  %v16707_v48 = vor.u32 %v18912_v62, %v16706_v29  ;;  %v13687_v0 = vor.u32 %v18147_v31, %v13684_v18  ;;  %v15268_v29 = vld [vmem:[#allocation11 + $0xcb8] sm:$0xf0]  ;;  %v18795_v31 = vld [vmem:[#allocation11 + $0x1454] sm:$0xf]  ;;  %v19848_v18 = vpop.f32.mrf.mxu3 }
 0x33a   :  { %10368 = vmatpush.bf16.msra.mxu1 %v16779_v37  ;;  %10271 = vmatpush.bf16.msra.mxu2 %v16703_v15  ;;  %v18957_v37 = vld [vmem:[#allocation11 + $0x1964] sm:$0xf]  ;;  %v18543_v15 = vld [vmem:[#allocation11 + $0xc74] sm:$0xf]  ;;  %v16132_v55 = vld [vmem:[#allocation11 + $0x1378] sm:$0xf0] }
 0x33b   :  { %v16927_v43 = vor.u32 %v18957_v37, %v16924_v16  ;;  %v16135_v16 = vor.u32 %v18759_v39, %v16132_v55  ;;  %v9914_v39 = vadd.f32 %v19834_v53, %v4826_v59 }
 0x33c   :  { %10395 = vmatpush.bf16.msra.mxu3 %v13975_v10  ;;  %v18866_v10 = vld [vmem:[#allocation11 + $0x168c] sm:$0xf] }
 0x33d   :  { %10409 = vmatpush.bf16.msrb.mxu0 %v14551_v14  ;;  %v14263_v14 = vor.u32 %v18291_v38, %v14260_v11  ;;  %v19844_v28 = vpop.f32.mrf.mxu1  ;;  %v15271_v38 = vor.u32 %v18543_v15, %v15268_v29  ;;  %v18939_v11 = vld [vmem:[#allocation11 + $0x18d4] sm:$0xf]  ;;  %v18480_v15 = vld [vmem:[#allocation11 + $0xa74] sm:$0xf0]  ;;  %v9912_v29 = vadd.f32 %v19830_v12, %v4826_v59 }
 0x33e   :  { %10369 = vmatpush.bf16.msra.mxu1 %v16707_v48  ;;  %10272 = vmatpush.bf16.msra.mxu2 %v16631_v6  ;;  %v16852_v48 = vld [vmem:[#allocation11 + $0x1918] sm:$0xf0]  ;;  %v15196_v6 = vld [vmem:[#allocation11 + $0xc28] sm:$0xf0] }
 0x33f   :  { %v15199_v50 = vor.u32 %v18525_v4, %v15196_v6  ;;  %v18471_v4 = vld [vmem:[#allocation11 + $0xa34] sm:$0xf]  ;;  %v14980_v6 = vld [vmem:[#allocation11 + $0xa78] sm:$0xf0] }
 0x340   :  { %10396 = vmatpush.bf16.msra.mxu3 %v13903_v20  ;;  %v16420_v20 = vld [vmem:[#allocation11 + $0x15b8] sm:$0xf0] }
 0x341   :  { %10410 = vmatpush.bf16.msrb.mxu0 %v14479_v46  ;;  %v16559_v46 = vor.u32 %v18866_v10, %v16556_v61  ;;  %v16423_v45 = vor.u32 %v18831_v22, %v16420_v20  ;;  %v18516_v10 = vld [vmem:[#allocation11 + $0xb94] sm:$0xf0]  ;;  %v16855_v61 = vor.u32 %v18939_v11, %v16852_v48  ;;  %v18507_v22 = vld [vmem:[#allocation11 + $0xb54] sm:$0xf]  ;;  %v15124_v20 = vld [vmem:[#allocation11 + $0xb98] sm:$0xf0]  ;;  %v9926_v11 = vadd.f32 %v19832_v13, %v9912_v29 }
 0x342   :  { %10370 = vmatpush.bf16.msra.mxu1 %v16635_v30  ;;  %v18921_v30 = vld [vmem:[#allocation11 + $0x1844] sm:$0xf]  ;;  %v4827_v48 = vperm.slane %v19858_v54, 1  ;;  %v14983_v13 = vor.u32 %v18471_v4, %v14980_v6  ;;  %v18435_v29 = vld [vmem:[#allocation11 + $0x914] sm:$0xf] }
 0x343   :  { %10273 = vmatpush.bf16.msra.mxu2 %v16559_v46  ;;  %v19137_v4 = vld [vmem:[#allocation11 + $0x1f04] sm:$0xf]  ;;  %v17644_v6 = vld [vmem:[#allocation11 + $0x1f48] sm:$0xf0] }
 0x344   :  { %10397 = vmatpush.bf16.msra.mxu3 %v13831_v2  ;;  %v18552_v2 = vld [vmem:[#allocation11 + $0xcb4] sm:$0xf0] }
 0x345   :  { %10411 = vmatpush.bf16.msrb.mxu0 %v14407_v33  ;;  %v18813_v33 = vld [vmem:[#allocation11 + $0x14e4] sm:$0xf]  ;;  %v15267_v1 = vor.u32 %v18552_v2, %v15266_v25  ;;  %v19855_v35 = vpop.f32.mrf.mxu1  ;;  %v15127_v25 = vor.u32 %v18507_v22, %v15124_v20  ;;  %v18903_v2 = vld [vmem:[#allocation11 + $0x17b4] sm:$0xf]  ;;  %v18427_v22 = vld [vmem:[#allocation11 + $0x8cc] sm:$0xf0] }
 0x346   :  { %v16351_v62 = vor.u32 %v18813_v33, %v16348_v36  ;;  %10371 = vmatpush.bf16.msra.mxu1 %v16563_v51  ;;  %10274 = vmatmul.bf16.vlgmr.msra.gmra.mxu2 %v19797_v24  ;;  %v16708_v51 = vld [vmem:[#allocation11 + $0x17f8] sm:$0xf0]  ;;  %v18489_v33 = vld [vmem:[#allocation11 + $0xac4] sm:$0xf]  ;;  %v15052_v36 = vld [vmem:[#allocation11 + $0xb08] sm:$0xf0] }
 0x347   :  { %10322 = vmatpush.bf16.msrb.mxu2 %v15339_v27  ;;  %v19863_v37 = vpop.f32.mrf.mxu2 }
 0x348   :  { %10398 = vmatpush.bf16.msra.mxu3 %v13759_v56  ;;  %v15194_v56 = vld [vmem:[#allocation11 + $0xbe0] sm:$0xf] }
 0x349   :  { %10412 = vmatpush.bf16.msrb.mxu0 %v14335_v49  ;;  %v16276_v49 = vld [vmem:[#allocation11 + $0x1498] sm:$0xf0]  ;;  %v15195_v47 = vor.u32 %v18534_v32, %v15194_v56  ;;  %10372 = vmatmul.bf16.vlgmr.msra.gmra.mxu1 %v19797_v24  ;;  %v18741_v56 = vld [vmem:[#allocation11 + $0x12a4] sm:$0xf]  ;;  %v16060_v32 = vld [vmem:[#allocation11 + $0x12e8] sm:$0xf0] }
 0x34a   :  { %10420 = vmatpush.bf16.msrb.mxu1 %v15343_v57  ;;  %v16279_v23 = vor.u32 %v18795_v31, %v16276_v49  ;;  %v19861_v57 = vpop.f32.mrf.mxu0  ;;  %v15055_v31 = vor.u32 %v18489_v33, %v15052_v36  ;;  %v18885_v49 = vld [vmem:[#allocation11 + $0x1724] sm:$0xf]  ;;  %v16063_v12 = vor.u32 %v18741_v56, %v16060_v32  ;;  %v17642_v36 = vld [vmem:[#allocation11 + $0x1f00] sm:$0xf] }
 0x34b   :  { %10323 = vmatpush.bf16.msrb.mxu2 %v15267_v1  ;;  %v14978_v1 = vld [vmem:[#allocation11 + $0xa30] sm:$0xf]  ;;  %v18409_v56 = vld [vmem:[#allocation11 + $0x83c] sm:$0xf0] }
 0x34c   :  { %10399 = vmatpush.bf16.msra.mxu3 %v13687_v0  ;;  %v15122_v0 = vld [vmem:[#allocation11 + $0xb50] sm:$0xf] }
 0x34d   :  { %10413 = vmatpush.bf16.msrb.mxu0 %v14263_v14  ;;  %v18777_v14 = vld [vmem:[#allocation11 + $0x13c4] sm:$0xf]  ;;  %v15123_v60 = vor.u32 %v18516_v10, %v15122_v0  ;;  %v18462_v0 = vld [vmem:[#allocation11 + $0x9e4] sm:$0xf0]  ;;  %v18723_v10 = vld [vmem:[#allocation11 + $0x1214] sm:$0xf] }
 0x34e   :  { %10421 = vmatpush.bf16.msrb.mxu1 %v15271_v38  ;;  %v16636_v38 = vld [vmem:[#allocation11 + $0x1768] sm:$0xf0] }
 0x34f   :  { %10400 = vmatmul.bf16.vlgmr.msra.gmra.mxu3 %v19753_v26  ;;  %10324 = vmatpush.bf16.msrb.mxu2 %v15195_v47  ;;  %v14979_v47 = vor.u32 %v18480_v15, %v14978_v1  ;;  %v19873_v55 = vpop.f32.mrf.mxu2  ;;  %v9928_v1 = vadd.f32 %v19836_v58, %v9914_v39 }
 0x350   :  { %10448 = vmatpush.bf16.msrb.mxu3 %v16495_v17  ;;  %10414 = vmatmul.bf16.vlgmr.msrb.gmra.mxu0 %v19770_v44  ;;  %v16204_v17 = vld [vmem:[#allocation11 + $0x1408] sm:$0xf0] }
 0x351   :  { %10462 = vmatpush.bf16.msra.mxu0 %v17071_v63  ;;  %v16780_v63 = vld [vmem:[#allocation11 + $0x1888] sm:$0xf0]  ;;  %v16207_v46 = vor.u32 %v18777_v14, %v16204_v17  ;;  %v16639_v14 = vor.u32 %v18885_v49, %v16636_v38  ;;  %v15988_v17 = vld [vmem:[#allocation11 + $0x1258] sm:$0xf0]  ;;  %v15274_v49 = vld [vmem:[#allocation11 + $0xc78] sm:$0xf] }
 0x352   :  { %v16783_v27 = vor.u32 %v18921_v30, %v16780_v63  ;;  %10422 = vmatpush.bf16.msrb.mxu1 %v15199_v50  ;;  %v18867_v50 = vld [vmem:[#allocation11 + $0x1694] sm:$0xf]  ;;  %v16564_v30 = vld [vmem:[#allocation11 + $0x16d8] sm:$0xf0]  ;;  %v18453_v63 = vld [vmem:[#allocation11 + $0x9a4] sm:$0xf]  ;;  %v19878_v15 = vpop.f32.mrf.mxu0 }
 0x353   :  { %10325 = vmatpush.bf16.msrb.mxu2 %v15123_v60  ;;  %v14770_v60 = vld [vmem:[#allocation11 + $0x888] sm:$0xf]  ;;  %v16567_v33 = vor.u32 %v18867_v50, %v16564_v30  ;;  %v18553_v38 = vld [vmem:[#allocation11 + $0xcbc] sm:$0xf0]  ;;  %v18391_v50 = vld [vmem:[#allocation11 + $0x7ac] sm:$0xf0] }
 0x354   :  { %10449 = vmatpush.bf16.msrb.mxu3 %v16423_v45  ;;  %v10009_v45 = vpop.f32.mrf.mxu3 }
 0x355   :  { %10463 = vmatpush.bf16.msra.mxu0 %v16999_v42  ;;  %v15051_v42 = vor.u32 %v18498_v40, %v15050_v19  ;;  %v14908_v19 = vld [vmem:[#allocation11 + $0x9e8] sm:$0xf0]  ;;  %v15346_v40 = vld [vmem:[#allocation11 + $0xd08] sm:$0xf] }
 0x356   :  { %10423 = vmatpush.bf16.msrb.mxu1 %v15127_v25  ;;  %v15991_v25 = vor.u32 %v18723_v10, %v15988_v17  ;;  %v14911_v53 = vor.u32 %v18453_v63, %v14908_v19  ;;  %v19128_v10 = vld [vmem:[#allocation11 + $0x1eb4] sm:$0xf0]  ;;  %v14626_v17 = vld [vmem:[#allocation11 + $0x768] sm:$0xf]  ;;  %v18535_v63 = vld [vmem:[#allocation11 + $0xc2c] sm:$0xf0] }
 0x357   :  { %10326 = vmatpush.bf16.msrb.mxu2 %v15051_v42  ;;  %v10010_v42 = vadd.f32 %v10009_v45, %v4827_v48  ;;  %v14836_v45 = vld [vmem:[#allocation11 + $0x958] sm:$0xf0] }
 0x358   :  { %10450 = vmatpush.bf16.msrb.mxu3 %v16351_v62  ;;  %v16711_v62 = vor.u32 %v18903_v2, %v16708_v51  ;;  %v14834_v2 = vld [vmem:[#allocation11 + $0x910] sm:$0xf]  ;;  %v18444_v51 = vld [vmem:[#allocation11 + $0x954] sm:$0xf0]  ;;  %v17572_v19 = vld [vmem:[#allocation11 + $0x1eb8] sm:$0xf0] }
 0x359   :  { %10464 = vmatpush.bf16.msra.mxu0 %v16927_v43  ;;  %v19866_v43 = vpop.f32.mrf.mxu1 }
 0x35a   :  { %10424 = vmatpush.bf16.msrb.mxu1 %v15055_v31  ;;  %v14835_v31 = vor.u32 %v18444_v51, %v14834_v2  ;;  %v10079_v39 = vpop.f32.mrf.mxu0  ;;  %v14554_v2 = vld [vmem:[#allocation11 + $0x6d8] sm:$0xf]  ;;  %v18373_v51 = vld [vmem:[#allocation11 + $0x71c] sm:$0xf0] }
 0x35b   :  { %10327 = vmatpush.bf16.msrb.mxu2 %v14979_v47 }
 0x35c   :  { %10451 = vmatpush.bf16.msrb.mxu3 %v16279_v23  ;;  %v14906_v23 = vld [vmem:[#allocation11 + $0x9a0] sm:$0xf] }
 0x35d   :  { %10465 = vmatpush.bf16.msra.mxu0 %v16855_v61  ;;  %v9940_v61 = vadd.f32 %v19840_v21, %v9926_v11  ;;  %v10011_v21 = vpop.f32.mrf.mxu3  ;;  %v9942_v11 = vadd.f32 %v19851_v34, %v9928_v1  ;;  %v14839_v34 = vor.u32 %v18435_v29, %v14836_v45  ;;  %v17500_v29 = vld [vmem:[#allocation11 + $0x1e28] sm:$0xf0] }
 0x35e   :  { %10425 = vmatpush.bf16.msrb.mxu1 %v14983_v13 }
 0x35f   :  { %v9954_v20 = vadd.f32 %v19838_v3, %v9940_v61  ;;  %v14771_v3 = vor.u32 %v18427_v22, %v14770_v60  ;;  %v9956_v61 = vadd.f32 %v19848_v18, %v9942_v11  ;;  %v10012_v60 = vadd.f32 %v10011_v21, %v4827_v48  ;;  %v10051_v22 = vpop.f32.mrf.mxu2 }
 0x360   :  { %10452 = vmatpush.bf16.msrb.mxu3 %v16207_v46  ;;  %v14907_v46 = vor.u32 %v18462_v0, %v14906_v23  ;;  %v10024_v23 = vadd.f32 %v19861_v57, %v10010_v42  ;;  %v17570_v0 = vld [vmem:[#allocation11 + $0x1e70] sm:$0xf]  ;;  %v15202_v57 = vld [vmem:[#allocation11 + $0xbe8] sm:$0xf] }
 0x361   :  { %10466 = vmatpush.bf16.msra.mxu0 %v16783_v27  ;;  %v18571_v27 = vld [vmem:[#allocation11 + $0xd4c] sm:$0xf0]  ;;  %v9968_v32 = vadd.f32 %v19842_v8, %v9954_v20  ;;  %v19882_v47 = vpop.f32.mrf.mxu1  ;;  %v17571_v20 = vor.u32 %v19128_v10, %v17570_v0  ;;  %v9970_v48 = vadd.f32 %v19853_v52, %v9956_v61  ;;  %v14555_v52 = vor.u32 %v18373_v51, %v14554_v2  ;;  %v17428_v0 = vld [vmem:[#allocation11 + $0x1d98] sm:$0xf0] }
 0x362   :  { %v15347_v59 = vor.u32 %v18571_v27, %v15346_v40  ;;  %10328 = vmatpush.bf16.msrb.mxu2 %v14907_v46  ;;  %10426 = vmatpush.bf16.msrb.mxu1 %v14911_v53  ;;  %v10038_v30 = vadd.f32 %v19866_v43, %v10024_v23  ;;  %v19119_v46 = vld [vmem:[#allocation11 + $0x1e74] sm:$0xf]  ;;  %v17498_v40 = vld [vmem:[#allocation11 + $0x1de0] sm:$0xf]  ;;  %v19110_v27 = vld [vmem:[#allocation11 + $0x1e24] sm:$0xf0] }
 0x363   :  { %v17499_v53 = vor.u32 %v19110_v27, %v17498_v40  ;;  %v17282_v40 = vld [vmem:[#allocation11 + $0x1c30] sm:$0xf]  ;;  %v19056_v27 = vld [vmem:[#allocation11 + $0x1c74] sm:$0xf0] }
 0x364   :  { %10453 = vmatpush.bf16.msrb.mxu3 %v16135_v16  ;;  %v19146_v16 = vld [vmem:[#allocation11 + $0x1f44] sm:$0xf0]  ;;  %v10052_v43 = vadd.f32 %v10051_v22, %v10038_v30  ;;  %v18337_v30 = vld [vmem:[#allocation11 + $0x5fc] sm:$0xf0]  ;;  %v18319_v51 = vld [vmem:[#allocation11 + $0x56c] sm:$0xf0] }
 0x365   :  { %10467 = vmatpush.bf16.msra.mxu0 %v16711_v62  ;;  %v14698_v62 = vld [vmem:[#allocation11 + $0x7f8] sm:$0xf]  ;;  %v17643_v58 = vor.u32 %v19146_v16, %v17642_v36  ;;  %v10065_v18 = vpop.f32.mrf.mxu3  ;;  %v18517_v36 = vld [vmem:[#allocation11 + $0xb9c] sm:$0xf0]  ;;  %v10026_v16 = vadd.f32 %v19878_v15, %v10012_v60  ;;  %v18355_v15 = vld [vmem:[#allocation11 + $0x68c] sm:$0xf0] }
 0x366   :  { %v14699_v8 = vor.u32 %v18409_v56, %v14698_v62  ;;  %10329 = vmatpush.bf16.msrb.mxu2 %v14835_v31  ;;  %10427 = vmatpush.bf16.msrb.mxu1 %v14839_v34  ;;  %v10066_v42 = vadd.f32 %v10065_v18, %v10052_v43  ;;  %v9984_v62 = vadd.f32 %v19855_v35, %v9970_v48  ;;  %v19092_v31 = vld [vmem:[#allocation11 + $0x1d94] sm:$0xf0]  ;;  %v15058_v35 = vld [vmem:[#allocation11 + $0xac8] sm:$0xf]  ;;  %v17354_v34 = vld [vmem:[#allocation11 + $0x1cc0] sm:$0xf]  ;;  %v10081_v18 = vpop.f32.mrf.mxu0 }
 0x367   :  { %v10040_v45 = vadd.f32 %v19882_v47, %v10026_v16  ;;  %v18481_v60 = vld [vmem:[#allocation11 + $0xa7c] sm:$0xf0]  ;;  %v14914_v48 = vld [vmem:[#allocation11 + $0x9a8] sm:$0xf] }
 0x368   :  { %10454 = vmatpush.bf16.msrb.mxu3 %v16063_v12  ;;  %v9982_v12 = vadd.f32 %v19844_v28, %v9968_v32  ;;  %v17647_v28 = vor.u32 %v19137_v4, %v17644_v6  ;;  %v10080_v56 = vadd.f32 %v10079_v39, %v10066_v42  ;;  %v17426_v32 = vld [vmem:[#allocation11 + $0x1d50] sm:$0xf]  ;;  %v9998_v11 = vadd.f32 %v19873_v55, %v9984_v62  ;;  %v14410_v55 = vld [vmem:[#allocation11 + $0x5b8] sm:$0xf]  ;;  %v14338_v39 = vld [vmem:[#allocation11 + $0x528] sm:$0xf] }
 0x369   :  { %10468 = vmatpush.bf16.msra.mxu0 %v16639_v14  ;;  %v15275_v14 = vor.u32 %v18553_v38, %v15274_v49  ;;  %10330 = vmatmul.bf16.vlgmr.msrb.gmra.mxu2 %v19768_v5  ;;  %v10093_v1 = vpop.f32.mrf.mxu1  ;;  %v14482_v38 = vld [vmem:[#allocation11 + $0x648] sm:$0xf]  ;;  %v18499_v6 = vld [vmem:[#allocation11 + $0xb0c] sm:$0xf0]  ;;  %v17427_v23 = vor.u32 %v19092_v31, %v17426_v32  ;;  %v17210_v16 = vld [vmem:[#allocation11 + $0x1ba0] sm:$0xf] }
 0x36a   :  { %v9996_v13 = vadd.f32 %v19863_v37, %v9982_v12  ;;  %10378 = vmatpush.bf16.msra.mxu2 %v17643_v58  ;;  %v14627_v37 = vor.u32 %v18391_v50, %v14626_v17  ;;  %10476 = vmatpush.bf16.msra.mxu1 %v17647_v28  ;;  %v10094_v58 = vadd.f32 %v10093_v1, %v10080_v56  ;;  %v10053_v12 = vpop.f32.mrf.mxu2  ;;  %v18301_v32 = vld [vmem:[#allocation11 + $0x4dc] sm:$0xf0]  ;;  %v14842_v31 = vld [vmem:[#allocation11 + $0x918] sm:$0xf] }
 0x36b   :  { %10428 = vmatmul.bf16.vlgmr.msrb.gmra.mxu1 %v19768_v5  ;;  %v10054_v47 = vadd.f32 %v10053_v12, %v10040_v45  ;;  %v14483_v61 = vor.u32 %v18355_v15, %v14482_v38  ;;  %v15059_v50 = vor.u32 %v18499_v6, %v15058_v35  ;;  %v18445_v38 = vld [vmem:[#allocation11 + $0x95c] sm:$0xf0]  ;;  %v19029_v15 = vld [vmem:[#allocation11 + $0x1ba4] sm:$0xf]  ;;  %v19003_v35 = vld [vmem:[#allocation11 + $0x1acc] sm:$0xf0] }
 0x36c   :  { %10455 = vmatpush.bf16.msrb.mxu3 %v15991_v25  ;;  %v15203_v25 = vor.u32 %v18535_v63, %v15202_v57  ;;  %v11666_v21 = vmul.f32 0.5, %v9996_v13  ;;  %v11667_v10 = vmul.f32 0.5, %v10094_v58  ;;  %v11684_v13 = vmul.f32 0.5, %v9998_v11  ;;  %v14986_v63 = vld [vmem:[#allocation11 + $0xa38] sm:$0xf] }
 0x36d   :  { %10469 = vmatpush.bf16.msra.mxu0 %v16567_v33  ;;  %v17575_v33 = vor.u32 %v19119_v46, %v17572_v19  ;;  %v10067_v17 = vpop.f32.mrf.mxu3  ;;  %v17356_v46 = vld [vmem:[#allocation11 + $0x1d08] sm:$0xf0]  ;;  %v14987_v2 = vor.u32 %v18481_v60, %v14986_v63  ;;  %v17140_v63 = vld [vmem:[#allocation11 + $0x1b58] sm:$0xf0]  ;;  %v17002_v60 = vld [vmem:[#allocation11 + $0x19f8] sm:$0xf] }
 0x36e   :  { %10379 = vmatpush.bf16.msra.mxu2 %v17571_v20  ;;  %19167 = vtanh.f32 %v11666_v21  ;;  %v10068_v28 = vadd.f32 %v10067_v17, %v10054_v47  ;;  %v19065_v20 = vld [vmem:[#allocation11 + $0x1cc4] sm:$0xf]  ;;  %v18463_v21 = vld [vmem:[#allocation11 + $0x9ec] sm:$0xf0]  ;;  %v17212_v58 = vld [vmem:[#allocation11 + $0x1be8] sm:$0xf0]  ;;  %v14843_v17 = vor.u32 %v18445_v38, %v14842_v31 }
 0x36f   :  { %10456 = vmatmul.bf16.vlgmr.msrb.gmra.mxu3 %v19790_v7  ;;  %10477 = vmatpush.bf16.msra.mxu1 %v17575_v33  ;;  %19169 = vtanh.f32 %v11667_v10  ;;  %v17359_v33 = vor.u32 %v19065_v20, %v17356_v46  ;;  %v17578_v46 = vld [vmem:[#allocation11 + $0x1e78] sm:$0xf]  ;;  %v15772_v31 = vld [vmem:[#allocation11 + $0x10a8] sm:$0xf0]  ;;  %v18949_v38 = vld [vmem:[#allocation11 + $0x191c] sm:$0xf0] }
 0x370   :  { %10504 = vmatpush.bf16.msra.mxu3 %v14771_v3  ;;  %10470 = vmatmul.bf16.vlgmr.msra.gmra.mxu0 %v19797_v24  ;;  %v15130_v3 = vld [vmem:[#allocation11 + $0xb58] sm:$0xf]  ;;  %v10082_v43 = vadd.f32 %v10081_v18, %v10068_v28  ;;  %19171 = vtanh.f32 %v11684_v13  ;;  %v19011_v13 = vld [vmem:[#allocation11 + $0x1b14] sm:$0xf]  ;;  %v17215_v28 = vor.u32 %v19029_v15, %v17212_v58  ;;  %v18985_v18 = vld [vmem:[#allocation11 + $0x1a3c] sm:$0xf0] }
 0x371   :  { %10518 = vmatpush.bf16.msrb.mxu0 %v15347_v59  ;;  %v19101_v59 = vld [vmem:[#allocation11 + $0x1de4] sm:$0xf]  ;;  %v15131_v49 = vor.u32 %v18517_v36, %v15130_v3  ;;  %v19047_v3 = vld [vmem:[#allocation11 + $0x1c34] sm:$0xf]  ;;  %v17284_v36 = vld [vmem:[#allocation11 + $0x1c78] sm:$0xf0] }
 0x372   :  { %v17503_v4 = vor.u32 %v19101_v59, %v17500_v29  ;;  %10380 = vmatpush.bf16.msra.mxu2 %v17499_v53  ;;  %v17283_v53 = vor.u32 %v19056_v27, %v17282_v40  ;;  %v19038_v59 = vld [vmem:[#allocation11 + $0x1be4] sm:$0xf0]  ;;  %v14266_v29 = vld [vmem:[#allocation11 + $0x498] sm:$0xf]  ;;  %v17287_v11 = vor.u32 %v19047_v3, %v17284_v36  ;;  %v18715_v27 = vld [vmem:[#allocation11 + $0x11cc] sm:$0xf0] }
 0x373   :  { %v14267_v47 = vor.u32 %v18301_v32, %v14266_v29  ;;  %v15922_v40 = vld [vmem:[#allocation11 + $0x1188] sm:$0xf]  ;;  %v15850_v29 = vld [vmem:[#allocation11 + $0x10f8] sm:$0xf]  ;;  %v18669_v32 = vld [vmem:[#allocation11 + $0x1064] sm:$0xf] }
 0x374   :  { %10505 = vmatpush.bf16.msra.mxu3 %v14699_v8  ;;  %v19083_v8 = vld [vmem:[#allocation11 + $0x1d54] sm:$0xf]  ;;  %10478 = vmatpush.bf16.msra.mxu1 %v17503_v4  ;;  %v19168_v19 = vpop.eup %19167  ;;  %v17074_v4 = vld [vmem:[#allocation11 + $0x1a88] sm:$0xf]  ;;  %v19093_v58 = vld [vmem:[#allocation11 + $0x1d9c] sm:$0xf0] }
 0x375   :  { %10519 = vmatpush.bf16.msrb.mxu0 %v15275_v14  ;;  %v19074_v14 = vld [vmem:[#allocation11 + $0x1d04] sm:$0xf0]  ;;  %v17431_v57 = vor.u32 %v19083_v8, %v17428_v0  ;;  %v11738_v1 = vmul.f32 0.5, %v19168_v19  ;;  %v19170_v62 = vpop.eup %19169  ;;  %v19147_v0 = vld [vmem:[#allocation11 + $0x1f4c] sm:$0xf0] }
 0x376   :  { %10381 = vmatpush.bf16.msra.mxu2 %v17427_v23  ;;  %v17355_v22 = vor.u32 %v19074_v14, %v17354_v34  ;;  %v11739_v45 = vmul.f32 0.5, %v19170_v62  ;;  %v17211_v23 = vor.u32 %v19038_v59, %v17210_v16  ;;  %v17650_v8 = vld [vmem:[#allocation11 + $0x1f08] sm:$0xf]  ;;  %v19172_v10 = vpop.eup %19171  ;;  %v19020_v34 = vld [vmem:[#allocation11 + $0x1b54] sm:$0xf0]  ;;  %v15923_v16 = vor.u32 %v18715_v27, %v15922_v40 }
 0x377   :  { %v11774_v6 = vadd.f32 0.5, %v11738_v1  ;;  %v19129_v19 = vld [vmem:[#allocation11 + $0x1ebc] sm:$0xf0]  ;;  %v17506_v1 = vld [vmem:[#allocation11 + $0x1de8] sm:$0xf] }
 0x378   :  { %10506 = vmatpush.bf16.msra.mxu3 %v14627_v37  ;;  %v14411_v37 = vor.u32 %v18337_v30, %v14410_v55  ;;  %10479 = vmatpush.bf16.msra.mxu1 %v17431_v57  ;;  %v11775_v12 = vadd.f32 0.5, %v11739_v45  ;;  %v18705_v55 = vld [vmem:[#allocation11 + $0x1184] sm:$0xf]  ;;  %v15916_v30 = vld [vmem:[#allocation11 + $0x11c8] sm:$0xf0]  ;;  %v17651_v57 = vor.u32 %v19147_v0, %v17650_v8 }
 0x379   :  { %10520 = vmatpush.bf16.msrb.mxu0 %v15203_v25  ;;  %v10095_v25 = vpop.f32.mrf.mxu1  ;;  %v18697_v62 = vld [vmem:[#allocation11 + $0x113c] sm:$0xf0]  ;;  %v15700_v8 = vld [vmem:[#allocation11 + $0x1018] sm:$0xf0]  ;;  %v18615_v40 = vld [vmem:[#allocation11 + $0xeb4] sm:$0xf] }
 0x37a   :  { %v10096_v42 = vadd.f32 %v10095_v25, %v10082_v43  ;;  %10382 = vmatpush.bf16.msra.mxu2 %v17355_v22  ;;  %v11810_v14 = vpack.c.bf16 %v11775_v12, %v11774_v6  ;;  %v11756_v22 = vmul.f32 0.5, %v19172_v10  ;;  %v17003_v25 = vor.u32 %v18985_v18, %v17002_v60  ;;  %v18679_v6 = vld [vmem:[#allocation11 + $0x10ac] sm:$0xf0]  ;;  %v16786_v10 = vld [vmem:[#allocation11 + $0x1848] sm:$0xf] }
 0x37b   :  { %v15851_v15 = vor.u32 %v18697_v62, %v15850_v29  ;;  %v18913_v60 = vld [vmem:[#allocation11 + $0x17fc] sm:$0xf0]  ;;  %v15556_v27 = vld [vmem:[#allocation11 + $0xef8] sm:$0xf0]  ;;  %v17146_v62 = vld [vmem:[#allocation11 + $0x1b18] sm:$0xf] }
 0x37c   :  { %10507 = vmatpush.bf16.msra.mxu3 %v14555_v52  ;;  %v11685_v56 = vmul.f32 0.5, %v10096_v42  ;;  %v14339_v52 = vor.u32 %v18319_v51, %v14338_v39  ;;  %10480 = vmatpush.bf16.msra.mxu1 %v17359_v33  ;;  %11828 = vst [vmem:[#allocation14] sm:$0xff] %v11810_v14  ;;  %v15844_v51 = vld [vmem:[#allocation11 + $0x1138] sm:$0xf0]  ;;  %v16930_v42 = vld [vmem:[#allocation11 + $0x1968] sm:$0xf] }
 0x37d   :  { %10521 = vmatpush.bf16.msrb.mxu0 %v15131_v49  ;;  %v14915_v49 = vor.u32 %v18463_v21, %v14914_v48  ;;  %v17143_v48 = vor.u32 %v19011_v13, %v17140_v63  ;;  %v17579_v21 = vor.u32 %v19129_v19, %v17578_v46  ;;  %v18967_v33 = vld [vmem:[#allocation11 + $0x19ac] sm:$0xf0]  ;;  %v11792_v3 = vadd.f32 0.5, %v11756_v22  ;;  %v18633_v13 = vld [vmem:[#allocation11 + $0xf44] sm:$0xf] }
 0x37e   :  { %19173 = vtanh.f32 %v11685_v56  ;;  %10383 = vmatpush.bf16.msra.mxu2 %v17283_v53  ;;  %v19111_v53 = vld [vmem:[#allocation11 + $0x1e2c] sm:$0xf0]  ;;  %v16714_v63 = vld [vmem:[#allocation11 + $0x17b8] sm:$0xf]  ;;  %v15634_v19 = vld [vmem:[#allocation11 + $0xf48] sm:$0xf] }
 0x37f   :  { %v17507_v45 = vor.u32 %v19111_v53, %v17506_v1  ;;  %v19075_v14 = vld [vmem:[#allocation11 + $0x1d0c] sm:$0xf0]  ;;  %v17290_v22 = vld [vmem:[#allocation11 + $0x1c38] sm:$0xf]  ;;  %v15484_v1 = vld [vmem:[#allocation11 + $0xe68] sm:$0xf0] }
 0x380   :  { %10508 = vmatpush.bf16.msra.mxu3 %v14483_v61  ;;  %v17138_v61 = vld [vmem:[#allocation11 + $0x1b10] sm:$0xf]  ;;  %10481 = vmatpush.bf16.msra.mxu1 %v17287_v11  ;;  %v17434_v11 = vld [vmem:[#allocation11 + $0x1d58] sm:$0xf]  ;;  %v18877_v29 = vld [vmem:[#allocation11 + $0x16dc] sm:$0xf0] }
 0x381   :  { %10522 = vmatpush.bf16.msrb.mxu0 %v15059_v50  ;;  %v17075_v50 = vor.u32 %v19003_v35, %v17074_v4  ;;  %v17139_v20 = vor.u32 %v19020_v34, %v17138_v61  ;;  %v15775_v4 = vor.u32 %v18669_v32, %v15772_v31  ;;  %v15778_v35 = vld [vmem:[#allocation11 + $0x1068] sm:$0xf]  ;;  %v17435_v0 = vor.u32 %v19093_v58, %v17434_v11  ;;  %v16570_v53 = vld [vmem:[#allocation11 + $0x1698] sm:$0xf]  ;;  %v18562_v31 = vld [vmem:[#allocation11 + $0xd0c] sm:$0xf] }
 0x382   :  { %10384 = vmatpush.bf16.msra.mxu2 %v17211_v23  ;;  %v18651_v23 = vld [vmem:[#allocation11 + $0xfd4] sm:$0xf]  ;;  %v15779_v61 = vor.u32 %v18679_v6, %v15778_v35  ;;  %v17362_v34 = vld [vmem:[#allocation11 + $0x1cc8] sm:$0xf]  ;;  %v16571_v58 = vor.u32 %v18877_v29, %v16570_v53  ;;  %v15412_v35 = vld [vmem:[#allocation11 + $0xdd8] sm:$0xf0]  ;;  %v19904_v6 = vpop.f32.mrf.mxu3 }
 0x383   :  { %v15490_v32 = vld [vmem:[#allocation11 + $0xe28] sm:$0xf]  ;;  %v15924_v11 = vld [vmem:[#allocation11 + $0x11d0] sm:$0xf0]  ;;  %v15708_v29 = vld [vmem:[#allocation11 + $0x1020] sm:$0xf0] }
 0x384   :  { %10509 = vmatpush.bf16.msra.mxu3 %v14411_v37  ;;  %v19174_v43 = vpop.eup %19173  ;;  %v15919_v37 = vor.u32 %v18705_v55, %v15916_v30  ;;  %10482 = vmatpush.bf16.msra.mxu1 %v17215_v28  ;;  %v18661_v55 = vld [vmem:[#allocation11 + $0x101c] sm:$0xf0]  ;;  %v15628_v28 = vld [vmem:[#allocation11 + $0xf88] sm:$0xf0] }
 0x385   :  { %10523 = vmatpush.bf16.msrb.mxu0 %v14987_v2  ;;  %v11757_v39 = vmul.f32 0.5, %v19174_v43  ;;  %v18687_v2 = vld [vmem:[#allocation11 + $0x10f4] sm:$0xf]  ;;  %v15631_v46 = vor.u32 %v18633_v13, %v15628_v28  ;;  %v18643_v43 = vld [vmem:[#allocation11 + $0xf8c] sm:$0xf0] }
 0x386   :  { %10385 = vmatpush.bf16.msra.mxu2 %v17139_v20  ;;  %v15847_v59 = vor.u32 %v18687_v2, %v15844_v51  ;;  %v19057_v20 = vld [vmem:[#allocation11 + $0x1c7c] sm:$0xf0]  ;;  %v18895_v2 = vld [vmem:[#allocation11 + $0x176c] sm:$0xf0]  ;;  %v15635_v51 = vor.u32 %v18643_v43, %v15634_v19  ;;  %v15852_v13 = vld [vmem:[#allocation11 + $0x1140] sm:$0xf0] }
 0x387   :  { %v11793_v36 = vadd.f32 0.5, %v11757_v39  ;;  %v17291_v39 = vor.u32 %v19057_v20, %v17290_v22  ;;  %v18265_v22 = vld [vmem:[#allocation11 + $0x3bc] sm:$0xf0]  ;;  %v18526_v19 = vld [vmem:[#allocation11 + $0xbec] sm:$0xf] }
 0x388   :  { %10510 = vmatpush.bf16.msra.mxu3 %v14339_v52  ;;  %v16931_v52 = vor.u32 %v18967_v33, %v16930_v42  ;;  %10483 = vmatpush.bf16.msra.mxu1 %v17143_v48  ;;  %v17218_v48 = vld [vmem:[#allocation11 + $0x1ba8] sm:$0xf]  ;;  %v15559_v42 = vor.u32 %v18615_v40, %v15556_v27  ;;  %v15562_v33 = vld [vmem:[#allocation11 + $0xeb8] sm:$0xf]  ;;  %v15204_v43 = vld [vmem:[#allocation11 + $0xc30] sm:$0xf0] }
 0x389   :  { %10524 = vmatpush.bf16.msrb.mxu0 %v14915_v49  ;;  %v11819_v56 = vpack.c.bf16 %v11793_v36, %v11792_v3  ;;  %v16858_v49 = vld [vmem:[#allocation11 + $0x18d8] sm:$0xf]  ;;  %10386 = vmatmul.bf16.vlgmr.msra.gmra.mxu2 %v19810_v9  ;;  %v18625_v3 = vld [vmem:[#allocation11 + $0xefc] sm:$0xf0]  ;;  %v18670_v40 = vld [vmem:[#allocation11 + $0x106c] sm:$0xf] }
 0x38a   :  { %10434 = vmatpush.bf16.msrb.mxu2 %v15919_v37  ;;  %v16859_v12 = vor.u32 %v18949_v38, %v16858_v49  ;;  %v16715_v37 = vor.u32 %v18913_v60, %v16714_v63  ;;  %v18607_v38 = vld [vmem:[#allocation11 + $0xe6c] sm:$0xf0]  ;;  %v14196_v63 = vld [vmem:[#allocation11 + $0x450] sm:$0xf0] }
 0x38b   :  { %11837 = vst [vmem:[#allocation14 + $0x48] sm:$0xff] %v11819_v56  ;;  %10484 = vmatmul.bf16.vlgmr.msra.gmra.mxu1 %v19810_v9  ;;  %v19021_v56 = vld [vmem:[#allocation11 + $0x1b5c] sm:$0xf0]  ;;  %v15780_v27 = vld [vmem:[#allocation11 + $0x10b0] sm:$0xf0] }
 0x38c   :  { %10511 = vmatpush.bf16.msra.mxu3 %v14267_v47  ;;  %10532 = vmatpush.bf16.msrb.mxu1 %v15923_v16  ;;  %v18931_v47 = vld [vmem:[#allocation11 + $0x188c] sm:$0xf0]  ;;  %v18597_v16 = vld [vmem:[#allocation11 + $0xe24] sm:$0xf] }
 0x38d   :  { %10525 = vmatpush.bf16.msrb.mxu0 %v14843_v17  ;;  %v15703_v17 = vor.u32 %v18651_v23, %v15700_v8  ;;  %v16787_v30 = vor.u32 %v18931_v47, %v16786_v10  ;;  %v15487_v49 = vor.u32 %v18597_v16, %v15484_v1  ;;  %v17147_v23 = vor.u32 %v19021_v56, %v17146_v62  ;;  %v18283_v10 = vld [vmem:[#allocation11 + $0x44c] sm:$0xf0]  ;;  %v19912_v16 = vpop.f32.mrf.mxu3  ;;  %v18238_v56 = vld [vmem:[#allocation11 + $0x2ec] sm:$0xf] }
 0x38e   :  { %10435 = vmatpush.bf16.msrb.mxu2 %v15847_v59  ;;  %v15491_v47 = vor.u32 %v18607_v38, %v15490_v32  ;;  %v19917_v32 = vpop.f32.mrf.mxu1 }
 0x38f   :  { %10512 = vmatmul.bf16.vlgmr.msra.gmra.mxu3 %v19770_v44 }
 0x390   :  { %10560 = vmatpush.bf16.msrb.mxu3 %v17075_v50  ;;  %10526 = vmatmul.bf16.vlgmr.msrb.gmra.mxu0 %v19768_v5  ;;  %v15706_v50 = vld [vmem:[#allocation11 + $0xfd8] sm:$0xf] }
 0x391   :  { %10574 = vmatpush.bf16.msra.mxu0 %v17651_v57  ;;  %10533 = vmatpush.bf16.msrb.mxu1 %v15851_v15  ;;  %v17363_v57 = vor.u32 %v19075_v14, %v17362_v34  ;;  %v15707_v18 = vor.u32 %v18661_v55, %v15706_v50  ;;  %v18706_v15 = vld [vmem:[#allocation11 + $0x118c] sm:$0xf]  ;;  %v15418_v34 = vld [vmem:[#allocation11 + $0xd98] sm:$0xf]  ;;  %v18544_v14 = vld [vmem:[#allocation11 + $0xc7c] sm:$0xf] }
 0x392   :  { %10436 = vmatpush.bf16.msrb.mxu2 %v15775_v4  ;;  %v18579_v4 = vld [vmem:[#allocation11 + $0xd94] sm:$0xf]  ;;  %v18589_v55 = vld [vmem:[#allocation11 + $0xddc] sm:$0xf0] }
 0x393   :  { %v15415_v50 = vor.u32 %v18579_v4, %v15412_v35  ;;  %v15419_v20 = vor.u32 %v18589_v55, %v15418_v34  ;;  %v18634_v4 = vld [vmem:[#allocation11 + $0xf4c] sm:$0xf]  ;;  %v15636_v35 = vld [vmem:[#allocation11 + $0xf90] sm:$0xf0] }
 0x394   :  { %10561 = vmatpush.bf16.msrb.mxu3 %v17003_v25  ;;  %v16642_v25 = vld [vmem:[#allocation11 + $0x1728] sm:$0xf]  ;;  %v15639_v34 = vor.u32 %v18634_v4, %v15636_v35  ;;  %v14202_v4 = vld [vmem:[#allocation11 + $0x410] sm:$0xf]  ;;  %v18284_v35 = vld [vmem:[#allocation11 + $0x454] sm:$0xf0] }
 0x395   :  { %10575 = vmatpush.bf16.msra.mxu0 %v17579_v21  ;;  %10534 = vmatpush.bf16.msrb.mxu1 %v15779_v61  ;;  %v19039_v21 = vld [vmem:[#allocation11 + $0x1bec] sm:$0xf0]  ;;  %v16643_v36 = vor.u32 %v18895_v2, %v16642_v25  ;;  %v15927_v61 = vor.u32 %v18706_v15, %v15924_v11  ;;  %v18256_v25 = vld [vmem:[#allocation11 + $0x37c] sm:$0xf]  ;;  %v14124_v2 = vld [vmem:[#allocation11 + $0x3c0] sm:$0xf0] }
 0x396   :  { %10437 = vmatpush.bf16.msrb.mxu2 %v15703_v17  ;;  %v17219_v59 = vor.u32 %v19039_v21, %v17218_v48  ;;  %v15276_v17 = vld [vmem:[#allocation11 + $0xcc0] sm:$0xf0]  ;;  %v14050_v48 = vld [vmem:[#allocation11 + $0x2e8] sm:$0xf]  ;;  %v18247_v21 = vld [vmem:[#allocation11 + $0x32c] sm:$0xf0]  ;;  %v14127_v53 = vor.u32 %v18256_v25, %v14124_v2 }
 0x397   :  { %v15279_v60 = vor.u32 %v18544_v14, %v15276_v17  ;;  %v14051_v62 = vor.u32 %v18247_v21, %v14050_v48  ;;  %v18490_v15 = vld [vmem:[#allocation11 + $0xacc] sm:$0xf]  ;;  %v15060_v11 = vld [vmem:[#allocation11 + $0xb10] sm:$0xf0]  ;;  %v18472_v14 = vld [vmem:[#allocation11 + $0xa3c] sm:$0xf] }
 0x398   :  { %10562 = vmatpush.bf16.msrb.mxu3 %v16931_v52  ;;  %v15563_v52 = vor.u32 %v18625_v3, %v15562_v33  ;;  %v15783_v33 = vor.u32 %v18670_v40, %v15780_v27  ;;  %v18508_v3 = vld [vmem:[#allocation11 + $0xb5c] sm:$0xf]  ;;  %v14988_v17 = vld [vmem:[#allocation11 + $0xa80] sm:$0xf0]  ;;  %v19926_v40 = vpop.f32.mrf.mxu1  ;;  %v4828_v27 = vperm.slane %v19858_v54, 2 }
 0x399   :  { %10576 = vmatpush.bf16.msra.mxu0 %v17507_v45  ;;  %10535 = vmatpush.bf16.msrb.mxu1 %v15707_v18  ;;  %v15348_v45 = vld [vmem:[#allocation11 + $0xd50] sm:$0xf0]  ;;  %v14122_v18 = vld [vmem:[#allocation11 + $0x378] sm:$0xf]  ;;  %v18598_v25 = vld [vmem:[#allocation11 + $0xe2c] sm:$0xf] }
 0x39a   :  { %10438 = vmatpush.bf16.msrb.mxu2 %v15631_v46  ;;  %v15351_v8 = vor.u32 %v18562_v31, %v15348_v45  ;;  %v13978_v45 = vld [vmem:[#allocation11 + $0x258] sm:$0xf]  ;;  %v15492_v2 = vld [vmem:[#allocation11 + $0xe70] sm:$0xf0]  ;;  %v18184_v48 = vld [vmem:[#allocation11 + $0x13c] sm:$0xf] }
 0x39b   :  { %v13836_v21 = vld [vmem:[#allocation11 + $0x180] sm:$0xf0] }
 0x39c   :  { %10563 = vmatpush.bf16.msrb.mxu3 %v16859_v12  ;;  %v19906_v12 = vpop.f32.mrf.mxu2 }
 0x39d   :  { %10577 = vmatpush.bf16.msra.mxu0 %v17435_v0  ;;  %10536 = vmatpush.bf16.msrb.mxu1 %v15635_v51  ;;  %v14194_v0 = vld [vmem:[#allocation11 + $0x408] sm:$0xf]  ;;  %v15207_v51 = vor.u32 %v18526_v19, %v15204_v43  ;;  %v18454_v43 = vld [vmem:[#allocation11 + $0x9ac] sm:$0xf] }
 0x39e   :  { %10439 = vmatpush.bf16.msrb.mxu2 %v15559_v42  ;;  %v14195_v28 = vor.u32 %v18283_v10, %v14194_v0  ;;  %v19910_v42 = vpop.f32.mrf.mxu0  ;;  %v13980_v0 = vld [vmem:[#allocation11 + $0x2a0] sm:$0xf0]  ;;  %v15063_v10 = vor.u32 %v18490_v15, %v15060_v11 }
 0x3a0   :  { %10564 = vmatpush.bf16.msrb.mxu3 %v16787_v30  ;;  %v18688_v30 = vld [vmem:[#allocation11 + $0x10fc] sm:$0xf] }
 0x3a1   :  { %10578 = vmatpush.bf16.msra.mxu0 %v17363_v57  ;;  %10537 = vmatpush.bf16.msrb.mxu1 %v15563_v52  ;;  %v18274_v57 = vld [vmem:[#allocation11 + $0x40c] sm:$0xf]  ;;  %v15855_v46 = vor.u32 %v18688_v30, %v15852_v13  ;;  %v14052_v52 = vld [vmem:[#allocation11 + $0x330] sm:$0xf0]  ;;  %v18616_v13 = vld [vmem:[#allocation11 + $0xebc] sm:$0xf] }
 0x3a2   :  { %10440 = vmatpush.bf16.msrb.mxu2 %v15487_v49  ;;  %v18229_v49 = vld [vmem:[#allocation11 + $0x29c] sm:$0xf0] }
 0x3a4   :  { %10565 = vmatpush.bf16.msrb.mxu3 %v16715_v37  ;;  %v14199_v37 = vor.u32 %v18274_v57, %v14196_v63  ;;  %v19914_v1 = vpop.f32.mrf.mxu2 }
 0x3a5   :  { %10579 = vmatpush.bf16.msra.mxu0 %v17291_v39  ;;  %10538 = vmatpush.bf16.msrb.mxu1 %v15491_v47  ;;  %v14123_v39 = vor.u32 %v18265_v22, %v14122_v18  ;;  %v13906_v47 = vld [vmem:[#allocation11 + $0x1c8] sm:$0xf]  ;;  %v13908_v18 = vld [vmem:[#allocation11 + $0x210] sm:$0xf0]  ;;  %v14991_v22 = vor.u32 %v18472_v14, %v14988_v17  ;;  %v18859_v14 = vld [vmem:[#allocation11 + $0x164c] sm:$0xf0] }
 0x3a6   :  { %10441 = vmatpush.bf16.msrb.mxu2 %v15415_v50  ;;  %v19920_v50 = vpop.f32.mrf.mxu3  ;;  %v19924_v57 = vpop.f32.mrf.mxu0 }
 0x3a8   :  { %10566 = vmatpush.bf16.msrb.mxu3 %v16643_v36  ;;  %v15132_v36 = vld [vmem:[#allocation11 + $0xba0] sm:$0xf0] }
 0x3a9   :  { %10580 = vmatpush.bf16.msra.mxu0 %v17219_v59  ;;  %10539 = vmatpush.bf16.msrb.mxu1 %v15419_v20  ;;  %v18652_v59 = vld [vmem:[#allocation11 + $0xfdc] sm:$0xf]  ;;  %v15135_v31 = vor.u32 %v18508_v3, %v15132_v36  ;;  %v13834_v20 = vld [vmem:[#allocation11 + $0x138] sm:$0xf]  ;;  %v13762_v3 = vld [vmem:[#allocation11 + $0xa8] sm:$0xf] }
 0x3aa   :  { %10490 = vmatpush.bf16.msra.mxu2 %v14195_v28  ;;  %v15711_v38 = vor.u32 %v18652_v59, %v15708_v29  ;;  %v15564_v28 = vld [vmem:[#allocation11 + $0xf00] sm:$0xf0]  ;;  %v18175_v36 = vld [vmem:[#allocation11 + $0xec] sm:$0xf0]  ;;  %v15495_v59 = vor.u32 %v18598_v25, %v15492_v2  ;;  %v18841_v2 = vld [vmem:[#allocation11 + $0x15bc] sm:$0xf0] }
 0x3ab   :  { %10442 = vmatmul.bf16.vlgmr.msrb.gmra.mxu2 %v19787_v41  ;;  %v15567_v19 = vor.u32 %v18616_v13, %v15564_v28  ;;  %v14844_v29 = vld [vmem:[#allocation11 + $0x960] sm:$0xf0]  ;;  %v13763_v11 = vor.u32 %v18175_v36, %v13762_v3  ;;  %v14203_v13 = vor.u32 %v18284_v35, %v14202_v4  ;;  %v18148_v28 = vld [vmem:[#allocation11 + $0x1c] sm:$0xf]  ;;  %v17508_v3 = vld [vmem:[#allocation11 + $0x1e30] sm:$0xf0] }
 0x3ac   :  { %10567 = vmatpush.bf16.msrb.mxu3 %v16571_v58  ;;  %10540 = vmatmul.bf16.vlgmr.msrb.gmra.mxu1 %v19787_v41  ;;  %v14055_v58 = vor.u32 %v18238_v56, %v14052_v52  ;;  %v19922_v55 = vpop.f32.mrf.mxu2  ;;  %v15420_v56 = vld [vmem:[#allocation11 + $0xde0] sm:$0xf0]  ;;  %v10108_v52 = vadd.f32 %v19906_v12, %v4828_v27  ;;  %v18157_v12 = vld [vmem:[#allocation11 + $0x5c] sm:$0xf0]  ;;  %v19084_v4 = vld [vmem:[#allocation11 + $0x1d5c] sm:$0xf] }
 0x3ad   :  { %10581 = vmatpush.bf16.msra.mxu0 %v17147_v23  ;;  %10588 = vmatpush.bf16.msra.mxu1 %v14199_v37  ;;  %v13979_v23 = vor.u32 %v18229_v49, %v13978_v45  ;;  %v14916_v37 = vld [vmem:[#allocation11 + $0x9f0] sm:$0xf0]  ;;  %v18166_v45 = vld [vmem:[#allocation11 + $0xac] sm:$0xf]  ;;  %v19940_v36 = vld [vmem:[#allocation13] sm:$0xff] }
 0x3ae   :  { %10491 = vmatpush.bf16.msra.mxu2 %v14123_v39  ;;  %v19138_v49 = vld [vmem:[#allocation11 + $0x1f0c] sm:$0xf]  ;;  %v19932_v15 = vpop.f32.mrf.mxu0  ;;  %v10122_v17 = vadd.f32 %v19904_v6, %v10108_v52  ;;  %v16426_v6 = vld [vmem:[#allocation11 + $0x1578] sm:$0xf]  ;;  %v17436_v35 = vld [vmem:[#allocation11 + $0x1da0] sm:$0xf0] }
 0x3af   :  { %10568 = vmatmul.bf16.vlgmr.msrb.gmra.mxu3 %v19797_v24 }
 0x3b0   :  { %10616 = vmatpush.bf16.msra.mxu3 %v15351_v8  ;;  %10582 = vmatmul.bf16.vlgmr.msra.gmra.mxu0 %v19810_v9  ;;  %v18220_v8 = vld [vmem:[#allocation11 + $0x25c] sm:$0xf] }
 0x3b1   :  { %10630 = vmatpush.bf16.msrb.mxu0 %v15927_v61  ;;  %10589 = vmatpush.bf16.msra.mxu1 %v14127_v53  ;;  %v18211_v61 = vld [vmem:[#allocation11 + $0x20c] sm:$0xf0]  ;;  %v13983_v30 = vor.u32 %v18220_v8, %v13980_v0  ;;  %v18436_v53 = vld [vmem:[#allocation11 + $0x91c] sm:$0xf] }
 0x3b2   :  { %10492 = vmatpush.bf16.msra.mxu2 %v14051_v62  ;;  %v13907_v63 = vor.u32 %v18211_v61, %v13906_v47  ;;  %v18580_v62 = vld [vmem:[#allocation11 + $0xd9c] sm:$0xf]  ;;  %v14847_v0 = vor.u32 %v18436_v53, %v14844_v29  ;;  %v4829_v53 = vperm.slane %v19940_v36, 3 }
 0x3b3   :  { %v15423_v47 = vor.u32 %v18580_v62, %v15420_v56  ;;  %v14058_v62 = vld [vmem:[#allocation11 + $0x2f0] sm:$0xf] }
 0x3b4   :  { %10617 = vmatpush.bf16.msra.mxu3 %v15279_v60  ;;  %v18202_v60 = vld [vmem:[#allocation11 + $0x1cc] sm:$0xf]  ;;  %v19936_v8 = vpop.f32.mrf.mxu2 }
 0x3b5   :  { %10631 = vmatpush.bf16.msrb.mxu0 %v15855_v46  ;;  %10590 = vmatpush.bf16.msra.mxu1 %v14055_v58  ;;  %v18193_v46 = vld [vmem:[#allocation11 + $0x17c] sm:$0xf0]  ;;  %v13911_v39 = vor.u32 %v18202_v60, %v13908_v18  ;;  %v13764_v58 = vld [vmem:[#allocation11 + $0xf0] sm:$0xf0]  ;;  %v17580_v60 = vld [vmem:[#allocation11 + $0x1ec0] sm:$0xf0] }
 0x3b6   :  { %10493 = vmatpush.bf16.msra.mxu2 %v13979_v23  ;;  %v19934_v23 = vpop.f32.mrf.mxu3 }
 0x3b8   :  { %10618 = vmatpush.bf16.msra.mxu3 %v15207_v51  ;;  %v13835_v51 = vor.u32 %v18193_v46, %v13834_v20  ;;  %v14130_v20 = vld [vmem:[#allocation11 + $0x380] sm:$0xf]  ;;  %v18266_v46 = vld [vmem:[#allocation11 + $0x3c4] sm:$0xf0] }
 0x3b9   :  { %10632 = vmatpush.bf16.msrb.mxu0 %v15783_v33  ;;  %10591 = vmatpush.bf16.msra.mxu1 %v13983_v30  ;;  %v14919_v33 = vor.u32 %v18454_v43, %v14916_v37  ;;  %v13767_v30 = vor.u32 %v18166_v45, %v13764_v58  ;;  %v18850_v37 = vld [vmem:[#allocation11 + $0x160c] sm:$0xf]  ;;  %v18832_v45 = vld [vmem:[#allocation11 + $0x157c] sm:$0xf] }
 0x3ba   :  { %10494 = vmatpush.bf16.msra.mxu2 %v13907_v63  ;;  %v19120_v63 = vld [vmem:[#allocation11 + $0x1e7c] sm:$0xf] }
 0x3bb   :  { %v17583_v25 = vor.u32 %v19120_v63, %v17580_v60  ;;  %v18805_v63 = vld [vmem:[#allocation11 + $0x149c] sm:$0xf0] }
 0x3bc   :  { %10619 = vmatpush.bf16.msra.mxu3 %v15135_v31  ;;  %v13839_v31 = vor.u32 %v18184_v48, %v13836_v21  ;;  %v14131_v21 = vor.u32 %v18266_v46, %v14130_v20  ;;  %v10219_v52 = vpop.f32.mrf.mxu2  ;;  %v13914_v46 = vld [vmem:[#allocation11 + $0x1d0] sm:$0xf] }
 0x3bd   :  { %10633 = vmatpush.bf16.msrb.mxu0 %v15711_v38  ;;  %10592 = vmatpush.bf16.msra.mxu1 %v13911_v39  ;;  %v17652_v38 = vld [vmem:[#allocation11 + $0x1f50] sm:$0xf0] }
 0x3be   :  { %10495 = vmatpush.bf16.msra.mxu2 %v13835_v51  ;;  %v17655_v61 = vor.u32 %v19138_v49, %v17652_v38  ;;  %v16500_v39 = vld [vmem:[#allocation11 + $0x1650] sm:$0xf0]  ;;  %v10136_v51 = vadd.f32 %v19910_v42, %v10122_v17  ;;  %v18248_v42 = vld [vmem:[#allocation11 + $0x334] sm:$0xf0]  ;;  %v10233_v56 = vpop.f32.mrf.mxu3  ;;  %v16428_v49 = vld [vmem:[#allocation11 + $0x15c0] sm:$0xf0]  ;;  %v19948_v38 = vpop.f32.mrf.mxu0 }
 0x3bf   :  { %v16503_v29 = vor.u32 %v18850_v37, %v16500_v39  ;;  %v14059_v58 = vor.u32 %v18248_v42, %v14058_v62  ;;  %v16356_v17 = vld [vmem:[#allocation11 + $0x1530] sm:$0xf0]  ;;  %v18796_v39 = vld [vmem:[#allocation11 + $0x145c] sm:$0xf] }
 0x3c0   :  { %10620 = vmatpush.bf16.msra.mxu3 %v15063_v10  ;;  %v13690_v10 = vld [vmem:[#allocation11 + $0x18] sm:$0xf] }
 0x3c1   :  { %10634 = vmatpush.bf16.msrb.mxu0 %v15639_v34  ;;  %v16498_v34 = vld [vmem:[#allocation11 + $0x1608] sm:$0xf]  ;;  %10593 = vmatpush.bf16.msra.mxu1 %v13839_v31  ;;  %v13691_v18 = vor.u32 %v18157_v12, %v13690_v10  ;;  %v16427_v31 = vor.u32 %v18841_v2, %v16426_v6  ;;  %v16431_v12 = vor.u32 %v18832_v45, %v16428_v49  ;;  %v18778_v49 = vld [vmem:[#allocation11 + $0x13cc] sm:$0xf] }
 0x3c2   :  { %10496 = vmatpush.bf16.msra.mxu2 %v13763_v11  ;;  %v16499_v43 = vor.u32 %v18859_v14, %v16498_v34  ;;  %v16354_v11 = vld [vmem:[#allocation11 + $0x14e8] sm:$0xf]  ;;  %v18814_v14 = vld [vmem:[#allocation11 + $0x14ec] sm:$0xf] }
 0x3c4   :  { %10621 = vmatpush.bf16.msra.mxu3 %v14991_v22  ;;  %v13692_v22 = vld [vmem:[#allocation11 + $0x60] sm:$0xf0] }
 0x3c5   :  { %10635 = vmatpush.bf16.msrb.mxu0 %v15567_v19  ;;  %v10205_v19 = vpop.f32.mrf.mxu1  ;;  %10594 = vmatpush.bf16.msra.mxu1 %v13767_v30  ;;  %v13695_v48 = vor.u32 %v18148_v28, %v13692_v22  ;;  %v16282_v28 = vld [vmem:[#allocation11 + $0x1458] sm:$0xf]  ;;  %v17364_v22 = vld [vmem:[#allocation11 + $0x1d10] sm:$0xf0] }
 0x3c6   :  { %10497 = vmatpush.bf16.msra.mxu2 %v13691_v18  ;;  %v19066_v18 = vld [vmem:[#allocation11 + $0x1ccc] sm:$0xf]  ;;  %v16283_v37 = vor.u32 %v18805_v63, %v16282_v28  ;;  %v10247_v6 = vpop.f32.mrf.mxu0  ;;  %v16066_v28 = vld [vmem:[#allocation11 + $0x12a8] sm:$0xf]  ;;  %v18751_v63 = vld [vmem:[#allocation11 + $0x12ec] sm:$0xf0] }
 0x3c8   :  { %10622 = vmatpush.bf16.msra.mxu3 %v14919_v33  ;;  %v19102_v33 = vld [vmem:[#allocation11 + $0x1dec] sm:$0xf] }
 0x3c9   :  { %10636 = vmatpush.bf16.msrb.mxu0 %v15495_v59  ;;  %v10110_v59 = vadd.f32 %v19914_v1, %v4828_v27  ;;  %v17511_v54 = vor.u32 %v19102_v33, %v17508_v3  ;;  %v18823_v1 = vld [vmem:[#allocation11 + $0x152c] sm:$0xf0]  ;;  %v10150_v27 = vadd.f32 %v19917_v32, %v10136_v51  ;;  %10595 = vmatpush.bf16.msra.mxu1 %v13695_v48  ;;  %v16210_v48 = vld [vmem:[#allocation11 + $0x13c8] sm:$0xf]  ;;  %v10235_v33 = vpop.f32.mrf.mxu3  ;;  %v10221_v3 = vpop.f32.mrf.mxu2 }
 0x3ca   :  { %10546 = vmatpush.bf16.msrb.mxu2 %v16499_v43  ;;  %v16355_v32 = vor.u32 %v18823_v1, %v16354_v11  ;;  %v17367_v51 = vor.u32 %v19066_v18, %v17364_v22 }
 0x3cb   :  { %v10124_v10 = vadd.f32 %v19912_v16, %v10110_v59  ;;  %10498 = vmatmul.bf16.vlgmr.msra.gmra.mxu2 %v19753_v26  ;;  %v10164_v34 = vadd.f32 %v19922_v55, %v10150_v27  ;;  %v16359_v55 = vor.u32 %v18814_v14, %v16356_v17  ;;  %v19048_v59 = vld [vmem:[#allocation11 + $0x1c3c] sm:$0xf] }
 0x3cc   :  { %10623 = vmatpush.bf16.msra.mxu3 %v14847_v0  ;;  %v10206_v0 = vadd.f32 %v10205_v19, %v4829_v53  ;;  %10596 = vmatmul.bf16.vlgmr.msra.gmra.mxu1 %v19753_v26  ;;  %v18212_v19 = vld [vmem:[#allocation11 + $0x214] sm:$0xf0] }
 0x3cd   :  { %10637 = vmatpush.bf16.msrb.mxu0 %v15423_v47  ;;  %10644 = vmatpush.bf16.msrb.mxu1 %v16503_v29  ;;  %v13986_v47 = vld [vmem:[#allocation11 + $0x260] sm:$0xf]  ;;  %v10207_v16 = vpop.f32.mrf.mxu1  ;;  %v10138_v20 = vadd.f32 %v19924_v57, %v10124_v10  ;;  %v10178_v43 = vadd.f32 %v19920_v50, %v10164_v34  ;;  %v13915_v57 = vor.u32 %v18212_v19, %v13914_v46  ;;  %v17292_v29 = vld [vmem:[#allocation11 + $0x1c80] sm:$0xf0]  ;;  %v17220_v10 = vld [vmem:[#allocation11 + $0x1bf0] sm:$0xf0] }
 0x3ce   :  { %10547 = vmatpush.bf16.msrb.mxu2 %v16427_v31  ;;  %v10220_v30 = vadd.f32 %v10219_v52, %v10206_v0  ;;  %v10208_v62 = vadd.f32 %v10207_v16, %v4829_v53  ;;  %v13842_v52 = vld [vmem:[#allocation11 + $0x140] sm:$0xf]  ;;  %v18194_v31 = vld [vmem:[#allocation11 + $0x184] sm:$0xf0]  ;;  %v19030_v0 = vld [vmem:[#allocation11 + $0x1bac] sm:$0xf] }
 0x3cf   :  { %10624 = vmatmul.bf16.vlgmr.msra.gmra.mxu3 %v19768_v5  ;;  %v10152_v50 = vadd.f32 %v19926_v40, %v10138_v20  ;;  %v18769_v53 = vld [vmem:[#allocation11 + $0x137c] sm:$0xf0]  ;;  %v13843_v40 = vor.u32 %v18194_v31, %v13842_v52  ;;  %v19012_v16 = vld [vmem:[#allocation11 + $0x1b1c] sm:$0xf]  ;;  %v17148_v20 = vld [vmem:[#allocation11 + $0x1b60] sm:$0xf0] }
 0x3d0   :  { %10672 = vmatpush.bf16.msrb.mxu3 %v17655_v61  ;;  %10638 = vmatmul.bf16.vlgmr.msrb.gmra.mxu0 %v19787_v41  ;;  %v18230_v61 = vld [vmem:[#allocation11 + $0x2a4] sm:$0xf0]  ;;  %v10234_v2 = vadd.f32 %v10233_v56, %v10220_v30  ;;  %v10192_v56 = vadd.f32 %v19932_v15, %v10178_v43  ;;  %v10222_v1 = vadd.f32 %v10221_v3, %v10208_v62  ;;  %v13770_v15 = vld [vmem:[#allocation11 + $0xb0] sm:$0xf]  ;;  %v14772_v52 = vld [vmem:[#allocation11 + $0x8d0] sm:$0xf0] }
 0x3d1   :  { %10686 = vmatpush.bf16.msra.mxu0 %v14203_v13  ;;  %v17439_v13 = vor.u32 %v19084_v4, %v17436_v35  ;;  %v13987_v60 = vor.u32 %v18230_v61, %v13986_v47  ;;  %10645 = vmatpush.bf16.msrb.mxu1 %v16431_v12  ;;  %v10166_v11 = vadd.f32 %v19936_v8, %v10152_v50  ;;  %v16138_v4 = vld [vmem:[#allocation11 + $0x1338] sm:$0xf]  ;;  %v16140_v8 = vld [vmem:[#allocation11 + $0x1380] sm:$0xf0]  ;;  %v10275_v18 = vpop.f32.mrf.mxu2  ;;  %v18158_v46 = vld [vmem:[#allocation11 + $0x64] sm:$0xf0] }
 0x3d2   :  { %10548 = vmatpush.bf16.msrb.mxu2 %v16355_v32  ;;  %v10248_v27 = vadd.f32 %v10247_v6, %v10234_v2  ;;  %v18176_v47 = vld [vmem:[#allocation11 + $0xf4] sm:$0xf0]  ;;  %v11668_v61 = vmul.f32 0.5, %v10192_v56  ;;  %v16139_v34 = vor.u32 %v18769_v53, %v16138_v4  ;;  %v18760_v32 = vld [vmem:[#allocation11 + $0x133c] sm:$0xf]  ;;  %v10236_v17 = vadd.f32 %v10235_v33, %v10222_v1 }
 0x3d3   :  { %v10180_v14 = vadd.f32 %v19934_v23, %v10166_v11  ;;  %v13771_v22 = vor.u32 %v18176_v47, %v13770_v15  ;;  %v16143_v43 = vor.u32 %v18760_v32, %v16140_v8  ;;  %v18716_v23 = vld [vmem:[#allocation11 + $0x11d4] sm:$0xf0]  ;;  %v16067_v6 = vor.u32 %v18751_v63, %v16066_v28  ;;  %v16068_v2 = vld [vmem:[#allocation11 + $0x12f0] sm:$0xf0]  ;;  %v18724_v31 = vld [vmem:[#allocation11 + $0x121c] sm:$0xf] }
 0x3d4   :  { %10673 = vmatpush.bf16.msrb.mxu3 %v17583_v25  ;;  %v16284_v25 = vld [vmem:[#allocation11 + $0x14a0] sm:$0xf0]  ;;  %19175 = vtanh.f32 %v11668_v61  ;;  %v18698_v11 = vld [vmem:[#allocation11 + $0x1144] sm:$0xf0]  ;;  %v18400_v61 = vld [vmem:[#allocation11 + $0x7fc] sm:$0xf] }
 0x3d5   :  { %10687 = vmatpush.bf16.msra.mxu0 %v14131_v21  ;;  %v18787_v21 = vld [vmem:[#allocation11 + $0x140c] sm:$0xf0]  ;;  %10646 = vmatpush.bf16.msrb.mxu1 %v16359_v55  ;;  %v16287_v42 = vor.u32 %v18796_v39, %v16284_v25  ;;  %v10261_v35 = vpop.f32.mrf.mxu1  ;;  %v13698_v55 = vld [vmem:[#allocation11 + $0x20] sm:$0xf]  ;;  %v10249_v25 = vpop.f32.mrf.mxu0  ;;  %v18842_v4 = vld [vmem:[#allocation11 + $0x15c4] sm:$0xf0] }
 0x3d6   :  { %10549 = vmatpush.bf16.msrb.mxu2 %v16283_v37  ;;  %v16211_v45 = vor.u32 %v18787_v21, %v16210_v48  ;;  %v10262_v30 = vadd.f32 %v10261_v35, %v10248_v27  ;;  %v18742_v37 = vld [vmem:[#allocation11 + $0x12ac] sm:$0xf]  ;;  %v15930_v39 = vld [vmem:[#allocation11 + $0x1190] sm:$0xf]  ;;  %v18860_v48 = vld [vmem:[#allocation11 + $0x1654] sm:$0xf0]  ;;  %v10194_v21 = vadd.f32 %v19948_v38, %v10180_v14  ;;  %v10250_v3 = vadd.f32 %v10249_v25, %v10236_v17 }
 0x3d7   :  { %v13699_v62 = vor.u32 %v18158_v46, %v13698_v55  ;;  %v15931_v50 = vor.u32 %v18716_v23, %v15930_v39  ;;  %v15996_v27 = vld [vmem:[#allocation11 + $0x1260] sm:$0xf0]  ;;  %v15786_v17 = vld [vmem:[#allocation11 + $0x1070] sm:$0xf]  ;;  %v15714_v25 = vld [vmem:[#allocation11 + $0xfe0] sm:$0xf] }
 0x3d8   :  { %10674 = vmatpush.bf16.msrb.mxu3 %v17511_v54  ;;  %v16212_v54 = vld [vmem:[#allocation11 + $0x1410] sm:$0xf0]  ;;  %v10276_v19 = vadd.f32 %v10275_v18, %v10262_v30  ;;  %v11686_v53 = vmul.f32 0.5, %v10194_v21  ;;  %v15999_v8 = vor.u32 %v18724_v31, %v15996_v27  ;;  %v18680_v30 = vld [vmem:[#allocation11 + $0x10b4] sm:$0xf0] }
 0x3d9   :  { %10688 = vmatpush.bf16.msra.mxu0 %v14059_v58  ;;  %v17295_v58 = vor.u32 %v19048_v59, %v17292_v29  ;;  %10647 = vmatpush.bf16.msrb.mxu1 %v16287_v42  ;;  %v16215_v12 = vor.u32 %v18778_v49, %v16212_v54  ;;  %v15994_v59 = vld [vmem:[#allocation11 + $0x1218] sm:$0xf]  ;;  %v18733_v29 = vld [vmem:[#allocation11 + $0x125c] sm:$0xf0]  ;;  %v18418_v42 = vld [vmem:[#allocation11 + $0x88c] sm:$0xf]  ;;  %v10277_v15 = vpop.f32.mrf.mxu2  ;;  %v15787_v46 = vor.u32 %v18680_v30, %v15786_v17 }
 0x3da   :  { %10550 = vmatpush.bf16.msrb.mxu2 %v16211_v45  ;;  %v16071_v45 = vor.u32 %v18742_v37, %v16068_v2  ;;  %v15858_v54 = vld [vmem:[#allocation11 + $0x1100] sm:$0xf]  ;;  %v15995_v38 = vor.u32 %v18733_v29, %v15994_v59  ;;  %v16362_v63 = vld [vmem:[#allocation11 + $0x14f0] sm:$0xf]  ;;  %v18806_v21 = vld [vmem:[#allocation11 + $0x14a4] sm:$0xf0] }
 0x3db   :  { %v15859_v47 = vor.u32 %v18698_v11, %v15858_v54  ;;  %v16218_v11 = vld [vmem:[#allocation11 + $0x13d0] sm:$0xf]  ;;  %v14562_v27 = vld [vmem:[#allocation11 + $0x6e0] sm:$0xf]  ;;  %v18356_v17 = vld [vmem:[#allocation11 + $0x694] sm:$0xf0] }
 0x3dc   :  { %10675 = vmatpush.bf16.msrb.mxu3 %v17439_v13  ;;  %v17223_v13 = vor.u32 %v19030_v0, %v17220_v10  ;;  %v14778_v0 = vld [vmem:[#allocation11 + $0x890] sm:$0xf]  ;;  %v18428_v10 = vld [vmem:[#allocation11 + $0x8d4] sm:$0xf0] }
 0x3dd   :  { %10689 = vmatpush.bf16.msra.mxu0 %v13987_v60  ;;  %v10289_v60 = vpop.f32.mrf.mxu3  ;;  %10648 = vmatpush.bf16.msrb.mxu1 %v16215_v12  ;;  %v10263_v1 = vpop.f32.mrf.mxu1  ;;  %v14779_v28 = vor.u32 %v18428_v10, %v14778_v0 }
 0x3de   :  { %10551 = vmatpush.bf16.msrb.mxu2 %v16139_v34  ;;  %v10290_v33 = vadd.f32 %v10289_v60, %v10276_v19  ;;  %v10264_v35 = vadd.f32 %v10263_v1, %v10250_v3  ;;  %v19176_v12 = vpop.eup %19175  ;;  %v14700_v34 = vld [vmem:[#allocation11 + $0x840] sm:$0xf0]  ;;  %v18382_v19 = vld [vmem:[#allocation11 + $0x76c] sm:$0xf]  ;;  %v14634_v3 = vld [vmem:[#allocation11 + $0x770] sm:$0xf] }
 0x3df   :  { %v14703_v18 = vor.u32 %v18400_v61, %v14700_v34  ;;  %v11740_v55 = vmul.f32 0.5, %v19176_v12  ;;  %v18788_v1 = vld [vmem:[#allocation11 + $0x1414] sm:$0xf0]  ;;  %v15570_v12 = vld [vmem:[#allocation11 + $0xec0] sm:$0xf] }
 0x3e0   :  { %10676 = vmatpush.bf16.msrb.mxu3 %v17367_v51  ;;  %v16506_v51 = vld [vmem:[#allocation11 + $0x1610] sm:$0xf]  ;;  %v11669_v56 = vmul.f32 0.5, %v10290_v33  ;;  %v10278_v32 = vadd.f32 %v10277_v15, %v10264_v35  ;;  %v18346_v35 = vld [vmem:[#allocation11 + $0x64c] sm:$0xf]  ;;  %v16219_v10 = vor.u32 %v18788_v1, %v16218_v11 }
 0x3e1   :  { %10690 = vmatpush.bf16.msra.mxu0 %v13915_v57  ;;  %v17151_v57 = vor.u32 %v19012_v16, %v17148_v20  ;;  %10649 = vmatpush.bf16.msrb.mxu1 %v16143_v43  ;;  %v16507_v49 = vor.u32 %v18860_v48, %v16506_v51  ;;  %v18824_v16 = vld [vmem:[#allocation11 + $0x1534] sm:$0xf0]  ;;  %v18410_v20 = vld [vmem:[#allocation11 + $0x844] sm:$0xf0]  ;;  %v14628_v43 = vld [vmem:[#allocation11 + $0x7b0] sm:$0xf0] }
 0x3e2   :  { %10552 = vmatpush.bf16.msrb.mxu2 %v16067_v6  ;;  %19177 = vtanh.f32 %v11669_v56  ;;  %v16363_v23 = vor.u32 %v18824_v16, %v16362_v63  ;;  %v18662_v6 = vld [vmem:[#allocation11 + $0x1024] sm:$0xf0]  ;;  %v16290_v48 = vld [vmem:[#allocation11 + $0x1460] sm:$0xf]  ;;  %v14631_v33 = vor.u32 %v18382_v19, %v14628_v43  ;;  %v11776_v59 = vadd.f32 0.5, %v11740_v55 }
 0x3e3   :  { %19179 = vtanh.f32 %v11686_v53  ;;  %v16291_v31 = vor.u32 %v18806_v21, %v16290_v48  ;;  %v15642_v56 = vld [vmem:[#allocation11 + $0xf50] sm:$0xf]  ;;  %v18626_v15 = vld [vmem:[#allocation11 + $0xf04] sm:$0xf0]  ;;  %v16146_v34 = vld [vmem:[#allocation11 + $0x1340] sm:$0xf] }
 0x3e4   :  { %10677 = vmatpush.bf16.msrb.mxu3 %v17295_v58  ;;  %v16434_v58 = vld [vmem:[#allocation11 + $0x1580] sm:$0xf]  ;;  %v18328_v63 = vld [vmem:[#allocation11 + $0x5bc] sm:$0xf]  ;;  %v14412_v16 = vld [vmem:[#allocation11 + $0x600] sm:$0xf0] }
 0x3e5   :  { %10691 = vmatpush.bf16.msra.mxu0 %v13843_v40  ;;  %v14775_v40 = vor.u32 %v18418_v42, %v14772_v52  ;;  %10650 = vmatpush.bf16.msrb.mxu1 %v16071_v45  ;;  %v16435_v14 = vor.u32 %v18842_v4, %v16434_v58  ;;  %v14556_v42 = vld [vmem:[#allocation11 + $0x720] sm:$0xf0]  ;;  %v18644_v45 = vld [vmem:[#allocation11 + $0xf94] sm:$0xf0]  ;;  %v18374_v58 = vld [vmem:[#allocation11 + $0x724] sm:$0xf0]  ;;  %v14415_v43 = vor.u32 %v18328_v63, %v14412_v16 }
 0x3e6   :  { %10553 = vmatpush.bf16.msrb.mxu2 %v15995_v38  ;;  %v15643_v53 = vor.u32 %v18644_v45, %v15642_v56  ;;  %v14563_v61 = vor.u32 %v18374_v58, %v14562_v27  ;;  %v18752_v19 = vld [vmem:[#allocation11 + $0x12f4] sm:$0xf0]  ;;  %v18590_v48 = vld [vmem:[#allocation11 + $0xde4] sm:$0xf0]  ;;  %v16002_v21 = vld [vmem:[#allocation11 + $0x1220] sm:$0xf] }
 0x3e7   :  { %v18292_v56 = vld [vmem:[#allocation11 + $0x49c] sm:$0xf]  ;;  %v14268_v45 = vld [vmem:[#allocation11 + $0x4e0] sm:$0xf0]  ;;  %v18994_v11 = vld [vmem:[#allocation11 + $0x1a8c] sm:$0xf] }
 0x3e8   :  { %10678 = vmatpush.bf16.msrb.mxu3 %v17223_v13  ;;  %v10291_v13 = vpop.f32.mrf.mxu3  ;;  %v19178_v37 = vpop.eup %19177  ;;  %v17076_v1 = vld [vmem:[#allocation11 + $0x1ad0] sm:$0xf0]  ;;  %v14274_v58 = vld [vmem:[#allocation11 + $0x4a0] sm:$0xf] }
 0x3e9   :  { %10692 = vmatpush.bf16.msra.mxu0 %v13771_v22  ;;  %v10292_v60 = vadd.f32 %v10291_v13, %v10278_v32  ;;  %v14706_v22 = vld [vmem:[#allocation11 + $0x800] sm:$0xf]  ;;  %10651 = vmatpush.bf16.msrb.mxu1 %v15999_v8  ;;  %v11741_v2 = vmul.f32 0.5, %v19178_v37  ;;  %v19180_v52 = vpop.eup %19179  ;;  %v18770_v32 = vld [vmem:[#allocation11 + $0x1384] sm:$0xf0] }
 0x3ea   :  { %10602 = vmatpush.bf16.msra.mxu2 %v14775_v40  ;;  %v14707_v51 = vor.u32 %v18410_v20, %v14706_v22  ;;  %v11758_v4 = vmul.f32 0.5, %v19180_v52  ;;  %v14484_v40 = vld [vmem:[#allocation11 + $0x690] sm:$0xf0]  ;;  %v18608_v22 = vld [vmem:[#allocation11 + $0xe74] sm:$0xf0] }
 0x3eb   :  { %v11687_v39 = vmul.f32 0.5, %v10292_v60  ;;  %10554 = vmatmul.bf16.vlgmr.msrb.gmra.mxu2 %v19790_v7  ;;  %v11777_v29 = vadd.f32 0.5, %v11741_v2  ;;  %v14487_v8 = vor.u32 %v18346_v35, %v14484_v40  ;;  %v16147_v60 = vor.u32 %v18770_v32, %v16146_v34  ;;  %v14418_v37 = vld [vmem:[#allocation11 + $0x5c0] sm:$0xf]  ;;  %v14780_v52 = vld [vmem:[#allocation11 + $0x8d8] sm:$0xf0]  ;;  %v19970_v35 = vpop.f32.mrf.mxu0  ;;  %v19972_v34 = vpop.f32.mrf.mxu1 }
 0x3ec   :  { %10679 = vmatpush.bf16.msrb.mxu3 %v17151_v57  ;;  %v18392_v57 = vld [vmem:[#allocation11 + $0x7b4] sm:$0xf0]  ;;  %10652 = vmatmul.bf16.vlgmr.msrb.gmra.mxu1 %v19790_v7  ;;  %v11794_v30 = vadd.f32 0.5, %v11758_v4  ;;  %v15426_v2 = vld [vmem:[#allocation11 + $0xda0] sm:$0xf]  ;;  %v14271_v40 = vor.u32 %v18292_v56, %v14268_v45 }
 0x3ed   :  { %10693 = vmatpush.bf16.msra.mxu0 %v13699_v62  ;;  %10700 = vmatpush.bf16.msra.mxu1 %v14779_v28  ;;  %19181 = vtanh.f32 %v11687_v39  ;;  %v15715_v62 = vor.u32 %v18662_v6, %v15714_v25  ;;  %v14635_v54 = vor.u32 %v18392_v57, %v14634_v3  ;;  %v15571_v28 = vor.u32 %v18626_v15, %v15570_v12  ;;  %v18338_v39 = vld [vmem:[#allocation11 + $0x604] sm:$0xf0]  ;;  %v14340_v6 = vld [vmem:[#allocation11 + $0x570] sm:$0xf0]  ;;  %v14346_v57 = vld [vmem:[#allocation11 + $0x530] sm:$0xf] }
 0x3ee   :  { %10603 = vmatpush.bf16.msra.mxu2 %v14703_v18  ;;  %v15498_v18 = vld [vmem:[#allocation11 + $0xe30] sm:$0xf]  ;;  %v14419_v3 = vor.u32 %v18338_v39, %v14418_v37  ;;  %v18257_v4 = vld [vmem:[#allocation11 + $0x384] sm:$0xf]  ;;  %v14708_v12 = vld [vmem:[#allocation11 + $0x848] sm:$0xf0]  ;;  %v17079_v15 = vor.u32 %v18994_v11, %v17076_v1 }
 0x3ef   :  { %10680 = vmatmul.bf16.vlgmr.msrb.gmra.mxu3 %v19810_v9  ;;  %v15499_v25 = vor.u32 %v18608_v22, %v15498_v18  ;;  %v18383_v16 = vld [vmem:[#allocation11 + $0x774] sm:$0xf]  ;;  %v17010_v22 = vld [vmem:[#allocation11 + $0x1a00] sm:$0xf]  ;;  %v18221_v37 = vld [vmem:[#allocation11 + $0x264] sm:$0xf] }
 0x3f0   :  { %10728 = vmatpush.bf16.msra.mxu3 %v15931_v50  ;;  %10694 = vmatmul.bf16.vlgmr.msra.gmra.mxu0 %v19753_v26  ;;  %v18364_v50 = vld [vmem:[#allocation11 + $0x6dc] sm:$0xf]  ;;  %v13988_v39 = vld [vmem:[#allocation11 + $0x2a8] sm:$0xf0]  ;;  %v16866_v45 = vld [vmem:[#allocation11 + $0x18e0] sm:$0xf] }
 0x3f1   :  { %10742 = vmatpush.bf16.msrb.mxu0 %v16507_v49  ;;  %v11811_v49 = vpack.c.bf16 %v11777_v29, %v11776_v59  ;;  %10701 = vmatpush.bf16.msra.mxu1 %v14707_v51  ;;  %v14559_v38 = vor.u32 %v18364_v50, %v14556_v42  ;;  %v18275_v59 = vld [vmem:[#allocation11 + $0x414] sm:$0xf]  ;;  %v14204_v29 = vld [vmem:[#allocation11 + $0x458] sm:$0xf0]  ;;  %v18320_v50 = vld [vmem:[#allocation11 + $0x574] sm:$0xf0] }
 0x3f2   :  { %10604 = vmatpush.bf16.msra.mxu2 %v14631_v33  ;;  %v18734_v33 = vld [vmem:[#allocation11 + $0x1264] sm:$0xf0]  ;;  %v18419_v42 = vld [vmem:[#allocation11 + $0x894] sm:$0xf]  ;;  %v18922_v11 = vld [vmem:[#allocation11 + $0x184c] sm:$0xf] }
 0x3f3   :  { %11829 = vst [vmem:[#allocation14 + $0x8] sm:$0xff] %v11811_v49  ;;  %v19182_v0 = vpop.eup %19181  ;;  %v16003_v49 = vor.u32 %v18734_v33, %v16002_v21  ;;  %v14783_v27 = vor.u32 %v18419_v42, %v14780_v52  ;;  %v19977_v21 = vpop.f32.mrf.mxu0  ;;  %v13991_v33 = vor.u32 %v18221_v37, %v13988_v39  ;;  %v18347_v52 = vld [vmem:[#allocation11 + $0x654] sm:$0xf]  ;;  %v13700_v39 = vld [vmem:[#allocation11 + $0x68] sm:$0xf0] }
 0x3f4   :  { %10729 = vmatpush.bf16.msra.mxu3 %v15859_v47  ;;  %v11759_v47 = vmul.f32 0.5, %v19182_v0  ;;  %v18302_v0 = vld [vmem:[#allocation11 + $0x4e4] sm:$0xf0]  ;;  %v16788_v1 = vld [vmem:[#allocation11 + $0x1890] sm:$0xf0] }
 0x3f5   :  { %10743 = vmatpush.bf16.msrb.mxu0 %v16435_v14  ;;  %10702 = vmatpush.bf16.msra.mxu1 %v14635_v54  ;;  %v14490_v14 = vld [vmem:[#allocation11 + $0x650] sm:$0xf]  ;;  %v14207_v54 = vor.u32 %v18275_v59, %v14204_v29  ;;  %v18203_v29 = vld [vmem:[#allocation11 + $0x1d4] sm:$0xf] }
 0x3f6   :  { %10605 = vmatpush.bf16.msra.mxu2 %v14559_v38  ;;  %v11795_v13 = vadd.f32 0.5, %v11759_v47  ;;  %v14491_v55 = vor.u32 %v18356_v17, %v14490_v14  ;;  %v14347_v38 = vor.u32 %v18320_v50, %v14346_v57  ;;  %v17082_v47 = vld [vmem:[#allocation11 + $0x1a90] sm:$0xf]  ;;  %v17004_v14 = vld [vmem:[#allocation11 + $0x1a40] sm:$0xf0]  ;;  %v14275_v17 = vor.u32 %v18302_v0, %v14274_v58  ;;  %v19980_v50 = vpop.f32.mrf.mxu1 }
 0x3f7   :  { %v16860_v57 = vld [vmem:[#allocation11 + $0x1920] sm:$0xf0]  ;;  %v13844_v58 = vld [vmem:[#allocation11 + $0x188] sm:$0xf0] }
 0x3f8   :  { %10730 = vmatpush.bf16.msra.mxu3 %v15787_v46  ;;  %v11820_v20 = vpack.c.bf16 %v11795_v13, %v11794_v30  ;;  %v16074_v46 = vld [vmem:[#allocation11 + $0x12b0] sm:$0xf]  ;;  %v18239_v13 = vld [vmem:[#allocation11 + $0x2f4] sm:$0xf]  ;;  %v18329_v0 = vld [vmem:[#allocation11 + $0x5c4] sm:$0xf] }
 0x3f9   :  { %10744 = vmatpush.bf16.msrb.mxu0 %v16363_v23  ;;  %10703 = vmatpush.bf16.msra.mxu1 %v14563_v61  ;;  %v18310_v23 = vld [vmem:[#allocation11 + $0x52c] sm:$0xf]  ;;  %v16075_v51 = vor.u32 %v18752_v19, %v16074_v46  ;;  %v19004_v61 = vld [vmem:[#allocation11 + $0x1ad4] sm:$0xf0]  ;;  %v16932_v19 = vld [vmem:[#allocation11 + $0x19b0] sm:$0xf0] }
 0x3fa   :  { %10606 = vmatpush.bf16.msra.mxu2 %v14487_v8  ;;  %11838 = vst [vmem:[#allocation14 + $0x50] sm:$0xff] %v11820_v20  ;;  %v18976_v8 = vld [vmem:[#allocation11 + $0x19fc] sm:$0xf]  ;;  %v17083_v63 = vor.u32 %v19004_v61, %v17082_v47  ;;  %v18986_v20 = vld [vmem:[#allocation11 + $0x1a44] sm:$0xf0] }
 0x3fb   :  { %v17007_v18 = vor.u32 %v18976_v8, %v17004_v14  ;;  %v18958_v46 = vld [vmem:[#allocation11 + $0x196c] sm:$0xf]  ;;  %v18932_v47 = vld [vmem:[#allocation11 + $0x1894] sm:$0xf0]  ;;  %v19986_v61 = vpop.f32.mrf.mxu0  ;;  %v18904_v8 = vld [vmem:[#allocation11 + $0x17bc] sm:$0xf] }
 0x3fc   :  { %10731 = vmatpush.bf16.msra.mxu3 %v15715_v62  ;;  %v14343_v62 = vor.u32 %v18310_v23, %v14340_v6  ;;  %v17011_v23 = vor.u32 %v18986_v20, %v17010_v22  ;;  %v14564_v6 = vld [vmem:[#allocation11 + $0x728] sm:$0xf0]  ;;  %v16716_v14 = vld [vmem:[#allocation11 + $0x1800] sm:$0xf0]  ;;  %v16722_v22 = vld [vmem:[#allocation11 + $0x17c0] sm:$0xf] }
 0x3fd   :  { %10745 = vmatpush.bf16.msrb.mxu0 %v16291_v31  ;;  %10704 = vmatpush.bf16.msra.mxu1 %v14491_v55  ;;  %v15427_v31 = vor.u32 %v18590_v48, %v15426_v2  ;;  %v16935_v2 = vor.u32 %v18958_v46, %v16932_v19  ;;  %v18968_v48 = vld [vmem:[#allocation11 + $0x19b4] sm:$0xf0]  ;;  %v18914_v20 = vld [vmem:[#allocation11 + $0x1804] sm:$0xf0]  ;;  %v18886_v46 = vld [vmem:[#allocation11 + $0x172c] sm:$0xf] }
 0x3fe   :  { %10607 = vmatpush.bf16.msra.mxu2 %v14415_v43  ;;  %v16644_v19 = vld [vmem:[#allocation11 + $0x1770] sm:$0xf0] }
 0x400   :  { %10732 = vmatpush.bf16.msra.mxu3 %v15643_v53  ;;  %v14132_v53 = vld [vmem:[#allocation11 + $0x3c8] sm:$0xf0] }
 0x401   :  { %10746 = vmatpush.bf16.msrb.mxu0 %v16219_v10  ;;  %10705 = vmatpush.bf16.msra.mxu1 %v14419_v3  ;;  %v18401_v10 = vld [vmem:[#allocation11 + $0x804] sm:$0xf]  ;;  %v14135_v32 = vor.u32 %v18257_v4, %v14132_v53  ;;  %v18940_v3 = vld [vmem:[#allocation11 + $0x18dc] sm:$0xf]  ;;  %v19982_v4 = vpop.f32.mrf.mxu3  ;;  %v19984_v53 = vpop.f32.mrf.mxu2 }
 0x402   :  { %10608 = vmatpush.bf16.msra.mxu2 %v14343_v62  ;;  %v14711_v30 = vor.u32 %v18401_v10, %v14708_v12  ;;  %v13916_v62 = vld [vmem:[#allocation11 + $0x218] sm:$0xf0]  ;;  %v16863_v56 = vor.u32 %v18940_v3, %v16860_v57  ;;  %v14420_v10 = vld [vmem:[#allocation11 + $0x608] sm:$0xf0]  ;;  %v16791_v12 = vor.u32 %v18922_v11, %v16788_v1  ;;  %v18896_v3 = vld [vmem:[#allocation11 + $0x1774] sm:$0xf0] }
 0x403   :  { %v18995_v57 = vld [vmem:[#allocation11 + $0x1a94] sm:$0xf]  ;;  %v18572_v11 = vld [vmem:[#allocation11 + $0xd54] sm:$0xf0]  ;;  %v19995_v1 = vpop.f32.mrf.mxu0 }
 0x404   :  { %10733 = vmatpush.bf16.msra.mxu3 %v15571_v28  ;;  %v14060_v28 = vld [vmem:[#allocation11 + $0x338] sm:$0xf0] }
 0x405   :  { %10747 = vmatpush.bf16.msrb.mxu0 %v16147_v60  ;;  %10706 = vmatpush.bf16.msra.mxu1 %v14347_v38  ;;  %v14636_v60 = vld [vmem:[#allocation11 + $0x7b8] sm:$0xf0]  ;;  %v14063_v55 = vor.u32 %v18239_v13, %v14060_v28  ;;  %v19988_v28 = vpop.f32.mrf.mxu1 }
 0x406   :  { %10609 = vmatpush.bf16.msra.mxu2 %v14271_v40  ;;  %v14639_v43 = vor.u32 %v18383_v16, %v14636_v60  ;;  %v13772_v13 = vld [vmem:[#allocation11 + $0xf8] sm:$0xf0]  ;;  %v18311_v16 = vld [vmem:[#allocation11 + $0x534] sm:$0xf] }
 0x407   :  { %v14348_v60 = vld [vmem:[#allocation11 + $0x578] sm:$0xf0] }
 0x408   :  { %10734 = vmatpush.bf16.msra.mxu3 %v15499_v25  ;;  %v18365_v25 = vld [vmem:[#allocation11 + $0x6e4] sm:$0xf]  ;;  %v14351_v37 = vor.u32 %v18311_v16, %v14348_v60 }
 0x409   :  { %10748 = vmatpush.bf16.msrb.mxu0 %v16075_v51  ;;  %10707 = vmatpush.bf16.msra.mxu1 %v14275_v17  ;;  %v16938_v51 = vld [vmem:[#allocation11 + $0x1970] sm:$0xf]  ;;  %v14567_v59 = vor.u32 %v18365_v25, %v14564_v6  ;;  %v14423_v17 = vor.u32 %v18329_v0, %v14420_v10  ;;  %v14276_v25 = vld [vmem:[#allocation11 + $0x4e8] sm:$0xf0]  ;;  %v16723_v6 = vor.u32 %v18914_v20, %v16722_v22  ;;  %v16364_v22 = vld [vmem:[#allocation11 + $0x1538] sm:$0xf0] }
 0x40a   :  { %10658 = vmatpush.bf16.msrb.mxu2 %v17079_v15  ;;  %v16939_v42 = vor.u32 %v18968_v48, %v16938_v51  ;;  %v16794_v15 = vld [vmem:[#allocation11 + $0x1850] sm:$0xf]  ;;  %v18851_v51 = vld [vmem:[#allocation11 + $0x1614] sm:$0xf]  ;;  %v16508_v48 = vld [vmem:[#allocation11 + $0x1658] sm:$0xf0] }
 0x40b   :  { %10610 = vmatmul.bf16.vlgmr.msra.gmra.mxu2 %v19770_v44  ;;  %v16436_v0 = vld [vmem:[#allocation11 + $0x15c8] sm:$0xf0] }
 0x40c   :  { %10735 = vmatpush.bf16.msra.mxu3 %v15427_v31  ;;  %10708 = vmatmul.bf16.vlgmr.msra.gmra.mxu1 %v19770_v44  ;;  %v14492_v31 = vld [vmem:[#allocation11 + $0x698] sm:$0xf0] }
 0x40d   :  { %10749 = vmatpush.bf16.msrb.mxu0 %v16003_v49  ;;  %10756 = vmatpush.bf16.msrb.mxu1 %v17083_v63  ;;  %v18950_v49 = vld [vmem:[#allocation11 + $0x1924] sm:$0xf0]  ;;  %v14495_v38 = vor.u32 %v18347_v52, %v14492_v31  ;;  %v16795_v63 = vor.u32 %v18932_v47, %v16794_v15  ;;  %v18868_v52 = vld [vmem:[#allocation11 + $0x169c] sm:$0xf]  ;;  %v16572_v31 = vld [vmem:[#allocation11 + $0x16e0] sm:$0xf0] }
 0x40e   :  { %10659 = vmatpush.bf16.msrb.mxu2 %v17007_v18  ;;  %v16867_v40 = vor.u32 %v18950_v49, %v16866_v45  ;;  %v16719_v18 = vor.u32 %v18904_v8, %v16716_v14  ;;  %v16511_v49 = vor.u32 %v18851_v51, %v16508_v48  ;;  %v16575_v10 = vor.u32 %v18868_v52, %v16572_v31  ;;  %v18977_v15 = vld [vmem:[#allocation11 + $0x1a04] sm:$0xf]  ;;  %v17012_v47 = vld [vmem:[#allocation11 + $0x1a48] sm:$0xf0]  ;;  %v18563_v14 = vld [vmem:[#allocation11 + $0xd14] sm:$0xf]  ;;  %v20007_v48 = vpop.f32.mrf.mxu0 }
 0x40f   :  { %10736 = vmatmul.bf16.vlgmr.msra.gmra.mxu3 %v19787_v41  ;;  %v17015_v60 = vor.u32 %v18977_v15, %v17012_v47  ;;  %v18536_v51 = vld [vmem:[#allocation11 + $0xc34] sm:$0xf0]  ;;  %v18941_v52 = vld [vmem:[#allocation11 + $0x18e4] sm:$0xf]  ;;  %v16868_v31 = vld [vmem:[#allocation11 + $0x1928] sm:$0xf0] }
 0x410   :  { %10784 = vmatpush.bf16.msrb.mxu3 %v14207_v54  ;;  %10750 = vmatmul.bf16.vlgmr.msrb.gmra.mxu0 %v19790_v7  ;;  %v13919_v54 = vor.u32 %v18203_v29, %v13916_v62  ;;  %v19990_v29 = vpop.f32.mrf.mxu3  ;;  %v19992_v62 = vpop.f32.mrf.mxu2 }
 0x411   :  { %10798 = vmatpush.bf16.msra.mxu0 %v14783_v27  ;;  %10757 = vmatpush.bf16.msrb.mxu1 %v17011_v23  ;;  %v18185_v27 = vld [vmem:[#allocation11 + $0x144] sm:$0xf] }
 0x412   :  { %10660 = vmatpush.bf16.msrb.mxu2 %v16935_v2  ;;  %v18293_v23 = vld [vmem:[#allocation11 + $0x4a4] sm:$0xf]  ;;  %v16650_v2 = vld [vmem:[#allocation11 + $0x1730] sm:$0xf] }
 0x413   :  { %v14279_v45 = vor.u32 %v18293_v23, %v14276_v25  ;;  %v18545_v23 = vld [vmem:[#allocation11 + $0xc84] sm:$0xf]  ;;  %v15284_v25 = vld [vmem:[#allocation11 + $0xcc8] sm:$0xf0] }
 0x414   :  { %10785 = vmatpush.bf16.msrb.mxu3 %v14135_v32  ;;  %v13847_v32 = vor.u32 %v18185_v27, %v13844_v58  ;;  %v16578_v58 = vld [vmem:[#allocation11 + $0x16a0] sm:$0xf] }
 0x415   :  { %10799 = vmatpush.bf16.msra.mxu0 %v14711_v30  ;;  %10758 = vmatpush.bf16.msrb.mxu1 %v16939_v42  ;;  %v18167_v30 = vld [vmem:[#allocation11 + $0xb4] sm:$0xf] }
 0x416   :  { %10661 = vmatpush.bf16.msrb.mxu2 %v16863_v56  ;;  %v4830_v56 = vperm.slane %v19940_v36, 4 }
 0x418   :  { %10786 = vmatpush.bf16.msrb.mxu3 %v14063_v55  ;;  %v13775_v55 = vor.u32 %v18167_v30, %v13772_v13  ;;  %v15282_v13 = vld [vmem:[#allocation11 + $0xc80] sm:$0xf]  ;;  %v10304_v20 = vadd.f32 %v19970_v35, %v4830_v56  ;;  %v15210_v35 = vld [vmem:[#allocation11 + $0xbf0] sm:$0xf] }
 0x419   :  { %10800 = vmatpush.bf16.msra.mxu0 %v14639_v43  ;;  %10759 = vmatpush.bf16.msrb.mxu1 %v16867_v40  ;;  %v18149_v43 = vld [vmem:[#allocation11 + $0x24] sm:$0xf] }
 0x41a   :  { %10662 = vmatpush.bf16.msrb.mxu2 %v16791_v12  ;;  %v13703_v42 = vor.u32 %v18149_v43, %v13700_v39  ;;  %v18833_v40 = vld [vmem:[#allocation11 + $0x1584] sm:$0xf]  ;;  %v18878_v12 = vld [vmem:[#allocation11 + $0x16e4] sm:$0xf0]  ;;  %v10401_v43 = vpop.f32.mrf.mxu3 }
 0x41b   :  { %v16439_v30 = vor.u32 %v18833_v40, %v16436_v0  ;;  %v16579_v16 = vor.u32 %v18878_v12, %v16578_v58  ;;  %v18779_v58 = vld [vmem:[#allocation11 + $0x13d4] sm:$0xf]  ;;  %v16220_v40 = vld [vmem:[#allocation11 + $0x1418] sm:$0xf0]  ;;  %v10306_v0 = vadd.f32 %v19977_v21, %v4830_v56  ;;  %v18500_v21 = vld [vmem:[#allocation11 + $0xb14] sm:$0xf0] }
 0x41c   :  { %10787 = vmatpush.bf16.msrb.mxu3 %v13991_v33  ;;  %v16647_v33 = vor.u32 %v18886_v46, %v16644_v19  ;;  %v18959_v46 = vld [vmem:[#allocation11 + $0x1974] sm:$0xf]  ;;  %v16940_v19 = vld [vmem:[#allocation11 + $0x19b8] sm:$0xf0]  ;;  %v16223_v36 = vor.u32 %v18779_v58, %v16220_v40  ;;  %v14922_v58 = vld [vmem:[#allocation11 + $0x9b0] sm:$0xf] }
 0x41d   :  { %10801 = vmatpush.bf16.msra.mxu0 %v14567_v59  ;;  %10760 = vmatpush.bf16.msrb.mxu1 %v16795_v63  ;;  %v17084_v59 = vld [vmem:[#allocation11 + $0x1ad8] sm:$0xf0]  ;;  %v18554_v63 = vld [vmem:[#allocation11 + $0xcc4] sm:$0xf0]  ;;  %v18725_v40 = vld [vmem:[#allocation11 + $0x1224] sm:$0xf] }
 0x41e   :  { %10663 = vmatpush.bf16.msrb.mxu2 %v16719_v18  ;;  %v17087_v27 = vor.u32 %v18995_v57, %v17084_v59  ;;  %v18815_v18 = vld [vmem:[#allocation11 + $0x14f4] sm:$0xf]  ;;  %v15283_v39 = vor.u32 %v18554_v63, %v15282_v13  ;;  %v16292_v57 = vld [vmem:[#allocation11 + $0x14a8] sm:$0xf0]  ;;  %v10320_v63 = vadd.f32 %v19980_v50, %v10306_v0 }
 0x41f   :  { %v15140_v13 = vld [vmem:[#allocation11 + $0xba8] sm:$0xf0] }
 0x420   :  { %10788 = vmatpush.bf16.msrb.mxu3 %v13919_v54  ;;  %v15354_v54 = vld [vmem:[#allocation11 + $0xd10] sm:$0xf]  ;;  %v16724_v50 = vld [vmem:[#allocation11 + $0x1808] sm:$0xf0] }
 0x421   :  { %10802 = vmatpush.bf16.msra.mxu0 %v14495_v38  ;;  %10761 = vmatpush.bf16.msrb.mxu1 %v16723_v6  ;;  %v16651_v38 = vor.u32 %v18896_v3, %v16650_v2  ;;  %v15355_v8 = vor.u32 %v18572_v11, %v15354_v54  ;;  %v10318_v6 = vadd.f32 %v19972_v34, %v10304_v20  ;;  %v18797_v3 = vld [vmem:[#allocation11 + $0x1464] sm:$0xf]  ;;  %v15212_v54 = vld [vmem:[#allocation11 + $0xc38] sm:$0xf0] }
 0x422   :  { %10664 = vmatpush.bf16.msrb.mxu2 %v16647_v33  ;;  %v16367_v2 = vor.u32 %v18815_v18, %v16364_v22  ;;  %v16943_v33 = vor.u32 %v18959_v46, %v16940_v19  ;;  %v16295_v11 = vor.u32 %v18797_v3, %v16292_v57  ;;  %v10403_v56 = vpop.f32.mrf.mxu3  ;;  %v16148_v22 = vld [vmem:[#allocation11 + $0x1388] sm:$0xf0]  ;;  %v16076_v57 = vld [vmem:[#allocation11 + $0x12f8] sm:$0xf0] }
 0x423   :  { %v10332_v59 = vadd.f32 %v19984_v53, %v10318_v6  ;;  %v16871_v53 = vor.u32 %v18941_v52, %v16868_v31  ;;  %v18491_v6 = vld [vmem:[#allocation11 + $0xad4] sm:$0xf] }
 0x424   :  { %10789 = vmatpush.bf16.msrb.mxu3 %v13847_v32  ;;  %v19997_v32 = vpop.f32.mrf.mxu1  ;;  %v18887_v31 = vld [vmem:[#allocation11 + $0x1734] sm:$0xf] }
 0x425   :  { %10803 = vmatpush.bf16.msra.mxu0 %v14423_v17  ;;  %v15356_v17 = vld [vmem:[#allocation11 + $0xd58] sm:$0xf0]  ;;  %10762 = vmatpush.bf16.msrb.mxu1 %v16651_v38  ;;  %v15138_v38 = vld [vmem:[#allocation11 + $0xb60] sm:$0xf]  ;;  %v10346_v15 = vadd.f32 %v19982_v4, %v10332_v59  ;;  %v18761_v4 = vld [vmem:[#allocation11 + $0x1344] sm:$0xf] }
 0x426   :  { %10665 = vmatpush.bf16.msrb.mxu2 %v16575_v10  ;;  %v20017_v10 = vld [vmem:[#allocation13] sm:$0xff] }
 0x427   :  { %v4831_v12 = vperm.slane %v20017_v10, 5  ;;  %v10360_v46 = vadd.f32 %v19986_v61, %v10346_v15 }
 0x428   :  { %10790 = vmatpush.bf16.msrb.mxu3 %v13775_v55  ;;  %v15359_v55 = vor.u32 %v18563_v14, %v15356_v17  ;;  %v16796_v14 = vld [vmem:[#allocation11 + $0x1898] sm:$0xf0] }
 0x429   :  { %10804 = vmatpush.bf16.msra.mxu0 %v14351_v37  ;;  %v20003_v37 = vpop.f32.mrf.mxu2  ;;  %10763 = vmatpush.bf16.msrb.mxu1 %v16579_v16  ;;  %v15066_v16 = vld [vmem:[#allocation11 + $0xad0] sm:$0xf]  ;;  %v10402_v20 = vadd.f32 %v10401_v43, %v4831_v12 }
 0x42a   :  { %10714 = vmatpush.bf16.msra.mxu2 %v15355_v8  ;;  %v18923_v8 = vld [vmem:[#allocation11 + $0x1854] sm:$0xf]  ;;  %v10457_v0 = vpop.f32.mrf.mxu3 }
 0x42b   :  { %10666 = vmatmul.bf16.vlgmr.msrb.gmra.mxu2 %v19797_v24  ;;  %v16799_v18 = vor.u32 %v18923_v8, %v16796_v14  ;;  %v10416_v61 = vadd.f32 %v20007_v48, %v10402_v20  ;;  %v18464_v48 = vld [vmem:[#allocation11 + $0x9f4] sm:$0xf0]  ;;  %v18869_v8 = vld [vmem:[#allocation11 + $0x16a4] sm:$0xf]  ;;  %v16580_v14 = vld [vmem:[#allocation11 + $0x16e8] sm:$0xf0] }
 0x42c   :  { %10791 = vmatpush.bf16.msrb.mxu3 %v13703_v42  ;;  %v15287_v42 = vor.u32 %v18545_v23, %v15284_v25  ;;  %v20011_v34 = vpop.f32.mrf.mxu1  ;;  %10764 = vmatmul.bf16.vlgmr.msrb.gmra.mxu1 %v19797_v24  ;;  %v10417_v23 = vpop.f32.mrf.mxu0  ;;  %v15067_v25 = vor.u32 %v18500_v21, %v15066_v16  ;;  %v14923_v16 = vor.u32 %v18464_v48, %v14922_v58  ;;  %v14924_v21 = vld [vmem:[#allocation11 + $0x9f8] sm:$0xf0]  ;;  %v14850_v20 = vld [vmem:[#allocation11 + $0x920] sm:$0xf] }
 0x42d   :  { %10805 = vmatpush.bf16.msra.mxu0 %v14279_v45  ;;  %10812 = vmatpush.bf16.msra.mxu1 %v15359_v55  ;;  %v15211_v45 = vor.u32 %v18536_v51, %v15210_v35  ;;  %v10334_v55 = vadd.f32 %v19992_v62, %v10320_v63  ;;  %v16151_v35 = vor.u32 %v18761_v4, %v16148_v22  ;;  %v14994_v51 = vld [vmem:[#allocation11 + $0xa40] sm:$0xf]  ;;  %v18743_v62 = vld [vmem:[#allocation11 + $0x12b4] sm:$0xf] }
 0x42e   :  { %10715 = vmatpush.bf16.msra.mxu2 %v15283_v39  ;;  %v18905_v39 = vld [vmem:[#allocation11 + $0x17c4] sm:$0xf]  ;;  %v18429_v63 = vld [vmem:[#allocation11 + $0x8dc] sm:$0xf0] }
 0x42f   :  { %10792 = vmatmul.bf16.vlgmr.msrb.gmra.mxu3 %v19753_v26  ;;  %v16727_v43 = vor.u32 %v18905_v39, %v16724_v50  ;;  %v10348_v59 = vadd.f32 %v19990_v29, %v10334_v55  ;;  %v10404_v29 = vadd.f32 %v10403_v56, %v4831_v12  ;;  %v15362_v12 = vld [vmem:[#allocation11 + $0xd18] sm:$0xf]  ;;  %v18573_v56 = vld [vmem:[#allocation11 + $0xd5c] sm:$0xf0]  ;;  %v18446_v55 = vld [vmem:[#allocation11 + $0x964] sm:$0xf0] }
 0x430   :  { %10840 = vmatpush.bf16.msra.mxu3 %v16511_v49  ;;  %10806 = vmatmul.bf16.vlgmr.msra.gmra.mxu0 %v19770_v44  ;;  %v18527_v49 = vld [vmem:[#allocation11 + $0xbf4] sm:$0xf]  ;;  %v17658_v50 = vld [vmem:[#allocation11 + $0x1f10] sm:$0xf] }
 0x431   :  { %10854 = vmatpush.bf16.msrb.mxu0 %v17087_v27  ;;  %v18518_v27 = vld [vmem:[#allocation11 + $0xba4] sm:$0xf0]  ;;  %10813 = vmatpush.bf16.msra.mxu1 %v15287_v42  ;;  %v15215_v47 = vor.u32 %v18527_v49, %v15212_v54  ;;  %v10374_v42 = vadd.f32 %v19988_v28, %v10360_v46  ;;  %v18473_v54 = vld [vmem:[#allocation11 + $0xa44] sm:$0xf]  ;;  %v10418_v46 = vadd.f32 %v10417_v23, %v10404_v29  ;;  %v14852_v23 = vld [vmem:[#allocation11 + $0x968] sm:$0xf0] }
 0x432   :  { %10716 = vmatpush.bf16.msra.mxu2 %v15211_v45  ;;  %v15139_v17 = vor.u32 %v18518_v27, %v15138_v38  ;;  %v16652_v45 = vld [vmem:[#allocation11 + $0x1778] sm:$0xf0]  ;;  %v10430_v38 = vadd.f32 %v20011_v34, %v10416_v61  ;;  %v14851_v61 = vor.u32 %v18446_v55, %v14850_v20  ;;  %v18393_v29 = vld [vmem:[#allocation11 + $0x7bc] sm:$0xf0]  ;;  %v18519_v20 = vld [vmem:[#allocation11 + $0xbac] sm:$0xf0] }
 0x433   :  { %v10388_v27 = vadd.f32 %v20003_v37, %v10374_v42  ;;  %v16655_v15 = vor.u32 %v18887_v31, %v16652_v45  ;;  %v14786_v37 = vld [vmem:[#allocation11 + $0x898] sm:$0xf]  ;;  %v18555_v42 = vld [vmem:[#allocation11 + $0xccc] sm:$0xf0]  ;;  %v19139_v45 = vld [vmem:[#allocation11 + $0x1f14] sm:$0xf] }
 0x434   :  { %10841 = vmatpush.bf16.msra.mxu3 %v16439_v30  ;;  %v18509_v30 = vld [vmem:[#allocation11 + $0xb64] sm:$0xf]  ;;  %v20026_v3 = vpop.f32.mrf.mxu1  ;;  %v14787_v39 = vor.u32 %v18429_v63, %v14786_v37  ;;  %v17514_v37 = vld [vmem:[#allocation11 + $0x1df0] sm:$0xf]  ;;  %v19112_v63 = vld [vmem:[#allocation11 + $0x1e34] sm:$0xf0] }
 0x435   :  { %10855 = vmatpush.bf16.msrb.mxu0 %v17015_v60  ;;  %v20022_v60 = vpop.f32.mrf.mxu2  ;;  %10814 = vmatpush.bf16.msra.mxu1 %v15215_v47  ;;  %v15143_v19 = vor.u32 %v18509_v30, %v15140_v13  ;;  %v16004_v47 = vld [vmem:[#allocation11 + $0x1268] sm:$0xf0]  ;;  %v18455_v13 = vld [vmem:[#allocation11 + $0x9b4] sm:$0xf] }
 0x436   :  { %10717 = vmatpush.bf16.msra.mxu2 %v15139_v17  ;;  %v10362_v17 = vadd.f32 %v19995_v1, %v10348_v59  ;;  %v16007_v22 = vor.u32 %v18725_v40, %v16004_v47  ;;  %v15290_v59 = vld [vmem:[#allocation11 + $0xc88] sm:$0xf]  ;;  %v14642_v40 = vld [vmem:[#allocation11 + $0x778] sm:$0xf] }
 0x437   :  { %v15291_v48 = vor.u32 %v18555_v42, %v15290_v59  ;;  %v19085_v42 = vld [vmem:[#allocation11 + $0x1d64] sm:$0xf] }
 0x438   :  { %10842 = vmatpush.bf16.msra.mxu3 %v16367_v2  ;;  %v15068_v2 = vld [vmem:[#allocation11 + $0xb18] sm:$0xf0] }
 0x439   :  { %10856 = vmatpush.bf16.msrb.mxu0 %v16943_v33  ;;  %v18482_v33 = vld [vmem:[#allocation11 + $0xa84] sm:$0xf0]  ;;  %10815 = vmatpush.bf16.msra.mxu1 %v15143_v19  ;;  %v15071_v52 = vor.u32 %v18491_v6, %v15068_v2  ;;  %v16583_v19 = vor.u32 %v18869_v8, %v16580_v14  ;;  %v10376_v6 = vadd.f32 %v19997_v32, %v10362_v17  ;;  %v19121_v17 = vld [vmem:[#allocation11 + $0x1e84] sm:$0xf] }
 0x43a   :  { %10718 = vmatpush.bf16.msra.mxu2 %v15067_v25  ;;  %v14995_v49 = vor.u32 %v18482_v33, %v14994_v51  ;;  %v19148_v25 = vld [vmem:[#allocation11 + $0x1f54] sm:$0xf0]  ;;  %v15363_v51 = vor.u32 %v18573_v56, %v15362_v12  ;;  %v18437_v33 = vld [vmem:[#allocation11 + $0x924] sm:$0xf]  ;;  %v14570_v12 = vld [vmem:[#allocation11 + $0x6e8] sm:$0xf] }
 0x43b   :  { %v17659_v32 = vor.u32 %v19148_v25, %v17658_v50  ;;  %v14855_v58 = vor.u32 %v18437_v33, %v14852_v23  ;;  %v18375_v56 = vld [vmem:[#allocation11 + $0x72c] sm:$0xf0]  ;;  %v17442_v25 = vld [vmem:[#allocation11 + $0x1d60] sm:$0xf]  ;;  %v14498_v33 = vld [vmem:[#allocation11 + $0x658] sm:$0xf] }
 0x43c   :  { %10843 = vmatpush.bf16.msra.mxu3 %v16295_v11  ;;  %v14996_v11 = vld [vmem:[#allocation11 + $0xa88] sm:$0xf0]  ;;  %v10485_v1 = vpop.f32.mrf.mxu1  ;;  %v14571_v50 = vor.u32 %v18375_v56, %v14570_v12  ;;  %v18501_v23 = vld [vmem:[#allocation11 + $0xb1c] sm:$0xf0]  ;;  %v17226_v56 = vld [vmem:[#allocation11 + $0x1bb0] sm:$0xf] }
 0x43d   :  { %10857 = vmatpush.bf16.msrb.mxu0 %v16871_v53  ;;  %v16079_v53 = vor.u32 %v18743_v62, %v16076_v57  ;;  %v10443_v28 = vpop.f32.mrf.mxu2  ;;  %10816 = vmatpush.bf16.msra.mxu1 %v15071_v52  ;;  %v14999_v34 = vor.u32 %v18473_v54, %v14996_v11  ;;  %v18411_v62 = vld [vmem:[#allocation11 + $0x84c] sm:$0xf0]  ;;  %v10432_v57 = vadd.f32 %v20026_v3, %v10418_v46  ;;  %v17300_v12 = vld [vmem:[#allocation11 + $0x1c88] sm:$0xf0] }
 0x43e   :  { %v10444_v30 = vadd.f32 %v10443_v28, %v10430_v38  ;;  %10719 = vmatpush.bf16.msra.mxu2 %v14995_v49  ;;  %v10390_v52 = vadd.f32 %v20022_v60, %v10376_v6  ;;  %v17660_v49 = vld [vmem:[#allocation11 + $0x1f58] sm:$0xf0]  ;;  %v17586_v38 = vld [vmem:[#allocation11 + $0x1e80] sm:$0xf]  ;;  %v10459_v60 = vpop.f32.mrf.mxu3  ;;  %v15218_v28 = vld [vmem:[#allocation11 + $0xbf8] sm:$0xf]  ;;  %v17515_v46 = vor.u32 %v19112_v63, %v17514_v37 }
 0x43f   :  { %v19094_v6 = vld [vmem:[#allocation11 + $0x1da4] sm:$0xf0]  ;;  %v14930_v63 = vld [vmem:[#allocation11 + $0x9b8] sm:$0xf] }
 0x440   :  { %10844 = vmatpush.bf16.msra.mxu3 %v16223_v36  ;;  %v10471_v36 = vpop.f32.mrf.mxu0  ;;  %v10458_v4 = vadd.f32 %v10457_v0, %v10444_v30  ;;  %v17663_v0 = vor.u32 %v19139_v45, %v17660_v49  ;;  %v11688_v47 = vmul.f32 0.5, %v10390_v52  ;;  %v17588_v30 = vld [vmem:[#allocation11 + $0x1ec8] sm:$0xf0]  ;;  %v17443_v59 = vor.u32 %v19094_v6, %v17442_v25  ;;  %v17370_v49 = vld [vmem:[#allocation11 + $0x1cd0] sm:$0xf] }
 0x441   :  { %10858 = vmatpush.bf16.msrb.mxu0 %v16799_v18  ;;  %v11670_v18 = vmul.f32 0.5, %v10388_v27  ;;  %10817 = vmatpush.bf16.msra.mxu1 %v14999_v34  ;;  %v19130_v27 = vld [vmem:[#allocation11 + $0x1ec4] sm:$0xf0]  ;;  %v17444_v52 = vld [vmem:[#allocation11 + $0x1da8] sm:$0xf0] }
 0x442   :  { %v10472_v2 = vadd.f32 %v10471_v36, %v10458_v4  ;;  %10720 = vmatpush.bf16.msra.mxu2 %v14923_v16  ;;  %v17587_v14 = vor.u32 %v19130_v27, %v17586_v38  ;;  %v17591_v4 = vor.u32 %v19121_v17, %v17588_v30  ;;  %v14426_v27 = vld [vmem:[#allocation11 + $0x5c8] sm:$0xf]  ;;  %v14354_v30 = vld [vmem:[#allocation11 + $0x538] sm:$0xf]  ;;  %v19031_v6 = vld [vmem:[#allocation11 + $0x1bb4] sm:$0xf] }
 0x443   :  { %19183 = vtanh.f32 %v11670_v18 }
 0x444   :  { %10845 = vmatpush.bf16.msra.mxu3 %v16151_v35  ;;  %v14927_v35 = vor.u32 %v18455_v13, %v14924_v21  ;;  %v10486_v31 = vadd.f32 %v10485_v1, %v10472_v2  ;;  %v14643_v13 = vor.u32 %v18393_v29, %v14642_v40  ;;  %v10487_v18 = vpop.f32.mrf.mxu1  ;;  %v19103_v1 = vld [vmem:[#allocation11 + $0x1df4] sm:$0xf]  ;;  %v18483_v40 = vld [vmem:[#allocation11 + $0xa8c] sm:$0xf0] }
 0x445   :  { %10859 = vmatpush.bf16.msrb.mxu0 %v16727_v43  ;;  %v14714_v43 = vld [vmem:[#allocation11 + $0x808] sm:$0xf]  ;;  %v10445_v54 = vpop.f32.mrf.mxu2 }
 0x446   :  { %v14715_v11 = vor.u32 %v18411_v62, %v14714_v43  ;;  %v11671_v3 = vmul.f32 0.5, %v10486_v31  ;;  %10818 = vmatpush.bf16.msra.mxu1 %v14927_v35  ;;  %10721 = vmatpush.bf16.msra.mxu2 %v14851_v61  ;;  %v18357_v43 = vld [vmem:[#allocation11 + $0x69c] sm:$0xf0]  ;;  %v15074_v61 = vld [vmem:[#allocation11 + $0xad8] sm:$0xf] }
 0x447   :  { %v14499_v45 = vor.u32 %v18357_v43, %v14498_v33  ;;  %v15075_v38 = vor.u32 %v18501_v23, %v15074_v61  ;;  %v17228_v33 = vld [vmem:[#allocation11 + $0x1bf8] sm:$0xf0]  ;;  %v17666_v43 = vld [vmem:[#allocation11 + $0x1f18] sm:$0xf]  ;;  %v17154_v61 = vld [vmem:[#allocation11 + $0x1b20] sm:$0xf] }
 0x448   :  { %10846 = vmatpush.bf16.msra.mxu3 %v16079_v53  ;;  %v10446_v53 = vadd.f32 %v10445_v54, %v10432_v57  ;;  %19185 = vtanh.f32 %v11671_v3  ;;  %v10473_v34 = vpop.f32.mrf.mxu0  ;;  %v19076_v54 = vld [vmem:[#allocation11 + $0x1d14] sm:$0xf0]  ;;  %v18339_v3 = vld [vmem:[#allocation11 + $0x60c] sm:$0xf0]  ;;  %v19022_v23 = vld [vmem:[#allocation11 + $0x1b64] sm:$0xf0] }
 0x449   :  { %10860 = vmatpush.bf16.msrb.mxu0 %v16655_v15  ;;  %v18537_v15 = vld [vmem:[#allocation11 + $0xc3c] sm:$0xf0]  ;;  %v19184_v36 = vpop.eup %19183  ;;  %10722 = vmatmul.bf16.vlgmr.msra.gmra.mxu2 %v19768_v5  ;;  %19187 = vtanh.f32 %v11688_v47  ;;  %v17371_v29 = vor.u32 %v19076_v54, %v17370_v49  ;;  %v19013_v49 = vld [vmem:[#allocation11 + $0x1b24] sm:$0xf]  ;;  %v17018_v54 = vld [vmem:[#allocation11 + $0x1a08] sm:$0xf] }
 0x44a   :  { %v10460_v8 = vadd.f32 %v10459_v60, %v10446_v53  ;;  %10770 = vmatpush.bf16.msrb.mxu2 %v17659_v32  ;;  %10819 = vmatpush.bf16.msra.mxu1 %v14855_v58  ;;  %v15219_v21 = vor.u32 %v18537_v15, %v15218_v28  ;;  %v17447_v58 = vor.u32 %v19085_v42, %v17444_v52  ;;  %v19067_v60 = vld [vmem:[#allocation11 + $0x1cd4] sm:$0xf]  ;;  %v17298_v47 = vld [vmem:[#allocation11 + $0x1c40] sm:$0xf] }
 0x44b   :  { %v14427_v15 = vor.u32 %v18339_v3, %v14426_v27  ;;  %v18707_v52 = vld [vmem:[#allocation11 + $0x1194] sm:$0xf]  ;;  %v17156_v27 = vld [vmem:[#allocation11 + $0x1b68] sm:$0xf0]  ;;  %v17594_v3 = vld [vmem:[#allocation11 + $0x1e88] sm:$0xf] }
 0x44c   :  { %10847 = vmatpush.bf16.msra.mxu3 %v16007_v22  ;;  %v10474_v16 = vadd.f32 %v10473_v34, %v10460_v8  ;;  %v15146_v22 = vld [vmem:[#allocation11 + $0xb68] sm:$0xf]  ;;  %v18321_v34 = vld [vmem:[#allocation11 + $0x57c] sm:$0xf0] }
 0x44d   :  { %10861 = vmatpush.bf16.msrb.mxu0 %v16583_v19  ;;  %v17516_v19 = vld [vmem:[#allocation11 + $0x1e38] sm:$0xf0]  ;;  %10820 = vmatmul.bf16.vlgmr.msra.gmra.mxu1 %v19768_v5  ;;  %v19058_v8 = vld [vmem:[#allocation11 + $0x1c84] sm:$0xf0] }
 0x44e   :  { %10868 = vmatpush.bf16.msrb.mxu1 %v17663_v0  ;;  %v10488_v55 = vadd.f32 %v10487_v18, %v10474_v16  ;;  %10771 = vmatpush.bf16.msrb.mxu2 %v17587_v14  ;;  %v19186_v2 = vpop.eup %19185  ;;  %v17519_v57 = vor.u32 %v19103_v1, %v17516_v19  ;;  %v17372_v0 = vld [vmem:[#allocation11 + $0x1d18] sm:$0xf0]  ;;  %v17299_v16 = vor.u32 %v19058_v8, %v17298_v47  ;;  %v18303_v1 = vld [vmem:[#allocation11 + $0x4ec] sm:$0xf0]  ;;  %v14858_v19 = vld [vmem:[#allocation11 + $0x928] sm:$0xf] }
 0x44f   :  { %10848 = vmatmul.bf16.vlgmr.msra.gmra.mxu3 %v19790_v7  ;;  %v11743_v62 = vmul.f32 0.5, %v19186_v2  ;;  %v17375_v37 = vor.u32 %v19067_v60, %v17372_v0  ;;  %v17090_v2 = vld [vmem:[#allocation11 + $0x1a98] sm:$0xf]  ;;  %v18689_v60 = vld [vmem:[#allocation11 + $0x1104] sm:$0xf] }
 0x450   :  { %10896 = vmatpush.bf16.msrb.mxu3 %v14787_v39  ;;  %10862 = vmatmul.bf16.vlgmr.msrb.gmra.mxu0 %v19797_v24  ;;  %v11742_v39 = vmul.f32 0.5, %v19184_v36  ;;  %v11689_v35 = vmul.f32 0.5, %v10488_v55  ;;  %v18465_v36 = vld [vmem:[#allocation11 + $0x9fc] sm:$0xf0]  ;;  %v14282_v55 = vld [vmem:[#allocation11 + $0x4a8] sm:$0xf] }
 0x451   :  { %10910 = vmatpush.bf16.msra.mxu0 %v15363_v51  ;;  %v15147_v51 = vor.u32 %v18519_v20, %v15146_v22  ;;  %v11779_v32 = vadd.f32 0.5, %v11743_v62  ;;  %v14355_v22 = vor.u32 %v18321_v34, %v14354_v30  ;;  %v19040_v20 = vld [vmem:[#allocation11 + $0x1bf4] sm:$0xf0]  ;;  %v19149_v62 = vld [vmem:[#allocation11 + $0x1f5c] sm:$0xf0] }
 0x452   :  { %10869 = vmatpush.bf16.msrb.mxu1 %v17591_v4  ;;  %19189 = vtanh.f32 %v11689_v35  ;;  %10772 = vmatpush.bf16.msrb.mxu2 %v17515_v46  ;;  %v11778_v31 = vadd.f32 0.5, %v11742_v39  ;;  %v14931_v46 = vor.u32 %v18465_v36, %v14930_v63  ;;  %v18447_v39 = vld [vmem:[#allocation11 + $0x96c] sm:$0xf0]  ;;  %v19005_v35 = vld [vmem:[#allocation11 + $0x1adc] sm:$0xf0] }
 0x453   :  { %v17091_v42 = vor.u32 %v19005_v35, %v17090_v2  ;;  %v15860_v0 = vld [vmem:[#allocation11 + $0x1148] sm:$0xf0]  ;;  %v16946_v47 = vld [vmem:[#allocation11 + $0x1978] sm:$0xf]  ;;  %v18969_v8 = vld [vmem:[#allocation11 + $0x19bc] sm:$0xf0] }
 0x454   :  { %10897 = vmatpush.bf16.msrb.mxu3 %v14715_v11  ;;  %v19188_v11 = vpop.eup %19187  ;;  %v11812_v53 = vpack.c.bf16 %v11779_v32, %v11778_v31  ;;  %v15932_v31 = vld [vmem:[#allocation11 + $0x11d8] sm:$0xf0]  ;;  %v17231_v32 = vor.u32 %v19031_v6, %v17228_v33  ;;  %v19113_v30 = vld [vmem:[#allocation11 + $0x1e3c] sm:$0xf0]  ;;  %v15863_v34 = vor.u32 %v18689_v60, %v15860_v0  ;;  %v16947_v63 = vor.u32 %v18969_v8, %v16946_v47  ;;  %v18671_v36 = vld [vmem:[#allocation11 + $0x1074] sm:$0xf] }
 0x455   :  { %10911 = vmatpush.bf16.msra.mxu0 %v15291_v48  ;;  %v15002_v48 = vld [vmem:[#allocation11 + $0xa48] sm:$0xf]  ;;  %v11760_v28 = vmul.f32 0.5, %v19188_v11  ;;  %v18987_v11 = vld [vmem:[#allocation11 + $0x1a4c] sm:$0xf0] }
 0x456   :  { %10870 = vmatpush.bf16.msrb.mxu1 %v17519_v57  ;;  %10773 = vmatpush.bf16.msrb.mxu2 %v17443_v59  ;;  %11830 = vst [vmem:[#allocation14 + $0x10] sm:$0xff] %v11812_v53  ;;  %v15003_v17 = vor.u32 %v18483_v40, %v15002_v48  ;;  %v14283_v57 = vor.u32 %v18303_v1, %v14282_v55  ;;  %v19131_v53 = vld [vmem:[#allocation11 + $0x1ecc] sm:$0xf0]  ;;  %v15938_v48 = vld [vmem:[#allocation11 + $0x1198] sm:$0xf] }
 0x457   :  { %v11796_v18 = vadd.f32 0.5, %v11760_v28  ;;  %v14859_v59 = vor.u32 %v18447_v39, %v14858_v19  ;;  %v18717_v40 = vld [vmem:[#allocation11 + $0x11dc] sm:$0xf0]  ;;  %v17159_v28 = vor.u32 %v19013_v49, %v17156_v27  ;;  %v15794_v55 = vld [vmem:[#allocation11 + $0x1078] sm:$0xf] }
 0x458   :  { %10898 = vmatpush.bf16.msrb.mxu3 %v14643_v13  ;;  %v19190_v14 = vpop.eup %19189  ;;  %v18653_v19 = vld [vmem:[#allocation11 + $0xfe4] sm:$0xf]  ;;  %v15716_v39 = vld [vmem:[#allocation11 + $0x1028] sm:$0xf0]  ;;  %v18933_v6 = vld [vmem:[#allocation11 + $0x189c] sm:$0xf0] }
 0x459   :  { %10912 = vmatpush.bf16.msra.mxu0 %v15219_v21  ;;  %v11761_v13 = vmul.f32 0.5, %v19190_v14  ;;  %v19049_v21 = vld [vmem:[#allocation11 + $0x1c44] sm:$0xf]  ;;  %v15939_v14 = vor.u32 %v18717_v40, %v15938_v48  ;;  %v17378_v35 = vld [vmem:[#allocation11 + $0x1cd8] sm:$0xf]  ;;  %v15719_v33 = vor.u32 %v18653_v19, %v15716_v39 }
 0x45a   :  { %10871 = vmatpush.bf16.msrb.mxu1 %v17447_v58  ;;  %10774 = vmatpush.bf16.msrb.mxu2 %v17371_v29  ;;  %v17303_v25 = vor.u32 %v19049_v21, %v17300_v12  ;;  %v15935_v58 = vor.u32 %v18707_v52, %v15932_v31  ;;  %v17019_v29 = vor.u32 %v18987_v11, %v17018_v54  ;;  %v16874_v12 = vld [vmem:[#allocation11 + $0x18e8] sm:$0xf]  ;;  %v18915_v52 = vld [vmem:[#allocation11 + $0x180c] sm:$0xf0]  ;;  %v15650_v54 = vld [vmem:[#allocation11 + $0xf58] sm:$0xf] }
 0x45b   :  { %v11797_v4 = vadd.f32 0.5, %v11761_v13  ;;  %v15866_v13 = vld [vmem:[#allocation11 + $0x1108] sm:$0xf]  ;;  %v18645_v11 = vld [vmem:[#allocation11 + $0xf9c] sm:$0xf0] }
 0x45c   :  { %10899 = vmatpush.bf16.msrb.mxu3 %v14571_v50  ;;  %v18617_v27 = vld [vmem:[#allocation11 + $0xec4] sm:$0xf]  ;;  %v18897_v48 = vld [vmem:[#allocation11 + $0x177c] sm:$0xf0]  ;;  %v15651_v40 = vor.u32 %v18645_v11, %v15650_v54  ;;  %v18599_v8 = vld [vmem:[#allocation11 + $0xe34] sm:$0xf] }
 0x45d   :  { %10913 = vmatpush.bf16.msra.mxu0 %v15147_v51  ;;  %v11821_v50 = vpack.c.bf16 %v11797_v4, %v11796_v18  ;;  %v17227_v51 = vor.u32 %v19040_v20, %v17226_v56  ;;  %v18951_v56 = vld [vmem:[#allocation11 + $0x192c] sm:$0xf0]  ;;  %v17450_v4 = vld [vmem:[#allocation11 + $0x1d68] sm:$0xf]  ;;  %v19041_v60 = vld [vmem:[#allocation11 + $0x1bfc] sm:$0xf0] }
 0x45e   :  { %10872 = vmatpush.bf16.msrb.mxu1 %v17375_v37  ;;  %10775 = vmatpush.bf16.msrb.mxu2 %v17299_v16  ;;  %v18699_v37 = vld [vmem:[#allocation11 + $0x114c] sm:$0xf0]  ;;  %v15788_v16 = vld [vmem:[#allocation11 + $0x10b8] sm:$0xf0]  ;;  %v16875_v1 = vor.u32 %v18951_v56, %v16874_v12  ;;  %v18609_v56 = vld [vmem:[#allocation11 + $0xe7c] sm:$0xf0] }
 0x45f   :  { %11839 = vst [vmem:[#allocation14 + $0x58] sm:$0xff] %v11821_v50  ;;  %v15867_v18 = vor.u32 %v18699_v37, %v15866_v13  ;;  %v15791_v20 = vor.u32 %v18671_v36, %v15788_v16  ;;  %v17162_v13 = vld [vmem:[#allocation11 + $0x1b28] sm:$0xf]  ;;  %v19023_v37 = vld [vmem:[#allocation11 + $0x1b6c] sm:$0xf0] }
 0x460   :  { %10900 = vmatpush.bf16.msrb.mxu3 %v14499_v45  ;;  %v17667_v45 = vor.u32 %v19149_v62, %v17666_v43  ;;  %v15722_v43 = vld [vmem:[#allocation11 + $0xfe8] sm:$0xf]  ;;  %v18663_v62 = vld [vmem:[#allocation11 + $0x102c] sm:$0xf0]  ;;  %v15506_v36 = vld [vmem:[#allocation11 + $0xe38] sm:$0xf]  ;;  %v17163_v19 = vor.u32 %v19023_v37, %v17162_v13 }
 0x461   :  { %10914 = vmatpush.bf16.msra.mxu0 %v15075_v38  ;;  %v17155_v38 = vor.u32 %v19022_v23, %v17154_v61  ;;  %v18635_v61 = vld [vmem:[#allocation11 + $0xf54] sm:$0xf]  ;;  %v15644_v23 = vld [vmem:[#allocation11 + $0xf98] sm:$0xf0]  ;;  %v15723_v31 = vor.u32 %v18663_v62, %v15722_v43  ;;  %v18591_v62 = vld [vmem:[#allocation11 + $0xdec] sm:$0xf0] }
 0x462   :  { %10873 = vmatpush.bf16.msrb.mxu1 %v17303_v25  ;;  %10776 = vmatpush.bf16.msrb.mxu2 %v17227_v51  ;;  %v16802_v25 = vld [vmem:[#allocation11 + $0x1858] sm:$0xf]  ;;  %v19077_v51 = vld [vmem:[#allocation11 + $0x1d1c] sm:$0xf0]  ;;  %v15647_v49 = vor.u32 %v18635_v61, %v15644_v23  ;;  %v18564_v16 = vld [vmem:[#allocation11 + $0xd1c] sm:$0xf] }
 0x463   :  { %v15868_v61 = vld [vmem:[#allocation11 + $0x1150] sm:$0xf0]  ;;  %v18528_v54 = vld [vmem:[#allocation11 + $0xbfc] sm:$0xf]  ;;  %v15220_v11 = vld [vmem:[#allocation11 + $0xc40] sm:$0xf0] }
 0x464   :  { %10901 = vmatpush.bf16.msrb.mxu3 %v14427_v15  ;;  %v17595_v15 = vor.u32 %v19131_v53, %v17594_v3  ;;  %v15572_v3 = vld [vmem:[#allocation11 + $0xf08] sm:$0xf0]  ;;  %v18240_v37 = vld [vmem:[#allocation11 + $0x2fc] sm:$0xf] }
 0x465   :  { %10915 = vmatpush.bf16.msra.mxu0 %v15003_v17  ;;  %v17522_v17 = vld [vmem:[#allocation11 + $0x1df8] sm:$0xf]  ;;  %v15575_v0 = vor.u32 %v18617_v27, %v15572_v3  ;;  %v18672_v27 = vld [vmem:[#allocation11 + $0x107c] sm:$0xf]  ;;  %v15796_v3 = vld [vmem:[#allocation11 + $0x10c0] sm:$0xf0] }
 0x466   :  { %10874 = vmatpush.bf16.msrb.mxu1 %v17231_v32  ;;  %10777 = vmatpush.bf16.msrb.mxu2 %v17155_v38  ;;  %v17523_v21 = vor.u32 %v19113_v30, %v17522_v17  ;;  %v17306_v32 = vld [vmem:[#allocation11 + $0x1c48] sm:$0xf] }
 0x467   :  { %v16586_v17 = vld [vmem:[#allocation11 + $0x16a8] sm:$0xf] }
 0x468   :  { %10902 = vmatpush.bf16.msrb.mxu3 %v14355_v22  ;;  %v19095_v22 = vld [vmem:[#allocation11 + $0x1dac] sm:$0xf0] }
 0x469   :  { %10916 = vmatpush.bf16.msra.mxu0 %v14931_v46  ;;  %10778 = vmatmul.bf16.vlgmr.msrb.gmra.mxu2 %v19810_v9  ;;  %v18681_v46 = vld [vmem:[#allocation11 + $0x10bc] sm:$0xf0]  ;;  %v17451_v50 = vor.u32 %v19095_v22, %v17450_v4  ;;  %v15940_v4 = vld [vmem:[#allocation11 + $0x11e0] sm:$0xf0] }
 0x46a   :  { %10826 = vmatpush.bf16.msra.mxu2 %v15935_v58  ;;  %10875 = vmatpush.bf16.msrb.mxu1 %v17159_v28  ;;  %v15795_v2 = vor.u32 %v18681_v46, %v15794_v55  ;;  %v16658_v58 = vld [vmem:[#allocation11 + $0x1738] sm:$0xf]  ;;  %v15578_v28 = vld [vmem:[#allocation11 + $0xec8] sm:$0xf]  ;;  %v15428_v55 = vld [vmem:[#allocation11 + $0xde8] sm:$0xf0]  ;;  %v20045_v46 = vpop.f32.mrf.mxu3 }
 0x46b   :  { %v16659_v47 = vor.u32 %v18897_v48, %v16658_v58  ;;  %v18258_v58 = vld [vmem:[#allocation11 + $0x38c] sm:$0xf]  ;;  %v14140_v48 = vld [vmem:[#allocation11 + $0x3d0] sm:$0xf0] }
 0x46c   :  { %10903 = vmatpush.bf16.msrb.mxu3 %v14283_v57  ;;  %v16803_v57 = vor.u32 %v18933_v6, %v16802_v25  ;;  %v18285_v25 = vld [vmem:[#allocation11 + $0x45c] sm:$0xf0]  ;;  %v15507_v6 = vor.u32 %v18609_v56, %v15506_v36  ;;  %v18492_v56 = vld [vmem:[#allocation11 + $0xadc] sm:$0xf] }
 0x46d   :  { %10917 = vmatpush.bf16.msra.mxu0 %v14859_v59  ;;  %10876 = vmatmul.bf16.vlgmr.msrb.gmra.mxu1 %v19810_v9  ;;  %v17379_v59 = vor.u32 %v19077_v51, %v17378_v35  ;;  %v15434_v35 = vld [vmem:[#allocation11 + $0xda8] sm:$0xf]  ;;  %v18546_v51 = vld [vmem:[#allocation11 + $0xc8c] sm:$0xf] }
 0x46e   :  { %10924 = vmatpush.bf16.msra.mxu1 %v15939_v14  ;;  %10827 = vmatpush.bf16.msra.mxu2 %v15863_v34  ;;  %v15500_v14 = vld [vmem:[#allocation11 + $0xe78] sm:$0xf0]  ;;  %v18879_v34 = vld [vmem:[#allocation11 + $0x16ec] sm:$0xf0] }
 0x46f   :  { %10904 = vmatmul.bf16.vlgmr.msrb.gmra.mxu3 %v19770_v44  ;;  %v15503_v12 = vor.u32 %v18599_v8, %v15500_v14  ;;  %v16587_v22 = vor.u32 %v18879_v34, %v16586_v17  ;;  %v14143_v17 = vor.u32 %v18258_v58, %v14140_v48  ;;  %v15724_v34 = vld [vmem:[#allocation11 + $0x1030] sm:$0xf0]  ;;  %v15508_v58 = vld [vmem:[#allocation11 + $0xe80] sm:$0xf0] }
 0x470   :  { %10952 = vmatpush.bf16.msra.mxu3 %v17091_v42  ;;  %10918 = vmatmul.bf16.vlgmr.msra.gmra.mxu0 %v19768_v5  ;;  %v16730_v42 = vld [vmem:[#allocation11 + $0x17c8] sm:$0xf] }
 0x471   :  { %10966 = vmatpush.bf16.msrb.mxu0 %v17667_v45  ;;  %v19059_v45 = vld [vmem:[#allocation11 + $0x1c8c] sm:$0xf0]  ;;  %v16731_v38 = vor.u32 %v18915_v52, %v16730_v42  ;;  %v14212_v42 = vld [vmem:[#allocation11 + $0x460] sm:$0xf0] }
 0x472   :  { %10925 = vmatpush.bf16.msra.mxu1 %v15867_v18  ;;  %10828 = vmatpush.bf16.msra.mxu2 %v15791_v20  ;;  %v17307_v53 = vor.u32 %v19059_v45, %v17306_v32  ;;  %v18708_v18 = vld [vmem:[#allocation11 + $0x119c] sm:$0xf]  ;;  %v18581_v20 = vld [vmem:[#allocation11 + $0xda4] sm:$0xf]  ;;  %v18267_v32 = vld [vmem:[#allocation11 + $0x3cc] sm:$0xf0]  ;;  %v15435_v45 = vor.u32 %v18591_v62, %v15434_v35  ;;  %v20053_v8 = vpop.f32.mrf.mxu3 }
 0x473   :  { %v15431_v43 = vor.u32 %v18581_v20, %v15428_v55  ;;  %v18636_v20 = vld [vmem:[#allocation11 + $0xf5c] sm:$0xf]  ;;  %v15652_v55 = vld [vmem:[#allocation11 + $0xfa0] sm:$0xf0] }
 0x474   :  { %10953 = vmatpush.bf16.msra.mxu3 %v17019_v29  ;;  %v17234_v29 = vld [vmem:[#allocation11 + $0x1bb8] sm:$0xf]  ;;  %v15655_v35 = vor.u32 %v18636_v20, %v15652_v55  ;;  %v14218_v20 = vld [vmem:[#allocation11 + $0x420] sm:$0xf]  ;;  %v18286_v55 = vld [vmem:[#allocation11 + $0x464] sm:$0xf0] }
 0x475   :  { %10967 = vmatpush.bf16.msrb.mxu0 %v17595_v15  ;;  %v18627_v15 = vld [vmem:[#allocation11 + $0xf0c] sm:$0xf0]  ;;  %v17235_v30 = vor.u32 %v19041_v60, %v17234_v29  ;;  %v14066_v29 = vld [vmem:[#allocation11 + $0x2f8] sm:$0xf]  ;;  %v18249_v60 = vld [vmem:[#allocation11 + $0x33c] sm:$0xf0] }
 0x476   :  { %10926 = vmatpush.bf16.msra.mxu1 %v15795_v2  ;;  %10829 = vmatpush.bf16.msra.mxu2 %v15719_v33  ;;  %v15943_v2 = vor.u32 %v18708_v18, %v15940_v4  ;;  %v15292_v33 = vld [vmem:[#allocation11 + $0xcd0] sm:$0xf0]  ;;  %v14067_v13 = vor.u32 %v18249_v60, %v14066_v29  ;;  %v15076_v18 = vld [vmem:[#allocation11 + $0xb20] sm:$0xf0]  ;;  %v20059_v4 = vpop.f32.mrf.mxu1 }
 0x477   :  { %v15295_v52 = vor.u32 %v18546_v51, %v15292_v33  ;;  %v18474_v51 = vld [vmem:[#allocation11 + $0xa4c] sm:$0xf]  ;;  %v15004_v33 = vld [vmem:[#allocation11 + $0xa90] sm:$0xf0] }
 0x478   :  { %10954 = vmatpush.bf16.msra.mxu3 %v16947_v63  ;;  %v15579_v63 = vor.u32 %v18627_v15, %v15578_v28  ;;  %v15799_v28 = vor.u32 %v18672_v27, %v15796_v3  ;;  %v18510_v15 = vld [vmem:[#allocation11 + $0xb6c] sm:$0xf]  ;;  %v4832_v27 = vperm.slane %v20017_v10, 6  ;;  %v13852_v29 = vld [vmem:[#allocation11 + $0x190] sm:$0xf0] }
 0x479   :  { %10968 = vmatpush.bf16.msrb.mxu0 %v17523_v21  ;;  %v15364_v21 = vld [vmem:[#allocation11 + $0xd60] sm:$0xf0] }
 0x47a   :  { %10927 = vmatpush.bf16.msra.mxu1 %v15723_v31  ;;  %10830 = vmatpush.bf16.msra.mxu2 %v15647_v49  ;;  %v15367_v39 = vor.u32 %v18564_v16, %v15364_v21  ;;  %v14138_v31 = vld [vmem:[#allocation11 + $0x388] sm:$0xf]  ;;  %v18231_v21 = vld [vmem:[#allocation11 + $0x2ac] sm:$0xf0] }
 0x47b   :  { %v13994_v16 = vld [vmem:[#allocation11 + $0x268] sm:$0xf] }
 0x47c   :  { %10955 = vmatpush.bf16.msra.mxu3 %v16875_v1  ;;  %v20047_v1 = vpop.f32.mrf.mxu2 }
 0x47d   :  { %10969 = vmatpush.bf16.msrb.mxu0 %v17451_v50  ;;  %v14210_v50 = vld [vmem:[#allocation11 + $0x418] sm:$0xf] }
 0x47e   :  { %10928 = vmatpush.bf16.msra.mxu1 %v15651_v40  ;;  %10831 = vmatpush.bf16.msra.mxu2 %v15575_v0  ;;  %v14211_v23 = vor.u32 %v18285_v25, %v14210_v50  ;;  %v15223_v40 = vor.u32 %v18528_v54, %v15220_v11  ;;  %v20051_v0 = vpop.f32.mrf.mxu0  ;;  %v13996_v50 = vld [vmem:[#allocation11 + $0x2b0] sm:$0xf0]  ;;  %v15079_v25 = vor.u32 %v18492_v56, %v15076_v18  ;;  %v18456_v11 = vld [vmem:[#allocation11 + $0x9bc] sm:$0xf]  ;;  %v20068_v60 = vpop.f32.mrf.mxu1 }
 0x480   :  { %10956 = vmatpush.bf16.msra.mxu3 %v16803_v57  ;;  %v18690_v57 = vld [vmem:[#allocation11 + $0x110c] sm:$0xf] }
 0x481   :  { %10970 = vmatpush.bf16.msrb.mxu0 %v17379_v59  ;;  %v18276_v59 = vld [vmem:[#allocation11 + $0x41c] sm:$0xf]  ;;  %v15871_v49 = vor.u32 %v18690_v57, %v15868_v61  ;;  %v18618_v61 = vld [vmem:[#allocation11 + $0xecc] sm:$0xf] }
 0x482   :  { %10929 = vmatpush.bf16.msra.mxu1 %v15579_v63  ;;  %10832 = vmatpush.bf16.msra.mxu2 %v15503_v12  ;;  %v14068_v63 = vld [vmem:[#allocation11 + $0x340] sm:$0xf0] }
 0x484   :  { %10957 = vmatpush.bf16.msra.mxu3 %v16731_v38  ;;  %v14215_v38 = vor.u32 %v18276_v59, %v14212_v42  ;;  %v20055_v14 = vpop.f32.mrf.mxu2 }
 0x485   :  { %10971 = vmatpush.bf16.msrb.mxu0 %v17307_v53  ;;  %v14139_v53 = vor.u32 %v18267_v32, %v14138_v31  ;;  %v13924_v31 = vld [vmem:[#allocation11 + $0x220] sm:$0xf0]  ;;  %v15007_v32 = vor.u32 %v18474_v51, %v15004_v33  ;;  %v18861_v51 = vld [vmem:[#allocation11 + $0x165c] sm:$0xf0] }
 0x486   :  { %10930 = vmatpush.bf16.msra.mxu1 %v15507_v6  ;;  %10833 = vmatpush.bf16.msra.mxu2 %v15431_v43  ;;  %v13922_v6 = vld [vmem:[#allocation11 + $0x1d8] sm:$0xf]  ;;  %v20061_v43 = vpop.f32.mrf.mxu3  ;;  %v20065_v59 = vpop.f32.mrf.mxu0 }
 0x488   :  { %10958 = vmatpush.bf16.msra.mxu3 %v16659_v47  ;;  %v15148_v47 = vld [vmem:[#allocation11 + $0xbb0] sm:$0xf0] }
 0x489   :  { %10972 = vmatpush.bf16.msrb.mxu0 %v17235_v30  ;;  %10834 = vmatmul.bf16.vlgmr.msra.gmra.mxu2 %v19787_v41  ;;  %v18654_v30 = vld [vmem:[#allocation11 + $0xfec] sm:$0xf]  ;;  %v15151_v36 = vor.u32 %v18510_v15, %v15148_v47  ;;  %v13778_v15 = vld [vmem:[#allocation11 + $0xb8] sm:$0xf]  ;;  %v18177_v47 = vld [vmem:[#allocation11 + $0xfc] sm:$0xf0] }
 0x48a   :  { %10882 = vmatpush.bf16.msrb.mxu2 %v14211_v23  ;;  %10931 = vmatpush.bf16.msra.mxu1 %v15435_v45  ;;  %v15727_v12 = vor.u32 %v18654_v30, %v15724_v34  ;;  %v15580_v23 = vld [vmem:[#allocation11 + $0xf10] sm:$0xf0]  ;;  %v13850_v45 = vld [vmem:[#allocation11 + $0x148] sm:$0xf]  ;;  %v13779_v18 = vor.u32 %v18177_v47, %v13778_v15  ;;  %v17524_v15 = vld [vmem:[#allocation11 + $0x1e40] sm:$0xf0] }
 0x48b   :  { %v15583_v54 = vor.u32 %v18618_v61, %v15580_v23  ;;  %v14860_v34 = vld [vmem:[#allocation11 + $0x970] sm:$0xf0]  ;;  %v14219_v61 = vor.u32 %v18286_v55, %v14218_v20  ;;  %v18150_v23 = vld [vmem:[#allocation11 + $0x2c] sm:$0xf]  ;;  %v20081_v47 = vld [vmem:[#allocation13] sm:$0xff] }
 0x48c   :  { %10959 = vmatpush.bf16.msra.mxu3 %v16587_v22  ;;  %v14071_v22 = vor.u32 %v18240_v37, %v14068_v63  ;;  %v20063_v62 = vpop.f32.mrf.mxu2  ;;  %v15436_v37 = vld [vmem:[#allocation11 + $0xdf0] sm:$0xf0]  ;;  %v10500_v63 = vadd.f32 %v20047_v1, %v4832_v27  ;;  %v18159_v1 = vld [vmem:[#allocation11 + $0x6c] sm:$0xf0]  ;;  %v19086_v20 = vld [vmem:[#allocation11 + $0x1d6c] sm:$0xf] }
 0x48d   :  { %10973 = vmatpush.bf16.msrb.mxu0 %v17163_v19  ;;  %10932 = vmatmul.bf16.vlgmr.msra.gmra.mxu1 %v19787_v41  ;;  %v13995_v19 = vor.u32 %v18231_v21, %v13994_v16  ;;  %v18168_v16 = vld [vmem:[#allocation11 + $0xbc] sm:$0xf]  ;;  %v17452_v55 = vld [vmem:[#allocation11 + $0x1db0] sm:$0xf0] }
 0x48e   :  { %10980 = vmatpush.bf16.msrb.mxu1 %v14215_v38  ;;  %10883 = vmatpush.bf16.msrb.mxu2 %v14139_v53  ;;  %v14932_v38 = vld [vmem:[#allocation11 + $0xa00] sm:$0xf0]  ;;  %v18600_v53 = vld [vmem:[#allocation11 + $0xe3c] sm:$0xf]  ;;  %v20073_v56 = vpop.f32.mrf.mxu0  ;;  %v10514_v33 = vadd.f32 %v20045_v46, %v10500_v63  ;;  %v16442_v46 = vld [vmem:[#allocation11 + $0x1588] sm:$0xf] }
 0x48f   :  { %10960 = vmatmul.bf16.vlgmr.msra.gmra.mxu3 %v19797_v24  ;;  %v15511_v30 = vor.u32 %v18600_v53, %v15508_v58  ;;  %v19140_v21 = vld [vmem:[#allocation11 + $0x1f1c] sm:$0xf]  ;;  %v18843_v58 = vld [vmem:[#allocation11 + $0x15cc] sm:$0xf0] }
 0x490   :  { %11008 = vmatpush.bf16.msrb.mxu3 %v15367_v39  ;;  %10974 = vmatmul.bf16.vlgmr.msrb.gmra.mxu0 %v19810_v9  ;;  %v18222_v39 = vld [vmem:[#allocation11 + $0x26c] sm:$0xf] }
 0x491   :  { %11022 = vmatpush.bf16.msra.mxu0 %v15943_v2  ;;  %v18213_v2 = vld [vmem:[#allocation11 + $0x21c] sm:$0xf0]  ;;  %v13999_v57 = vor.u32 %v18222_v39, %v13996_v50 }
 0x492   :  { %10981 = vmatpush.bf16.msrb.mxu1 %v14143_v17  ;;  %10884 = vmatpush.bf16.msrb.mxu2 %v14067_v13  ;;  %v13923_v42 = vor.u32 %v18213_v2, %v13922_v6  ;;  %v18438_v17 = vld [vmem:[#allocation11 + $0x92c] sm:$0xf] }
 0x493   :  { %v18582_v13 = vld [vmem:[#allocation11 + $0xdac] sm:$0xf]  ;;  %v14863_v50 = vor.u32 %v18438_v17, %v14860_v34  ;;  %v4833_v17 = vperm.slane %v20081_v47, 7  ;;  %v16154_v47 = vld [vmem:[#allocation11 + $0x1348] sm:$0xf] }
 0x494   :  { %11009 = vmatpush.bf16.msrb.mxu3 %v15295_v52  ;;  %v18204_v52 = vld [vmem:[#allocation11 + $0x1dc] sm:$0xf]  ;;  %v20077_v39 = vpop.f32.mrf.mxu2  ;;  %v15439_v6 = vor.u32 %v18582_v13, %v15436_v37  ;;  %v14074_v13 = vld [vmem:[#allocation11 + $0x300] sm:$0xf] }
 0x495   :  { %11023 = vmatpush.bf16.msra.mxu0 %v15871_v49  ;;  %v18195_v49 = vld [vmem:[#allocation11 + $0x18c] sm:$0xf0]  ;;  %v13927_v3 = vor.u32 %v18204_v52, %v13924_v31  ;;  %v17596_v52 = vld [vmem:[#allocation11 + $0x1ed0] sm:$0xf0] }
 0x496   :  { %10982 = vmatpush.bf16.msrb.mxu1 %v14071_v22  ;;  %10885 = vmatpush.bf16.msrb.mxu2 %v13995_v19  ;;  %v13851_v48 = vor.u32 %v18195_v49, %v13850_v45  ;;  %v13780_v22 = vld [vmem:[#allocation11 + $0x100] sm:$0xf0]  ;;  %v20075_v19 = vpop.f32.mrf.mxu3  ;;  %v14146_v45 = vld [vmem:[#allocation11 + $0x390] sm:$0xf]  ;;  %v18268_v49 = vld [vmem:[#allocation11 + $0x3d4] sm:$0xf0] }
 0x498   :  { %11010 = vmatpush.bf16.msrb.mxu3 %v15223_v40  ;;  %v18186_v40 = vld [vmem:[#allocation11 + $0x14c] sm:$0xf] }
 0x499   :  { %11024 = vmatpush.bf16.msra.mxu0 %v15799_v28  ;;  %v14935_v28 = vor.u32 %v18456_v11, %v14932_v38  ;;  %v18852_v38 = vld [vmem:[#allocation11 + $0x161c] sm:$0xf] }
 0x49a   :  { %10983 = vmatpush.bf16.msrb.mxu1 %v13999_v57  ;;  %10886 = vmatpush.bf16.msrb.mxu2 %v13923_v42  ;;  %v13783_v57 = vor.u32 %v18168_v16, %v13780_v22  ;;  %v19122_v42 = vld [vmem:[#allocation11 + $0x1e8c] sm:$0xf] }
 0x49b   :  { %v17599_v53 = vor.u32 %v19122_v42, %v17596_v52  ;;  %v18834_v16 = vld [vmem:[#allocation11 + $0x158c] sm:$0xf]  ;;  %v18807_v42 = vld [vmem:[#allocation11 + $0x14ac] sm:$0xf0] }
 0x49c   :  { %11011 = vmatpush.bf16.msrb.mxu3 %v15151_v36  ;;  %v13855_v36 = vor.u32 %v18186_v40, %v13852_v29  ;;  %v14147_v29 = vor.u32 %v18268_v49, %v14146_v45  ;;  %v10611_v63 = vpop.f32.mrf.mxu2  ;;  %v13930_v49 = vld [vmem:[#allocation11 + $0x1e0] sm:$0xf] }
 0x49d   :  { %11025 = vmatpush.bf16.msra.mxu0 %v15727_v12  ;;  %v17668_v12 = vld [vmem:[#allocation11 + $0x1f60] sm:$0xf0] }
 0x49e   :  { %10984 = vmatpush.bf16.msrb.mxu1 %v13927_v3  ;;  %10887 = vmatpush.bf16.msrb.mxu2 %v13851_v48  ;;  %v17671_v2 = vor.u32 %v19140_v21, %v17668_v12  ;;  %v16516_v3 = vld [vmem:[#allocation11 + $0x1660] sm:$0xf0]  ;;  %v10528_v48 = vadd.f32 %v20051_v0, %v10514_v33  ;;  %v18250_v0 = vld [vmem:[#allocation11 + $0x344] sm:$0xf0]  ;;  %v10625_v37 = vpop.f32.mrf.mxu3  ;;  %v16444_v21 = vld [vmem:[#allocation11 + $0x15d0] sm:$0xf0]  ;;  %v20089_v12 = vpop.f32.mrf.mxu0 }
 0x49f   :  { %v16519_v34 = vor.u32 %v18852_v38, %v16516_v3  ;;  %v14075_v22 = vor.u32 %v18250_v0, %v14074_v13  ;;  %v16372_v33 = vld [vmem:[#allocation11 + $0x1540] sm:$0xf0]  ;;  %v18798_v3 = vld [vmem:[#allocation11 + $0x146c] sm:$0xf] }
 0x4a0   :  { %11012 = vmatpush.bf16.msrb.mxu3 %v15079_v25  ;;  %v13706_v25 = vld [vmem:[#allocation11 + $0x28] sm:$0xf] }
 0x4a1   :  { %11026 = vmatpush.bf16.msra.mxu0 %v15655_v35  ;;  %v16514_v35 = vld [vmem:[#allocation11 + $0x1618] sm:$0xf]  ;;  %v13707_v31 = vor.u32 %v18159_v1, %v13706_v25  ;;  %v16447_v1 = vor.u32 %v18834_v16, %v16444_v21  ;;  %v18780_v21 = vld [vmem:[#allocation11 + $0x13dc] sm:$0xf] }
 0x4a2   :  { %10985 = vmatpush.bf16.msrb.mxu1 %v13855_v36  ;;  %10888 = vmatpush.bf16.msrb.mxu2 %v13779_v18  ;;  %v16515_v11 = vor.u32 %v18861_v51, %v16514_v35  ;;  %v16443_v36 = vor.u32 %v18843_v58, %v16442_v46  ;;  %v16370_v18 = vld [vmem:[#allocation11 + $0x14f8] sm:$0xf]  ;;  %v18816_v51 = vld [vmem:[#allocation11 + $0x14fc] sm:$0xf] }
 0x4a4   :  { %11013 = vmatpush.bf16.msrb.mxu3 %v15007_v32  ;;  %v13708_v32 = vld [vmem:[#allocation11 + $0x70] sm:$0xf0] }
 0x4a5   :  { %11027 = vmatpush.bf16.msra.mxu0 %v15583_v54  ;;  %v10597_v54 = vpop.f32.mrf.mxu1  ;;  %v13711_v40 = vor.u32 %v18150_v23, %v13708_v32  ;;  %v16298_v23 = vld [vmem:[#allocation11 + $0x1468] sm:$0xf]  ;;  %v17380_v32 = vld [vmem:[#allocation11 + $0x1d20] sm:$0xf0] }
 0x4a6   :  { %10986 = vmatpush.bf16.msrb.mxu1 %v13783_v57  ;;  %10889 = vmatpush.bf16.msrb.mxu2 %v13707_v31  ;;  %v19068_v31 = vld [vmem:[#allocation11 + $0x1cdc] sm:$0xf]  ;;  %v16299_v38 = vor.u32 %v18807_v42, %v16298_v23  ;;  %v10639_v46 = vpop.f32.mrf.mxu0  ;;  %v18753_v23 = vld [vmem:[#allocation11 + $0x12fc] sm:$0xf0]  ;;  %v19014_v42 = vld [vmem:[#allocation11 + $0x1b2c] sm:$0xf] }
 0x4a8   :  { %11014 = vmatpush.bf16.msrb.mxu3 %v14935_v28  ;;  %v19104_v28 = vld [vmem:[#allocation11 + $0x1dfc] sm:$0xf] }
 0x4a9   :  { %11028 = vmatpush.bf16.msra.mxu0 %v15511_v30  ;;  %v10502_v30 = vadd.f32 %v20055_v14, %v4832_v27  ;;  %v17527_v10 = vor.u32 %v19104_v28, %v17524_v15  ;;  %v18825_v14 = vld [vmem:[#allocation11 + $0x153c] sm:$0xf0]  ;;  %v10542_v27 = vadd.f32 %v20059_v4, %v10528_v48  ;;  %10890 = vmatmul.bf16.vlgmr.msrb.gmra.mxu2 %v19753_v26  ;;  %v10627_v28 = vpop.f32.mrf.mxu3  ;;  %v10613_v15 = vpop.f32.mrf.mxu2 }
 0x4aa   :  { %10938 = vmatpush.bf16.msra.mxu2 %v16515_v11  ;;  %10987 = vmatpush.bf16.msrb.mxu1 %v13711_v40  ;;  %v16371_v4 = vor.u32 %v18825_v14, %v16370_v18  ;;  %v17383_v48 = vor.u32 %v19068_v31, %v17380_v32  ;;  %v16226_v40 = vld [vmem:[#allocation11 + $0x13d8] sm:$0xf]  ;;  %v17164_v32 = vld [vmem:[#allocation11 + $0x1b70] sm:$0xf0] }
 0x4ab   :  { %v10516_v25 = vadd.f32 %v20053_v8, %v10502_v30  ;;  %v10556_v35 = vadd.f32 %v20063_v62, %v10542_v27  ;;  %v16375_v62 = vor.u32 %v18816_v51, %v16372_v33  ;;  %v19050_v30 = vld [vmem:[#allocation11 + $0x1c4c] sm:$0xf] }
 0x4ac   :  { %11015 = vmatpush.bf16.msrb.mxu3 %v14863_v50  ;;  %v10598_v50 = vadd.f32 %v10597_v54, %v4833_v17  ;;  %v18214_v54 = vld [vmem:[#allocation11 + $0x224] sm:$0xf0] }
 0x4ad   :  { %11029 = vmatpush.bf16.msra.mxu0 %v15439_v6  ;;  %v14002_v6 = vld [vmem:[#allocation11 + $0x270] sm:$0xf]  ;;  %10988 = vmatmul.bf16.vlgmr.msrb.gmra.mxu1 %v19753_v26  ;;  %v10599_v8 = vpop.f32.mrf.mxu1  ;;  %v10530_v45 = vadd.f32 %v20065_v59, %v10516_v25  ;;  %v10570_v11 = vadd.f32 %v20061_v43, %v10556_v35  ;;  %v13931_v59 = vor.u32 %v18214_v54, %v13930_v49  ;;  %v18762_v35 = vld [vmem:[#allocation11 + $0x134c] sm:$0xf] }
 0x4ae   :  { %11036 = vmatpush.bf16.msra.mxu1 %v16519_v34  ;;  %10939 = vmatpush.bf16.msra.mxu2 %v16443_v36  ;;  %v10612_v57 = vadd.f32 %v10611_v63, %v10598_v50  ;;  %v17308_v34 = vld [vmem:[#allocation11 + $0x1c90] sm:$0xf0]  ;;  %v10600_v13 = vadd.f32 %v10599_v8, %v4833_v17  ;;  %v13858_v63 = vld [vmem:[#allocation11 + $0x150] sm:$0xf]  ;;  %v18196_v36 = vld [vmem:[#allocation11 + $0x194] sm:$0xf0] }
 0x4af   :  { %11016 = vmatmul.bf16.vlgmr.msrb.gmra.mxu3 %v19768_v5  ;;  %v10544_v43 = vadd.f32 %v20068_v60, %v10530_v45  ;;  %v18771_v17 = vld [vmem:[#allocation11 + $0x138c] sm:$0xf0]  ;;  %v13859_v60 = vor.u32 %v18196_v36, %v13858_v63  ;;  %v17236_v50 = vld [vmem:[#allocation11 + $0x1c00] sm:$0xf0]  ;;  %v18726_v63 = vld [vmem:[#allocation11 + $0x122c] sm:$0xf] }
 0x4b0   :  { %11064 = vmatpush.bf16.msra.mxu3 %v17671_v2  ;;  %11030 = vmatmul.bf16.vlgmr.msra.gmra.mxu0 %v19787_v41  ;;  %v18232_v2 = vld [vmem:[#allocation11 + $0x2b4] sm:$0xf0]  ;;  %v10626_v58 = vadd.f32 %v10625_v37, %v10612_v57  ;;  %v10584_v37 = vadd.f32 %v20073_v56, %v10570_v11  ;;  %v10614_v14 = vadd.f32 %v10613_v15, %v10600_v13  ;;  %v13786_v56 = vld [vmem:[#allocation11 + $0xc0] sm:$0xf]  ;;  %v13714_v45 = vld [vmem:[#allocation11 + $0x30] sm:$0xf] }
 0x4b1   :  { %11078 = vmatpush.bf16.msrb.mxu0 %v14219_v61  ;;  %v17455_v61 = vor.u32 %v19086_v20, %v17452_v55  ;;  %v14003_v52 = vor.u32 %v18232_v2, %v14002_v6  ;;  %v10558_v18 = vadd.f32 %v20077_v39, %v10544_v43  ;;  %v19032_v55 = vld [vmem:[#allocation11 + $0x1bbc] sm:$0xf]  ;;  %v16155_v2 = vor.u32 %v18771_v17, %v16154_v47  ;;  %v16156_v39 = vld [vmem:[#allocation11 + $0x1390] sm:$0xf0]  ;;  %v10681_v8 = vpop.f32.mrf.mxu3 }
 0x4b2   :  { %11037 = vmatpush.bf16.msra.mxu1 %v16447_v1  ;;  %10940 = vmatpush.bf16.msra.mxu2 %v16371_v4  ;;  %v10640_v27 = vadd.f32 %v10639_v46, %v10626_v58  ;;  %v18178_v1 = vld [vmem:[#allocation11 + $0x104] sm:$0xf0]  ;;  %v11672_v6 = vmul.f32 0.5, %v10584_v37  ;;  %v10628_v51 = vadd.f32 %v10627_v28, %v10614_v14  ;;  %v17239_v57 = vor.u32 %v19032_v55, %v17236_v50  ;;  %v18744_v11 = vld [vmem:[#allocation11 + $0x12bc] sm:$0xf] }
 0x4b3   :  { %v10572_v4 = vadd.f32 %v20075_v19, %v10558_v18  ;;  %v13787_v31 = vor.u32 %v18178_v1, %v13786_v56  ;;  %v16159_v54 = vor.u32 %v18762_v35, %v16156_v39  ;;  %v18718_v19 = vld [vmem:[#allocation11 + $0x11e4] sm:$0xf0]  ;;  %v16084_v46 = vld [vmem:[#allocation11 + $0x1300] sm:$0xf0]  ;;  %v16522_v58 = vld [vmem:[#allocation11 + $0x1620] sm:$0xf]  ;;  %v17167_v15 = vor.u32 %v19014_v42, %v17164_v32 }
 0x4b4   :  { %11065 = vmatpush.bf16.msra.mxu3 %v17599_v53  ;;  %v16300_v53 = vld [vmem:[#allocation11 + $0x14b0] sm:$0xf0]  ;;  %19191 = vtanh.f32 %v11672_v6  ;;  %v18420_v43 = vld [vmem:[#allocation11 + $0x89c] sm:$0xf]  ;;  %v16087_v37 = vor.u32 %v18744_v11, %v16084_v46  ;;  %v18430_v55 = vld [vmem:[#allocation11 + $0x8e4] sm:$0xf0] }
 0x4b5   :  { %11079 = vmatpush.bf16.msrb.mxu0 %v14147_v29  ;;  %v18789_v29 = vld [vmem:[#allocation11 + $0x141c] sm:$0xf0]  ;;  %v16303_v0 = vor.u32 %v18798_v3, %v16300_v53  ;;  %v10653_v20 = vpop.f32.mrf.mxu1  ;;  %v10641_v3 = vpop.f32.mrf.mxu0  ;;  %v16012_v14 = vld [vmem:[#allocation11 + $0x1270] sm:$0xf0]  ;;  %v18402_v1 = vld [vmem:[#allocation11 + $0x80c] sm:$0xf] }
 0x4b6   :  { %11038 = vmatpush.bf16.msra.mxu1 %v16375_v62  ;;  %10941 = vmatpush.bf16.msra.mxu2 %v16299_v38  ;;  %v16227_v16 = vor.u32 %v18789_v29, %v16226_v40  ;;  %v10654_v33 = vadd.f32 %v10653_v20, %v10640_v27  ;;  %v18160_v62 = vld [vmem:[#allocation11 + $0x74] sm:$0xf0]  ;;  %v15946_v38 = vld [vmem:[#allocation11 + $0x11a0] sm:$0xf]  ;;  %v10586_v40 = vadd.f32 %v20089_v12, %v10572_v4  ;;  %v16450_v27 = vld [vmem:[#allocation11 + $0x1590] sm:$0xf] }
 0x4b7   :  { %v10642_v28 = vadd.f32 %v10641_v3, %v10628_v51  ;;  %v15947_v13 = vor.u32 %v18718_v19, %v15946_v38  ;;  %v14716_v6 = vld [vmem:[#allocation11 + $0x850] sm:$0xf0]  ;;  %v16015_v35 = vor.u32 %v18726_v63, %v16012_v14  ;;  %v15802_v4 = vld [vmem:[#allocation11 + $0x1080] sm:$0xf]  ;;  %v18682_v51 = vld [vmem:[#allocation11 + $0x10c4] sm:$0xf0] }
 0x4b8   :  { %11066 = vmatpush.bf16.msra.mxu3 %v17527_v10  ;;  %v16228_v10 = vld [vmem:[#allocation11 + $0x1420] sm:$0xf0]  ;;  %v11690_v47 = vmul.f32 0.5, %v10586_v40  ;;  %v15730_v19 = vld [vmem:[#allocation11 + $0xff0] sm:$0xf] }
 0x4b9   :  { %11080 = vmatpush.bf16.msrb.mxu0 %v14075_v22  ;;  %v17311_v22 = vor.u32 %v19050_v30, %v17308_v34  ;;  %v16231_v25 = vor.u32 %v18780_v21, %v16228_v10  ;;  %v18735_v30 = vld [vmem:[#allocation11 + $0x126c] sm:$0xf0]  ;;  %v13715_v34 = vor.u32 %v18160_v62, %v13714_v45  ;;  %v18700_v10 = vld [vmem:[#allocation11 + $0x1154] sm:$0xf0]  ;;  %v15803_v45 = vor.u32 %v18682_v51, %v15802_v4  ;;  %v18384_v62 = vld [vmem:[#allocation11 + $0x77c] sm:$0xf] }
 0x4ba   :  { %11039 = vmatpush.bf16.msra.mxu1 %v16303_v0  ;;  %10942 = vmatpush.bf16.msra.mxu2 %v16227_v16  ;;  %v14788_v0 = vld [vmem:[#allocation11 + $0x8e0] sm:$0xf0]  ;;  %v15874_v21 = vld [vmem:[#allocation11 + $0x1110] sm:$0xf]  ;;  %v19192_v50 = vpop.eup %19191  ;;  %v18664_v3 = vld [vmem:[#allocation11 + $0x1034] sm:$0xf0] }
 0x4bb   :  { %v14791_v20 = vor.u32 %v18420_v43, %v14788_v0  ;;  %v15875_v56 = vor.u32 %v18700_v10, %v15874_v21  ;;  %v11744_v32 = vmul.f32 0.5, %v19192_v50  ;;  %v15658_v63 = vld [vmem:[#allocation11 + $0xf60] sm:$0xf]  ;;  %v18790_v10 = vld [vmem:[#allocation11 + $0x1424] sm:$0xf0] }
 0x4bc   :  { %11067 = vmatpush.bf16.msra.mxu3 %v17455_v61  ;;  %v16082_v61 = vld [vmem:[#allocation11 + $0x12b8] sm:$0xf]  ;;  %v16234_v21 = vld [vmem:[#allocation11 + $0x13e0] sm:$0xf] }
 0x4bd   :  { %11081 = vmatpush.bf16.msrb.mxu0 %v14003_v52  ;;  %v10667_v52 = vpop.f32.mrf.mxu2  ;;  %v16083_v53 = vor.u32 %v18753_v23, %v16082_v61  ;;  %v10655_v18 = vpop.f32.mrf.mxu1  ;;  %v16378_v61 = vld [vmem:[#allocation11 + $0x1500] sm:$0xf]  ;;  %v18826_v23 = vld [vmem:[#allocation11 + $0x1544] sm:$0xf0]  ;;  %v18376_v14 = vld [vmem:[#allocation11 + $0x734] sm:$0xf0] }
 0x4be   :  { %v10668_v49 = vadd.f32 %v10667_v52, %v10654_v33  ;;  %11040 = vmatpush.bf16.msra.mxu1 %v16231_v25  ;;  %10943 = vmatpush.bf16.msra.mxu2 %v16155_v2  ;;  %v10656_v17 = vadd.f32 %v10655_v18, %v10642_v28  ;;  %v10683_v33 = vpop.f32.mrf.mxu3  ;;  %v14722_v52 = vld [vmem:[#allocation11 + $0x810] sm:$0xf]  ;;  %v16379_v38 = vor.u32 %v18826_v23, %v16378_v61  ;;  %v18394_v28 = vld [vmem:[#allocation11 + $0x7c4] sm:$0xf0]  ;;  %v18628_v50 = vld [vmem:[#allocation11 + $0xf14] sm:$0xf0] }
 0x4bf   :  { %v14428_v61 = vld [vmem:[#allocation11 + $0x610] sm:$0xf0] }
 0x4c0   :  { %11068 = vmatpush.bf16.msra.mxu3 %v17383_v48  ;;  %v18862_v48 = vld [vmem:[#allocation11 + $0x1664] sm:$0xf0]  ;;  %v10682_v29 = vadd.f32 %v10681_v8, %v10668_v49  ;;  %v14719_v8 = vor.u32 %v18402_v1, %v14716_v6  ;;  %v14644_v49 = vld [vmem:[#allocation11 + $0x7c0] sm:$0xf0]  ;;  %v16162_v1 = vld [vmem:[#allocation11 + $0x1350] sm:$0xf] }
 0x4c1   :  { %11082 = vmatpush.bf16.msrb.mxu0 %v13931_v59  ;;  %v16010_v59 = vld [vmem:[#allocation11 + $0x1228] sm:$0xf]  ;;  %v16523_v16 = vor.u32 %v18862_v48, %v16522_v58  ;;  %v16306_v58 = vld [vmem:[#allocation11 + $0x1470] sm:$0xf]  ;;  %v18808_v48 = vld [vmem:[#allocation11 + $0x14b4] sm:$0xf0]  ;;  %v14647_v40 = vor.u32 %v18384_v62, %v14644_v49 }
 0x4c2   :  { %v11673_v36 = vmul.f32 0.5, %v10682_v29  ;;  %11041 = vmatpush.bf16.msra.mxu1 %v16159_v54  ;;  %10944 = vmatpush.bf16.msra.mxu2 %v16083_v53  ;;  %v16011_v12 = vor.u32 %v18735_v30, %v16010_v59  ;;  %v14650_v29 = vld [vmem:[#allocation11 + $0x780] sm:$0xf]  ;;  %v15731_v30 = vor.u32 %v18664_v3, %v15730_v19  ;;  %v16307_v0 = vor.u32 %v18808_v48, %v16306_v58  ;;  %v18772_v6 = vld [vmem:[#allocation11 + $0x1394] sm:$0xf0] }
 0x4c3   :  { %v16163_v23 = vor.u32 %v18772_v6, %v16162_v1  ;;  %v14434_v49 = vld [vmem:[#allocation11 + $0x5d0] sm:$0xf]  ;;  %v14356_v19 = vld [vmem:[#allocation11 + $0x580] sm:$0xf0]  ;;  %v18736_v48 = vld [vmem:[#allocation11 + $0x1274] sm:$0xf0] }
 0x4c4   :  { %11069 = vmatpush.bf16.msra.mxu3 %v17311_v22  ;;  %v18844_v22 = vld [vmem:[#allocation11 + $0x15d4] sm:$0xf0]  ;;  %19193 = vtanh.f32 %v11673_v36  ;;  %v18646_v36 = vld [vmem:[#allocation11 + $0xfa4] sm:$0xf0]  ;;  %v15442_v3 = vld [vmem:[#allocation11 + $0xdb0] sm:$0xf] }
 0x4c5   :  { %11083 = vmatpush.bf16.msrb.mxu0 %v13859_v60  ;;  %v14794_v60 = vld [vmem:[#allocation11 + $0x8a0] sm:$0xf]  ;;  %v10669_v25 = vpop.f32.mrf.mxu2  ;;  %v16451_v39 = vor.u32 %v18844_v22, %v16450_v27  ;;  %19195 = vtanh.f32 %v11690_v47  ;;  %v15659_v22 = vor.u32 %v18646_v36, %v15658_v63  ;;  %v18348_v47 = vld [vmem:[#allocation11 + $0x65c] sm:$0xf]  ;;  %v16018_v58 = vld [vmem:[#allocation11 + $0x1230] sm:$0xf] }
 0x4c6   :  { %v10670_v2 = vadd.f32 %v10669_v25, %v10656_v17  ;;  %11042 = vmatpush.bf16.msra.mxu1 %v16087_v37  ;;  %10945 = vmatpush.bf16.msra.mxu2 %v16011_v12  ;;  %v14578_v12 = vld [vmem:[#allocation11 + $0x6f0] sm:$0xf]  ;;  %v14500_v17 = vld [vmem:[#allocation11 + $0x6a0] sm:$0xf0]  ;;  %v14284_v63 = vld [vmem:[#allocation11 + $0x4f0] sm:$0xf0]  ;;  %v16019_v36 = vor.u32 %v18736_v48, %v16018_v58 }
 0x4c7   :  { %v18978_v6 = vld [vmem:[#allocation11 + $0x1a0c] sm:$0xf] }
 0x4c8   :  { %11070 = vmatpush.bf16.msra.mxu3 %v17239_v57  ;;  %v14795_v57 = vor.u32 %v18430_v55, %v14794_v60  ;;  %v10684_v42 = vadd.f32 %v10683_v33, %v10670_v2  ;;  %v16235_v60 = vor.u32 %v18790_v10, %v16234_v21  ;;  %v15586_v55 = vld [vmem:[#allocation11 + $0xed0] sm:$0xf]  ;;  %v14503_v2 = vor.u32 %v18348_v47, %v14500_v17  ;;  %v17092_v21 = vld [vmem:[#allocation11 + $0x1ae0] sm:$0xf0]  ;;  %v18304_v17 = vld [vmem:[#allocation11 + $0x4f4] sm:$0xf0] }
 0x4c9   :  { %11084 = vmatpush.bf16.msrb.mxu0 %v13787_v31  ;;  %v18412_v31 = vld [vmem:[#allocation11 + $0x854] sm:$0xf0]  ;;  %10946 = vmatmul.bf16.vlgmr.msra.gmra.mxu2 %v19790_v7  ;;  %v15587_v33 = vor.u32 %v18628_v50, %v15586_v55  ;;  %v17098_v50 = vld [vmem:[#allocation11 + $0x1aa0] sm:$0xf]  ;;  %v18942_v48 = vld [vmem:[#allocation11 + $0x18ec] sm:$0xf] }
 0x4ca   :  { %10994 = vmatpush.bf16.msrb.mxu2 %v14791_v20  ;;  %v19194_v54 = vpop.eup %19193  ;;  %v11691_v11 = vmul.f32 0.5, %v10684_v42  ;;  %11043 = vmatpush.bf16.msra.mxu1 %v16015_v35  ;;  %v14723_v46 = vor.u32 %v18412_v31, %v14722_v52  ;;  %v14506_v35 = vld [vmem:[#allocation11 + $0x660] sm:$0xf] }
 0x4cb   :  { %v11745_v53 = vmul.f32 0.5, %v19194_v54  ;;  %v19196_v43 = vpop.eup %19195  ;;  %v15514_v42 = vld [vmem:[#allocation11 + $0xe40] sm:$0xf]  ;;  %v18340_v54 = vld [vmem:[#allocation11 + $0x614] sm:$0xf0] }
 0x4cc   :  { %11071 = vmatpush.bf16.msra.mxu3 %v17167_v15  ;;  %19197 = vtanh.f32 %v11691_v11  ;;  %v11780_v15 = vadd.f32 0.5, %v11744_v32  ;;  %v11762_v27 = vmul.f32 0.5, %v19196_v43  ;;  %v16090_v32 = vld [vmem:[#allocation11 + $0x12c0] sm:$0xf]  ;;  %v18312_v11 = vld [vmem:[#allocation11 + $0x53c] sm:$0xf] }
 0x4cd   :  { %11085 = vmatpush.bf16.msrb.mxu0 %v13715_v34  ;;  %v11781_v59 = vadd.f32 0.5, %v11745_v53  ;;  %11044 = vmatmul.bf16.vlgmr.msra.gmra.mxu1 %v19790_v7  ;;  %v18366_v34 = vld [vmem:[#allocation11 + $0x6ec] sm:$0xf] }
 0x4ce   :  { %11092 = vmatpush.bf16.msrb.mxu1 %v14795_v57  ;;  %10995 = vmatpush.bf16.msrb.mxu2 %v14719_v8  ;;  %v11798_v4 = vadd.f32 0.5, %v11762_v27  ;;  %v18330_v57 = vld [vmem:[#allocation11 + $0x5cc] sm:$0xf]  ;;  %v18610_v8 = vld [vmem:[#allocation11 + $0xe84] sm:$0xf0] }
 0x4cf   :  { %11072 = vmatmul.bf16.vlgmr.msra.gmra.mxu3 %v19810_v9  ;;  %v11813_v37 = vpack.c.bf16 %v11781_v59, %v11780_v15  ;;  %v14431_v62 = vor.u32 %v18330_v57, %v14428_v61  ;;  %v14220_v15 = vld [vmem:[#allocation11 + $0x468] sm:$0xf0]  ;;  %v14359_v59 = vor.u32 %v18312_v11, %v14356_v19  ;;  %v14148_v27 = vld [vmem:[#allocation11 + $0x3d8] sm:$0xf0]  ;;  %v18385_v57 = vld [vmem:[#allocation11 + $0x784] sm:$0xf] }
 0x4d0   :  { %11120 = vmatpush.bf16.msrb.mxu3 %v15947_v13  ;;  %11086 = vmatmul.bf16.vlgmr.msrb.gmra.mxu0 %v19753_v26  ;;  %v14572_v13 = vld [vmem:[#allocation11 + $0x730] sm:$0xf0]  ;;  %v14652_v61 = vld [vmem:[#allocation11 + $0x7c8] sm:$0xf0] }
 0x4d1   :  { %11134 = vmatpush.bf16.msra.mxu0 %v16523_v16  ;;  %v14651_v16 = vor.u32 %v18394_v28, %v14650_v29  ;;  %v14575_v18 = vor.u32 %v18366_v34, %v14572_v13  ;;  %11831 = vst [vmem:[#allocation14 + $0x18] sm:$0xff] %v11813_v37  ;;  %v14362_v29 = vld [vmem:[#allocation11 + $0x540] sm:$0xf]  ;;  %v18277_v28 = vld [vmem:[#allocation11 + $0x424] sm:$0xf] }
 0x4d2   :  { %11093 = vmatpush.bf16.msrb.mxu1 %v14723_v46  ;;  %10996 = vmatpush.bf16.msrb.mxu2 %v14647_v40  ;;  %v19198_v20 = vpop.eup %19197  ;;  %v18592_v46 = vld [vmem:[#allocation11 + $0xdf4] sm:$0xf0]  ;;  %v14435_v40 = vor.u32 %v18340_v54, %v14434_v49  ;;  %v18421_v34 = vld [vmem:[#allocation11 + $0x8a4] sm:$0xf]  ;;  %v14796_v13 = vld [vmem:[#allocation11 + $0x8e8] sm:$0xf0]  ;;  %v14223_v37 = vor.u32 %v18277_v28, %v14220_v15 }
 0x4d3   :  { %v11763_v25 = vmul.f32 0.5, %v19198_v20  ;;  %v15443_v43 = vor.u32 %v18592_v46, %v15442_v3  ;;  %v18403_v20 = vld [vmem:[#allocation11 + $0x814] sm:$0xf]  ;;  %v14004_v49 = vld [vmem:[#allocation11 + $0x2b8] sm:$0xf0] }
 0x4d4   :  { %11121 = vmatpush.bf16.msrb.mxu3 %v15875_v56  ;;  %v14579_v56 = vor.u32 %v18376_v14, %v14578_v12  ;;  %v14290_v12 = vld [vmem:[#allocation11 + $0x4b0] sm:$0xf]  ;;  %v18259_v14 = vld [vmem:[#allocation11 + $0x394] sm:$0xf]  ;;  %v16954_v3 = vld [vmem:[#allocation11 + $0x1980] sm:$0xf] }
 0x4d5   :  { %11135 = vmatpush.bf16.msra.mxu0 %v16451_v39  ;;  %v18358_v39 = vld [vmem:[#allocation11 + $0x6a4] sm:$0xf0]  ;;  %v11799_v51 = vadd.f32 0.5, %v11763_v25  ;;  %v14151_v1 = vor.u32 %v18259_v14, %v14148_v27  ;;  %v18367_v11 = vld [vmem:[#allocation11 + $0x6f4] sm:$0xf]  ;;  %v20125_v14 = vpop.f32.mrf.mxu2 }
 0x4d6   :  { %11094 = vmatpush.bf16.msrb.mxu1 %v14651_v16  ;;  %10997 = vmatpush.bf16.msrb.mxu2 %v14575_v18  ;;  %v14507_v31 = vor.u32 %v18358_v39, %v14506_v35  ;;  %v18996_v16 = vld [vmem:[#allocation11 + $0x1a9c] sm:$0xf]  ;;  %v14799_v18 = vor.u32 %v18421_v34, %v14796_v13  ;;  %v19006_v25 = vld [vmem:[#allocation11 + $0x1ae4] sm:$0xf0]  ;;  %v14291_v35 = vor.u32 %v18304_v17, %v14290_v12  ;;  %v18205_v28 = vld [vmem:[#allocation11 + $0x1e4] sm:$0xf]  ;;  %v20123_v12 = vpop.f32.mrf.mxu3 }
 0x4d7   :  { %v11822_v52 = vpack.c.bf16 %v11799_v51, %v11798_v4  ;;  %v17095_v55 = vor.u32 %v18996_v16, %v17092_v21  ;;  %v18241_v4 = vld [vmem:[#allocation11 + $0x304] sm:$0xf]  ;;  %v14076_v51 = vld [vmem:[#allocation11 + $0x348] sm:$0xf0]  ;;  %v14436_v17 = vld [vmem:[#allocation11 + $0x618] sm:$0xf0] }
 0x4d8   :  { %11122 = vmatpush.bf16.msrb.mxu3 %v15803_v45  ;;  %v18754_v45 = vld [vmem:[#allocation11 + $0x1304] sm:$0xf0]  ;;  %v13932_v15 = vld [vmem:[#allocation11 + $0x228] sm:$0xf0]  ;;  %v18349_v34 = vld [vmem:[#allocation11 + $0x664] sm:$0xf] }
 0x4d9   :  { %11136 = vmatpush.bf16.msra.mxu0 %v16379_v38  ;;  %11840 = vst [vmem:[#allocation14 + $0x60] sm:$0xff] %v11822_v52  ;;  %v15515_v38 = vor.u32 %v18610_v8, %v15514_v42  ;;  %v16091_v53 = vor.u32 %v18754_v45, %v16090_v32  ;;  %v17026_v42 = vld [vmem:[#allocation11 + $0x1a10] sm:$0xf]  ;;  %v18988_v8 = vld [vmem:[#allocation11 + $0x1a54] sm:$0xf0]  ;;  %v14079_v52 = vor.u32 %v18241_v4, %v14076_v51 }
 0x4da   :  { %11095 = vmatpush.bf16.msrb.mxu1 %v14579_v56  ;;  %10998 = vmatpush.bf16.msrb.mxu2 %v14503_v2  ;;  %v20113_v56 = vpop.f32.mrf.mxu1  ;;  %v17020_v2 = vld [vmem:[#allocation11 + $0x1a50] sm:$0xf0]  ;;  %v16948_v32 = vld [vmem:[#allocation11 + $0x19c0] sm:$0xf0]  ;;  %v14655_v45 = vor.u32 %v18385_v57, %v14652_v61  ;;  %v17027_v54 = vor.u32 %v18988_v8, %v17026_v42  ;;  %v14508_v13 = vld [vmem:[#allocation11 + $0x6a8] sm:$0xf0] }
 0x4db   :  { %v16804_v16 = vld [vmem:[#allocation11 + $0x18a0] sm:$0xf0]  ;;  %v14511_v21 = vor.u32 %v18349_v34, %v14508_v13  ;;  %v14364_v57 = vld [vmem:[#allocation11 + $0x588] sm:$0xf0]  ;;  %v18916_v42 = vld [vmem:[#allocation11 + $0x1814] sm:$0xf0] }
 0x4dc   :  { %11123 = vmatpush.bf16.msrb.mxu3 %v15731_v30  ;;  %v18322_v30 = vld [vmem:[#allocation11 + $0x584] sm:$0xf0]  ;;  %v18870_v34 = vld [vmem:[#allocation11 + $0x16ac] sm:$0xf]  ;;  %v16588_v13 = vld [vmem:[#allocation11 + $0x16f0] sm:$0xf0] }
 0x4dd   :  { %11137 = vmatpush.bf16.msra.mxu0 %v16307_v0  ;;  %v18294_v0 = vld [vmem:[#allocation11 + $0x4ac] sm:$0xf]  ;;  %v14363_v10 = vor.u32 %v18322_v30, %v14362_v29 }
 0x4de   :  { %11096 = vmatpush.bf16.msrb.mxu1 %v14507_v31  ;;  %10999 = vmatpush.bf16.msrb.mxu2 %v14431_v62  ;;  %v14287_v47 = vor.u32 %v18294_v0, %v14284_v63  ;;  %v18960_v31 = vld [vmem:[#allocation11 + $0x197c] sm:$0xf]  ;;  %v18223_v62 = vld [vmem:[#allocation11 + $0x274] sm:$0xf]  ;;  %v16882_v0 = vld [vmem:[#allocation11 + $0x18f0] sm:$0xf] }
 0x4df   :  { %v16951_v19 = vor.u32 %v18960_v31, %v16948_v32  ;;  %v14007_v58 = vor.u32 %v18223_v62, %v14004_v49  ;;  %v18952_v63 = vld [vmem:[#allocation11 + $0x1934] sm:$0xf0]  ;;  %v20131_v8 = vld [vmem:[#allocation13 + $0x8] sm:$0xff]  ;;  %v18888_v31 = vld [vmem:[#allocation11 + $0x173c] sm:$0xf] }
 0x4e0   :  { %11124 = vmatpush.bf16.msrb.mxu3 %v15659_v22  ;;  %v20111_v22 = vpop.f32.mrf.mxu0  ;;  %v16883_v27 = vor.u32 %v18952_v63, %v16882_v0  ;;  %v16660_v32 = vld [vmem:[#allocation11 + $0x1780] sm:$0xf0]  ;;  %v13716_v49 = vld [vmem:[#allocation11 + $0x78] sm:$0xf0] }
 0x4e1   :  { %11138 = vmatpush.bf16.msra.mxu0 %v16235_v60  ;;  %v14724_v60 = vld [vmem:[#allocation11 + $0x858] sm:$0xf0] }
 0x4e2   :  { %11097 = vmatpush.bf16.msrb.mxu1 %v14435_v40  ;;  %11000 = vmatpush.bf16.msrb.mxu2 %v14359_v59  ;;  %v14727_v39 = vor.u32 %v18403_v20, %v14724_v60  ;;  %v16876_v40 = vld [vmem:[#allocation11 + $0x1930] sm:$0xf0]  ;;  %v20121_v59 = vpop.f32.mrf.mxu1  ;;  %v16810_v60 = vld [vmem:[#allocation11 + $0x1860] sm:$0xf] }
 0x4e4   :  { %11125 = vmatpush.bf16.msrb.mxu3 %v15587_v33  ;;  %v17099_v33 = vor.u32 %v19006_v25, %v17098_v50 }
 0x4e5   :  { %11139 = vmatpush.bf16.msra.mxu0 %v16163_v23  ;;  %v17023_v23 = vor.u32 %v18978_v6, %v17020_v2  ;;  %v16732_v6 = vld [vmem:[#allocation11 + $0x1810] sm:$0xf0] }
 0x4e6   :  { %11098 = vmatpush.bf16.msrb.mxu1 %v14363_v10  ;;  %11001 = vmatpush.bf16.msrb.mxu2 %v14287_v47  ;;  %v18187_v10 = vld [vmem:[#allocation11 + $0x154] sm:$0xf] }
 0x4e7   :  { %v18331_v47 = vld [vmem:[#allocation11 + $0x5d4] sm:$0xf] }
 0x4e8   :  { %11126 = vmatpush.bf16.msrb.mxu3 %v15515_v38  ;;  %v14580_v38 = vld [vmem:[#allocation11 + $0x738] sm:$0xf0]  ;;  %v20118_v46 = vpop.f32.mrf.mxu0  ;;  %v14439_v2 = vor.u32 %v18331_v47, %v14436_v17  ;;  %v16591_v17 = vor.u32 %v18870_v34, %v16588_v13  ;;  %v18943_v34 = vld [vmem:[#allocation11 + $0x18f4] sm:$0xf] }
 0x4e9   :  { %11140 = vmatpush.bf16.msra.mxu0 %v16091_v53  ;;  %11002 = vmatmul.bf16.vlgmr.msrb.gmra.mxu2 %v19770_v44  ;;  %v18970_v53 = vld [vmem:[#allocation11 + $0x19c4] sm:$0xf0]  ;;  %v14583_v29 = vor.u32 %v18367_v11, %v14580_v38  ;;  %v14292_v11 = vld [vmem:[#allocation11 + $0x4f8] sm:$0xf0] }
 0x4ea   :  { %11050 = vmatpush.bf16.msra.mxu2 %v17095_v55  ;;  %11099 = vmatpush.bf16.msrb.mxu1 %v14291_v35  ;;  %v16955_v30 = vor.u32 %v18970_v53, %v16954_v3  ;;  %v18934_v55 = vld [vmem:[#allocation11 + $0x18a4] sm:$0xf0]  ;;  %v18169_v35 = vld [vmem:[#allocation11 + $0xc4] sm:$0xf]  ;;  %v20129_v4 = vpop.f32.mrf.mxu1  ;;  %v16524_v53 = vld [vmem:[#allocation11 + $0x1668] sm:$0xf0] }
 0x4eb   :  { %v16811_v51 = vor.u32 %v18934_v55, %v16810_v60  ;;  %v18853_v3 = vld [vmem:[#allocation11 + $0x1624] sm:$0xf]  ;;  %v16452_v47 = vld [vmem:[#allocation11 + $0x15d8] sm:$0xf0]  ;;  %v18979_v60 = vld [vmem:[#allocation11 + $0x1a14] sm:$0xf] }
 0x4ec   :  { %11127 = vmatpush.bf16.msrb.mxu3 %v15443_v43  ;;  %v16879_v43 = vor.u32 %v18942_v48, %v16876_v40  ;;  %v18898_v48 = vld [vmem:[#allocation11 + $0x1784] sm:$0xf0]  ;;  %v18997_v40 = vld [vmem:[#allocation11 + $0x1aa4] sm:$0xf]  ;;  %v16527_v63 = vor.u32 %v18853_v3, %v16524_v53  ;;  %v17028_v55 = vld [vmem:[#allocation11 + $0x1a58] sm:$0xf0] }
 0x4ed   :  { %11141 = vmatpush.bf16.msra.mxu0 %v16019_v36  ;;  %11100 = vmatmul.bf16.vlgmr.msrb.gmra.mxu1 %v19770_v44  ;;  %v13935_v36 = vor.u32 %v18205_v28, %v13932_v15  ;;  %v20133_v28 = vpop.f32.mrf.mxu3  ;;  %v20135_v15 = vpop.f32.mrf.mxu2  ;;  %v18538_v3 = vld [vmem:[#allocation11 + $0xc44] sm:$0xf0]  ;;  %v16884_v13 = vld [vmem:[#allocation11 + $0x1938] sm:$0xf0] }
 0x4ee   :  { %11148 = vmatpush.bf16.msra.mxu1 %v17099_v33  ;;  %11051 = vmatpush.bf16.msra.mxu2 %v17023_v23  ;;  %v18313_v33 = vld [vmem:[#allocation11 + $0x544] sm:$0xf]  ;;  %v16738_v23 = vld [vmem:[#allocation11 + $0x17d0] sm:$0xf] }
 0x4ef   :  { %11128 = vmatmul.bf16.vlgmr.msrb.gmra.mxu3 %v19787_v41  ;;  %v14367_v62 = vor.u32 %v18313_v33, %v14364_v57  ;;  %v16739_v38 = vor.u32 %v18916_v42, %v16738_v23  ;;  %v17031_v57 = vor.u32 %v18979_v60, %v17028_v55  ;;  %v16380_v23 = vld [vmem:[#allocation11 + $0x1548] sm:$0xf0]  ;;  %v18925_v55 = vld [vmem:[#allocation11 + $0x1864] sm:$0xf] }
 0x4f0   :  { %11176 = vmatpush.bf16.msra.mxu3 %v14223_v37  ;;  %11142 = vmatmul.bf16.vlgmr.msra.gmra.mxu0 %v19790_v7  ;;  %v18924_v37 = vld [vmem:[#allocation11 + $0x185c] sm:$0xf]  ;;  %v20127_v50 = vpop.f32.mrf.mxu0 }
 0x4f1   :  { %11190 = vmatpush.bf16.msrb.mxu0 %v14799_v18  ;;  %v13860_v18 = vld [vmem:[#allocation11 + $0x198] sm:$0xf0]  ;;  %v16807_v20 = vor.u32 %v18924_v37, %v16804_v16  ;;  %v18574_v37 = vld [vmem:[#allocation11 + $0xd64] sm:$0xf0] }
 0x4f2   :  { %11149 = vmatpush.bf16.msra.mxu1 %v17027_v54  ;;  %11052 = vmatpush.bf16.msra.mxu2 %v16951_v19  ;;  %v13863_v25 = vor.u32 %v18187_v10, %v13860_v18  ;;  %v18295_v54 = vld [vmem:[#allocation11 + $0x4b4] sm:$0xf]  ;;  %v16666_v19 = vld [vmem:[#allocation11 + $0x1740] sm:$0xf]  ;;  %v16594_v18 = vld [vmem:[#allocation11 + $0x16b0] sm:$0xf] }
 0x4f3   :  { %v14295_v0 = vor.u32 %v18295_v54, %v14292_v11  ;;  %v18547_v54 = vld [vmem:[#allocation11 + $0xc94] sm:$0xf]  ;;  %v15300_v11 = vld [vmem:[#allocation11 + $0xcd8] sm:$0xf0] }
 0x4f4   :  { %11177 = vmatpush.bf16.msra.mxu3 %v14151_v1  ;;  %v18906_v1 = vld [vmem:[#allocation11 + $0x17cc] sm:$0xf] }
 0x4f5   :  { %11191 = vmatpush.bf16.msrb.mxu0 %v14727_v39  ;;  %v13788_v39 = vld [vmem:[#allocation11 + $0x108] sm:$0xf0]  ;;  %v16735_v61 = vor.u32 %v18906_v1, %v16732_v6  ;;  %v18565_v6 = vld [vmem:[#allocation11 + $0xd24] sm:$0xf] }
 0x4f6   :  { %11150 = vmatpush.bf16.msra.mxu1 %v16955_v30  ;;  %11053 = vmatpush.bf16.msra.mxu2 %v16879_v43  ;;  %v4834_v43 = vperm.slane %v20131_v8, 0 }
 0x4f8   :  { %11178 = vmatpush.bf16.msra.mxu3 %v14079_v52  ;;  %v13791_v52 = vor.u32 %v18169_v35, %v13788_v39  ;;  %v20138_v16 = vpop.f32.mrf.mxu0  ;;  %v15298_v39 = vld [vmem:[#allocation11 + $0xc90] sm:$0xf]  ;;  %v10696_v42 = vadd.f32 %v20111_v22, %v4834_v43  ;;  %v15226_v22 = vld [vmem:[#allocation11 + $0xc00] sm:$0xf] }
 0x4f9   :  { %11192 = vmatpush.bf16.msrb.mxu0 %v14655_v45  ;;  %v18151_v45 = vld [vmem:[#allocation11 + $0x34] sm:$0xf] }
 0x4fa   :  { %11151 = vmatpush.bf16.msra.mxu1 %v16883_v27  ;;  %11054 = vmatpush.bf16.msra.mxu2 %v16807_v20  ;;  %v13719_v30 = vor.u32 %v18151_v45, %v13716_v49  ;;  %v18835_v27 = vld [vmem:[#allocation11 + $0x1594] sm:$0xf]  ;;  %v18880_v20 = vld [vmem:[#allocation11 + $0x16f4] sm:$0xf0]  ;;  %v10793_v45 = vpop.f32.mrf.mxu3 }
 0x4fb   :  { %v16455_v35 = vor.u32 %v18835_v27, %v16452_v47  ;;  %v16595_v33 = vor.u32 %v18880_v20, %v16594_v18  ;;  %v18781_v18 = vld [vmem:[#allocation11 + $0x13e4] sm:$0xf]  ;;  %v16236_v27 = vld [vmem:[#allocation11 + $0x1428] sm:$0xf0]  ;;  %v10698_v47 = vadd.f32 %v20118_v46, %v4834_v43  ;;  %v16164_v43 = vld [vmem:[#allocation11 + $0x1398] sm:$0xf0] }
 0x4fc   :  { %11179 = vmatpush.bf16.msra.mxu3 %v14007_v58  ;;  %v16663_v58 = vor.u32 %v18888_v31, %v16660_v32  ;;  %v18961_v31 = vld [vmem:[#allocation11 + $0x1984] sm:$0xf]  ;;  %v16956_v32 = vld [vmem:[#allocation11 + $0x19c8] sm:$0xf0] }
 0x4fd   :  { %11193 = vmatpush.bf16.msrb.mxu0 %v14583_v29  ;;  %v17100_v29 = vld [vmem:[#allocation11 + $0x1ae8] sm:$0xf0] }
 0x4fe   :  { %11152 = vmatpush.bf16.msra.mxu1 %v16811_v51  ;;  %11055 = vmatpush.bf16.msra.mxu2 %v16735_v61  ;;  %v17103_v10 = vor.u32 %v18997_v40, %v17100_v29  ;;  %v18556_v51 = vld [vmem:[#allocation11 + $0xcd4] sm:$0xf0]  ;;  %v18817_v61 = vld [vmem:[#allocation11 + $0x1504] sm:$0xf]  ;;  %v16308_v40 = vld [vmem:[#allocation11 + $0x14b8] sm:$0xf0] }
 0x4ff   :  { %v15299_v49 = vor.u32 %v18556_v51, %v15298_v39  ;;  %v10712_v39 = vadd.f32 %v20121_v59, %v10698_v47  ;;  %v16239_v51 = vor.u32 %v18781_v18, %v16236_v27  ;;  %v16740_v59 = vld [vmem:[#allocation11 + $0x1818] sm:$0xf0]  ;;  %v18727_v18 = vld [vmem:[#allocation11 + $0x1234] sm:$0xf] }
 0x500   :  { %11180 = vmatpush.bf16.msra.mxu3 %v13935_v36  ;;  %v15370_v36 = vld [vmem:[#allocation11 + $0xd20] sm:$0xf]  ;;  %v20150_v53 = vpop.f32.mrf.mxu0 }
 0x501   :  { %11194 = vmatpush.bf16.msrb.mxu0 %v14511_v21  ;;  %v16667_v21 = vor.u32 %v18898_v48, %v16666_v19  ;;  %v15371_v1 = vor.u32 %v18574_v37, %v15370_v36  ;;  %v16383_v19 = vor.u32 %v18817_v61, %v16380_v23  ;;  %v18799_v48 = vld [vmem:[#allocation11 + $0x1474] sm:$0xf]  ;;  %v15228_v36 = vld [vmem:[#allocation11 + $0xc48] sm:$0xf0] }
 0x502   :  { %11153 = vmatpush.bf16.msra.mxu1 %v16739_v38  ;;  %11056 = vmatpush.bf16.msra.mxu2 %v16663_v58  ;;  %v10710_v38 = vadd.f32 %v20113_v56, %v10696_v42  ;;  %v16959_v58 = vor.u32 %v18961_v31, %v16956_v32  ;;  %v16311_v37 = vor.u32 %v18799_v48, %v16308_v40  ;;  %v10795_v61 = vpop.f32.mrf.mxu3  ;;  %v18907_v32 = vld [vmem:[#allocation11 + $0x17d4] sm:$0xf]  ;;  %v16092_v48 = vld [vmem:[#allocation11 + $0x1308] sm:$0xf0] }
 0x503   :  { %v10726_v42 = vadd.f32 %v20135_v15, %v10712_v39  ;;  %v18745_v15 = vld [vmem:[#allocation11 + $0x12c4] sm:$0xf] }
 0x504   :  { %11181 = vmatpush.bf16.msra.mxu3 %v13863_v25  ;;  %v20140_v25 = vpop.f32.mrf.mxu1  ;;  %v10724_v29 = vadd.f32 %v20125_v14, %v10710_v38  ;;  %v16887_v14 = vor.u32 %v18943_v34, %v16884_v13  ;;  %v15084_v38 = vld [vmem:[#allocation11 + $0xb28] sm:$0xf0]  ;;  %v18889_v34 = vld [vmem:[#allocation11 + $0x1744] sm:$0xf] }
 0x505   :  { %11195 = vmatpush.bf16.msrb.mxu0 %v14439_v2  ;;  %v15372_v2 = vld [vmem:[#allocation11 + $0xd68] sm:$0xf0]  ;;  %v10740_v40 = vadd.f32 %v20133_v28, %v10726_v42 }
 0x506   :  { %11154 = vmatpush.bf16.msra.mxu1 %v16667_v21  ;;  %11057 = vmatpush.bf16.msra.mxu2 %v16591_v17  ;;  %v15154_v21 = vld [vmem:[#allocation11 + $0xb70] sm:$0xf]  ;;  %v4835_v17 = vperm.slane %v20131_v8, 1  ;;  %v10738_v20 = vadd.f32 %v20123_v12, %v10724_v29  ;;  %v18763_v12 = vld [vmem:[#allocation11 + $0x1354] sm:$0xf] }
 0x507   :  { %v16668_v13 = vld [vmem:[#allocation11 + $0x1788] sm:$0xf0] }
 0x508   :  { %11182 = vmatpush.bf16.msra.mxu3 %v13791_v52  ;;  %v15375_v52 = vor.u32 %v18565_v6, %v15372_v2  ;;  %v18511_v2 = vld [vmem:[#allocation11 + $0xb74] sm:$0xf]  ;;  %v10794_v23 = vadd.f32 %v10793_v45, %v4835_v17  ;;  %v16743_v45 = vor.u32 %v18907_v32, %v16740_v59  ;;  %v10796_v28 = vadd.f32 %v10795_v61, %v4835_v17  ;;  %v15378_v17 = vld [vmem:[#allocation11 + $0xd28] sm:$0xf]  ;;  %v17674_v32 = vld [vmem:[#allocation11 + $0x1f20] sm:$0xf] }
 0x509   :  { %11196 = vmatpush.bf16.msrb.mxu0 %v14367_v62  ;;  %v20146_v62 = vpop.f32.mrf.mxu2  ;;  %11058 = vmatmul.bf16.vlgmr.msra.gmra.mxu2 %v19797_v24  ;;  %v16671_v47 = vor.u32 %v18889_v34, %v16668_v13  ;;  %v19150_v59 = vld [vmem:[#allocation11 + $0x1f64] sm:$0xf0]  ;;  %v19141_v34 = vld [vmem:[#allocation11 + $0x1f24] sm:$0xf]  ;;  %v17676_v13 = vld [vmem:[#allocation11 + $0x1f68] sm:$0xf0] }
 0x50a   :  { %11106 = vmatpush.bf16.msrb.mxu2 %v15371_v1  ;;  %11155 = vmatpush.bf16.msra.mxu1 %v16595_v33  ;;  %v16812_v1 = vld [vmem:[#allocation11 + $0x18a8] sm:$0xf0]  ;;  %v15082_v33 = vld [vmem:[#allocation11 + $0xae0] sm:$0xf]  ;;  %v10849_v27 = vpop.f32.mrf.mxu3 }
 0x50b   :  { %v16815_v8 = vor.u32 %v18925_v55, %v16812_v1  ;;  %v16596_v55 = vld [vmem:[#allocation11 + $0x16f8] sm:$0xf0]  ;;  %v10754_v1 = vadd.f32 %v20138_v16, %v10740_v40  ;;  %v18557_v40 = vld [vmem:[#allocation11 + $0xcdc] sm:$0xf0] }
 0x50c   :  { %11183 = vmatpush.bf16.msra.mxu3 %v13719_v30  ;;  %v15303_v30 = vor.u32 %v18547_v54, %v15300_v11  ;;  %v20154_v56 = vpop.f32.mrf.mxu1  ;;  %v18493_v11 = vld [vmem:[#allocation11 + $0xae4] sm:$0xf] }
 0x50d   :  { %11197 = vmatpush.bf16.msrb.mxu0 %v14295_v0  ;;  %v15227_v0 = vor.u32 %v18538_v3, %v15226_v22  ;;  %11156 = vmatmul.bf16.vlgmr.msra.gmra.mxu1 %v19797_v24  ;;  %v15010_v22 = vld [vmem:[#allocation11 + $0xa50] sm:$0xf]  ;;  %v18484_v3 = vld [vmem:[#allocation11 + $0xa94] sm:$0xf0] }
 0x50e   :  { %11204 = vmatpush.bf16.msrb.mxu1 %v15375_v52  ;;  %11107 = vmatpush.bf16.msrb.mxu2 %v15299_v49  ;;  %v10752_v52 = vadd.f32 %v20127_v50, %v10738_v20  ;;  %v10809_v49 = vpop.f32.mrf.mxu0  ;;  %v10808_v50 = vadd.f32 %v20150_v53, %v10794_v23  ;;  %v18466_v53 = vld [vmem:[#allocation11 + $0xa04] sm:$0xf0]  ;;  %v16020_v20 = vld [vmem:[#allocation11 + $0x1278] sm:$0xf0]  ;;  %v18448_v23 = vld [vmem:[#allocation11 + $0x974] sm:$0xf0] }
 0x50f   :  { %11184 = vmatmul.bf16.vlgmr.msra.gmra.mxu3 %v19753_v26  ;;  %v10810_v42 = vadd.f32 %v10809_v49, %v10796_v28  ;;  %v14868_v49 = vld [vmem:[#allocation11 + $0x978] sm:$0xf0]  ;;  %v17679_v28 = vor.u32 %v19141_v34, %v17676_v13  ;;  %v17386_v34 = vld [vmem:[#allocation11 + $0x1ce0] sm:$0xf]  ;;  %v19078_v13 = vld [vmem:[#allocation11 + $0x1d24] sm:$0xf0] }
 0x510   :  { %11232 = vmatpush.bf16.msrb.mxu3 %v16527_v63  ;;  %11198 = vmatmul.bf16.vlgmr.msrb.gmra.mxu0 %v19770_v44  ;;  %v18529_v63 = vld [vmem:[#allocation11 + $0xc04] sm:$0xf]  ;;  %v10766_v29 = vadd.f32 %v20129_v4, %v10752_v52 }
 0x511   :  { %11246 = vmatpush.bf16.msra.mxu0 %v17103_v10  ;;  %v18520_v10 = vld [vmem:[#allocation11 + $0xbb4] sm:$0xf0]  ;;  %v15231_v60 = vor.u32 %v18529_v63, %v15228_v36  ;;  %v20163_v46 = vpop.f32.mrf.mxu2  ;;  %v18475_v63 = vld [vmem:[#allocation11 + $0xa54] sm:$0xf]  ;;  %v15012_v36 = vld [vmem:[#allocation11 + $0xa98] sm:$0xf0] }
 0x512   :  { %11205 = vmatpush.bf16.msrb.mxu1 %v15303_v30  ;;  %11108 = vmatpush.bf16.msrb.mxu2 %v15227_v0  ;;  %v15155_v6 = vor.u32 %v18520_v10, %v15154_v21  ;;  %v15087_v30 = vor.u32 %v18493_v11, %v15084_v38  ;;  %v15011_v0 = vor.u32 %v18484_v3, %v15010_v22  ;;  %v18439_v22 = vld [vmem:[#allocation11 + $0x934] sm:$0xf]  ;;  %v14730_v3 = vld [vmem:[#allocation11 + $0x818] sm:$0xf] }
 0x513   :  { %v10780_v21 = vadd.f32 %v20146_v62, %v10766_v29  ;;  %v16095_v10 = vor.u32 %v18745_v15, %v16092_v48  ;;  %v14802_v62 = vld [vmem:[#allocation11 + $0x8a8] sm:$0xf] }
 0x514   :  { %11233 = vmatpush.bf16.msrb.mxu3 %v16455_v35  ;;  %v15156_v35 = vld [vmem:[#allocation11 + $0xbb8] sm:$0xf0] }
 0x515   :  { %11247 = vmatpush.bf16.msra.mxu0 %v17031_v57  ;;  %v18502_v57 = vld [vmem:[#allocation11 + $0xb24] sm:$0xf0]  ;;  %v15159_v31 = vor.u32 %v18511_v2, %v15156_v35  ;;  %v18457_v2 = vld [vmem:[#allocation11 + $0x9c4] sm:$0xf]  ;;  %v18431_v35 = vld [vmem:[#allocation11 + $0x8ec] sm:$0xf0] }
 0x516   :  { %11206 = vmatpush.bf16.msrb.mxu1 %v15231_v60  ;;  %11109 = vmatpush.bf16.msrb.mxu2 %v15155_v6  ;;  %v15083_v54 = vor.u32 %v18502_v57, %v15082_v33  ;;  %v18871_v60 = vld [vmem:[#allocation11 + $0x16b4] sm:$0xf]  ;;  %v10863_v39 = vpop.f32.mrf.mxu0  ;;  %v14940_v33 = vld [vmem:[#allocation11 + $0xa08] sm:$0xf0]  ;;  %v18575_v57 = vld [vmem:[#allocation11 + $0xd6c] sm:$0xf0] }
 0x517   :  { %v11674_v61 = vmul.f32 0.5, %v10780_v21  ;;  %v16599_v52 = vor.u32 %v18871_v60, %v16596_v55  ;;  %v14943_v38 = vor.u32 %v18457_v2, %v14940_v33  ;;  %v19123_v55 = vld [vmem:[#allocation11 + $0x1e94] sm:$0xf]  ;;  %v17530_v2 = vld [vmem:[#allocation11 + $0x1e00] sm:$0xf] }
 0x518   :  { %11234 = vmatpush.bf16.msrb.mxu3 %v16383_v19  ;;  %v16167_v19 = vor.u32 %v18763_v12, %v16164_v43  ;;  %v16023_v12 = vor.u32 %v18727_v18, %v16020_v20  ;;  %v14866_v43 = vld [vmem:[#allocation11 + $0x930] sm:$0xf]  ;;  %v14586_v33 = vld [vmem:[#allocation11 + $0x6f8] sm:$0xf] }
 0x519   :  { %11248 = vmatpush.bf16.msra.mxu0 %v16959_v58  ;;  %v20167_v58 = vpop.f32.mrf.mxu1  ;;  %v10835_v4 = vpop.f32.mrf.mxu2  ;;  %v14867_v48 = vor.u32 %v18448_v23, %v14866_v43  ;;  %19199 = vtanh.f32 %v11674_v61  ;;  %v18395_v18 = vld [vmem:[#allocation11 + $0x7cc] sm:$0xf0] }
 0x51a   :  { %11207 = vmatpush.bf16.msrb.mxu1 %v15159_v31  ;;  %11110 = vmatpush.bf16.msrb.mxu2 %v15083_v54  ;;  %v14803_v31 = vor.u32 %v18431_v35, %v14802_v62  ;;  %v10768_v54 = vadd.f32 %v20140_v25, %v10754_v1  ;;  %v10824_v15 = vadd.f32 %v20167_v58, %v10810_v42  ;;  %v17604_v1 = vld [vmem:[#allocation11 + $0x1ed8] sm:$0xf0]  ;;  %v19114_v62 = vld [vmem:[#allocation11 + $0x1e44] sm:$0xf0]  ;;  %v19105_v42 = vld [vmem:[#allocation11 + $0x1e04] sm:$0xf] }
 0x51b   :  { %v17675_v25 = vor.u32 %v19150_v59, %v17674_v32  ;;  %v17607_v61 = vor.u32 %v19123_v55, %v17604_v1  ;;  %v17531_v23 = vor.u32 %v19114_v62, %v17530_v2  ;;  %v17458_v32 = vld [vmem:[#allocation11 + $0x1d70] sm:$0xf]  ;;  %v19096_v59 = vld [vmem:[#allocation11 + $0x1db4] sm:$0xf0]  ;;  %v14370_v55 = vld [vmem:[#allocation11 + $0x548] sm:$0xf] }
 0x51c   :  { %11235 = vmatpush.bf16.msrb.mxu3 %v16311_v37  ;;  %v10822_v37 = vadd.f32 %v20154_v56, %v10808_v50  ;;  %v15015_v56 = vor.u32 %v18475_v63, %v15012_v36  ;;  %v15306_v50 = vld [vmem:[#allocation11 + $0xc98] sm:$0xf]  ;;  %v10782_v29 = vadd.f32 %v20163_v46, %v10768_v54  ;;  %v17602_v36 = vld [vmem:[#allocation11 + $0x1e90] sm:$0xf]  ;;  %v10851_v46 = vpop.f32.mrf.mxu3  ;;  %v14946_v2 = vld [vmem:[#allocation11 + $0x9c8] sm:$0xf] }
 0x51d   :  { %11249 = vmatpush.bf16.msra.mxu0 %v16887_v14  ;;  %v14938_v14 = vld [vmem:[#allocation11 + $0x9c0] sm:$0xf]  ;;  %v18323_v1 = vld [vmem:[#allocation11 + $0x58c] sm:$0xf0] }
 0x51e   :  { %v10836_v6 = vadd.f32 %v10835_v4, %v10822_v37  ;;  %11208 = vmatpush.bf16.msrb.mxu1 %v15087_v30  ;;  %11111 = vmatpush.bf16.msrb.mxu2 %v15011_v0  ;;  %v19132_v37 = vld [vmem:[#allocation11 + $0x1ed4] sm:$0xf0]  ;;  %v18539_v4 = vld [vmem:[#allocation11 + $0xc4c] sm:$0xf0] }
 0x51f   :  { %v17603_v60 = vor.u32 %v19132_v37, %v17602_v36  ;;  %v19200_v35 = vpop.eup %19199  ;;  %v14442_v36 = vld [vmem:[#allocation11 + $0x5d8] sm:$0xf]  ;;  %v18341_v37 = vld [vmem:[#allocation11 + $0x61c] sm:$0xf0]  ;;  %v18467_v62 = vld [vmem:[#allocation11 + $0xa0c] sm:$0xf0] }
 0x520   :  { %11236 = vmatpush.bf16.msrb.mxu3 %v16239_v51  ;;  %v14939_v51 = vor.u32 %v18466_v53, %v14938_v14  ;;  %v15307_v14 = vor.u32 %v18557_v40, %v15306_v50  ;;  %v14658_v53 = vld [vmem:[#allocation11 + $0x788] sm:$0xf]  ;;  %v19087_v50 = vld [vmem:[#allocation11 + $0x1d74] sm:$0xf]  ;;  %v17460_v40 = vld [vmem:[#allocation11 + $0x1db8] sm:$0xf0] }
 0x521   :  { %11250 = vmatpush.bf16.msra.mxu0 %v16815_v8  ;;  %v10850_v8 = vadd.f32 %v10849_v27, %v10836_v6  ;;  %v10877_v16 = vpop.f32.mrf.mxu1  ;;  %v10837_v0 = vpop.f32.mrf.mxu2  ;;  %v15234_v27 = vld [vmem:[#allocation11 + $0xc08] sm:$0xf] }
 0x522   :  { %11209 = vmatpush.bf16.msrb.mxu1 %v15015_v56  ;;  %11112 = vmatpush.bf16.msrb.mxu2 %v14939_v51  ;;  %v10838_v21 = vadd.f32 %v10837_v0, %v10824_v15  ;;  %v10865_v6 = vpop.f32.mrf.mxu0  ;;  %v14659_v56 = vor.u32 %v18395_v18, %v14658_v53  ;;  %v15235_v51 = vor.u32 %v18539_v4, %v15234_v27  ;;  %v15090_v15 = vld [vmem:[#allocation11 + $0xae8] sm:$0xf]  ;;  %v19069_v18 = vld [vmem:[#allocation11 + $0x1ce4] sm:$0xf]  ;;  %v17314_v4 = vld [vmem:[#allocation11 + $0x1c50] sm:$0xf] }
 0x523   :  { %v10864_v11 = vadd.f32 %v10863_v39, %v10850_v8  ;;  %v15162_v8 = vld [vmem:[#allocation11 + $0xb78] sm:$0xf]  ;;  %v17387_v53 = vor.u32 %v19078_v13, %v17386_v34  ;;  %v14443_v27 = vor.u32 %v18341_v37, %v14442_v36  ;;  %v18989_v13 = vld [vmem:[#allocation11 + $0x1a5c] sm:$0xf0] }
 0x524   :  { %11237 = vmatpush.bf16.msrb.mxu3 %v16167_v19  ;;  %v15379_v19 = vor.u32 %v18575_v57, %v15378_v17  ;;  %v10852_v20 = vadd.f32 %v10851_v46, %v10838_v21  ;;  %v18377_v17 = vld [vmem:[#allocation11 + $0x73c] sm:$0xf0]  ;;  %v17463_v21 = vor.u32 %v19087_v50, %v17460_v40  ;;  %v17388_v46 = vld [vmem:[#allocation11 + $0x1d28] sm:$0xf0]  ;;  %v18709_v50 = vld [vmem:[#allocation11 + $0x11a4] sm:$0xf] }
 0x525   :  { %11251 = vmatpush.bf16.msra.mxu0 %v16743_v45  ;;  %v18413_v45 = vld [vmem:[#allocation11 + $0x85c] sm:$0xf0]  ;;  %v10878_v30 = vadd.f32 %v10877_v16, %v10864_v11  ;;  %v17532_v16 = vld [vmem:[#allocation11 + $0x1e48] sm:$0xf0]  ;;  %v17034_v34 = vld [vmem:[#allocation11 + $0x1a18] sm:$0xf] }
 0x526   :  { %v14731_v63 = vor.u32 %v18413_v45, %v14730_v3  ;;  %11210 = vmatpush.bf16.msrb.mxu1 %v14943_v38  ;;  %11113 = vmatpush.bf16.msrb.mxu2 %v14867_v48  ;;  %v10866_v39 = vadd.f32 %v10865_v6, %v10852_v20  ;;  %v17535_v45 = vor.u32 %v19105_v42, %v17532_v16  ;;  %v18503_v48 = vld [vmem:[#allocation11 + $0xb2c] sm:$0xf0]  ;;  %v14874_v42 = vld [vmem:[#allocation11 + $0x938] sm:$0xf]  ;;  %v18449_v16 = vld [vmem:[#allocation11 + $0x97c] sm:$0xf0] }
 0x527   :  { %v11675_v58 = vmul.f32 0.5, %v10878_v30  ;;  %v15948_v40 = vld [vmem:[#allocation11 + $0x11e8] sm:$0xf0]  ;;  %v17610_v36 = vld [vmem:[#allocation11 + $0x1e98] sm:$0xf] }
 0x528   :  { %11238 = vmatpush.bf16.msrb.mxu3 %v16095_v10  ;;  %v14871_v10 = vor.u32 %v18439_v22, %v14868_v49  ;;  %v18359_v22 = vld [vmem:[#allocation11 + $0x6ac] sm:$0xf0]  ;;  %v17459_v49 = vor.u32 %v19096_v59, %v17458_v32  ;;  %v19033_v32 = vld [vmem:[#allocation11 + $0x1bc4] sm:$0xf]  ;;  %v17106_v59 = vld [vmem:[#allocation11 + $0x1aa8] sm:$0xf] }
 0x529   :  { %11252 = vmatpush.bf16.msra.mxu0 %v16671_v47  ;;  %v11692_v47 = vmul.f32 0.5, %v10782_v29  ;;  %19201 = vtanh.f32 %v11675_v58  ;;  %v10879_v57 = vpop.f32.mrf.mxu1  ;;  %11114 = vmatmul.bf16.vlgmr.msrb.gmra.mxu2 %v19768_v5  ;;  %v19133_v37 = vld [vmem:[#allocation11 + $0x1edc] sm:$0xf0] }
 0x52a   :  { %11162 = vmatpush.bf16.msra.mxu2 %v17675_v25  ;;  %11211 = vmatpush.bf16.msrb.mxu1 %v14871_v10  ;;  %v10880_v43 = vadd.f32 %v10879_v57, %v10866_v39  ;;  %v15018_v10 = vld [vmem:[#allocation11 + $0xa58] sm:$0xf]  ;;  %v19051_v39 = vld [vmem:[#allocation11 + $0x1c54] sm:$0xf] }
 0x52b   :  { %19203 = vtanh.f32 %v11692_v47  ;;  %v19060_v47 = vld [vmem:[#allocation11 + $0x1c94] sm:$0xf0] }
 0x52c   :  { %11239 = vmatpush.bf16.msrb.mxu3 %v16023_v12  ;;  %v18521_v12 = vld [vmem:[#allocation11 + $0xbbc] sm:$0xf0]  ;;  %v11693_v11 = vmul.f32 0.5, %v10880_v43  ;;  %v14947_v43 = vor.u32 %v18467_v62, %v14946_v2  ;;  %v18673_v2 = vld [vmem:[#allocation11 + $0x1084] sm:$0xf] }
 0x52d   :  { %11253 = vmatpush.bf16.msra.mxu0 %v16599_v52  ;;  %v11746_v52 = vmul.f32 0.5, %v19200_v35  ;;  %11212 = vmatmul.bf16.vlgmr.msrb.gmra.mxu1 %v19768_v5  ;;  %v15163_v38 = vor.u32 %v18521_v12, %v15162_v8  ;;  %v17315_v35 = vor.u32 %v19060_v47, %v17314_v4  ;;  %v19042_v8 = vld [vmem:[#allocation11 + $0x1c04] sm:$0xf0]  ;;  %v14298_v12 = vld [vmem:[#allocation11 + $0x4b8] sm:$0xf] }
 0x52e   :  { %11260 = vmatpush.bf16.msra.mxu1 %v17679_v28  ;;  %11163 = vmatpush.bf16.msra.mxu2 %v17603_v60  ;;  %19205 = vtanh.f32 %v11693_v11  ;;  %v18971_v4 = vld [vmem:[#allocation11 + $0x19cc] sm:$0xf0]  ;;  %v15804_v62 = vld [vmem:[#allocation11 + $0x10c8] sm:$0xf0] }
 0x52f   :  { %11240 = vmatmul.bf16.vlgmr.msrb.gmra.mxu3 %v19790_v7  ;;  %v19202_v54 = vpop.eup %19201  ;;  %v11782_v29 = vadd.f32 0.5, %v11746_v52 }
 0x530   :  { %11288 = vmatpush.bf16.msra.mxu3 %v14803_v31  ;;  %11254 = vmatmul.bf16.vlgmr.msra.gmra.mxu0 %v19797_v24  ;;  %v14587_v31 = vor.u32 %v18377_v17, %v14586_v33  ;;  %v11747_v3 = vmul.f32 0.5, %v19202_v54  ;;  %v17242_v33 = vld [vmem:[#allocation11 + $0x1bc0] sm:$0xf]  ;;  %v19007_v54 = vld [vmem:[#allocation11 + $0x1aec] sm:$0xf0] }
 0x531   :  { %11302 = vmatpush.bf16.msrb.mxu0 %v15379_v19  ;;  %v14514_v19 = vld [vmem:[#allocation11 + $0x668] sm:$0xf]  ;;  %v19204_v0 = vpop.eup %19203  ;;  %v17243_v11 = vor.u32 %v19042_v8, %v17242_v33 }
 0x532   :  { %11261 = vmatpush.bf16.msra.mxu1 %v17607_v61  ;;  %11164 = vmatpush.bf16.msra.mxu2 %v17531_v23  ;;  %v11783_v30 = vadd.f32 0.5, %v11747_v3  ;;  %v14515_v25 = vor.u32 %v18359_v22, %v14514_v19  ;;  %v11764_v28 = vmul.f32 0.5, %v19204_v0  ;;  %v14371_v61 = vor.u32 %v18323_v1, %v14370_v55  ;;  %v18305_v23 = vld [vmem:[#allocation11 + $0x4fc] sm:$0xf0]  ;;  %v17682_v19 = vld [vmem:[#allocation11 + $0x1f28] sm:$0xf] }
 0x533   :  { %v19151_v22 = vld [vmem:[#allocation11 + $0x1f6c] sm:$0xf0]  ;;  %v14299_v3 = vor.u32 %v18305_v23, %v14298_v12  ;;  %v15882_v1 = vld [vmem:[#allocation11 + $0x1118] sm:$0xf]  ;;  %v15810_v8 = vld [vmem:[#allocation11 + $0x1088] sm:$0xf] }
 0x534   :  { %11289 = vmatpush.bf16.msra.mxu3 %v14731_v63  ;;  %v15091_v63 = vor.u32 %v18503_v48, %v15090_v15  ;;  %v11814_v58 = vpack.c.bf16 %v11783_v30, %v11782_v29  ;;  %v19206_v20 = vpop.eup %19205  ;;  %v11800_v17 = vadd.f32 0.5, %v11764_v28  ;;  %v19024_v15 = vld [vmem:[#allocation11 + $0x1b74] sm:$0xf0]  ;;  %v14875_v48 = vor.u32 %v18449_v16, %v14874_v42  ;;  %v18683_v12 = vld [vmem:[#allocation11 + $0x10cc] sm:$0xf0] }
 0x535   :  { %11303 = vmatpush.bf16.msrb.mxu0 %v15307_v14  ;;  %v18485_v14 = vld [vmem:[#allocation11 + $0xa9c] sm:$0xf0]  ;;  %v11765_v6 = vmul.f32 0.5, %v19206_v20  ;;  %v17683_v30 = vor.u32 %v19151_v22, %v17682_v19  ;;  %v17611_v28 = vor.u32 %v19133_v37, %v17610_v36  ;;  %v17538_v20 = vld [vmem:[#allocation11 + $0x1e08] sm:$0xf] }
 0x536   :  { %11262 = vmatpush.bf16.msra.mxu1 %v17535_v45  ;;  %11165 = vmatpush.bf16.msra.mxu2 %v17459_v49  ;;  %11832 = vst [vmem:[#allocation14 + $0x20] sm:$0xff] %v11814_v58  ;;  %v15019_v60 = vor.u32 %v18485_v14, %v15018_v10  ;;  %v17170_v45 = vld [vmem:[#allocation11 + $0x1b30] sm:$0xf]  ;;  %v17107_v49 = vor.u32 %v19007_v54, %v17106_v59  ;;  %v18655_v23 = vld [vmem:[#allocation11 + $0xff4] sm:$0xf] }
 0x537   :  { %v11801_v57 = vadd.f32 0.5, %v11765_v6  ;;  %v17171_v0 = vor.u32 %v19024_v15, %v17170_v45  ;;  %v15951_v58 = vor.u32 %v18709_v50, %v15948_v40  ;;  %v18719_v10 = vld [vmem:[#allocation11 + $0x11ec] sm:$0xf0]  ;;  %v17035_v14 = vor.u32 %v18989_v13, %v17034_v34  ;;  %v18701_v6 = vld [vmem:[#allocation11 + $0x115c] sm:$0xf0] }
 0x538   :  { %11290 = vmatpush.bf16.msra.mxu3 %v14659_v56  ;;  %v17391_v56 = vor.u32 %v19069_v18, %v17388_v46  ;;  %v15876_v18 = vld [vmem:[#allocation11 + $0x1158] sm:$0xf0]  ;;  %v15883_v33 = vor.u32 %v18701_v6, %v15882_v1  ;;  %v17394_v59 = vld [vmem:[#allocation11 + $0x1ce8] sm:$0xf]  ;;  %v19079_v54 = vld [vmem:[#allocation11 + $0x1d2c] sm:$0xf0] }
 0x539   :  { %11304 = vmatpush.bf16.msrb.mxu0 %v15235_v51  ;;  %v17316_v51 = vld [vmem:[#allocation11 + $0x1c98] sm:$0xf0]  ;;  %v11823_v52 = vpack.c.bf16 %v11801_v57, %v11800_v17  ;;  %v17466_v17 = vld [vmem:[#allocation11 + $0x1d78] sm:$0xf]  ;;  %v19097_v57 = vld [vmem:[#allocation11 + $0x1dbc] sm:$0xf0]  ;;  %v17395_v15 = vor.u32 %v19079_v54, %v17394_v59 }
 0x53a   :  { %11263 = vmatpush.bf16.msra.mxu1 %v17463_v21  ;;  %11166 = vmatpush.bf16.msra.mxu2 %v17387_v53  ;;  %v15954_v21 = vld [vmem:[#allocation11 + $0x11a8] sm:$0xf]  ;;  %v18691_v53 = vld [vmem:[#allocation11 + $0x1114] sm:$0xf]  ;;  %v15732_v42 = vld [vmem:[#allocation11 + $0x1038] sm:$0xf0]  ;;  %v17467_v16 = vor.u32 %v19097_v57, %v17466_v17 }
 0x53b   :  { %11841 = vst [vmem:[#allocation14 + $0x68] sm:$0xff] %v11823_v52  ;;  %v15955_v47 = vor.u32 %v18719_v10, %v15954_v21  ;;  %v15879_v55 = vor.u32 %v18691_v53, %v15876_v18  ;;  %v16818_v52 = vld [vmem:[#allocation11 + $0x1868] sm:$0xf]  ;;  %v18665_v19 = vld [vmem:[#allocation11 + $0x103c] sm:$0xf0] }
 0x53c   :  { %11291 = vmatpush.bf16.msra.mxu3 %v14587_v31  ;;  %v17319_v31 = vor.u32 %v19051_v39, %v17316_v51  ;;  %v16890_v39 = vld [vmem:[#allocation11 + $0x18f8] sm:$0xf]  ;;  %v18953_v51 = vld [vmem:[#allocation11 + $0x193c] sm:$0xf0]  ;;  %v15660_v45 = vld [vmem:[#allocation11 + $0xfa8] sm:$0xf0] }
 0x53d   :  { %11305 = vmatpush.bf16.msrb.mxu0 %v15163_v38  ;;  %v17244_v38 = vld [vmem:[#allocation11 + $0x1c08] sm:$0xf0]  ;;  %v17322_v40 = vld [vmem:[#allocation11 + $0x1c58] sm:$0xf]  ;;  %v18647_v34 = vld [vmem:[#allocation11 + $0xfac] sm:$0xf0] }
 0x53e   :  { %11264 = vmatpush.bf16.msra.mxu1 %v17391_v56  ;;  %11167 = vmatpush.bf16.msra.mxu2 %v17315_v35  ;;  %v17247_v29 = vor.u32 %v19033_v32, %v17244_v38  ;;  %v15811_v32 = vor.u32 %v18683_v12, %v15810_v8  ;;  %v15738_v38 = vld [vmem:[#allocation11 + $0xff8] sm:$0xf]  ;;  %v16674_v37 = vld [vmem:[#allocation11 + $0x1748] sm:$0xf]  ;;  %v19025_v1 = vld [vmem:[#allocation11 + $0x1b7c] sm:$0xf0]  ;;  %v20186_v8 = vpop.f32.mrf.mxu3  ;;  %v20188_v12 = vpop.f32.mrf.mxu2 }
 0x53f   :  { %v15739_v50 = vor.u32 %v18665_v19, %v15738_v38  ;;  %v17250_v10 = vld [vmem:[#allocation11 + $0x1bc8] sm:$0xf]  ;;  %v15594_v18 = vld [vmem:[#allocation11 + $0xed8] sm:$0xf]  ;;  %v18583_v57 = vld [vmem:[#allocation11 + $0xdb4] sm:$0xf] }
 0x540   :  { %11292 = vmatpush.bf16.msra.mxu3 %v14515_v25  ;;  %v19015_v25 = vld [vmem:[#allocation11 + $0x1b34] sm:$0xf]  ;;  %v18548_v59 = vld [vmem:[#allocation11 + $0xc9c] sm:$0xf]  ;;  %v15308_v54 = vld [vmem:[#allocation11 + $0xce0] sm:$0xf0] }
 0x541   :  { %11306 = vmatpush.bf16.msrb.mxu0 %v15091_v63  ;;  %v17172_v63 = vld [vmem:[#allocation11 + $0x1b78] sm:$0xf0]  ;;  %v18593_v38 = vld [vmem:[#allocation11 + $0xdfc] sm:$0xf0] }
 0x542   :  { %11265 = vmatpush.bf16.msra.mxu1 %v17319_v31  ;;  %11168 = vmatpush.bf16.msra.mxu2 %v17243_v11  ;;  %v17175_v46 = vor.u32 %v19015_v25, %v17172_v63  ;;  %v18935_v31 = vld [vmem:[#allocation11 + $0x18ac] sm:$0xf0]  ;;  %v15735_v11 = vor.u32 %v18655_v23, %v15732_v42  ;;  %v15666_v25 = vld [vmem:[#allocation11 + $0xf68] sm:$0xf]  ;;  %v15588_v63 = vld [vmem:[#allocation11 + $0xf18] sm:$0xf0] }
 0x543   :  { %v16819_v22 = vor.u32 %v18935_v31, %v16818_v52  ;;  %v15667_v21 = vor.u32 %v18647_v34, %v15666_v25  ;;  %v14226_v42 = vld [vmem:[#allocation11 + $0x428] sm:$0xf]  ;;  %v18692_v19 = vld [vmem:[#allocation11 + $0x111c] sm:$0xf]  ;;  %v15236_v25 = vld [vmem:[#allocation11 + $0xc50] sm:$0xf0] }
 0x544   :  { %11293 = vmatpush.bf16.msra.mxu3 %v14443_v27  ;;  %v16962_v27 = vld [vmem:[#allocation11 + $0x1988] sm:$0xf] }
 0x545   :  { %11307 = vmatpush.bf16.msrb.mxu0 %v15019_v60  ;;  %v19115_v60 = vld [vmem:[#allocation11 + $0x1e4c] sm:$0xf0]  ;;  %v16963_v56 = vor.u32 %v18971_v4, %v16962_v27  ;;  %v18601_v27 = vld [vmem:[#allocation11 + $0xe44] sm:$0xf]  ;;  %v15516_v4 = vld [vmem:[#allocation11 + $0xe88] sm:$0xf0] }
 0x546   :  { %11266 = vmatpush.bf16.msra.mxu1 %v17247_v29  ;;  %11169 = vmatpush.bf16.msra.mxu2 %v17171_v0  ;;  %v17539_v35 = vor.u32 %v19115_v60, %v17538_v20  ;;  %v19061_v29 = vld [vmem:[#allocation11 + $0x1c9c] sm:$0xf0]  ;;  %v18619_v0 = vld [vmem:[#allocation11 + $0xed4] sm:$0xf] }
 0x547   :  { %v17323_v36 = vor.u32 %v19061_v29, %v17322_v40  ;;  %v15591_v53 = vor.u32 %v18619_v0, %v15588_v63  ;;  %v18881_v60 = vld [vmem:[#allocation11 + $0x16fc] sm:$0xf0]  ;;  %v15812_v0 = vld [vmem:[#allocation11 + $0x10d0] sm:$0xf0] }
 0x548   :  { %11294 = vmatpush.bf16.msra.mxu3 %v14371_v61  ;;  %v15807_v61 = vor.u32 %v18673_v2, %v15804_v62  ;;  %v18566_v2 = vld [vmem:[#allocation11 + $0xd2c] sm:$0xf]  ;;  %v15380_v62 = vld [vmem:[#allocation11 + $0xd70] sm:$0xf0] }
 0x549   :  { %11308 = vmatpush.bf16.msrb.mxu0 %v14947_v43  ;;  %11170 = vmatmul.bf16.vlgmr.msra.gmra.mxu2 %v19810_v9  ;;  %v16891_v43 = vor.u32 %v18953_v51, %v16890_v39  ;;  %v18611_v39 = vld [vmem:[#allocation11 + $0xe8c] sm:$0xf0]  ;;  %v18710_v51 = vld [vmem:[#allocation11 + $0x11ac] sm:$0xf]  ;;  %v15383_v23 = vor.u32 %v18566_v2, %v15380_v62  ;;  %v18233_v2 = vld [vmem:[#allocation11 + $0x2bc] sm:$0xf0] }
 0x54a   :  { %11218 = vmatpush.bf16.msrb.mxu2 %v15951_v58  ;;  %11267 = vmatpush.bf16.msra.mxu1 %v17175_v46  ;;  %v18899_v58 = vld [vmem:[#allocation11 + $0x178c] sm:$0xf0]  ;;  %v18629_v46 = vld [vmem:[#allocation11 + $0xf1c] sm:$0xf0] }
 0x54b   :  { %v15595_v6 = vor.u32 %v18629_v46, %v15594_v18  ;;  %v18512_v18 = vld [vmem:[#allocation11 + $0xb7c] sm:$0xf]  ;;  %v15164_v46 = vld [vmem:[#allocation11 + $0xbc0] sm:$0xf0] }
 0x54c   :  { %11295 = vmatpush.bf16.msra.mxu3 %v14299_v3  ;;  %v18637_v3 = vld [vmem:[#allocation11 + $0xf64] sm:$0xf] }
 0x54d   :  { %11309 = vmatpush.bf16.msrb.mxu0 %v14875_v48  ;;  %11268 = vmatmul.bf16.vlgmr.msra.gmra.mxu1 %v19810_v9  ;;  %v16746_v48 = vld [vmem:[#allocation11 + $0x17d8] sm:$0xf] }
 0x54e   :  { %11316 = vmatpush.bf16.msrb.mxu1 %v15955_v47  ;;  %11219 = vmatpush.bf16.msrb.mxu2 %v15879_v55  ;;  %v16602_v47 = vld [vmem:[#allocation11 + $0x16b8] sm:$0xf] }
 0x54f   :  { %11296 = vmatmul.bf16.vlgmr.msra.gmra.mxu3 %v19770_v44  ;;  %v17178_v55 = vld [vmem:[#allocation11 + $0x1b38] sm:$0xf]  ;;  %v16603_v17 = vor.u32 %v18881_v60, %v16602_v47  ;;  %v18656_v47 = vld [vmem:[#allocation11 + $0xffc] sm:$0xf] }
 0x550   :  { %11344 = vmatpush.bf16.msrb.mxu3 %v17107_v49  ;;  %11310 = vmatmul.bf16.vlgmr.msrb.gmra.mxu0 %v19768_v5  ;;  %v18917_v49 = vld [vmem:[#allocation11 + $0x181c] sm:$0xf0] }
 0x551   :  { %11358 = vmatpush.bf16.msra.mxu0 %v17683_v30  ;;  %v15663_v30 = vor.u32 %v18637_v3, %v15660_v45  ;;  %v16747_v13 = vor.u32 %v18917_v49, %v16746_v48  ;;  %v18278_v45 = vld [vmem:[#allocation11 + $0x42c] sm:$0xf]  ;;  %v15311_v48 = vor.u32 %v18548_v59, %v15308_v54  ;;  %v14154_v49 = vld [vmem:[#allocation11 + $0x398] sm:$0xf]  ;;  %v15020_v59 = vld [vmem:[#allocation11 + $0xaa0] sm:$0xf0] }
 0x552   :  { %11317 = vmatpush.bf16.msrb.mxu1 %v15883_v33  ;;  %11220 = vmatpush.bf16.msrb.mxu2 %v15807_v61  ;;  %v15956_v33 = vld [vmem:[#allocation11 + $0x11f0] sm:$0xf0]  ;;  %v15444_v61 = vld [vmem:[#allocation11 + $0xdf8] sm:$0xf0] }
 0x553   :  { %v15959_v31 = vor.u32 %v18710_v51, %v15956_v33  ;;  %v20200_v51 = vpop.f32.mrf.mxu1 }
 0x554   :  { %11345 = vmatpush.bf16.msrb.mxu3 %v17035_v14  ;;  %v19043_v14 = vld [vmem:[#allocation11 + $0x1c0c] sm:$0xf0] }
 0x555   :  { %11359 = vmatpush.bf16.msra.mxu0 %v17611_v28  ;;  %v16675_v28 = vor.u32 %v18899_v58, %v16674_v37  ;;  %v17251_v20 = vor.u32 %v19043_v14, %v17250_v10  ;;  %v14156_v37 = vld [vmem:[#allocation11 + $0x3e0] sm:$0xf0]  ;;  %v18251_v10 = vld [vmem:[#allocation11 + $0x34c] sm:$0xf0]  ;;  %v20192_v14 = vpop.f32.mrf.mxu0 }
 0x556   :  { %11318 = vmatpush.bf16.msrb.mxu1 %v15811_v32  ;;  %11221 = vmatpush.bf16.msrb.mxu2 %v15735_v11  ;;  %v15450_v32 = vld [vmem:[#allocation11 + $0xdb8] sm:$0xf]  ;;  %v15447_v11 = vor.u32 %v18583_v57, %v15444_v61  ;;  %v15668_v57 = vld [vmem:[#allocation11 + $0xfb0] sm:$0xf0] }
 0x557   :  { %v15451_v40 = vor.u32 %v18593_v38, %v15450_v32  ;;  %v18476_v32 = vld [vmem:[#allocation11 + $0xa5c] sm:$0xf] }
 0x558   :  { %11346 = vmatpush.bf16.msrb.mxu3 %v16963_v56  ;;  %v15522_v56 = vld [vmem:[#allocation11 + $0xe48] sm:$0xf] }
 0x559   :  { %11360 = vmatpush.bf16.msra.mxu0 %v17539_v35  ;;  %v15519_v35 = vor.u32 %v18601_v27, %v15516_v4  ;;  %v15523_v52 = vor.u32 %v18611_v39, %v15522_v56  ;;  %v20196_v27 = vpop.f32.mrf.mxu2  ;;  %v14010_v56 = vld [vmem:[#allocation11 + $0x278] sm:$0xf]  ;;  %v15092_v39 = vld [vmem:[#allocation11 + $0xb30] sm:$0xf0] }
 0x55a   :  { %11319 = vmatpush.bf16.msrb.mxu1 %v15739_v50  ;;  %11222 = vmatpush.bf16.msrb.mxu2 %v15663_v30  ;;  %v18269_v50 = vld [vmem:[#allocation11 + $0x3dc] sm:$0xf0]  ;;  %v18530_v30 = vld [vmem:[#allocation11 + $0xc0c] sm:$0xf]  ;;  %v14011_v61 = vor.u32 %v18233_v2, %v14010_v56 }
 0x55b   :  { %v14155_v63 = vor.u32 %v18269_v50, %v14154_v49  ;;  %v15239_v58 = vor.u32 %v18530_v30, %v15236_v25  ;;  %v15023_v49 = vor.u32 %v18476_v32, %v15020_v59  ;;  %v13866_v50 = vld [vmem:[#allocation11 + $0x158] sm:$0xf]  ;;  %v18458_v30 = vld [vmem:[#allocation11 + $0x9cc] sm:$0xf]  ;;  %v14948_v25 = vld [vmem:[#allocation11 + $0xa10] sm:$0xf0] }
 0x55c   :  { %11347 = vmatpush.bf16.msrb.mxu3 %v16891_v43  ;;  %v17179_v43 = vor.u32 %v19025_v1, %v17178_v55  ;;  %v18242_v55 = vld [vmem:[#allocation11 + $0x30c] sm:$0xf]  ;;  %v14084_v1 = vld [vmem:[#allocation11 + $0x350] sm:$0xf0]  ;;  %v18863_v32 = vld [vmem:[#allocation11 + $0x166c] sm:$0xf0] }
 0x55d   :  { %11361 = vmatpush.bf16.msra.mxu0 %v17467_v16  ;;  %v18287_v16 = vld [vmem:[#allocation11 + $0x46c] sm:$0xf0]  ;;  %v14087_v33 = vor.u32 %v18242_v55, %v14084_v1  ;;  %v15452_v55 = vld [vmem:[#allocation11 + $0xe00] sm:$0xf0]  ;;  %v18170_v56 = vld [vmem:[#allocation11 + $0xcc] sm:$0xf] }
 0x55e   :  { %11320 = vmatpush.bf16.msrb.mxu1 %v15667_v21  ;;  %11223 = vmatpush.bf16.msrb.mxu2 %v15591_v53  ;;  %v14227_v3 = vor.u32 %v18287_v16, %v14226_v42  ;;  %v14082_v21 = vld [vmem:[#allocation11 + $0x308] sm:$0xf]  ;;  %v19142_v2 = vld [vmem:[#allocation11 + $0x1f2c] sm:$0xf] }
 0x55f   :  { %v14083_v60 = vor.u32 %v18251_v10, %v14082_v21  ;;  %v13938_v16 = vld [vmem:[#allocation11 + $0x1e8] sm:$0xf]  ;;  %v13868_v21 = vld [vmem:[#allocation11 + $0x1a0] sm:$0xf0]  ;;  %v20211_v10 = vpop.f32.mrf.mxu1 }
 0x560   :  { %11348 = vmatpush.bf16.msrb.mxu3 %v16819_v22  ;;  %v15884_v22 = vld [vmem:[#allocation11 + $0x1160] sm:$0xf0] }
 0x561   :  { %11362 = vmatpush.bf16.msra.mxu0 %v17395_v15  ;;  %v14228_v15 = vld [vmem:[#allocation11 + $0x470] sm:$0xf0]  ;;  %v15887_v29 = vor.u32 %v18692_v19, %v15884_v22  ;;  %v18620_v19 = vld [vmem:[#allocation11 + $0xedc] sm:$0xf]  ;;  %v15596_v22 = vld [vmem:[#allocation11 + $0xf20] sm:$0xf0] }
 0x562   :  { %11321 = vmatpush.bf16.msrb.mxu1 %v15595_v6  ;;  %11224 = vmatpush.bf16.msrb.mxu2 %v15519_v35  ;;  %v14231_v34 = vor.u32 %v18278_v45, %v14228_v15  ;;  %v15167_v6 = vor.u32 %v18512_v18, %v15164_v46  ;;  %v18494_v35 = vld [vmem:[#allocation11 + $0xaec] sm:$0xf]  ;;  %v13794_v18 = vld [vmem:[#allocation11 + $0xc8] sm:$0xf]  ;;  %v18179_v46 = vld [vmem:[#allocation11 + $0x10c] sm:$0xf0] }
 0x563   :  { %v15095_v42 = vor.u32 %v18494_v35, %v15092_v39  ;;  %v18206_v15 = vld [vmem:[#allocation11 + $0x1ec] sm:$0xf]  ;;  %v13795_v39 = vor.u32 %v18179_v46, %v13794_v18  ;;  %v17540_v18 = vld [vmem:[#allocation11 + $0x1e50] sm:$0xf0] }
 0x564   :  { %11349 = vmatpush.bf16.msrb.mxu3 %v16747_v13  ;;  %v18674_v13 = vld [vmem:[#allocation11 + $0x108c] sm:$0xf] }
 0x565   :  { %11363 = vmatpush.bf16.msra.mxu0 %v17323_v36  ;;  %v18260_v36 = vld [vmem:[#allocation11 + $0x39c] sm:$0xf]  ;;  %v15815_v53 = vor.u32 %v18674_v13, %v15812_v0 }
 0x566   :  { %11322 = vmatpush.bf16.msrb.mxu1 %v15523_v52  ;;  %11225 = vmatpush.bf16.msrb.mxu2 %v15447_v11  ;;  %v14159_v4 = vor.u32 %v18260_v36, %v14156_v37  ;;  %v18215_v52 = vld [vmem:[#allocation11 + $0x22c] sm:$0xf0]  ;;  %v20204_v11 = vpop.f32.mrf.mxu2  ;;  %v15524_v36 = vld [vmem:[#allocation11 + $0xe90] sm:$0xf0] }
 0x567   :  { %v13939_v45 = vor.u32 %v18215_v52, %v13938_v16 }
 0x568   :  { %11350 = vmatpush.bf16.msrb.mxu3 %v16675_v28  ;;  %v20194_v28 = vpop.f32.mrf.mxu3 }
 0x569   :  { %11364 = vmatpush.bf16.msra.mxu0 %v17251_v20  ;;  %11226 = vmatmul.bf16.vlgmr.msrb.gmra.mxu2 %v19787_v41  ;;  %v15740_v20 = vld [vmem:[#allocation11 + $0x1040] sm:$0xf0] }
 0x56a   :  { %11274 = vmatpush.bf16.msra.mxu2 %v14227_v3  ;;  %11323 = vmatpush.bf16.msrb.mxu1 %v15451_v40  ;;  %v15743_v62 = vor.u32 %v18656_v47, %v15740_v20  ;;  %v20206_v3 = vpop.f32.mrf.mxu0  ;;  %v18197_v40 = vld [vmem:[#allocation11 + $0x19c] sm:$0xf0]  ;;  %v14876_v20 = vld [vmem:[#allocation11 + $0x980] sm:$0xf0] }
 0x56b   :  { %v13867_v37 = vor.u32 %v18197_v40, %v13866_v50  ;;  %v14162_v50 = vld [vmem:[#allocation11 + $0x3a0] sm:$0xf]  ;;  %v18270_v40 = vld [vmem:[#allocation11 + $0x3e4] sm:$0xf0] }
 0x56c   :  { %11351 = vmatpush.bf16.msrb.mxu3 %v16603_v17  ;;  %v18638_v17 = vld [vmem:[#allocation11 + $0xf6c] sm:$0xf] }
 0x56d   :  { %11365 = vmatpush.bf16.msra.mxu0 %v17179_v43  ;;  %11324 = vmatmul.bf16.vlgmr.msrb.gmra.mxu1 %v19787_v41  ;;  %v18224_v43 = vld [vmem:[#allocation11 + $0x27c] sm:$0xf] }
 0x56e   :  { %11372 = vmatpush.bf16.msra.mxu1 %v14231_v34  ;;  %11275 = vmatpush.bf16.msra.mxu2 %v14155_v63  ;;  %v20208_v34 = vld [vmem:[#allocation13 + $0x8] sm:$0xff] }
 0x56f   :  { %11352 = vmatmul.bf16.vlgmr.msrb.gmra.mxu3 %v19797_v24  ;;  %v4836_v13 = vperm.slane %v20208_v34, 2  ;;  %v18602_v63 = vld [vmem:[#allocation11 + $0xe4c] sm:$0xf]  ;;  %v4837_v46 = vperm.slane %v20208_v34, 3 }
 0x570   :  { %11400 = vmatpush.bf16.msra.mxu3 %v15383_v23  ;;  %11366 = vmatmul.bf16.vlgmr.msra.gmra.mxu0 %v19810_v9  ;;  %v14012_v23 = vld [vmem:[#allocation11 + $0x2c0] sm:$0xf0]  ;;  %v20202_v54 = vpop.f32.mrf.mxu3  ;;  %v15527_v47 = vor.u32 %v18602_v63, %v15524_v36  ;;  %v18845_v36 = vld [vmem:[#allocation11 + $0x15dc] sm:$0xf0] }
 0x571   :  { %11414 = vmatpush.bf16.msrb.mxu0 %v15959_v31  ;;  %v15671_v31 = vor.u32 %v18638_v17, %v15668_v57  ;;  %v14015_v38 = vor.u32 %v18224_v43, %v14012_v23  ;;  %v10892_v1 = vadd.f32 %v20188_v12, %v4836_v13  ;;  %v14234_v17 = vld [vmem:[#allocation11 + $0x430] sm:$0xf]  ;;  %v18288_v57 = vld [vmem:[#allocation11 + $0x474] sm:$0xf0]  ;;  %v20220_v43 = vpop.f32.mrf.mxu2  ;;  %v18161_v12 = vld [vmem:[#allocation11 + $0x7c] sm:$0xf0] }
 0x572   :  { %11373 = vmatpush.bf16.msra.mxu1 %v14159_v4  ;;  %11276 = vmatpush.bf16.msra.mxu2 %v14083_v60  ;;  %v18440_v4 = vld [vmem:[#allocation11 + $0x93c] sm:$0xf]  ;;  %v20216_v35 = vpop.f32.mrf.mxu0 }
 0x573   :  { %v18584_v60 = vld [vmem:[#allocation11 + $0xdbc] sm:$0xf]  ;;  %v14879_v23 = vor.u32 %v18440_v4, %v14876_v20  ;;  %v10906_v59 = vadd.f32 %v20186_v8, %v10892_v1  ;;  %v16458_v8 = vld [vmem:[#allocation11 + $0x1598] sm:$0xf]  ;;  %v10894_v4 = vadd.f32 %v20196_v27, %v4836_v13  ;;  %v14090_v20 = vld [vmem:[#allocation11 + $0x310] sm:$0xf] }
 0x574   :  { %11401 = vmatpush.bf16.msra.mxu3 %v15311_v48  ;;  %v13940_v48 = vld [vmem:[#allocation11 + $0x230] sm:$0xf0]  ;;  %v15455_v16 = vor.u32 %v18584_v60, %v15452_v55  ;;  %v18252_v60 = vld [vmem:[#allocation11 + $0x354] sm:$0xf0]  ;;  %v16459_v1 = vor.u32 %v18845_v36, %v16458_v8  ;;  %v18827_v27 = vld [vmem:[#allocation11 + $0x154c] sm:$0xf0] }
 0x575   :  { %11415 = vmatpush.bf16.msrb.mxu0 %v15887_v29  ;;  %v15599_v29 = vor.u32 %v18620_v19, %v15596_v22  ;;  %v13943_v0 = vor.u32 %v18206_v15, %v13940_v48  ;;  %v14235_v19 = vor.u32 %v18288_v57, %v14234_v17  ;;  %v18152_v22 = vld [vmem:[#allocation11 + $0x3c] sm:$0xf]  ;;  %v17612_v15 = vld [vmem:[#allocation11 + $0x1ee0] sm:$0xf0] }
 0x576   :  { %11374 = vmatpush.bf16.msra.mxu1 %v14087_v33  ;;  %11277 = vmatpush.bf16.msra.mxu2 %v14011_v61  ;;  %v13796_v33 = vld [vmem:[#allocation11 + $0x110] sm:$0xf0]  ;;  %v19088_v17 = vld [vmem:[#allocation11 + $0x1d7c] sm:$0xf]  ;;  %v17468_v57 = vld [vmem:[#allocation11 + $0x1dc0] sm:$0xf0] }
 0x578   :  { %11402 = vmatpush.bf16.msra.mxu3 %v15239_v58  ;;  %v18188_v58 = vld [vmem:[#allocation11 + $0x15c] sm:$0xf]  ;;  %v20218_v61 = vpop.f32.mrf.mxu3 }
 0x579   :  { %11416 = vmatpush.bf16.msrb.mxu0 %v15815_v53  ;;  %v14951_v53 = vor.u32 %v18458_v30, %v14948_v25  ;;  %v18854_v25 = vld [vmem:[#allocation11 + $0x162c] sm:$0xf] }
 0x57a   :  { %11375 = vmatpush.bf16.msra.mxu1 %v14015_v38  ;;  %11278 = vmatpush.bf16.msra.mxu2 %v13939_v45  ;;  %v13799_v38 = vor.u32 %v18170_v56, %v13796_v33  ;;  %v19124_v45 = vld [vmem:[#allocation11 + $0x1e9c] sm:$0xf]  ;;  %v16460_v56 = vld [vmem:[#allocation11 + $0x15e0] sm:$0xf0]  ;;  %v14091_v33 = vor.u32 %v18252_v60, %v14090_v20 }
 0x57b   :  { %v17615_v63 = vor.u32 %v19124_v45, %v17612_v15  ;;  %v18809_v45 = vld [vmem:[#allocation11 + $0x14bc] sm:$0xf0] }
 0x57c   :  { %11403 = vmatpush.bf16.msra.mxu3 %v15167_v6  ;;  %v13871_v6 = vor.u32 %v18188_v58, %v13868_v21  ;;  %v14163_v21 = vor.u32 %v18270_v40, %v14162_v50  ;;  %v13946_v40 = vld [vmem:[#allocation11 + $0x1f0] sm:$0xf] }
 0x57d   :  { %11417 = vmatpush.bf16.msrb.mxu0 %v15743_v62  ;;  %v17684_v62 = vld [vmem:[#allocation11 + $0x1f70] sm:$0xf0] }
 0x57e   :  { %11376 = vmatpush.bf16.msra.mxu1 %v13943_v0  ;;  %11279 = vmatpush.bf16.msra.mxu2 %v13867_v37  ;;  %v17687_v52 = vor.u32 %v19142_v2, %v17684_v62  ;;  %v16532_v0 = vld [vmem:[#allocation11 + $0x1670] sm:$0xf0]  ;;  %v10920_v37 = vadd.f32 %v20192_v14, %v10906_v59  ;;  %v11003_v14 = vpop.f32.mrf.mxu2  ;;  %v20230_v2 = vpop.f32.mrf.mxu0 }
 0x57f   :  { %v16388_v59 = vld [vmem:[#allocation11 + $0x1550] sm:$0xf0] }
 0x580   :  { %11404 = vmatpush.bf16.msra.mxu3 %v15095_v42  ;;  %v13722_v42 = vld [vmem:[#allocation11 + $0x38] sm:$0xf]  ;;  %v11017_v55 = vpop.f32.mrf.mxu3  ;;  %v10934_v13 = vadd.f32 %v20200_v51, %v10920_v37 }
 0x581   :  { %11418 = vmatpush.bf16.msrb.mxu0 %v15671_v31  ;;  %v16530_v31 = vld [vmem:[#allocation11 + $0x1628] sm:$0xf]  ;;  %v13723_v48 = vor.u32 %v18161_v12, %v13722_v42  ;;  %v10908_v42 = vadd.f32 %v20194_v28, %v10894_v4  ;;  %v19052_v4 = vld [vmem:[#allocation11 + $0x1c5c] sm:$0xf] }
 0x582   :  { %11377 = vmatpush.bf16.msra.mxu1 %v13871_v6  ;;  %11280 = vmatpush.bf16.msra.mxu2 %v13795_v39  ;;  %v16531_v30 = vor.u32 %v18863_v32, %v16530_v31  ;;  %v18836_v6 = vld [vmem:[#allocation11 + $0x159c] sm:$0xf]  ;;  %v16386_v39 = vld [vmem:[#allocation11 + $0x1508] sm:$0xf]  ;;  %v10948_v31 = vadd.f32 %v20204_v11, %v10934_v13  ;;  %v18818_v32 = vld [vmem:[#allocation11 + $0x150c] sm:$0xf] }
 0x583   :  { %v16463_v12 = vor.u32 %v18836_v6, %v16460_v56  ;;  %v16387_v51 = vor.u32 %v18827_v27, %v16386_v39  ;;  %v10922_v50 = vadd.f32 %v20206_v3, %v10908_v42  ;;  %v16391_v11 = vor.u32 %v18818_v32, %v16388_v59  ;;  %v18782_v56 = vld [vmem:[#allocation11 + $0x13ec] sm:$0xf]  ;;  %v17252_v42 = vld [vmem:[#allocation11 + $0x1c10] sm:$0xf0] }
 0x584   :  { %11405 = vmatpush.bf16.msra.mxu3 %v15023_v49  ;;  %v13724_v49 = vld [vmem:[#allocation11 + $0x80] sm:$0xf0] }
 0x585   :  { %11419 = vmatpush.bf16.msrb.mxu0 %v15599_v29  ;;  %v10989_v29 = vpop.f32.mrf.mxu1  ;;  %v13727_v58 = vor.u32 %v18152_v22, %v13724_v49  ;;  %v16314_v22 = vld [vmem:[#allocation11 + $0x1478] sm:$0xf]  ;;  %v17396_v49 = vld [vmem:[#allocation11 + $0x1d30] sm:$0xf0] }
 0x586   :  { %11378 = vmatpush.bf16.msra.mxu1 %v13799_v38  ;;  %11281 = vmatpush.bf16.msra.mxu2 %v13723_v48  ;;  %v19070_v48 = vld [vmem:[#allocation11 + $0x1cec] sm:$0xf]  ;;  %v11031_v8 = vpop.f32.mrf.mxu0 }
 0x587   :  { %v17399_v37 = vor.u32 %v19070_v48, %v17396_v49 }
 0x588   :  { %11406 = vmatpush.bf16.msra.mxu3 %v14951_v53  ;;  %v19106_v53 = vld [vmem:[#allocation11 + $0x1e0c] sm:$0xf] }
 0x589   :  { %11420 = vmatpush.bf16.msrb.mxu0 %v15527_v47  ;;  %v16535_v47 = vor.u32 %v18854_v25, %v16532_v0  ;;  %v17543_v62 = vor.u32 %v19106_v53, %v17540_v18  ;;  %11282 = vmatmul.bf16.vlgmr.msra.gmra.mxu2 %v19753_v26  ;;  %v16315_v25 = vor.u32 %v18809_v45, %v16314_v22  ;;  %v18800_v0 = vld [vmem:[#allocation11 + $0x147c] sm:$0xf]  ;;  %v11019_v53 = vpop.f32.mrf.mxu3  ;;  %v11005_v18 = vpop.f32.mrf.mxu2  ;;  %v16098_v22 = vld [vmem:[#allocation11 + $0x12c8] sm:$0xf]  ;;  %v18755_v45 = vld [vmem:[#allocation11 + $0x130c] sm:$0xf0] }
 0x58a   :  { %11330 = vmatpush.bf16.msrb.mxu2 %v16531_v30  ;;  %11379 = vmatpush.bf16.msra.mxu1 %v13727_v58  ;;  %v10962_v30 = vadd.f32 %v20202_v54, %v10948_v31  ;;  %v16242_v58 = vld [vmem:[#allocation11 + $0x13e8] sm:$0xf]  ;;  %v10936_v54 = vadd.f32 %v20211_v10, %v10922_v50  ;;  %v17180_v50 = vld [vmem:[#allocation11 + $0x1b80] sm:$0xf0] }
 0x58c   :  { %11407 = vmatpush.bf16.msra.mxu3 %v14879_v23  ;;  %v10990_v23 = vadd.f32 %v10989_v29, %v4837_v46  ;;  %v18216_v29 = vld [vmem:[#allocation11 + $0x234] sm:$0xf0]  ;;  %v10950_v39 = vadd.f32 %v20220_v43, %v10936_v54  ;;  %v16172_v43 = vld [vmem:[#allocation11 + $0x13a0] sm:$0xf0] }
 0x58d   :  { %11421 = vmatpush.bf16.msrb.mxu0 %v15455_v16  ;;  %v14018_v16 = vld [vmem:[#allocation11 + $0x280] sm:$0xf]  ;;  %11380 = vmatmul.bf16.vlgmr.msra.gmra.mxu1 %v19753_v26  ;;  %v10991_v28 = vpop.f32.mrf.mxu1  ;;  %v13947_v3 = vor.u32 %v18216_v29, %v13946_v40  ;;  %v18162_v40 = vld [vmem:[#allocation11 + $0x84] sm:$0xf0] }
 0x58e   :  { %11428 = vmatpush.bf16.msrb.mxu1 %v16535_v47  ;;  %11331 = vmatpush.bf16.msrb.mxu2 %v16459_v1  ;;  %v11004_v38 = vadd.f32 %v11003_v14, %v10990_v23  ;;  %v17324_v47 = vld [vmem:[#allocation11 + $0x1ca0] sm:$0xf0]  ;;  %v10992_v20 = vadd.f32 %v10991_v28, %v4837_v46  ;;  %v13874_v14 = vld [vmem:[#allocation11 + $0x160] sm:$0xf]  ;;  %v18198_v1 = vld [vmem:[#allocation11 + $0x1a4] sm:$0xf0]  ;;  %v10964_v32 = vadd.f32 %v20218_v61, %v10950_v39 }
 0x58f   :  { %11408 = vmatmul.bf16.vlgmr.msra.gmra.mxu3 %v19768_v5  ;;  %v18773_v46 = vld [vmem:[#allocation11 + $0x139c] sm:$0xf0]  ;;  %v13875_v10 = vor.u32 %v18198_v1, %v13874_v14  ;;  %v19034_v23 = vld [vmem:[#allocation11 + $0x1bcc] sm:$0xf]  ;;  %v19016_v28 = vld [vmem:[#allocation11 + $0x1b3c] sm:$0xf] }
 0x590   :  { %11456 = vmatpush.bf16.msrb.mxu3 %v17687_v52  ;;  %11422 = vmatmul.bf16.vlgmr.msrb.gmra.mxu0 %v19787_v41  ;;  %v18234_v52 = vld [vmem:[#allocation11 + $0x2c4] sm:$0xf0]  ;;  %v11018_v36 = vadd.f32 %v11017_v55, %v11004_v38  ;;  %v10976_v55 = vadd.f32 %v20216_v35, %v10962_v30  ;;  %v11006_v27 = vadd.f32 %v11005_v18, %v10992_v20  ;;  %v13802_v35 = vld [vmem:[#allocation11 + $0xd0] sm:$0xf]  ;;  %v18720_v61 = vld [vmem:[#allocation11 + $0x11f4] sm:$0xf0] }
 0x591   :  { %11470 = vmatpush.bf16.msra.mxu0 %v14235_v19  ;;  %v17471_v19 = vor.u32 %v19088_v17, %v17468_v57  ;;  %v14019_v15 = vor.u32 %v18234_v52, %v14018_v16  ;;  %v16170_v17 = vld [vmem:[#allocation11 + $0x1358] sm:$0xf]  ;;  %v11059_v48 = vpop.f32.mrf.mxu2  ;;  %v14804_v14 = vld [vmem:[#allocation11 + $0x8f0] sm:$0xf0]  ;;  %v18728_v1 = vld [vmem:[#allocation11 + $0x123c] sm:$0xf] }
 0x592   :  { %11429 = vmatpush.bf16.msrb.mxu1 %v16463_v12  ;;  %11332 = vmatpush.bf16.msrb.mxu2 %v16387_v51  ;;  %v11032_v13 = vadd.f32 %v11031_v8, %v11018_v36  ;;  %v18180_v16 = vld [vmem:[#allocation11 + $0x114] sm:$0xf0]  ;;  %v11676_v52 = vmul.f32 0.5, %v10976_v55  ;;  %v16171_v31 = vor.u32 %v18773_v46, %v16170_v17  ;;  %v18764_v51 = vld [vmem:[#allocation11 + $0x135c] sm:$0xf]  ;;  %v11020_v59 = vadd.f32 %v11019_v53, %v11006_v27 }
 0x593   :  { %v13803_v49 = vor.u32 %v18180_v16, %v13802_v35  ;;  %v16175_v30 = vor.u32 %v18764_v51, %v16172_v43  ;;  %v16099_v8 = vor.u32 %v18755_v45, %v16098_v22  ;;  %v16100_v36 = vld [vmem:[#allocation11 + $0x1310] sm:$0xf0]  ;;  %v18702_v39 = vld [vmem:[#allocation11 + $0x1164] sm:$0xf0]  ;;  %v16394_v45 = vld [vmem:[#allocation11 + $0x1510] sm:$0xf] }
 0x594   :  { %11457 = vmatpush.bf16.msrb.mxu3 %v17615_v63  ;;  %v16316_v63 = vld [vmem:[#allocation11 + $0x14c0] sm:$0xf0]  ;;  %19207 = vtanh.f32 %v11676_v52  ;;  %v18846_v17 = vld [vmem:[#allocation11 + $0x15e4] sm:$0xf0]  ;;  %v18404_v52 = vld [vmem:[#allocation11 + $0x81c] sm:$0xf] }
 0x595   :  { %11471 = vmatpush.bf16.msra.mxu0 %v14163_v21  ;;  %v18791_v21 = vld [vmem:[#allocation11 + $0x142c] sm:$0xf0]  ;;  %v16319_v60 = vor.u32 %v18800_v0, %v16316_v63  ;;  %v11045_v57 = vpop.f32.mrf.mxu1  ;;  %v11033_v63 = vpop.f32.mrf.mxu0 }
 0x596   :  { %11430 = vmatpush.bf16.msrb.mxu1 %v16391_v11  ;;  %11333 = vmatpush.bf16.msrb.mxu2 %v16315_v25  ;;  %v16243_v6 = vor.u32 %v18791_v21, %v16242_v58  ;;  %v11046_v38 = vadd.f32 %v11045_v57, %v11032_v13  ;;  %v13730_v11 = vld [vmem:[#allocation11 + $0x40] sm:$0xf]  ;;  %v18746_v25 = vld [vmem:[#allocation11 + $0x12cc] sm:$0xf]  ;;  %v15962_v0 = vld [vmem:[#allocation11 + $0x11b0] sm:$0xf]  ;;  %v10978_v21 = vadd.f32 %v20230_v2, %v10964_v32 }
 0x597   :  { %v18864_v58 = vld [vmem:[#allocation11 + $0x1674] sm:$0xf0]  ;;  %v11034_v18 = vadd.f32 %v11033_v63, %v11020_v59  ;;  %v13731_v20 = vor.u32 %v18162_v40, %v13730_v11  ;;  %v15963_v54 = vor.u32 %v18720_v61, %v15962_v0  ;;  %v16028_v13 = vld [vmem:[#allocation11 + $0x1280] sm:$0xf0]  ;;  %v15818_v59 = vld [vmem:[#allocation11 + $0x1090] sm:$0xf] }
 0x598   :  { %11458 = vmatpush.bf16.msrb.mxu3 %v17543_v62  ;;  %v16244_v62 = vld [vmem:[#allocation11 + $0x1430] sm:$0xf0]  ;;  %v11060_v29 = vadd.f32 %v11059_v48, %v11046_v38  ;;  %v11694_v46 = vmul.f32 0.5, %v10978_v21  ;;  %v16031_v43 = vor.u32 %v18728_v1, %v16028_v13  ;;  %v18684_v38 = vld [vmem:[#allocation11 + $0x10d4] sm:$0xf0] }
 0x599   :  { %11472 = vmatpush.bf16.msra.mxu0 %v14091_v33  ;;  %v17327_v33 = vor.u32 %v19052_v4, %v17324_v47  ;;  %v16247_v12 = vor.u32 %v18782_v56, %v16244_v62  ;;  %v16026_v4 = vld [vmem:[#allocation11 + $0x1238] sm:$0xf]  ;;  %v18737_v47 = vld [vmem:[#allocation11 + $0x127c] sm:$0xf0]  ;;  %v11061_v35 = vpop.f32.mrf.mxu2  ;;  %v15819_v40 = vor.u32 %v18684_v38, %v15818_v59  ;;  %v18810_v21 = vld [vmem:[#allocation11 + $0x14c4] sm:$0xf0] }
 0x59a   :  { %11431 = vmatpush.bf16.msrb.mxu1 %v16319_v60  ;;  %11334 = vmatpush.bf16.msrb.mxu2 %v16243_v6  ;;  %v18422_v60 = vld [vmem:[#allocation11 + $0x8ac] sm:$0xf]  ;;  %v16103_v6 = vor.u32 %v18746_v25, %v16100_v36  ;;  %v15890_v62 = vld [vmem:[#allocation11 + $0x1120] sm:$0xf]  ;;  %v16027_v2 = vor.u32 %v18737_v47, %v16026_v4  ;;  %v18360_v59 = vld [vmem:[#allocation11 + $0x6b4] sm:$0xf0] }
 0x59b   :  { %v15891_v16 = vor.u32 %v18702_v39, %v15890_v62  ;;  %v15746_v63 = vld [vmem:[#allocation11 + $0x1000] sm:$0xf]  ;;  %v16250_v39 = vld [vmem:[#allocation11 + $0x13f0] sm:$0xf] }
 0x59c   :  { %11459 = vmatpush.bf16.msrb.mxu3 %v17471_v19  ;;  %v17255_v19 = vor.u32 %v19034_v23, %v17252_v42  ;;  %v14810_v23 = vld [vmem:[#allocation11 + $0x8b0] sm:$0xf]  ;;  %v18432_v42 = vld [vmem:[#allocation11 + $0x8f4] sm:$0xf0]  ;;  %v14594_v13 = vld [vmem:[#allocation11 + $0x700] sm:$0xf] }
 0x59d   :  { %11473 = vmatpush.bf16.msra.mxu0 %v14019_v15  ;;  %v11073_v15 = vpop.f32.mrf.mxu3  ;;  %v11047_v27 = vpop.f32.mrf.mxu1  ;;  %v14811_v22 = vor.u32 %v18432_v42, %v14810_v23 }
 0x59e   :  { %11432 = vmatpush.bf16.msrb.mxu1 %v16247_v12  ;;  %11335 = vmatpush.bf16.msrb.mxu2 %v16171_v31  ;;  %v11074_v53 = vadd.f32 %v11073_v15, %v11060_v29  ;;  %v11048_v57 = vadd.f32 %v11047_v27, %v11034_v18  ;;  %v19208_v12 = vpop.eup %19207  ;;  %v14732_v31 = vld [vmem:[#allocation11 + $0x860] sm:$0xf0]  ;;  %v18386_v29 = vld [vmem:[#allocation11 + $0x78c] sm:$0xf]  ;;  %v14666_v18 = vld [vmem:[#allocation11 + $0x790] sm:$0xf] }
 0x59f   :  { %v14735_v48 = vor.u32 %v18404_v52, %v14732_v31  ;;  %v11748_v11 = vmul.f32 0.5, %v19208_v12  ;;  %v18792_v27 = vld [vmem:[#allocation11 + $0x1434] sm:$0xf0]  ;;  %v15602_v12 = vld [vmem:[#allocation11 + $0xee0] sm:$0xf] }
 0x5a0   :  { %11460 = vmatpush.bf16.msrb.mxu3 %v17399_v37  ;;  %v16538_v37 = vld [vmem:[#allocation11 + $0x1630] sm:$0xf]  ;;  %v11677_v55 = vmul.f32 0.5, %v11074_v53  ;;  %v11062_v51 = vadd.f32 %v11061_v35, %v11048_v57  ;;  %v18350_v57 = vld [vmem:[#allocation11 + $0x66c] sm:$0xf]  ;;  %v16251_v42 = vor.u32 %v18792_v27, %v16250_v39 }
 0x5a1   :  { %11474 = vmatpush.bf16.msra.mxu0 %v13947_v3  ;;  %v17183_v3 = vor.u32 %v19016_v28, %v17180_v50  ;;  %v16539_v56 = vor.u32 %v18864_v58, %v16538_v37  ;;  %v18828_v28 = vld [vmem:[#allocation11 + $0x1554] sm:$0xf0]  ;;  %v18414_v50 = vld [vmem:[#allocation11 + $0x864] sm:$0xf0]  ;;  %v16322_v58 = vld [vmem:[#allocation11 + $0x1480] sm:$0xf] }
 0x5a2   :  { %11433 = vmatpush.bf16.msrb.mxu1 %v16175_v30  ;;  %11336 = vmatpush.bf16.msrb.mxu2 %v16099_v8  ;;  %19209 = vtanh.f32 %v11677_v55  ;;  %v14660_v30 = vld [vmem:[#allocation11 + $0x7d0] sm:$0xf0]  ;;  %v16395_v61 = vor.u32 %v18828_v28, %v16394_v45  ;;  %v18666_v8 = vld [vmem:[#allocation11 + $0x1044] sm:$0xf0]  ;;  %v11784_v4 = vadd.f32 0.5, %v11748_v11  ;;  %v16323_v1 = vor.u32 %v18810_v21, %v16322_v58 }
 0x5a3   :  { %19211 = vtanh.f32 %v11694_v46  ;;  %v14663_v53 = vor.u32 %v18386_v29, %v14660_v30  ;;  %v15674_v55 = vld [vmem:[#allocation11 + $0xf70] sm:$0xf]  ;;  %v18630_v35 = vld [vmem:[#allocation11 + $0xf24] sm:$0xf0]  ;;  %v16178_v31 = vld [vmem:[#allocation11 + $0x1360] sm:$0xf] }
 0x5a4   :  { %11461 = vmatpush.bf16.msrb.mxu3 %v17327_v33  ;;  %v16466_v33 = vld [vmem:[#allocation11 + $0x15a0] sm:$0xf]  ;;  %v18332_v45 = vld [vmem:[#allocation11 + $0x5dc] sm:$0xf]  ;;  %v14444_v28 = vld [vmem:[#allocation11 + $0x620] sm:$0xf0] }
 0x5a5   :  { %11475 = vmatpush.bf16.msra.mxu0 %v13875_v10  ;;  %v14807_v10 = vor.u32 %v18422_v60, %v14804_v14  ;;  %v16467_v32 = vor.u32 %v18846_v17, %v16466_v33  ;;  %v14588_v60 = vld [vmem:[#allocation11 + $0x740] sm:$0xf0]  ;;  %v18378_v33 = vld [vmem:[#allocation11 + $0x744] sm:$0xf0]  ;;  %v18756_v29 = vld [vmem:[#allocation11 + $0x1314] sm:$0xf0]  ;;  %v14447_v30 = vor.u32 %v18332_v45, %v14444_v28 }
 0x5a6   :  { %11434 = vmatpush.bf16.msrb.mxu1 %v16103_v6  ;;  %11337 = vmatpush.bf16.msrb.mxu2 %v16027_v2  ;;  %v18648_v6 = vld [vmem:[#allocation11 + $0xfb4] sm:$0xf0]  ;;  %v14595_v52 = vor.u32 %v18378_v33, %v14594_v13  ;;  %v18594_v58 = vld [vmem:[#allocation11 + $0xe04] sm:$0xf0]  ;;  %v16034_v21 = vld [vmem:[#allocation11 + $0x1240] sm:$0xf] }
 0x5a7   :  { %v15675_v46 = vor.u32 %v18648_v6, %v15674_v55  ;;  %v18296_v55 = vld [vmem:[#allocation11 + $0x4bc] sm:$0xf]  ;;  %v14300_v6 = vld [vmem:[#allocation11 + $0x500] sm:$0xf0]  ;;  %v18998_v39 = vld [vmem:[#allocation11 + $0x1aac] sm:$0xf] }
 0x5a8   :  { %11462 = vmatpush.bf16.msrb.mxu3 %v17255_v19  ;;  %v11075_v19 = vpop.f32.mrf.mxu3  ;;  %v19210_v25 = vpop.eup %19209  ;;  %v17108_v27 = vld [vmem:[#allocation11 + $0x1af0] sm:$0xf0]  ;;  %v14306_v33 = vld [vmem:[#allocation11 + $0x4c0] sm:$0xf] }
 0x5a9   :  { %11476 = vmatpush.bf16.msra.mxu0 %v13803_v49  ;;  %v11076_v15 = vadd.f32 %v11075_v19, %v11062_v51  ;;  %v14738_v49 = vld [vmem:[#allocation11 + $0x820] sm:$0xf]  ;;  %v11749_v36 = vmul.f32 0.5, %v19210_v25  ;;  %11338 = vmatmul.bf16.vlgmr.msrb.gmra.mxu2 %v19790_v7  ;;  %v19212_v14 = vpop.eup %19211  ;;  %v18774_v51 = vld [vmem:[#allocation11 + $0x13a4] sm:$0xf0] }
 0x5aa   :  { %11386 = vmatpush.bf16.msra.mxu2 %v14807_v10  ;;  %11435 = vmatpush.bf16.msrb.mxu1 %v16031_v43  ;;  %v14739_v37 = vor.u32 %v18414_v50, %v14738_v49  ;;  %v11766_v17 = vmul.f32 0.5, %v19212_v14  ;;  %v14516_v10 = vld [vmem:[#allocation11 + $0x6b0] sm:$0xf0]  ;;  %v18612_v49 = vld [vmem:[#allocation11 + $0xe94] sm:$0xf0] }
 0x5ab   :  { %v11695_v0 = vmul.f32 0.5, %v11076_v15  ;;  %v11785_v47 = vadd.f32 0.5, %v11749_v36  ;;  %v14519_v43 = vor.u32 %v18350_v57, %v14516_v10  ;;  %v16179_v15 = vor.u32 %v18774_v51, %v16178_v31  ;;  %v14450_v25 = vld [vmem:[#allocation11 + $0x5e0] sm:$0xf]  ;;  %v14812_v14 = vld [vmem:[#allocation11 + $0x8f8] sm:$0xf0]  ;;  %v20252_v57 = vpop.f32.mrf.mxu0  ;;  %v20254_v31 = vpop.f32.mrf.mxu1 }
 0x5ac   :  { %11463 = vmatpush.bf16.msrb.mxu3 %v17183_v3  ;;  %v18396_v3 = vld [vmem:[#allocation11 + $0x7d4] sm:$0xf0]  ;;  %v11802_v38 = vadd.f32 0.5, %v11766_v17  ;;  %v15458_v36 = vld [vmem:[#allocation11 + $0xdc0] sm:$0xf]  ;;  %v14303_v10 = vor.u32 %v18296_v55, %v14300_v6 }
 0x5ad   :  { %11477 = vmatpush.bf16.msra.mxu0 %v13731_v20  ;;  %19213 = vtanh.f32 %v11695_v0  ;;  %11436 = vmatmul.bf16.vlgmr.msrb.gmra.mxu1 %v19790_v7  ;;  %v15747_v20 = vor.u32 %v18666_v8, %v15746_v63  ;;  %v14667_v62 = vor.u32 %v18396_v3, %v14666_v18  ;;  %v18342_v0 = vld [vmem:[#allocation11 + $0x624] sm:$0xf0]  ;;  %v14372_v8 = vld [vmem:[#allocation11 + $0x590] sm:$0xf0]  ;;  %v14378_v3 = vld [vmem:[#allocation11 + $0x550] sm:$0xf] }
 0x5ae   :  { %11484 = vmatpush.bf16.msra.mxu1 %v14811_v22  ;;  %11387 = vmatpush.bf16.msra.mxu2 %v14735_v48  ;;  %v15603_v22 = vor.u32 %v18630_v35, %v15602_v12  ;;  %v15530_v48 = vld [vmem:[#allocation11 + $0xe50] sm:$0xf]  ;;  %v14451_v18 = vor.u32 %v18342_v0, %v14450_v25  ;;  %v18261_v17 = vld [vmem:[#allocation11 + $0x3a4] sm:$0xf]  ;;  %v14740_v12 = vld [vmem:[#allocation11 + $0x868] sm:$0xf0]  ;;  %v17111_v35 = vor.u32 %v18998_v39, %v17108_v27 }
 0x5af   :  { %11464 = vmatmul.bf16.vlgmr.msrb.gmra.mxu3 %v19810_v9  ;;  %v15531_v63 = vor.u32 %v18612_v49, %v15530_v48  ;;  %v18387_v28 = vld [vmem:[#allocation11 + $0x794] sm:$0xf]  ;;  %v17042_v49 = vld [vmem:[#allocation11 + $0x1a20] sm:$0xf]  ;;  %v18225_v25 = vld [vmem:[#allocation11 + $0x284] sm:$0xf] }
 0x5b0   :  { %11512 = vmatpush.bf16.msra.mxu3 %v15963_v54  ;;  %11478 = vmatmul.bf16.vlgmr.msra.gmra.mxu0 %v19753_v26  ;;  %v18368_v54 = vld [vmem:[#allocation11 + $0x6fc] sm:$0xf]  ;;  %v14020_v0 = vld [vmem:[#allocation11 + $0x2c8] sm:$0xf0]  ;;  %v16898_v6 = vld [vmem:[#allocation11 + $0x1900] sm:$0xf] }
 0x5b1   :  { %11526 = vmatpush.bf16.msrb.mxu0 %v16539_v56  ;;  %v11815_v56 = vpack.c.bf16 %v11785_v47, %v11784_v4  ;;  %v14591_v2 = vor.u32 %v18368_v54, %v14588_v60  ;;  %v18279_v4 = vld [vmem:[#allocation11 + $0x434] sm:$0xf]  ;;  %v14236_v47 = vld [vmem:[#allocation11 + $0x478] sm:$0xf0]  ;;  %v18324_v54 = vld [vmem:[#allocation11 + $0x594] sm:$0xf0] }
 0x5b2   :  { %11485 = vmatpush.bf16.msra.mxu1 %v14739_v37  ;;  %11388 = vmatpush.bf16.msra.mxu2 %v14663_v53  ;;  %v18738_v53 = vld [vmem:[#allocation11 + $0x1284] sm:$0xf0]  ;;  %v18423_v60 = vld [vmem:[#allocation11 + $0x8b4] sm:$0xf]  ;;  %v18926_v39 = vld [vmem:[#allocation11 + $0x186c] sm:$0xf] }
 0x5b3   :  { %11833 = vst [vmem:[#allocation14 + $0x28] sm:$0xff] %v11815_v56  ;;  %v19214_v23 = vpop.eup %19213  ;;  %v16035_v56 = vor.u32 %v18738_v53, %v16034_v21  ;;  %v14815_v13 = vor.u32 %v18423_v60, %v14812_v14  ;;  %v20259_v21 = vpop.f32.mrf.mxu0  ;;  %v14023_v53 = vor.u32 %v18225_v25, %v14020_v0  ;;  %v18351_v14 = vld [vmem:[#allocation11 + $0x674] sm:$0xf]  ;;  %v13732_v0 = vld [vmem:[#allocation11 + $0x88] sm:$0xf0] }
 0x5b4   :  { %11513 = vmatpush.bf16.msra.mxu3 %v15891_v16  ;;  %v11767_v16 = vmul.f32 0.5, %v19214_v23  ;;  %v18306_v23 = vld [vmem:[#allocation11 + $0x504] sm:$0xf0]  ;;  %v16820_v27 = vld [vmem:[#allocation11 + $0x18b0] sm:$0xf0] }
 0x5b5   :  { %11527 = vmatpush.bf16.msrb.mxu0 %v16467_v32  ;;  %v14522_v32 = vld [vmem:[#allocation11 + $0x670] sm:$0xf] }
 0x5b6   :  { %11486 = vmatpush.bf16.msra.mxu1 %v14667_v62  ;;  %11389 = vmatpush.bf16.msra.mxu2 %v14591_v2  ;;  %v11803_v19 = vadd.f32 0.5, %v11767_v16  ;;  %v14523_v11 = vor.u32 %v18360_v59, %v14522_v32  ;;  %v14239_v62 = vor.u32 %v18279_v4, %v14236_v47  ;;  %v14379_v2 = vor.u32 %v18324_v54, %v14378_v3  ;;  %v17114_v16 = vld [vmem:[#allocation11 + $0x1ab0] sm:$0xf]  ;;  %v17036_v32 = vld [vmem:[#allocation11 + $0x1a60] sm:$0xf0]  ;;  %v20262_v54 = vpop.f32.mrf.mxu1 }
 0x5b7   :  { %v14307_v59 = vor.u32 %v18306_v23, %v14306_v33  ;;  %v16892_v3 = vld [vmem:[#allocation11 + $0x1940] sm:$0xf0]  ;;  %v18207_v47 = vld [vmem:[#allocation11 + $0x1f4] sm:$0xf]  ;;  %v13876_v33 = vld [vmem:[#allocation11 + $0x1a8] sm:$0xf0] }
 0x5b8   :  { %11514 = vmatpush.bf16.msra.mxu3 %v15819_v40  ;;  %v11824_v50 = vpack.c.bf16 %v11803_v19, %v11802_v38  ;;  %v16106_v40 = vld [vmem:[#allocation11 + $0x12d0] sm:$0xf]  ;;  %v18243_v19 = vld [vmem:[#allocation11 + $0x314] sm:$0xf]  ;;  %v18333_v23 = vld [vmem:[#allocation11 + $0x5e4] sm:$0xf] }
 0x5b9   :  { %11528 = vmatpush.bf16.msrb.mxu0 %v16395_v61  ;;  %v18314_v61 = vld [vmem:[#allocation11 + $0x54c] sm:$0xf]  ;;  %v16107_v37 = vor.u32 %v18756_v29, %v16106_v40  ;;  %v16964_v29 = vld [vmem:[#allocation11 + $0x19d0] sm:$0xf0] }
 0x5ba   :  { %11487 = vmatpush.bf16.msra.mxu1 %v14595_v52  ;;  %11390 = vmatpush.bf16.msra.mxu2 %v14519_v43  ;;  %11842 = vst [vmem:[#allocation14 + $0x70] sm:$0xff] %v11824_v50  ;;  %v19008_v52 = vld [vmem:[#allocation11 + $0x1af4] sm:$0xf0]  ;;  %v18980_v43 = vld [vmem:[#allocation11 + $0x1a1c] sm:$0xf] }
 0x5bb   :  { %v17115_v45 = vor.u32 %v19008_v52, %v17114_v16  ;;  %v17039_v48 = vor.u32 %v18980_v43, %v17036_v32  ;;  %v18990_v50 = vld [vmem:[#allocation11 + $0x1a64] sm:$0xf0]  ;;  %v18962_v40 = vld [vmem:[#allocation11 + $0x198c] sm:$0xf]  ;;  %v18936_v16 = vld [vmem:[#allocation11 + $0x18b4] sm:$0xf0]  ;;  %v20268_v52 = vpop.f32.mrf.mxu0 }
 0x5bc   :  { %11515 = vmatpush.bf16.msra.mxu3 %v15747_v20  ;;  %v14375_v20 = vor.u32 %v18314_v61, %v14372_v8  ;;  %v17043_v61 = vor.u32 %v18990_v50, %v17042_v49  ;;  %v14596_v8 = vld [vmem:[#allocation11 + $0x748] sm:$0xf0]  ;;  %v18908_v43 = vld [vmem:[#allocation11 + $0x17dc] sm:$0xf]  ;;  %v16748_v32 = vld [vmem:[#allocation11 + $0x1820] sm:$0xf0] }
 0x5bd   :  { %11529 = vmatpush.bf16.msrb.mxu0 %v16323_v1  ;;  %v15459_v1 = vor.u32 %v18594_v58, %v15458_v36  ;;  %v16967_v36 = vor.u32 %v18962_v40, %v16964_v29  ;;  %v18972_v58 = vld [vmem:[#allocation11 + $0x19d4] sm:$0xf0]  ;;  %v16754_v49 = vld [vmem:[#allocation11 + $0x17e0] sm:$0xf]  ;;  %v18918_v50 = vld [vmem:[#allocation11 + $0x1824] sm:$0xf0] }
 0x5be   :  { %11488 = vmatpush.bf16.msra.mxu1 %v14523_v11  ;;  %11391 = vmatpush.bf16.msra.mxu2 %v14447_v30  ;;  %v18890_v40 = vld [vmem:[#allocation11 + $0x174c] sm:$0xf]  ;;  %v16676_v29 = vld [vmem:[#allocation11 + $0x1790] sm:$0xf0] }
 0x5c0   :  { %11516 = vmatpush.bf16.msra.mxu3 %v15675_v46  ;;  %v14164_v46 = vld [vmem:[#allocation11 + $0x3e8] sm:$0xf0] }
 0x5c1   :  { %11530 = vmatpush.bf16.msrb.mxu0 %v16251_v42  ;;  %v18405_v42 = vld [vmem:[#allocation11 + $0x824] sm:$0xf]  ;;  %v14167_v51 = vor.u32 %v18261_v17, %v14164_v46  ;;  %v20264_v17 = vpop.f32.mrf.mxu3  ;;  %v20266_v46 = vpop.f32.mrf.mxu2 }
 0x5c2   :  { %11489 = vmatpush.bf16.msra.mxu1 %v14451_v18  ;;  %11392 = vmatpush.bf16.msra.mxu2 %v14375_v20  ;;  %v14743_v38 = vor.u32 %v18405_v42, %v14740_v12  ;;  %v18944_v18 = vld [vmem:[#allocation11 + $0x18fc] sm:$0xf]  ;;  %v14452_v42 = vld [vmem:[#allocation11 + $0x628] sm:$0xf0]  ;;  %v16823_v12 = vor.u32 %v18926_v39, %v16820_v27  ;;  %v18576_v39 = vld [vmem:[#allocation11 + $0xd74] sm:$0xf0] }
 0x5c3   :  { %v13948_v20 = vld [vmem:[#allocation11 + $0x238] sm:$0xf0]  ;;  %v16895_v55 = vor.u32 %v18944_v18, %v16892_v3  ;;  %v18900_v18 = vld [vmem:[#allocation11 + $0x1794] sm:$0xf0]  ;;  %v18999_v3 = vld [vmem:[#allocation11 + $0x1ab4] sm:$0xf]  ;;  %v20277_v27 = vpop.f32.mrf.mxu0 }
 0x5c4   :  { %11517 = vmatpush.bf16.msra.mxu3 %v15603_v22  ;;  %v14092_v22 = vld [vmem:[#allocation11 + $0x358] sm:$0xf0] }
 0x5c5   :  { %11531 = vmatpush.bf16.msrb.mxu0 %v16179_v15  ;;  %v14668_v15 = vld [vmem:[#allocation11 + $0x7d8] sm:$0xf0]  ;;  %v14095_v11 = vor.u32 %v18243_v19, %v14092_v22  ;;  %v20270_v22 = vpop.f32.mrf.mxu1 }
 0x5c6   :  { %11490 = vmatpush.bf16.msra.mxu1 %v14379_v2  ;;  %11393 = vmatpush.bf16.msra.mxu2 %v14303_v10  ;;  %v14671_v30 = vor.u32 %v18387_v28, %v14668_v15  ;;  %v13804_v19 = vld [vmem:[#allocation11 + $0x118] sm:$0xf0]  ;;  %v18315_v28 = vld [vmem:[#allocation11 + $0x554] sm:$0xf] }
 0x5c7   :  { %v14380_v15 = vld [vmem:[#allocation11 + $0x598] sm:$0xf0] }
 0x5c8   :  { %11518 = vmatpush.bf16.msra.mxu3 %v15531_v63  ;;  %v18369_v63 = vld [vmem:[#allocation11 + $0x704] sm:$0xf]  ;;  %v14383_v25 = vor.u32 %v18315_v28, %v14380_v15 }
 0x5c9   :  { %11532 = vmatpush.bf16.msrb.mxu0 %v16107_v37  ;;  %11394 = vmatmul.bf16.vlgmr.msra.gmra.mxu2 %v19770_v44  ;;  %v16970_v37 = vld [vmem:[#allocation11 + $0x1990] sm:$0xf]  ;;  %v14599_v4 = vor.u32 %v18369_v63, %v14596_v8  ;;  %v14308_v63 = vld [vmem:[#allocation11 + $0x508] sm:$0xf0]  ;;  %v16755_v8 = vor.u32 %v18918_v50, %v16754_v49  ;;  %v16396_v49 = vld [vmem:[#allocation11 + $0x1558] sm:$0xf0] }
 0x5ca   :  { %11442 = vmatpush.bf16.msrb.mxu2 %v17111_v35  ;;  %11491 = vmatpush.bf16.msra.mxu1 %v14307_v59  ;;  %v16971_v60 = vor.u32 %v18972_v58, %v16970_v37  ;;  %v16826_v35 = vld [vmem:[#allocation11 + $0x1870] sm:$0xf]  ;;  %v14455_v59 = vor.u32 %v18333_v23, %v14452_v42  ;;  %v18855_v37 = vld [vmem:[#allocation11 + $0x1634] sm:$0xf]  ;;  %v16540_v58 = vld [vmem:[#allocation11 + $0x1678] sm:$0xf0] }
 0x5cb   :  { %v16468_v23 = vld [vmem:[#allocation11 + $0x15e8] sm:$0xf0] }
 0x5cc   :  { %11519 = vmatpush.bf16.msra.mxu3 %v15459_v1  ;;  %v14524_v1 = vld [vmem:[#allocation11 + $0x6b8] sm:$0xf0] }
 0x5cd   :  { %11533 = vmatpush.bf16.msrb.mxu0 %v16035_v56  ;;  %11492 = vmatmul.bf16.vlgmr.msra.gmra.mxu1 %v19770_v44  ;;  %v18954_v56 = vld [vmem:[#allocation11 + $0x1944] sm:$0xf0]  ;;  %v14527_v2 = vor.u32 %v18351_v14, %v14524_v1  ;;  %v18872_v14 = vld [vmem:[#allocation11 + $0x16bc] sm:$0xf]  ;;  %v16604_v1 = vld [vmem:[#allocation11 + $0x1700] sm:$0xf0] }
 0x5ce   :  { %11540 = vmatpush.bf16.msrb.mxu1 %v17115_v45  ;;  %11443 = vmatpush.bf16.msrb.mxu2 %v17039_v48  ;;  %v16899_v10 = vor.u32 %v18954_v56, %v16898_v6  ;;  %v16827_v45 = vor.u32 %v18936_v16, %v16826_v35  ;;  %v16751_v48 = vor.u32 %v18908_v43, %v16748_v32  ;;  %v18981_v35 = vld [vmem:[#allocation11 + $0x1a24] sm:$0xf]  ;;  %v17044_v16 = vld [vmem:[#allocation11 + $0x1a68] sm:$0xf0]  ;;  %v18567_v32 = vld [vmem:[#allocation11 + $0xd34] sm:$0xf] }
 0x5cf   :  { %11520 = vmatmul.bf16.vlgmr.msra.gmra.mxu3 %v19787_v41  ;;  %v16543_v56 = vor.u32 %v18855_v37, %v16540_v58  ;;  %v16607_v42 = vor.u32 %v18872_v14, %v16604_v1  ;;  %v17047_v15 = vor.u32 %v18981_v35, %v17044_v16  ;;  %v18540_v37 = vld [vmem:[#allocation11 + $0xc54] sm:$0xf0]  ;;  %v20289_v58 = vpop.f32.mrf.mxu0  ;;  %v18531_v1 = vld [vmem:[#allocation11 + $0xc14] sm:$0xf]  ;;  %v16828_v16 = vld [vmem:[#allocation11 + $0x18b8] sm:$0xf0] }
 0x5d0   :  { %11568 = vmatpush.bf16.msrb.mxu3 %v14239_v62  ;;  %11534 = vmatmul.bf16.vlgmr.msrb.gmra.mxu0 %v19790_v7  ;;  %v13951_v62 = vor.u32 %v18207_v47, %v13948_v20  ;;  %v20272_v47 = vpop.f32.mrf.mxu3  ;;  %v20274_v20 = vpop.f32.mrf.mxu2  ;;  %v18927_v35 = vld [vmem:[#allocation11 + $0x1874] sm:$0xf] }
 0x5d1   :  { %11582 = vmatpush.bf16.msra.mxu0 %v14815_v13  ;;  %v18189_v13 = vld [vmem:[#allocation11 + $0x164] sm:$0xf] }
 0x5d2   :  { %11541 = vmatpush.bf16.msrb.mxu1 %v17043_v61  ;;  %11444 = vmatpush.bf16.msrb.mxu2 %v16967_v36  ;;  %v18297_v61 = vld [vmem:[#allocation11 + $0x4c4] sm:$0xf]  ;;  %v16682_v36 = vld [vmem:[#allocation11 + $0x1750] sm:$0xf] }
 0x5d3   :  { %v14311_v6 = vor.u32 %v18297_v61, %v14308_v63  ;;  %v18549_v61 = vld [vmem:[#allocation11 + $0xca4] sm:$0xf]  ;;  %v15316_v63 = vld [vmem:[#allocation11 + $0xce8] sm:$0xf0] }
 0x5d4   :  { %11569 = vmatpush.bf16.msrb.mxu3 %v14167_v51  ;;  %v13879_v51 = vor.u32 %v18189_v13, %v13876_v33  ;;  %v16610_v33 = vld [vmem:[#allocation11 + $0x16c0] sm:$0xf] }
 0x5d5   :  { %11583 = vmatpush.bf16.msra.mxu0 %v14743_v38  ;;  %v18171_v38 = vld [vmem:[#allocation11 + $0xd4] sm:$0xf] }
 0x5d6   :  { %11542 = vmatpush.bf16.msrb.mxu1 %v16971_v60  ;;  %11445 = vmatpush.bf16.msrb.mxu2 %v16895_v55  ;;  %v4838_v55 = vperm.slane %v20208_v34, 4 }
 0x5d8   :  { %11570 = vmatpush.bf16.msrb.mxu3 %v14095_v11  ;;  %v13807_v11 = vor.u32 %v18171_v38, %v13804_v19  ;;  %v15314_v19 = vld [vmem:[#allocation11 + $0xca0] sm:$0xf]  ;;  %v11088_v50 = vadd.f32 %v20252_v57, %v4838_v55  ;;  %v15242_v57 = vld [vmem:[#allocation11 + $0xc10] sm:$0xf] }
 0x5d9   :  { %11584 = vmatpush.bf16.msra.mxu0 %v14671_v30  ;;  %v18153_v30 = vld [vmem:[#allocation11 + $0x44] sm:$0xf]  ;;  %v15243_v14 = vor.u32 %v18540_v37, %v15242_v57  ;;  %v18486_v57 = vld [vmem:[#allocation11 + $0xaa4] sm:$0xf0] }
 0x5da   :  { %11543 = vmatpush.bf16.msrb.mxu1 %v16899_v10  ;;  %11446 = vmatpush.bf16.msrb.mxu2 %v16823_v12  ;;  %v13735_v60 = vor.u32 %v18153_v30, %v13732_v0  ;;  %v18837_v10 = vld [vmem:[#allocation11 + $0x15a4] sm:$0xf]  ;;  %v18882_v12 = vld [vmem:[#allocation11 + $0x1704] sm:$0xf0]  ;;  %v11185_v30 = vpop.f32.mrf.mxu3 }
 0x5db   :  { %v16471_v38 = vor.u32 %v18837_v10, %v16468_v23  ;;  %v16611_v28 = vor.u32 %v18882_v12, %v16610_v33  ;;  %v11090_v33 = vadd.f32 %v20259_v21, %v4838_v55  ;;  %v20299_v10 = vld [vmem:[#allocation13 + $0x8] sm:$0xff]  ;;  %v18504_v21 = vld [vmem:[#allocation11 + $0xb34] sm:$0xf0] }
 0x5dc   :  { %11571 = vmatpush.bf16.msrb.mxu3 %v14023_v53  ;;  %v16679_v53 = vor.u32 %v18890_v40, %v16676_v29  ;;  %v18963_v40 = vld [vmem:[#allocation11 + $0x1994] sm:$0xf]  ;;  %v16972_v29 = vld [vmem:[#allocation11 + $0x19d8] sm:$0xf0]  ;;  %v4839_v23 = vperm.slane %v20299_v10, 5 }
 0x5dd   :  { %11585 = vmatpush.bf16.msra.mxu0 %v14599_v4  ;;  %v17116_v4 = vld [vmem:[#allocation11 + $0x1af8] sm:$0xf0] }
 0x5de   :  { %11544 = vmatpush.bf16.msrb.mxu1 %v16827_v45  ;;  %11447 = vmatpush.bf16.msrb.mxu2 %v16751_v48  ;;  %v17119_v13 = vor.u32 %v18999_v3, %v17116_v4  ;;  %v18558_v45 = vld [vmem:[#allocation11 + $0xce4] sm:$0xf0]  ;;  %v18819_v48 = vld [vmem:[#allocation11 + $0x1514] sm:$0xf]  ;;  %v18945_v4 = vld [vmem:[#allocation11 + $0x1904] sm:$0xf] }
 0x5df   :  { %v15315_v0 = vor.u32 %v18558_v45, %v15314_v19  ;;  %v15098_v19 = vld [vmem:[#allocation11 + $0xaf0] sm:$0xf] }
 0x5e0   :  { %11572 = vmatpush.bf16.msrb.mxu3 %v13951_v62  ;;  %v15386_v62 = vld [vmem:[#allocation11 + $0xd30] sm:$0xf] }
 0x5e1   :  { %11586 = vmatpush.bf16.msra.mxu0 %v14527_v2  ;;  %v16683_v2 = vor.u32 %v18900_v18, %v16682_v36  ;;  %v15387_v43 = vor.u32 %v18576_v39, %v15386_v62  ;;  %v16399_v36 = vor.u32 %v18819_v48, %v16396_v49  ;;  %v16324_v18 = vld [vmem:[#allocation11 + $0x14c8] sm:$0xf0]  ;;  %v15170_v62 = vld [vmem:[#allocation11 + $0xb80] sm:$0xf]  ;;  %v18522_v39 = vld [vmem:[#allocation11 + $0xbc4] sm:$0xf0]  ;;  %v11186_v48 = vadd.f32 %v11185_v30, %v4839_v23 }
 0x5e2   :  { %11545 = vmatpush.bf16.msrb.mxu1 %v16755_v8  ;;  %11448 = vmatpush.bf16.msrb.mxu2 %v16679_v53  ;;  %v11102_v8 = vadd.f32 %v20254_v31, %v11088_v50  ;;  %v18801_v53 = vld [vmem:[#allocation11 + $0x1484] sm:$0xf]  ;;  %v11187_v55 = vpop.f32.mrf.mxu3 }
 0x5e4   :  { %11573 = vmatpush.bf16.msrb.mxu3 %v13879_v51  ;;  %v20279_v51 = vpop.f32.mrf.mxu1  ;;  %v11116_v3 = vadd.f32 %v20266_v46, %v11102_v8 }
 0x5e5   :  { %11587 = vmatpush.bf16.msra.mxu0 %v14455_v59  ;;  %v15388_v59 = vld [vmem:[#allocation11 + $0xd78] sm:$0xf0] }
 0x5e6   :  { %11546 = vmatpush.bf16.msrb.mxu1 %v16683_v2  ;;  %11449 = vmatpush.bf16.msrb.mxu2 %v16607_v42  ;;  %v18783_v2 = vld [vmem:[#allocation11 + $0x13f4] sm:$0xf]  ;;  %v11130_v42 = vadd.f32 %v20264_v17, %v11116_v3  ;;  %v18765_v17 = vld [vmem:[#allocation11 + $0x1364] sm:$0xf] }
 0x5e8   :  { %11574 = vmatpush.bf16.msrb.mxu3 %v13807_v11  ;;  %v15391_v11 = vor.u32 %v18567_v32, %v15388_v59  ;;  %v18513_v32 = vld [vmem:[#allocation11 + $0xb84] sm:$0xf]  ;;  %v15172_v59 = vld [vmem:[#allocation11 + $0xbc8] sm:$0xf0]  ;;  %v11144_v50 = vadd.f32 %v20268_v52, %v11130_v42  ;;  %v11200_v52 = vadd.f32 %v20289_v58, %v11186_v48  ;;  %v18468_v58 = vld [vmem:[#allocation11 + $0xa14] sm:$0xf0] }
 0x5e9   :  { %11588 = vmatpush.bf16.msra.mxu0 %v14383_v25  ;;  %v20285_v25 = vpop.f32.mrf.mxu2  ;;  %11450 = vmatmul.bf16.vlgmr.msrb.gmra.mxu2 %v19797_v24 }
 0x5ea   :  { %11498 = vmatpush.bf16.msra.mxu2 %v15387_v43  ;;  %11547 = vmatpush.bf16.msrb.mxu1 %v16611_v28  ;;  %v15171_v43 = vor.u32 %v18522_v39, %v15170_v62  ;;  %v16831_v28 = vor.u32 %v18927_v35, %v16828_v16  ;;  %v14954_v39 = vld [vmem:[#allocation11 + $0x9d0] sm:$0xf]  ;;  %v18873_v16 = vld [vmem:[#allocation11 + $0x16c4] sm:$0xf] }
 0x5ec   :  { %11575 = vmatpush.bf16.msrb.mxu3 %v13735_v60  ;;  %v16900_v60 = vld [vmem:[#allocation11 + $0x1948] sm:$0xf0]  ;;  %v20293_v31 = vpop.f32.mrf.mxu1 }
 0x5ed   :  { %11589 = vmatpush.bf16.msra.mxu0 %v14311_v6  ;;  %v15244_v6 = vld [vmem:[#allocation11 + $0xc58] sm:$0xf0]  ;;  %11548 = vmatmul.bf16.vlgmr.msrb.gmra.mxu1 %v19797_v24  ;;  %v16903_v46 = vor.u32 %v18945_v4, %v16900_v60 }
 0x5ee   :  { %11596 = vmatpush.bf16.msra.mxu1 %v15391_v11  ;;  %11499 = vmatpush.bf16.msra.mxu2 %v15315_v0  ;;  %v15247_v12 = vor.u32 %v18531_v1, %v15244_v6  ;;  %v15175_v11 = vor.u32 %v18513_v32, %v15172_v59  ;;  %v15099_v0 = vor.u32 %v18504_v21, %v15098_v19  ;;  %v16684_v4 = vld [vmem:[#allocation11 + $0x1798] sm:$0xf0]  ;;  %v15028_v1 = vld [vmem:[#allocation11 + $0xaa8] sm:$0xf0]  ;;  %v18459_v32 = vld [vmem:[#allocation11 + $0x9d4] sm:$0xf] }
 0x5ef   :  { %11576 = vmatmul.bf16.vlgmr.msrb.gmra.mxu3 %v19753_v26  ;;  %v16975_v26 = vor.u32 %v18963_v40, %v16972_v29  ;;  %v18909_v40 = vld [vmem:[#allocation11 + $0x17e4] sm:$0xf]  ;;  %v11201_v29 = vpop.f32.mrf.mxu0  ;;  %v11214_v6 = vadd.f32 %v20293_v31, %v11200_v52  ;;  %v16612_v31 = vld [vmem:[#allocation11 + $0x1708] sm:$0xf0]  ;;  %v14956_v59 = vld [vmem:[#allocation11 + $0xa18] sm:$0xf0] }
 0x5f0   :  { %11624 = vmatpush.bf16.msra.mxu3 %v16543_v56  ;;  %11590 = vmatmul.bf16.vlgmr.msra.gmra.mxu0 %v19770_v44  ;;  %v15319_v44 = vor.u32 %v18549_v61, %v15316_v63  ;;  %v16327_v56 = vor.u32 %v18801_v53, %v16324_v18  ;;  %v18495_v61 = vld [vmem:[#allocation11 + $0xaf4] sm:$0xf]  ;;  %v15100_v63 = vld [vmem:[#allocation11 + $0xb38] sm:$0xf0]  ;;  %v11158_v18 = vadd.f32 %v20270_v22, %v11144_v50  ;;  %v14882_v19 = vld [vmem:[#allocation11 + $0x940] sm:$0xf] }
 0x5f1   :  { %11638 = vmatpush.bf16.msrb.mxu0 %v17119_v13  ;;  %v16252_v13 = vld [vmem:[#allocation11 + $0x1438] sm:$0xf0]  ;;  %v20304_v45 = vpop.f32.mrf.mxu2  ;;  %v15103_v3 = vor.u32 %v18495_v61, %v15100_v63  ;;  %v18450_v21 = vld [vmem:[#allocation11 + $0x984] sm:$0xf0]  ;;  %v14959_v50 = vor.u32 %v18459_v32, %v14956_v59  ;;  %v17402_v32 = vld [vmem:[#allocation11 + $0x1cf0] sm:$0xf] }
 0x5f2   :  { %11597 = vmatpush.bf16.msra.mxu1 %v15319_v44  ;;  %11500 = vmatpush.bf16.msra.mxu2 %v15243_v14  ;;  %v16255_v34 = vor.u32 %v18783_v2, %v16252_v13  ;;  %v18891_v44 = vld [vmem:[#allocation11 + $0x1754] sm:$0xf]  ;;  %v18477_v14 = vld [vmem:[#allocation11 + $0xa64] sm:$0xf]  ;;  %v19080_v59 = vld [vmem:[#allocation11 + $0x1d34] sm:$0xf0] }
 0x5f3   :  { %v16687_v22 = vor.u32 %v18891_v44, %v16684_v4  ;;  %v18729_v13 = vld [vmem:[#allocation11 + $0x1244] sm:$0xf]  ;;  %v15031_v35 = vor.u32 %v18477_v14, %v15028_v1  ;;  %v17620_v4 = vld [vmem:[#allocation11 + $0x1ee8] sm:$0xf0]  ;;  %v17546_v14 = vld [vmem:[#allocation11 + $0x1e10] sm:$0xf] }
 0x5f4   :  { %11625 = vmatpush.bf16.msra.mxu3 %v16471_v38  ;;  %v11104_v38 = vadd.f32 %v20262_v54, %v11090_v33  ;;  %v16756_v54 = vld [vmem:[#allocation11 + $0x1828] sm:$0xf0]  ;;  %v11215_v37 = vpop.f32.mrf.mxu1  ;;  %v19125_v44 = vld [vmem:[#allocation11 + $0x1ea4] sm:$0xf]  ;;  %v19116_v1 = vld [vmem:[#allocation11 + $0x1e54] sm:$0xf0] }
 0x5f5   :  { %11639 = vmatpush.bf16.msrb.mxu0 %v17047_v15  ;;  %v16180_v15 = vld [vmem:[#allocation11 + $0x13a8] sm:$0xf0]  ;;  %v16759_v30 = vor.u32 %v18909_v40, %v16756_v54  ;;  %v14883_v40 = vor.u32 %v18450_v21, %v14882_v19  ;;  %v18441_v54 = vld [vmem:[#allocation11 + $0x944] sm:$0xf]  ;;  %v19071_v19 = vld [vmem:[#allocation11 + $0x1cf4] sm:$0xf] }
 0x5f6   :  { %v11118_v49 = vadd.f32 %v20274_v20, %v11104_v38  ;;  %11598 = vmatpush.bf16.msra.mxu1 %v15247_v12  ;;  %11501 = vmatpush.bf16.msra.mxu2 %v15171_v43  ;;  %v16183_v8 = vor.u32 %v18765_v17, %v16180_v15  ;;  %v16108_v20 = vld [vmem:[#allocation11 + $0x1318] sm:$0xf0]  ;;  %v16036_v33 = vld [vmem:[#allocation11 + $0x1288] sm:$0xf0]  ;;  %v17690_v17 = vld [vmem:[#allocation11 + $0x1f30] sm:$0xf] }
 0x5f7   :  { %v11255_v43 = vpop.f32.mrf.mxu0  ;;  %v19152_v15 = vld [vmem:[#allocation11 + $0x1f74] sm:$0xf0]  ;;  %v17404_v21 = vld [vmem:[#allocation11 + $0x1d38] sm:$0xf0] }
 0x5f8   :  { %11626 = vmatpush.bf16.msra.mxu3 %v16399_v36  ;;  %v15026_v36 = vld [vmem:[#allocation11 + $0xa60] sm:$0xf]  ;;  %v11132_v53 = vadd.f32 %v20272_v47, %v11118_v49  ;;  %v11241_v47 = vpop.f32.mrf.mxu3 }
 0x5f9   :  { %11640 = vmatpush.bf16.msrb.mxu0 %v16975_v26  ;;  %v18747_v26 = vld [vmem:[#allocation11 + $0x12d4] sm:$0xf]  ;;  %v15027_v60 = vor.u32 %v18486_v57, %v15026_v36  ;;  %v11227_v2 = vpop.f32.mrf.mxu2  ;;  %v17692_v36 = vld [vmem:[#allocation11 + $0x1f78] sm:$0xf0] }
 0x5fa   :  { %11599 = vmatpush.bf16.msra.mxu1 %v15175_v11  ;;  %11502 = vmatpush.bf16.msra.mxu2 %v15099_v0  ;;  %v16111_v62 = vor.u32 %v18747_v26, %v16108_v20  ;;  %v11146_v42 = vadd.f32 %v20277_v27, %v11132_v53  ;;  %v11228_v12 = vadd.f32 %v11227_v2, %v11214_v6  ;;  %v14884_v0 = vld [vmem:[#allocation11 + $0x988] sm:$0xf0]  ;;  %v17474_v2 = vld [vmem:[#allocation11 + $0x1d80] sm:$0xf] }
 0x5fb   :  { %v16615_v27 = vor.u32 %v18873_v16, %v16612_v31  ;;  %v19089_v16 = vld [vmem:[#allocation11 + $0x1d84] sm:$0xf]  ;;  %v17476_v31 = vld [vmem:[#allocation11 + $0x1dc8] sm:$0xf0] }
 0x5fc   :  { %11627 = vmatpush.bf16.msra.mxu3 %v16327_v56  ;;  %v11172_v56 = vadd.f32 %v20285_v25, %v11158_v18  ;;  %v14955_v25 = vor.u32 %v18468_v58, %v14954_v39  ;;  %v11160_v48 = vadd.f32 %v20279_v51, %v11146_v42  ;;  %v19134_v51 = vld [vmem:[#allocation11 + $0x1ee4] sm:$0xf0]  ;;  %v17547_v58 = vor.u32 %v19116_v1, %v17546_v14  ;;  %v18675_v14 = vld [vmem:[#allocation11 + $0x1094] sm:$0xf]  ;;  %v15820_v1 = vld [vmem:[#allocation11 + $0x10d8] sm:$0xf0] }
 0x5fd   :  { %11641 = vmatpush.bf16.msrb.mxu0 %v16903_v46  ;;  %v11188_v46 = vadd.f32 %v11187_v55, %v4839_v23  ;;  %v11242_v23 = vadd.f32 %v11241_v47, %v11228_v12 }
 0x5fe   :  { %11600 = vmatpush.bf16.msra.mxu1 %v15103_v3  ;;  %11503 = vmatpush.bf16.msra.mxu2 %v15027_v60  ;;  %v11678_v38 = vmul.f32 0.5, %v11172_v56  ;;  %v11174_v61 = vadd.f32 %v20304_v45, %v11160_v48  ;;  %v17407_v48 = vor.u32 %v19071_v19, %v17404_v21 }
 0x5ff   :  { %v11202_v55 = vadd.f32 %v11201_v29, %v11188_v46  ;;  %v11256_v49 = vadd.f32 %v11255_v43, %v11242_v23  ;;  %v17691_v29 = vor.u32 %v19152_v15, %v17690_v17  ;;  %v11257_v60 = vpop.f32.mrf.mxu0  ;;  %v17548_v46 = vld [vmem:[#allocation11 + $0x1e58] sm:$0xf0] }
 0x600   :  { %11628 = vmatpush.bf16.msra.mxu3 %v16255_v34  ;;  %v16039_v34 = vor.u32 %v18729_v13, %v16036_v33  ;;  %19215 = vtanh.f32 %v11678_v38  ;;  %v11243_v52 = vpop.f32.mrf.mxu3  ;;  %v11696_v18 = vmul.f32 0.5, %v11174_v61  ;;  %v19044_v61 = vld [vmem:[#allocation11 + $0x1c14] sm:$0xf0] }
 0x601   :  { %11642 = vmatpush.bf16.msrb.mxu0 %v16831_v28  ;;  %v11269_v28 = vpop.f32.mrf.mxu1  ;;  %v11216_v11 = vadd.f32 %v11215_v37, %v11202_v55  ;;  %v11229_v57 = vpop.f32.mrf.mxu2  ;;  %v14887_v37 = vor.u32 %v18441_v54, %v14884_v0  ;;  %v17258_v0 = vld [vmem:[#allocation11 + $0x1bd0] sm:$0xf] }
 0x602   :  { %11601 = vmatpush.bf16.msra.mxu1 %v15031_v35  ;;  %11504 = vmatpush.bf16.msra.mxu2 %v14955_v25  ;;  %v11270_v63 = vadd.f32 %v11269_v28, %v11256_v49  ;;  %v17330_v28 = vld [vmem:[#allocation11 + $0x1c60] sm:$0xf] }
 0x603   :  { %v11230_v20 = vadd.f32 %v11229_v57, %v11216_v11  ;;  %v17332_v11 = vld [vmem:[#allocation11 + $0x1ca8] sm:$0xf0]  ;;  %v17260_v57 = vld [vmem:[#allocation11 + $0x1c18] sm:$0xf0] }
 0x604   :  { %11629 = vmatpush.bf16.msra.mxu3 %v16183_v8  ;;  %v19143_v8 = vld [vmem:[#allocation11 + $0x1f34] sm:$0xf]  ;;  %v11679_v26 = vmul.f32 0.5, %v11270_v63 }
 0x605   :  { %11643 = vmatpush.bf16.msrb.mxu0 %v16759_v30  ;;  %v17618_v30 = vld [vmem:[#allocation11 + $0x1ea0] sm:$0xf]  ;;  %v17695_v53 = vor.u32 %v19143_v8, %v17692_v36  ;;  %v11244_v45 = vadd.f32 %v11243_v52, %v11230_v20  ;;  %v17259_v8 = vor.u32 %v19044_v61, %v17258_v0  ;;  %v19035_v36 = vld [vmem:[#allocation11 + $0x1bd4] sm:$0xf]  ;;  %v15964_v20 = vld [vmem:[#allocation11 + $0x11f8] sm:$0xf0] }
 0x606   :  { %11602 = vmatpush.bf16.msra.mxu1 %v14959_v50  ;;  %11505 = vmatpush.bf16.msra.mxu2 %v14883_v40  ;;  %19217 = vtanh.f32 %v11679_v26  ;;  %v17619_v3 = vor.u32 %v19134_v51, %v17618_v30  ;;  %v19216_v6 = vpop.eup %19215  ;;  %v19053_v50 = vld [vmem:[#allocation11 + $0x1c64] sm:$0xf]  ;;  %v17186_v30 = vld [vmem:[#allocation11 + $0x1b40] sm:$0xf]  ;;  %v19026_v51 = vld [vmem:[#allocation11 + $0x1b84] sm:$0xf0] }
 0x607   :  { %v11258_v56 = vadd.f32 %v11257_v60, %v11244_v45  ;;  %19219 = vtanh.f32 %v11696_v18  ;;  %v11750_v47 = vmul.f32 0.5, %v19216_v6  ;;  %v18711_v26 = vld [vmem:[#allocation11 + $0x11b4] sm:$0xf]  ;;  %v17187_v52 = vor.u32 %v19026_v51, %v17186_v30  ;;  %v17188_v18 = vld [vmem:[#allocation11 + $0x1b88] sm:$0xf0] }
 0x608   :  { %11630 = vmatpush.bf16.msra.mxu3 %v16111_v62  ;;  %v15967_v45 = vor.u32 %v18711_v26, %v15964_v20  ;;  %v15823_v6 = vor.u32 %v18675_v14, %v15820_v1 }
 0x609   :  { %11644 = vmatpush.bf16.msrb.mxu0 %v16687_v22  ;;  %11506 = vmatmul.bf16.vlgmr.msra.gmra.mxu2 %v19768_v5  ;;  %v11271_v62 = vpop.f32.mrf.mxu1  ;;  %v19098_v22 = vld [vmem:[#allocation11 + $0x1dc4] sm:$0xf0]  ;;  %v11786_v43 = vadd.f32 0.5, %v11750_v47  ;;  %v15604_v47 = vld [vmem:[#allocation11 + $0xf28] sm:$0xf0] }
 0x60a   :  { %11554 = vmatpush.bf16.msrb.mxu2 %v17691_v29  ;;  %11603 = vmatpush.bf16.msra.mxu1 %v14887_v37  ;;  %v11272_v39 = vadd.f32 %v11271_v62, %v11258_v56  ;;  %v17475_v35 = vor.u32 %v19098_v22, %v17474_v2  ;;  %v17335_v29 = vor.u32 %v19053_v50, %v17332_v11  ;;  %v18657_v56 = vld [vmem:[#allocation11 + $0x1004] sm:$0xf]  ;;  %v15748_v62 = vld [vmem:[#allocation11 + $0x1048] sm:$0xf0]  ;;  %v18603_v22 = vld [vmem:[#allocation11 + $0xe54] sm:$0xf] }
 0x60b   :  { %v17263_v37 = vor.u32 %v19035_v36, %v17260_v57 }
 0x60c   :  { %11631 = vmatpush.bf16.msra.mxu3 %v16039_v34  ;;  %v19218_v13 = vpop.eup %19217  ;;  %v11697_v33 = vmul.f32 0.5, %v11272_v39  ;;  %v17403_v34 = vor.u32 %v19080_v59, %v17402_v32  ;;  %v18639_v39 = vld [vmem:[#allocation11 + $0xf74] sm:$0xf] }
 0x60d   :  { %11645 = vmatpush.bf16.msrb.mxu0 %v16615_v27  ;;  %11604 = vmatmul.bf16.vlgmr.msra.gmra.mxu1 %v19768_v5  ;;  %v11751_v42 = vmul.f32 0.5, %v19218_v13  ;;  %v19220_v38 = vpop.eup %19219  ;;  %v17479_v5 = vor.u32 %v19089_v16, %v17476_v31  ;;  %v19062_v27 = vld [vmem:[#allocation11 + $0x1ca4] sm:$0xf0]  ;;  %v15532_v13 = vld [vmem:[#allocation11 + $0xe98] sm:$0xf0]  ;;  %v11311_v31 = vpop.f32.mrf.mxu0 }
 0x60e   :  { %11652 = vmatpush.bf16.msrb.mxu1 %v17695_v53  ;;  %11555 = vmatpush.bf16.msrb.mxu2 %v17619_v3  ;;  %19221 = vtanh.f32 %v11697_v33  ;;  %v11768_v55 = vmul.f32 0.5, %v19220_v38  ;;  %v17331_v49 = vor.u32 %v19062_v27, %v17330_v28  ;;  %v19017_v53 = vld [vmem:[#allocation11 + $0x1b44] sm:$0xf]  ;;  %v15535_v33 = vor.u32 %v18603_v22, %v15532_v13 }
 0x60f   :  { %11632 = vmatmul.bf16.vlgmr.msra.gmra.mxu3 %v19790_v7  ;;  %v17623_v7 = vor.u32 %v19125_v44, %v17620_v4  ;;  %v11787_v25 = vadd.f32 0.5, %v11751_v42  ;;  %v18693_v3 = vld [vmem:[#allocation11 + $0x1124] sm:$0xf]  ;;  %v15892_v44 = vld [vmem:[#allocation11 + $0x1168] sm:$0xf0]  ;;  %v17191_v4 = vor.u32 %v19017_v53, %v17188_v18 }
 0x610   :  { %11646 = vmatmul.bf16.vlgmr.msrb.gmra.mxu0 %v19797_v24  ;;  %v19107_v24 = vld [vmem:[#allocation11 + $0x1e14] sm:$0xf]  ;;  %v11804_v40 = vadd.f32 0.5, %v11768_v55  ;;  %v15895_v60 = vor.u32 %v18693_v3, %v15892_v44  ;;  %v18585_v42 = vld [vmem:[#allocation11 + $0xdc4] sm:$0xf] }
 0x611   :  { %v17551_v12 = vor.u32 %v19107_v24, %v17548_v46  ;;  %v11816_v23 = vpack.c.bf16 %v11787_v25, %v11786_v43  ;;  %v18621_v46 = vld [vmem:[#allocation11 + $0xee4] sm:$0xf]  ;;  %v11325_v32 = vpop.f32.mrf.mxu1 }
 0x612   :  { %11653 = vmatpush.bf16.msrb.mxu1 %v17623_v7  ;;  %11556 = vmatpush.bf16.msrb.mxu2 %v17547_v58  ;;  %v15751_v7 = vor.u32 %v18657_v56, %v15748_v62  ;;  %v15676_v58 = vld [vmem:[#allocation11 + $0xfb8] sm:$0xf0]  ;;  %v15607_v2 = vor.u32 %v18621_v46, %v15604_v47 }
 0x613   :  { %11834 = vst [vmem:[#allocation14 + $0x30] sm:$0xff] %v11816_v23  ;;  %v15679_v24 = vor.u32 %v18639_v39, %v15676_v58 }
 0x614   :  { %v19222_v17 = vpop.eup %19221 }
 0x615   :  { %v11769_v15 = vmul.f32 0.5, %v19222_v17  ;;  %v11313_v23 = vpop.f32.mrf.mxu0 }
 0x616   :  { %11654 = vmatpush.bf16.msrb.mxu1 %v17551_v12  ;;  %11557 = vmatpush.bf16.msrb.mxu2 %v17475_v35  ;;  %v15460_v12 = vld [vmem:[#allocation11 + $0xe08] sm:$0xf0]  ;;  %v11297_v35 = vpop.f32.mrf.mxu3 }
 0x617   :  { %v11805_v54 = vadd.f32 0.5, %v11769_v15  ;;  %v15463_v16 = vor.u32 %v18585_v42, %v15460_v12  ;;  %v4841_v15 = vperm.slane %v20299_v10, 7 }
 0x619   :  { %v11825_v63 = vpack.c.bf16 %v11805_v54, %v11804_v40 }
 0x61a   :  { %11655 = vmatpush.bf16.msrb.mxu1 %v17479_v5  ;;  %11558 = vmatpush.bf16.msrb.mxu2 %v17403_v34  ;;  %v4840_v5 = vperm.slane %v20299_v10, 6  ;;  %v11327_v34 = vpop.f32.mrf.mxu1 }
 0x61b   :  { %11843 = vst [vmem:[#allocation14 + $0x78] sm:$0xff] %v11825_v63 }
 0x61d   :  { %v11367_v19 = vpop.f32.mrf.mxu0 }
 0x61e   :  { %11656 = vmatpush.bf16.msrb.mxu1 %v17407_v48  ;;  %11559 = vmatpush.bf16.msrb.mxu2 %v17331_v49  ;;  %v11299_v43 = vpop.f32.mrf.mxu3 }
 0x622   :  { %11657 = vmatpush.bf16.msrb.mxu1 %v17335_v29  ;;  %11560 = vmatpush.bf16.msrb.mxu2 %v17259_v8  ;;  %v11381_v17 = vpop.f32.mrf.mxu1 }
 0x623   :  { %v11382_v40 = vadd.f32 %v11381_v17, %v4841_v15 }
 0x625   :  { %v11369_v11 = vpop.f32.mrf.mxu0 }
 0x626   :  { %11658 = vmatpush.bf16.msrb.mxu1 %v17263_v37  ;;  %11561 = vmatpush.bf16.msrb.mxu2 %v17187_v52  ;;  %v11353_v59 = vpop.f32.mrf.mxu3 }
 0x629   :  { %11562 = vmatmul.bf16.vlgmr.msrb.gmra.mxu2 %v19810_v9 }
 0x62a   :  { %11610 = vmatpush.bf16.msra.mxu2 %v15967_v45  ;;  %11659 = vmatpush.bf16.msrb.mxu1 %v17191_v4  ;;  %v11383_v29 = vpop.f32.mrf.mxu1 }
 0x62b   :  { %v11384_v20 = vadd.f32 %v11383_v29, %v4841_v15 }
 0x62d   :  { %11660 = vmatmul.bf16.vlgmr.msrb.gmra.mxu1 %v19810_v9  ;;  %v11283_v9 = vpop.f32.mrf.mxu2  ;;  %v11423_v36 = vpop.f32.mrf.mxu0 }
 0x62e   :  { %11611 = vmatpush.bf16.msra.mxu2 %v15895_v60  ;;  %v11284_v21 = vadd.f32 %v11283_v9, %v4840_v5  ;;  %v11355_v55 = vpop.f32.mrf.mxu3 }
 0x630   :  { %v11298_v27 = vadd.f32 %v11297_v35, %v11284_v21 }
 0x632   :  { %11612 = vmatpush.bf16.msra.mxu2 %v15823_v6  ;;  %v11312_v49 = vadd.f32 %v11311_v31, %v11298_v27  ;;  %v11437_v45 = vpop.f32.mrf.mxu1 }
 0x634   :  { %v11326_v0 = vadd.f32 %v11325_v32, %v11312_v49 }
 0x635   :  { %v11285_v25 = vpop.f32.mrf.mxu2  ;;  %v11425_v56 = vpop.f32.mrf.mxu0 }
 0x636   :  { %11613 = vmatpush.bf16.msra.mxu2 %v15751_v7  ;;  %v11286_v48 = vadd.f32 %v11285_v25, %v4840_v5 }
 0x638   :  { %v11300_v54 = vadd.f32 %v11299_v43, %v11286_v48 }
 0x63a   :  { %11614 = vmatpush.bf16.msra.mxu2 %v15679_v24  ;;  %v11314_v8 = vadd.f32 %v11313_v23, %v11300_v54  ;;  %v11439_v24 = vpop.f32.mrf.mxu1 }
 0x63c   :  { %v11328_v37 = vadd.f32 %v11327_v34, %v11314_v8 }
 0x63d   :  { %v11339_v38 = vpop.f32.mrf.mxu2  ;;  %v11479_v21 = vpop.f32.mrf.mxu0 }
 0x63e   :  { %11615 = vmatpush.bf16.msra.mxu2 %v15607_v2  ;;  %v11340_v61 = vadd.f32 %v11339_v38, %v11326_v0 }
 0x640   :  { %v11354_v57 = vadd.f32 %v11353_v59, %v11340_v61 }
 0x642   :  { %11616 = vmatpush.bf16.msra.mxu2 %v15535_v33  ;;  %v11368_v10 = vadd.f32 %v11367_v19, %v11354_v57 }
 0x644   :  { %v11680_v3 = vmul.f32 0.5, %v11368_v10 }
 0x645   :  { %v11341_v28 = vpop.f32.mrf.mxu2 }
 0x646   :  { %11617 = vmatpush.bf16.msra.mxu2 %v15463_v16  ;;  %v11342_v52 = vadd.f32 %v11341_v28, %v11328_v37  ;;  %19223 = vtanh.f32 %v11680_v3  ;;  %v11481_v28 = vpop.f32.mrf.mxu0 }
 0x648   :  { %v11356_v44 = vadd.f32 %v11355_v55, %v11342_v52 }
 0x649   :  { %11618 = vmatmul.bf16.vlgmr.msra.gmra.mxu2 %v19787_v41  ;;  %v11409_v41 = vpop.f32.mrf.mxu3 }
 0x64a   :  { %v11370_v62 = vadd.f32 %v11369_v11, %v11356_v44  ;;  %v11493_v55 = vpop.f32.mrf.mxu1 }
 0x64c   :  { %v11698_v46 = vmul.f32 0.5, %v11370_v62  ;;  %v19224_v22 = vpop.eup %19223 }
 0x64d   :  { %v11395_v50 = vpop.f32.mrf.mxu2  ;;  %v11752_v12 = vmul.f32 0.5, %v19224_v22 }
 0x64e   :  { %v11396_v63 = vadd.f32 %v11395_v50, %v11382_v40  ;;  %v11535_v48 = vpop.f32.mrf.mxu0 }
 0x64f   :  { %v11788_v31 = vadd.f32 0.5, %v11752_v12 }
 0x650   :  { %v11410_v30 = vadd.f32 %v11409_v41, %v11396_v63  ;;  %v4822_v41 = vld [vmem:[#allocation13 + $0x10] sm:$0x3] }
 0x651   :  { %v11411_v51 = vpop.f32.mrf.mxu3  ;;  %v4842_v54 = vperm.slane %v4822_v41, 0 }
 0x652   :  { %v11424_v18 = vadd.f32 %v11423_v36, %v11410_v30  ;;  %v11495_v27 = vpop.f32.mrf.mxu1 }
 0x653   :  { %v11480_v61 = vadd.f32 %v11479_v21, %v4842_v54 }
 0x654   :  { %v11438_v60 = vadd.f32 %v11437_v45, %v11424_v18 }
 0x655   :  { %v11397_v26 = vpop.f32.mrf.mxu2  ;;  %v11494_v8 = vadd.f32 %v11493_v55, %v11480_v61 }
 0x656   :  { %v11398_v53 = vadd.f32 %v11397_v26, %v11384_v20  ;;  %v11537_v40 = vpop.f32.mrf.mxu0  ;;  %v4843_v26 = vperm.slane %v4822_v41, 1 }
 0x658   :  { %v11412_v4 = vadd.f32 %v11411_v51, %v11398_v53  ;;  %v11482_v51 = vadd.f32 %v11481_v28, %v4842_v54 }
 0x659   :  { %v11465_v14 = vpop.f32.mrf.mxu3 }
 0x65a   :  { %v11426_v39 = vadd.f32 %v11425_v56, %v11412_v4  ;;  %v11496_v37 = vadd.f32 %v11495_v27, %v11482_v51 }
 0x65c   :  { %v11440_v47 = vadd.f32 %v11439_v24, %v11426_v39 }
 0x661   :  { %v11467_v33 = vpop.f32.mrf.mxu3 }
 0x669   :  { %v11521_v17 = vpop.f32.mrf.mxu3 }
 0x66a   :  { %v11549_v49 = vpop.f32.mrf.mxu1 }
 0x66c   :  { %v11451_v1 = vpop.f32.mrf.mxu2 }
 0x66d   :  { %v11452_v6 = vadd.f32 %v11451_v1, %v11438_v60  ;;  %v11591_v36 = vpop.f32.mrf.mxu0 }
 0x66f   :  { %v11466_v7 = vadd.f32 %v11465_v14, %v11452_v6 }
 0x671   :  { %v11681_v58 = vmul.f32 0.5, %v11466_v7  ;;  %v11523_v50 = vpop.f32.mrf.mxu3 }
 0x672   :  { %v11551_v0 = vpop.f32.mrf.mxu1 }
 0x673   :  { %19225 = vtanh.f32 %v11681_v58 }
 0x674   :  { %v11453_v2 = vpop.f32.mrf.mxu2  ;;  %19227 = vtanh.f32 %v11698_v46 }
 0x675   :  { %v11454_v13 = vadd.f32 %v11453_v2, %v11440_v47  ;;  %v11593_v3 = vpop.f32.mrf.mxu0 }
 0x677   :  { %v11468_v42 = vadd.f32 %v11467_v33, %v11454_v13 }
 0x679   :  { %v19226_v35 = vpop.eup %19225  ;;  %v11699_v9 = vmul.f32 0.5, %v11468_v42  ;;  %v11577_v63 = vpop.f32.mrf.mxu3 }
 0x67a   :  { %v11753_v16 = vmul.f32 0.5, %v19226_v35  ;;  %v19228_v25 = vpop.eup %19227  ;;  %v11578_v53 = vadd.f32 %v11577_v63, %v4843_v26 }
 0x67b   :  { %19229 = vtanh.f32 %v11699_v9  ;;  %v11770_v59 = vmul.f32 0.5, %v19228_v25 }
 0x67c   :  { %v11789_v43 = vadd.f32 0.5, %v11753_v16  ;;  %v11592_v4 = vadd.f32 %v11591_v36, %v11578_v53 }
 0x67d   :  { %v11806_v5 = vadd.f32 0.5, %v11770_v59 }
 0x67e   :  { %v11817_v32 = vpack.c.bf16 %v11789_v43, %v11788_v31 }
 0x680   :  { %11835 = vst [vmem:[#allocation14 + $0x38] sm:$0xff] %v11817_v32 }
 0x681   :  { %v19230_v38 = vpop.eup %19229  ;;  %v11579_v10 = vpop.f32.mrf.mxu3 }
 0x682   :  { %v11771_v23 = vmul.f32 0.5, %v19230_v38  ;;  %v11580_v7 = vadd.f32 %v11579_v10, %v4843_v26 }
 0x684   :  { %v11807_v34 = vadd.f32 0.5, %v11771_v23  ;;  %v11594_v22 = vadd.f32 %v11593_v3, %v11580_v7 }
 0x686   :  { %v11826_v19 = vpack.c.bf16 %v11807_v34, %v11806_v5 }
 0x688   :  { %11844 = vst [vmem:[#allocation14 + $0x80] sm:$0xff] %v11826_v19 }
 0x68a   :  { %v11605_v30 = vpop.f32.mrf.mxu1 }
 0x68b   :  { %v11606_v1 = vadd.f32 %v11605_v30, %v11592_v4 }
 0x68c   :  { %v11507_v15 = vpop.f32.mrf.mxu2 }
 0x68d   :  { %v11508_v57 = vadd.f32 %v11507_v15, %v11494_v8  ;;  %v11647_v24 = vpop.f32.mrf.mxu0 }
 0x68f   :  { %v11522_v20 = vadd.f32 %v11521_v17, %v11508_v57 }
 0x691   :  { %v11536_v45 = vadd.f32 %v11535_v48, %v11522_v20 }
 0x692   :  { %v11607_v44 = vpop.f32.mrf.mxu1  ;;  %v11633_v56 = vpop.f32.mrf.mxu3 }
 0x693   :  { %v11550_v14 = vadd.f32 %v11549_v49, %v11536_v45  ;;  %v11608_v42 = vadd.f32 %v11607_v44, %v11594_v22 }
 0x694   :  { %v11509_v11 = vpop.f32.mrf.mxu2 }
 0x695   :  { %v11510_v18 = vadd.f32 %v11509_v11, %v11496_v37  ;;  %v11649_v59 = vpop.f32.mrf.mxu0 }
 0x697   :  { %v11524_v60 = vadd.f32 %v11523_v50, %v11510_v18 }
 0x699   :  { %v11538_v39 = vadd.f32 %v11537_v40, %v11524_v60 }
 0x69a   :  { %v11635_v43 = vpop.f32.mrf.mxu3 }
 0x69b   :  { %v11552_v13 = vadd.f32 %v11551_v0, %v11538_v39 }
 0x6aa   :  { %v11661_v2 = vpop.f32.mrf.mxu1 }
 0x6ac   :  { %v11563_v29 = vpop.f32.mrf.mxu2 }
 0x6ad   :  { %v11564_v6 = vadd.f32 %v11563_v29, %v11550_v14 }
 0x6af   :  { %v11682_v46 = vmul.f32 0.5, %v11564_v6 }
 0x6b1   :  { %19231 = vtanh.f32 %v11682_v46 }
 0x6b2   :  { %v11663_v5 = vpop.f32.mrf.mxu1 }
 0x6b4   :  { %v11565_v52 = vpop.f32.mrf.mxu2 }
 0x6b5   :  { %v11566_v12 = vadd.f32 %v11565_v52, %v11552_v13 }
 0x6b7   :  { %v11700_v25 = vmul.f32 0.5, %v11566_v12  ;;  %v19232_v38 = vpop.eup %19231 }
 0x6b8   :  { %v11754_v19 = vmul.f32 0.5, %v19232_v38 }
 0x6ba   :  { %v11790_v27 = vadd.f32 0.5, %v11754_v19 }
 0x6cc   :  { %v11619_v62 = vpop.f32.mrf.mxu2 }
 0x6cd   :  { %v11620_v58 = vadd.f32 %v11619_v62, %v11606_v1 }
 0x6cf   :  { %v11634_v47 = vadd.f32 %v11633_v56, %v11620_v58 }
 0x6d1   :  { %v11648_v33 = vadd.f32 %v11647_v24, %v11634_v47 }
 0x6d3   :  { %v11662_v35 = vadd.f32 %v11661_v2, %v11648_v33 }
 0x6d4   :  { %v11621_v9 = vpop.f32.mrf.mxu2 }
 0x6d5   :  { %v11683_v16 = vmul.f32 0.5, %v11662_v35  ;;  %v11622_v31 = vadd.f32 %v11621_v9, %v11608_v42 }
 0x6d7   :  { %19233 = vtanh.f32 %v11683_v16  ;;  %v11636_v32 = vadd.f32 %v11635_v43, %v11622_v31 }
 0x6d8   :  { %19235 = vtanh.f32 %v11700_v25 }
 0x6d9   :  { %v11650_v23 = vadd.f32 %v11649_v59, %v11636_v32 }
 0x6db   :  { %v11664_v34 = vadd.f32 %v11663_v5, %v11650_v23 }
 0x6dd   :  { %v19234_v21 = vpop.eup %19233  ;;  %v11701_v55 = vmul.f32 0.5, %v11664_v34 }
 0x6de   :  { %v11755_v28 = vmul.f32 0.5, %v19234_v21  ;;  %v19236_v15 = vpop.eup %19235 }
 0x6df   :  { %19237 = vtanh.f32 %v11701_v55  ;;  %v11772_v49 = vmul.f32 0.5, %v19236_v15 }
 0x6e0   :  { %v11791_v17 = vadd.f32 0.5, %v11755_v28 }
 0x6e1   :  { %v11808_v11 = vadd.f32 0.5, %v11772_v49 }
 0x6e2   :  { %v11818_v48 = vpack.c.bf16 %v11791_v17, %v11790_v27 }
 0x6e4   :  { %11836 = vst [vmem:[#allocation14 + $0x40] sm:$0xff] %v11818_v48 }
 0x6e5   :  { %v19238_v41 = vpop.eup %19237 }
 0x6e6   :  { %v11773_v50 = vmul.f32 0.5, %v19238_v41 }
 0x6e8   :  { %v11809_v40 = vadd.f32 0.5, %v11773_v50 }
 0x6ea   :  { %v11827_v54 = vpack.c.bf16 %v11809_v40, %v11808_v11 }
 0x6ec   :  { %11845 = vst [vmem:[#allocation14 + $0x88] sm:$0xff] %v11827_v54 }
 0x6ed   :  { %11858 = dma.vmem_to_hbm [thread:$0]  %s11851_s6, 2304, %s11853_s1, [#allocation4], %s19453_s19, %s19453_s19, %s19454_s20  }
 0x6ee   :  { %19446 = dma.done.wait [#allocation4], 2304  }
 0x6ef   :  { %19447 = vsyncadd [#allocation4], 4294964992 }
 0x6f0   :  { %11863 = vsyncpa [#allocation3], 1 }
 0x6f1   :  { %11864 = vsyncpa [#allocation6], 1 }
 0x6f2   :  { %11865 = vsyncpa [#allocation9], 1 }
 0x6f3   :  { %11866 = vsyncpa [#allocation12], 1 }
 0x6f4   :  { %11867 = vsyncpa [#allocation4], 1 }

</bundles_post_ra>
